<compile_context>
chip_gen: v7x
topology: tpu7x:2x2x1
jax: 0.10.0
libtpu: 0.0.40
codegen_flags: <defaults>
</compile_context>

<pallas_src>
import jax
import jax.numpy as jnp
from jax import lax
from jax.experimental import pallas as pl
from jax.experimental.pallas import tpu as pltpu


def _pick_vmem_limit():
    """Generation-aware scoped-VMEM budget (~3/4 of physical per-core VMEM)."""
    try:
        cap = int(pltpu.get_tpu_info().vmem_capacity_bytes)
        return max(32 * 1024 * 1024, (cap * 3) // 4)
    except Exception:
        return 64 * 1024 * 1024


_VMEM_LIMIT = _pick_vmem_limit()


# ------------------------- Pallas kernels -------------------------

def _conv3x3_bn_relu_kernel(xp_ref, w_ref, scale_ref, shift_ref, o_ref,
                            acc_ref, col_ref):
    """3x3 conv (pad pre-applied) + folded BN + ReLU for one (row tile, C tile).

    xp_ref : (1, H+2, W+2, tc)   padded input, channel tile, resident per (b,k)
    w_ref  : (9, tc, Cout)       tap-major weight slice (bf16)
    scale/shift : (1, Cout)      folded BN (f32)
    o_ref  : (1, TH, W, Cout)    output row tile (bf16), written at last k
    acc_ref: (TH*W, Cout) f32    VMEM accumulator across channel tiles
    col_ref: (TH*W, 9*tc) bf16   im2col scratch
    """
    th, w_out, c_out = o_ref.shape[1], o_ref.shape[2], o_ref.shape[3]
    tc = xp_ref.shape[3]
    kc = pl.program_id(2)

    @pl.when(kc == 0)
    def _():
        acc_ref[...] = jnp.zeros(acc_ref.shape, acc_ref.dtype)

    row0 = pl.multiple_of(pl.program_id(1) * th, th)
    win = xp_ref[0, pl.ds(row0, th + 2)]            # (TH+2, W+2, tc)

    # im2col: only 3 sublane-misaligned slices (one per kw); the kh shifts are
    # cheap leading-dim slices of the already-shifted window.
    for dw in range(3):
        shifted = win[:, dw:dw + w_out, :]          # (TH+2, W, tc)
        for dh in range(3):
            base = (dh * 3 + dw) * tc
            col_ref[:, base:base + tc] = shifted[dh:dh + th].reshape(
                th * w_out, tc)

    # One long-K matmul instead of 9 small ones.
    acc_ref[...] += jnp.dot(col_ref[...], w_ref[...].reshape(9 * tc, c_out),
                            preferred_element_type=jnp.float32)

    @pl.when(kc == pl.num_programs(2) - 1)
    def _():
        y = jnp.maximum(acc_ref[...] * scale_ref[...] + shift_ref[...], 0.0)
        o_ref[0] = y.reshape(th, w_out, c_out).astype(o_ref.dtype)


def _qkv_proj_kernel(x_ref, wq_ref, wk_ref, wv_ref, bq_ref, bk_ref, bv_ref,
                     q_ref, k_ref, v_ref):
    """Q/K/V projection: one pass over x, three lane-dense outputs."""
    x = x_ref[...]
    q_ref[...] = (jnp.dot(x, wq_ref[...], preferred_element_type=jnp.float32)
                  + bq_ref[...]).astype(q_ref.dtype)
    k_ref[...] = (jnp.dot(x, wk_ref[...], preferred_element_type=jnp.float32)
                  + bk_ref[...]).astype(k_ref.dtype)
    v_ref[...] = (jnp.dot(x, wv_ref[...], preferred_element_type=jnp.float32)
                  + bv_ref[...]).astype(v_ref.dtype)


def _pam_small_kernel(x_ref, q_ref, k_ref, v_ref, gamma_ref, o_ref):
    """Position attention, small-N fast path: one-shot softmax, full K/V resident."""
    q = q_ref[0]                                              # (TQ, Cq)
    k = k_ref[0]                                              # (N,  Cq)
    v = v_ref[0]                                              # (N,  C)
    s = lax.dot_general(q, k, (((1,), (1,)), ((), ())),
                        preferred_element_type=jnp.float32)   # (TQ, N)
    s = s - jnp.max(s, axis=-1, keepdims=True)
    p = jnp.exp(s)
    p = p * pl.reciprocal(jnp.sum(p, axis=-1, keepdims=True), approx=True)
    out = jnp.dot(p.astype(v.dtype), v, preferred_element_type=jnp.float32)
    o_ref[0] = (gamma_ref[0] * out
                + x_ref[0].astype(jnp.float32)).astype(o_ref.dtype)


def _pam_flash_kernel(x_ref, q_ref, k_ref, v_ref, gamma_ref, o_ref,
                      m_sc, l_sc, acc_sc):
    """Position attention, flash-style online softmax over kv tiles (large N)."""
    kv = pl.program_id(2)

    @pl.when(kv == 0)
    def _():
        m_sc[...] = jnp.full(m_sc.shape, -jnp.inf, m_sc.dtype)
        l_sc[...] = jnp.zeros(l_sc.shape, l_sc.dtype)
        acc_sc[...] = jnp.zeros(acc_sc.shape, acc_sc.dtype)

    q = q_ref[0]                                              # (TQ, Cq)
    k = k_ref[0]                                              # (TK, Cq)
    s = lax.dot_general(q, k, (((1,), (1,)), ((), ())),
                        preferred_element_type=jnp.float32)   # (TQ, TK)
    m_new = jnp.maximum(m_sc[...], s.max(axis=-1, keepdims=True))
    alpha = jnp.exp(m_sc[...] - m_new)
    p = jnp.exp(s - m_new)
    l_sc[...] = alpha * l_sc[...] + p.sum(axis=-1, keepdims=True)
    acc_sc[...] = alpha * acc_sc[...] + jnp.dot(
        p.astype(v_ref.dtype), v_ref[0], preferred_element_type=jnp.float32)
    m_sc[...] = m_new

    @pl.when(kv == pl.num_programs(2) - 1)
    def _():
        out = acc_sc[...] * pl.reciprocal(l_sc[...], approx=True)
        o_ref[0] = (gamma_ref[0] * out
                    + x_ref[0].astype(jnp.float32)).astype(o_ref.dtype)


def _cam_attn_kernel(x_ref, attn_ref, gram_sc):
    """CAM pass 1: accumulate (C,C) gram over N tiles, emit channel attention."""
    j = pl.program_id(1)

    @pl.when(j == 0)
    def _():
        gram_sc[...] = jnp.zeros(gram_sc.shape, gram_sc.dtype)

    x = x_ref[0]                                              # (TN, C)
    gram_sc[...] += lax.dot_general(x, x, (((0,), (0,)), ((), ())),
                                    preferred_element_type=jnp.float32)

    @pl.when(j == pl.num_programs(1) - 1)
    def _():
        e = gram_sc[...]
        e_new = jnp.max(e, axis=-1, keepdims=True) - e        # DANet trick
        e_new = e_new - jnp.max(e_new, axis=-1, keepdims=True)  # stable softmax
        p = jnp.exp(e_new)
        attn = p * pl.reciprocal(jnp.sum(p, axis=-1, keepdims=True), approx=True)
        attn_ref[0] = attn.astype(attn_ref.dtype)


def _cam_out_kernel(x_ref, attn_ref, gamma_ref, o_ref):
    """CAM pass 2: out[n,i] = gamma * sum_j x[n,j]*attn[i,j] + x[n,i], per N tile."""
    x = x_ref[0]                                              # (TN, C)
    out = lax.dot_general(x, attn_ref[0], (((1,), (1,)), ((), ())),
                          preferred_element_type=jnp.float32)  # (TN, C)
    o_ref[0] = (gamma_ref[0] * out + x.astype(jnp.float32)).astype(o_ref.dtype)


def _fuse_kernel(a_ref, c_ref, w6_ref, w7_ref, b_ref, o_ref):
    """conv6(sa) + conv7(sc): two matmuls into one accumulator, no HBM concat."""
    acc = jnp.dot(a_ref[...], w6_ref[...], preferred_element_type=jnp.float32)
    acc = acc + jnp.dot(c_ref[...], w7_ref[...],
                        preferred_element_type=jnp.float32)
    o_ref[...] = (acc + b_ref[...]).astype(o_ref.dtype)


# ------------------------- wrappers -------------------------

def conv3x3_bn_relu(x, w_hwio, scale, shift, row_tile=8, c_tile=512):
    """3x3 conv (pad=1, no bias) + folded BatchNorm (eval) + ReLU, NHWC."""
    B, H, W, C = x.shape
    Cout = w_hwio.shape[-1]
    th = min(row_tile, H)
    while H % th:
        th -= 1
    tc = min(c_tile, C)
    while C % tc:
        tc //= 2
    nk = C // tc

    xp = jnp.pad(x.astype(jnp.bfloat16), ((0, 0), (1, 1), (1, 1), (0, 0)))
    wt = w_hwio.reshape(9, C, Cout).astype(jnp.bfloat16)

    return pl.pallas_call(
        _conv3x3_bn_relu_kernel,
        grid=(B, H // th, nk),
        in_specs=[
            pl.BlockSpec((1, H + 2, W + 2, tc), lambda b, i, k: (b, 0, 0, k)),
            pl.BlockSpec((9, tc, Cout), lambda b, i, k: (0, k, 0)),
            pl.BlockSpec((1, Cout), lambda b, i, k: (0, 0)),
            pl.BlockSpec((1, Cout), lambda b, i, k: (0, 0)),
        ],
        out_specs=pl.BlockSpec((1, th, W, Cout), lambda b, i, k: (b, i, 0, 0)),
        out_shape=jax.ShapeDtypeStruct((B, H, W, Cout), jnp.bfloat16),
        scratch_shapes=[
            pltpu.VMEM((th * W, Cout), jnp.float32),      # f32 accumulator
            pltpu.VMEM((th * W, 9 * tc), jnp.bfloat16),   # im2col buffer
        ],
        compiler_params=pltpu.CompilerParams(
            dimension_semantics=("parallel", "parallel", "arbitrary"),
            vmem_limit_bytes=_VMEM_LIMIT),
    )(xp, wt, scale.reshape(1, Cout).astype(jnp.float32),
      shift.reshape(1, Cout).astype(jnp.float32))


def pam_module(x, p, tq=256, tk=256, small_n=2048, proj_tile=512):
    B, H, W, C = x.shape
    N = H * W
    M = B * N
    Cq = p["wq"].shape[-1]
    xf = x.reshape(M, C).astype(jnp.bfloat16)

    # QKV projection: one pass over x, three separate (lane-dense) outputs.
    tm = min(proj_tile, M)
    while M % tm:
        tm //= 2
    q, k, v = pl.pallas_call(
        _qkv_proj_kernel,
        grid=(M // tm,),
        in_specs=[
            pl.BlockSpec((tm, C), lambda i: (i, 0)),
            pl.BlockSpec((C, Cq), lambda i: (0, 0)),
            pl.BlockSpec((C, Cq), lambda i: (0, 0)),
            pl.BlockSpec((C, C), lambda i: (0, 0)),
            pl.BlockSpec((1, Cq), lambda i: (0, 0)),
            pl.BlockSpec((1, Cq), lambda i: (0, 0)),
            pl.BlockSpec((1, C), lambda i: (0, 0)),
        ],
        out_specs=(
            pl.BlockSpec((tm, Cq), lambda i: (i, 0)),
            pl.BlockSpec((tm, Cq), lambda i: (i, 0)),
            pl.BlockSpec((tm, C), lambda i: (i, 0)),
        ),
        out_shape=(
            jax.ShapeDtypeStruct((M, Cq), jnp.bfloat16),
            jax.ShapeDtypeStruct((M, Cq), jnp.bfloat16),
            jax.ShapeDtypeStruct((M, C), jnp.bfloat16),
        ),
        compiler_params=pltpu.CompilerParams(
            dimension_semantics=("parallel",),
            vmem_limit_bytes=_VMEM_LIMIT),
    )(xf, p["wq"].astype(jnp.bfloat16), p["wk"].astype(jnp.bfloat16),
      p["wv"].astype(jnp.bfloat16), p["bq"].astype(jnp.float32),
      p["bk"].astype(jnp.float32), p["bv"].astype(jnp.float32))

    xb = xf.reshape(B, N, C)
    qb = q.reshape(B, N, Cq)
    kb = k.reshape(B, N, Cq)
    vb = v.reshape(B, N, C)

    tq = min(tq, N)
    while N % tq:
        tq //= 2

    if N <= small_n:
        # Small-N fast path: full K/V resident per batch, one-shot softmax.
        out = pl.pallas_call(
            _pam_small_kernel,
            grid=(B, N // tq),
            in_specs=[
                pl.BlockSpec((1, tq, C), lambda b, qi: (b, qi, 0)),
                pl.BlockSpec((1, tq, Cq), lambda b, qi: (b, qi, 0)),
                pl.BlockSpec((1, N, Cq), lambda b, qi: (b, 0, 0)),
                pl.BlockSpec((1, N, C), lambda b, qi: (b, 0, 0)),
                pl.BlockSpec(memory_space=pltpu.MemorySpace.SMEM),
            ],
            out_specs=pl.BlockSpec((1, tq, C), lambda b, qi: (b, qi, 0)),
            out_shape=jax.ShapeDtypeStruct((B, N, C), jnp.bfloat16),
            compiler_params=pltpu.CompilerParams(
                dimension_semantics=("parallel", "parallel"),
                vmem_limit_bytes=_VMEM_LIMIT),
        )(xb, qb, kb, vb, p["gamma"])
        return out.reshape(B, H, W, C)

    # Flash-attention path for large N.
    tk = min(tk, N)
    while N % tk:
        tk //= 2
    out = pl.pallas_call(
        _pam_flash_kernel,
        grid=(B, N // tq, N // tk),
        in_specs=[
            pl.BlockSpec((1, tq, C), lambda b, qi, ki: (b, qi, 0)),
            pl.BlockSpec((1, tq, Cq), lambda b, qi, ki: (b, qi, 0)),
            pl.BlockSpec((1, tk, Cq), lambda b, qi, ki: (b, ki, 0)),
            pl.BlockSpec((1, tk, C), lambda b, qi, ki: (b, ki, 0)),
            pl.BlockSpec(memory_space=pltpu.MemorySpace.SMEM),
        ],
        out_specs=pl.BlockSpec((1, tq, C), lambda b, qi, ki: (b, qi, 0)),
        out_shape=jax.ShapeDtypeStruct((B, N, C), jnp.bfloat16),
        scratch_shapes=[pltpu.VMEM((tq, 1), jnp.float32),
                        pltpu.VMEM((tq, 1), jnp.float32),
                        pltpu.VMEM((tq, C), jnp.float32)],
        compiler_params=pltpu.CompilerParams(
            dimension_semantics=("parallel", "parallel", "arbitrary"),
            vmem_limit_bytes=_VMEM_LIMIT),
    )(xb, qb, kb, vb, p["gamma"])
    return out.reshape(B, H, W, C)


def cam_module(x, p, n_tile=512):
    B, H, W, C = x.shape
    N = H * W
    xf = x.reshape(B, N, C).astype(jnp.bfloat16)
    tn = min(n_tile, N)
    while N % tn:
        tn //= 2

    # Pass 1: channel-attention matrix, gram accumulated over N tiles.
    attn = pl.pallas_call(
        _cam_attn_kernel,
        grid=(B, N // tn),
        in_specs=[pl.BlockSpec((1, tn, C), lambda b, j: (b, j, 0))],
        out_specs=pl.BlockSpec((1, C, C), lambda b, j: (b, 0, 0)),
        out_shape=jax.ShapeDtypeStruct((B, C, C), jnp.bfloat16),
        scratch_shapes=[pltpu.VMEM((C, C), jnp.float32)],
        compiler_params=pltpu.CompilerParams(
            dimension_semantics=("parallel", "arbitrary"),
            vmem_limit_bytes=_VMEM_LIMIT),
    )(xf)

    # Pass 2: apply attention per N tile (parallel, pipelined).
    out = pl.pallas_call(
        _cam_out_kernel,
        grid=(B, N // tn),
        in_specs=[
            pl.BlockSpec((1, tn, C), lambda b, j: (b, j, 0)),
            pl.BlockSpec((1, C, C), lambda b, j: (b, 0, 0)),
            pl.BlockSpec(memory_space=pltpu.MemorySpace.SMEM),
        ],
        out_specs=pl.BlockSpec((1, tn, C), lambda b, j: (b, j, 0)),
        out_shape=jax.ShapeDtypeStruct((B, N, C), jnp.bfloat16),
        compiler_params=pltpu.CompilerParams(
            dimension_semantics=("parallel", "parallel"),
            vmem_limit_bytes=_VMEM_LIMIT),
    )(xf, attn, p["gamma"])
    return out.reshape(B, H, W, C)


def fuse_outputs(sa_conv, sc_conv, w6, b6, w7, b7, row_tile=512):
    """conv6(sa_conv) + conv7(sc_conv) fused in one kernel (no HBM concat)."""
    B, H, W, C = sa_conv.shape
    Co = w6.shape[-1]
    M = B * H * W
    tm = min(row_tile, M)
    while M % tm:
        tm //= 2
    out = pl.pallas_call(
        _fuse_kernel,
        grid=(M // tm,),
        in_specs=[
            pl.BlockSpec((tm, C), lambda i: (i, 0)),
            pl.BlockSpec((tm, C), lambda i: (i, 0)),
            pl.BlockSpec((C, Co), lambda i: (0, 0)),
            pl.BlockSpec((C, Co), lambda i: (0, 0)),
            pl.BlockSpec((1, Co), lambda i: (0, 0)),
        ],
        out_specs=pl.BlockSpec((tm, Co), lambda i: (i, 0)),
        out_shape=jax.ShapeDtypeStruct((M, Co), jnp.float32),
        compiler_params=pltpu.CompilerParams(
            dimension_semantics=("parallel",),
            vmem_limit_bytes=_VMEM_LIMIT),
    )(sa_conv.reshape(M, C).astype(jnp.bfloat16),
      sc_conv.reshape(M, C).astype(jnp.bfloat16),
      w6.astype(jnp.bfloat16), w7.astype(jnp.bfloat16),
      (b6 + b7).reshape(1, Co).astype(jnp.float32))
    return out.reshape(B, H, W, Co)


def dablock_forward(x, params):
    # --- position-attention branch ---
    feat1 = conv3x3_bn_relu(x, params["conv5a_w"],
                            params["conv5a_scale"], params["conv5a_shift"])
    sa_feat = pam_module(feat1, params["pam"])
    sa_conv = conv3x3_bn_relu(sa_feat, params["conv51_w"],
                              params["conv51_scale"], params["conv51_shift"])
    # --- channel-attention branch ---
    feat2 = conv3x3_bn_relu(x, params["conv5c_w"],
                            params["conv5c_scale"], params["conv5c_shift"])
    sc_feat = cam_module(feat2, params["cam"])
    sc_conv = conv3x3_bn_relu(sc_feat, params["conv52_w"],
                              params["conv52_scale"], params["conv52_shift"])
    # Dropout2d(0.1, False): identity in eval mode.
    # TODO(synk): training-mode channel dropout / BatchNorm stats not implemented.
    return fuse_outputs(sa_conv, sc_conv,
                        params["w6"], params["b6"], params["w7"], params["b7"])


# ------------------- pure-JAX reference (mirrors bf16 policy) -------------------

def _softmax_last(e):
    e = e - jnp.max(e, axis=-1, keepdims=True)
    p = jnp.exp(e)
    return p / jnp.sum(p, axis=-1, keepdims=True)


def dablock_reference(x, params):
    f32 = jnp.float32
    bf = lambda a: a.astype(jnp.bfloat16).astype(f32)   # mirror kernel rounding

    def conv(h, w, scale, shift):
        y = lax.conv_general_dilated(bf(h), bf(w), (1, 1), ((1, 1), (1, 1)),
                                     dimension_numbers=("NHWC", "HWIO", "NHWC"))
        y = jnp.maximum(y * scale.reshape(1, 1, 1, -1)
                        + shift.reshape(1, 1, 1, -1), 0.0)
        return bf(y)

    def pam(h, p):
        B, H, W, C = h.shape
        N = H * W
        xf = bf(h).reshape(B, N, C)
        q = bf(jnp.einsum("bnc,cd->bnd", xf, bf(p["wq"])) + p["bq"])
        k = bf(jnp.einsum("bnc,cd->bnd", xf, bf(p["wk"])) + p["bk"])
        v = bf(jnp.einsum("bnc,cd->bnd", xf, bf(p["wv"])) + p["bv"])
        attn = _softmax_last(jnp.einsum("bnc,bmc->bnm", q, k))
        out = jnp.einsum("bnm,bmc->bnc", attn, v)
        return bf(p["gamma"][0] * out + xf).reshape(B, H, W, C)

    def cam(h, p):
        B, H, W, C = h.shape
        N = H * W
        xf = bf(h).reshape(B, N, C)
        e = jnp.einsum("bnc,bnd->bcd", xf, xf)
        e_new = jnp.max(e, axis=-1, keepdims=True) - e
        attn = _softmax_last(e_new)
        out = jnp.einsum("bcd,bnd->bnc", attn, xf)
        return bf(p["gamma"][0] * out + xf).reshape(B, H, W, C)

    feat1 = conv(x, params["conv5a_w"], params["conv5a_scale"], params["conv5a_shift"])
    sa_feat = pam(feat1, params["pam"])
    sa_conv = conv(sa_feat, params["conv51_w"], params["conv51_scale"], params["conv51_shift"])
    feat2 = conv(x, params["conv5c_w"], params["conv5c_scale"], params["conv5c_shift"])
    sc_feat = cam(feat2, params["cam"])
    sc_conv = conv(sc_feat, params["conv52_w"], params["conv52_scale"], params["conv52_shift"])
    sa_out = jnp.einsum("bhwc,co->bhwo", bf(sa_conv), bf(params["w6"])) + params["b6"]
    sc_out = jnp.einsum("bhwc,co->bhwo", bf(sc_conv), bf(params["w7"])) + params["b7"]
    return sa_out + sc_out


# ------------------------- deterministic parameter init -------------------------

def _bn_fold(key, c):
    k1, k2, k3, k4 = jax.random.split(key, 4)
    g = 1.0 + 0.1 * jax.random.normal(k1, (c,), jnp.float32)
    b = 0.1 * jax.random.normal(k2, (c,), jnp.float32)
    mean = 0.1 * jax.random.normal(k3, (c,), jnp.float32)
    var = jnp.abs(1.0 + 0.1 * jax.random.normal(k4, (c,), jnp.float32))
    scale = g / jnp.sqrt(var + 1e-5)
    shift = b - mean * scale
    return scale, shift


def make_params(key, in_planes, out_planes):
    inner = in_planes // 4
    cq = max(inner // 8, 1)
    ks = list(jax.random.split(key, 24))
    nrm = lambda k, shape, s: (s * jax.random.normal(k, shape, jnp.float32))

    conv5a_scale, conv5a_shift = _bn_fold(ks[4], inner)
    conv5c_scale, conv5c_shift = _bn_fold(ks[5], inner)
    conv51_scale, conv51_shift = _bn_fold(ks[6], inner)
    conv52_scale, conv52_shift = _bn_fold(ks[7], inner)

    return {
        "conv5a_w": nrm(ks[0], (3, 3, in_planes, inner), 0.05),
        "conv5c_w": nrm(ks[1], (3, 3, in_planes, inner), 0.05),
        "conv51_w": nrm(ks[2], (3, 3, inner, inner), 0.05),
        "conv52_w": nrm(ks[3], (3, 3, inner, inner), 0.05),
        "conv5a_scale": conv5a_scale, "conv5a_shift": conv5a_shift,
        "conv5c_scale": conv5c_scale, "conv5c_shift": conv5c_shift,
        "conv51_scale": conv51_scale, "conv51_shift": conv51_shift,
        "conv52_scale": conv52_scale, "conv52_shift": conv52_shift,
        "pam": {
            "wq": nrm(ks[8], (inner, cq), 0.1),
            "bq": nrm(ks[9], (1, cq), 0.1),
            "wk": nrm(ks[10], (inner, cq), 0.1),
            "bk": nrm(ks[11], (1, cq), 0.1),
            "wv": nrm(ks[12], (inner, inner), 0.1),
            "bv": nrm(ks[13], (1, inner), 0.1),
            "gamma": jnp.array([0.5], jnp.float32),  # PyTorch init is 0.0
        },
        "cam": {
            "gamma": jnp.array([0.5], jnp.float32),  # PyTorch init is 0.0
        },
        "w6": nrm(ks[14], (inner, out_planes), 0.1),
        "b6": nrm(ks[15], (out_planes,), 0.1),
        "w7": nrm(ks[16], (inner, out_planes), 0.1),
        "b7": nrm(ks[17], (out_planes,), 0.1),
    }


if __name__ == "__main__":
    B, H, W = 2, 16, 16
    in_planes, out_planes = 128, 64        # scaled-down DABlock (orig: 2048 -> 512)

    key = jax.random.PRNGKey(0)
    kx, kp = jax.random.split(key)
    x = jax.random.normal(kx, (B, H, W, in_planes), jnp.float32)   # NHWC input
    params = make_params(kp, in_planes, out_planes)

    out = jax.jit(dablock_forward)(x, params)      # (B, H, W, out_planes), NHWC, f32
    jax.block_until_ready(out)
    assert out.shape == (B, H, W, out_planes)

    ref = dablock_reference(x, params)
    err = float(jnp.max(jnp.abs(out - ref)))
    scale = max(float(jnp.max(jnp.abs(ref))), 1.0)
    assert jnp.all(jnp.isfinite(out)) and err <= 0.1 * scale, (err, scale)

    print("KERNEL_OK")
</pallas_src>

<mosaic_0001>
module attributes {stable_mosaic.version = 11 : i64} {
  func.func @_qkv_proj_kernel(%arg0: i32, %arg1: memref<512x32xbf16, #tpu.memory_space<vmem>>, %arg2: memref<32x4xbf16, #tpu.memory_space<vmem>>, %arg3: memref<32x4xbf16, #tpu.memory_space<vmem>>, %arg4: memref<32x32xbf16, #tpu.memory_space<vmem>>, %arg5: memref<1x4xf32, #tpu.memory_space<vmem>>, %arg6: memref<1x4xf32, #tpu.memory_space<vmem>>, %arg7: memref<1x32xf32, #tpu.memory_space<vmem>>, %arg8: memref<512x4xbf16, #tpu.memory_space<vmem>>, %arg9: memref<512x4xbf16, #tpu.memory_space<vmem>>, %arg10: memref<512x32xbf16, #tpu.memory_space<vmem>>) attributes {dimension_semantics = [#tpu.dimension_semantics<parallel>], iteration_bounds = array<i64: 1>, scalar_prefetch = 0 : i64, scratch_operands = 0 : i64, tpu.core_type = #tpu.core_type<tc>, window_params = [{transform_indices = @transform_0, window_bounds = array<i64: 512, 32>}, {pipeline_mode = #tpu.pipeline_mode<synchronous>, transform_indices = @transform_1, window_bounds = array<i64: 32, 4>}, {pipeline_mode = #tpu.pipeline_mode<synchronous>, transform_indices = @transform_2, window_bounds = array<i64: 32, 4>}, {pipeline_mode = #tpu.pipeline_mode<synchronous>, transform_indices = @transform_3, window_bounds = array<i64: 32, 32>}, {pipeline_mode = #tpu.pipeline_mode<synchronous>, transform_indices = @transform_4, window_bounds = array<i64: 1, 4>}, {pipeline_mode = #tpu.pipeline_mode<synchronous>, transform_indices = @transform_5, window_bounds = array<i64: 1, 4>}, {pipeline_mode = #tpu.pipeline_mode<synchronous>, transform_indices = @transform_6, window_bounds = array<i64: 1, 32>}, {transform_indices = @transform_7, window_bounds = array<i64: 512, 4>}, {transform_indices = @transform_8, window_bounds = array<i64: 512, 4>}, {transform_indices = @transform_9, window_bounds = array<i64: 512, 32>}]} {
    %c0 = arith.constant 0 : index
    %c0_0 = arith.constant 0 : index
    %0 = vector.load %arg1[%c0, %c0_0] : memref<512x32xbf16, #tpu.memory_space<vmem>>, vector<512x32xbf16>
    %c0_1 = arith.constant 0 : index
    %c0_2 = arith.constant 0 : index
    %1 = vector.load %arg2[%c0_1, %c0_2] : memref<32x4xbf16, #tpu.memory_space<vmem>>, vector<32x4xbf16>
    %cst = arith.constant dense<0.000000e+00> : vector<512x4xf32>
    %2 = tpu.matmul %0, %1, %cst {dimension_numbers = #tpu.dot_dimension_numbers<[1], [0], [0], [1], [0, 0, 1, 1], [], []>} : vector<512x32xbf16>, vector<32x4xbf16>, vector<512x4xf32> -> vector<512x4xf32>
    %c0_3 = arith.constant 0 : index
    %c0_4 = arith.constant 0 : index
    %3 = vector.load %arg5[%c0_3, %c0_4] : memref<1x4xf32, #tpu.memory_space<vmem>>, vector<1x4xf32>
    %4 = vector.broadcast %3 : vector<1x4xf32> to vector<512x4xf32>
    %5 = arith.addf %2, %4 : vector<512x4xf32>
    %6 = arith.truncf %5 : vector<512x4xf32> to vector<512x4xbf16>
    %c0_5 = arith.constant 0 : index
    %c0_6 = arith.constant 0 : index
    %7 = vector.load %arg8[%c0_5, %c0_6] : memref<512x4xbf16, #tpu.memory_space<vmem>>, vector<512x4xbf16>
    tpu.vector_store %arg8[%c0_5, %c0_6], %6 {strides = array<i32>} : memref<512x4xbf16, #tpu.memory_space<vmem>>, vector<512x4xbf16>,
    %c0_7 = arith.constant 0 : index
    %c0_8 = arith.constant 0 : index
    %8 = vector.load %arg3[%c0_7, %c0_8] : memref<32x4xbf16, #tpu.memory_space<vmem>>, vector<32x4xbf16>
    %cst_9 = arith.constant dense<0.000000e+00> : vector<512x4xf32>
    %9 = tpu.matmul %0, %8, %cst_9 {dimension_numbers = #tpu.dot_dimension_numbers<[1], [0], [0], [1], [0, 0, 1, 1], [], []>} : vector<512x32xbf16>, vector<32x4xbf16>, vector<512x4xf32> -> vector<512x4xf32>
    %c0_10 = arith.constant 0 : index
    %c0_11 = arith.constant 0 : index
    %10 = vector.load %arg6[%c0_10, %c0_11] : memref<1x4xf32, #tpu.memory_space<vmem>>, vector<1x4xf32>
    %11 = vector.broadcast %10 : vector<1x4xf32> to vector<512x4xf32>
    %12 = arith.addf %9, %11 : vector<512x4xf32>
    %13 = arith.truncf %12 : vector<512x4xf32> to vector<512x4xbf16>
    %c0_12 = arith.constant 0 : index
    %c0_13 = arith.constant 0 : index
    %14 = vector.load %arg9[%c0_12, %c0_13] : memref<512x4xbf16, #tpu.memory_space<vmem>>, vector<512x4xbf16>
    tpu.vector_store %arg9[%c0_12, %c0_13], %13 {strides = array<i32>} : memref<512x4xbf16, #tpu.memory_space<vmem>>, vector<512x4xbf16>,
    %c0_14 = arith.constant 0 : index
    %c0_15 = arith.constant 0 : index
    %15 = vector.load %arg4[%c0_14, %c0_15] : memref<32x32xbf16, #tpu.memory_space<vmem>>, vector<32x32xbf16>
    %cst_16 = arith.constant dense<0.000000e+00> : vector<512x32xf32>
    %16 = tpu.matmul %0, %15, %cst_16 {dimension_numbers = #tpu.dot_dimension_numbers<[1], [0], [0], [1], [0, 0, 1, 1], [], []>} : vector<512x32xbf16>, vector<32x32xbf16>, vector<512x32xf32> -> vector<512x32xf32>
    %c0_17 = arith.constant 0 : index
    %c0_18 = arith.constant 0 : index
    %17 = vector.load %arg7[%c0_17, %c0_18] : memref<1x32xf32, #tpu.memory_space<vmem>>, vector<1x32xf32>
    %18 = vector.broadcast %17 : vector<1x32xf32> to vector<512x32xf32>
    %19 = arith.addf %16, %18 : vector<512x32xf32>
    %20 = arith.truncf %19 : vector<512x32xf32> to vector<512x32xbf16>
    %c0_19 = arith.constant 0 : index
    %c0_20 = arith.constant 0 : index
    %21 = vector.load %arg10[%c0_19, %c0_20] : memref<512x32xbf16, #tpu.memory_space<vmem>>, vector<512x32xbf16>
    tpu.vector_store %arg10[%c0_19, %c0_20], %20 {strides = array<i32>} : memref<512x32xbf16, #tpu.memory_space<vmem>>, vector<512x32xbf16>,
    return
  }
  func.func @transform_0(%arg0: i32) -> (i32, i32) {
    %c0_i32 = arith.constant 0 : i32
    %c0_i32_0 = arith.constant 0 : i32
    return %arg0, %c0_i32 : i32, i32
  }
  func.func @transform_1(%arg0: i32) -> (i32, i32) {
    %c0_i32 = arith.constant 0 : i32
    %c0_i32_0 = arith.constant 0 : i32
    %c0_i32_1 = arith.constant 0 : i32
    return %c0_i32, %c0_i32_0 : i32, i32
  }
  func.func @transform_2(%arg0: i32) -> (i32, i32) {
    %c0_i32 = arith.constant 0 : i32
    %c0_i32_0 = arith.constant 0 : i32
    %c0_i32_1 = arith.constant 0 : i32
    return %c0_i32, %c0_i32_0 : i32, i32
  }
  func.func @transform_3(%arg0: i32) -> (i32, i32) {
    %c0_i32 = arith.constant 0 : i32
    %c0_i32_0 = arith.constant 0 : i32
    %c0_i32_1 = arith.constant 0 : i32
    return %c0_i32, %c0_i32_0 : i32, i32
  }
  func.func @transform_4(%arg0: i32) -> (i32, i32) {
    %c0_i32 = arith.constant 0 : i32
    %c0_i32_0 = arith.constant 0 : i32
    %c0_i32_1 = arith.constant 0 : i32
    return %c0_i32, %c0_i32_0 : i32, i32
  }
  func.func @transform_5(%arg0: i32) -> (i32, i32) {
    %c0_i32 = arith.constant 0 : i32
    %c0_i32_0 = arith.constant 0 : i32
    %c0_i32_1 = arith.constant 0 : i32
    return %c0_i32, %c0_i32_0 : i32, i32
  }
  func.func @transform_6(%arg0: i32) -> (i32, i32) {
    %c0_i32 = arith.constant 0 : i32
    %c0_i32_0 = arith.constant 0 : i32
    %c0_i32_1 = arith.constant 0 : i32
    return %c0_i32, %c0_i32_0 : i32, i32
  }
  func.func @transform_7(%arg0: i32) -> (i32, i32) {
    %c0_i32 = arith.constant 0 : i32
    %c0_i32_0 = arith.constant 0 : i32
    return %arg0, %c0_i32 : i32, i32
  }
  func.func @transform_8(%arg0: i32) -> (i32, i32) {
    %c0_i32 = arith.constant 0 : i32
    %c0_i32_0 = arith.constant 0 : i32
    return %arg0, %c0_i32 : i32, i32
  }
  func.func @transform_9(%arg0: i32) -> (i32, i32) {
    %c0_i32 = arith.constant 0 : i32
    %c0_i32_0 = arith.constant 0 : i32
    return %arg0, %c0_i32 : i32, i32
  }
}

module attributes {stable_mosaic.version = 11 : i64} {
  func.func @_conv3x3_bn_relu_kernel(%arg0: i32, %arg1: i32, %arg2: i32, %arg3: memref<1x18x18x128xbf16, #tpu.memory_space<vmem>>, %arg4: memref<9x128x32xbf16, #tpu.memory_space<vmem>>, %arg5: memref<1x32xf32, #tpu.memory_space<vmem>>, %arg6: memref<1x32xf32, #tpu.memory_space<vmem>>, %arg7: memref<1x8x16x32xbf16, #tpu.memory_space<vmem>>, %arg8: memref<128x32xf32, #tpu.memory_space<vmem>>, %arg9: memref<128x1152xbf16, #tpu.memory_space<vmem>>) attributes {dimension_semantics = [#tpu.dimension_semantics<parallel>, #tpu.dimension_semantics<parallel>, #tpu.dimension_semantics<arbitrary>], iteration_bounds = array<i64: 2, 2, 1>, scalar_prefetch = 0 : i64, scratch_operands = 2 : i64, tpu.core_type = #tpu.core_type<tc>, window_params = [{transform_indices = @transform_0, window_bounds = array<i64: 1, 18, 18, 128>}, {transform_indices = @transform_1, window_bounds = array<i64: 9, 128, 32>}, {pipeline_mode = #tpu.pipeline_mode<synchronous>, transform_indices = @transform_2, window_bounds = array<i64: 1, 32>}, {pipeline_mode = #tpu.pipeline_mode<synchronous>, transform_indices = @transform_3, window_bounds = array<i64: 1, 32>}, {transform_indices = @transform_4, window_bounds = array<i64: 1, 8, 16, 32>}]} {
    %c0_i32 = arith.constant 0 : i32
    %0 = arith.cmpi eq, %arg2, %c0_i32 : i32
    %1 = arith.extui %0 : i1 to i32
    %c0_i32_0 = arith.constant 0 : i32
    %2 = arith.cmpi ne, %1, %c0_i32_0 : i32
    scf.if %2 {
      %cst_24 = arith.constant 0.000000e+00 : f32
      %48 = vector.broadcast %cst_24 : f32 to vector<128x32xf32>
      %c0_25 = arith.constant 0 : index
      %c0_26 = arith.constant 0 : index
      %49 = vector.load %arg8[%c0_25, %c0_26] : memref<128x32xf32, #tpu.memory_space<vmem>>, vector<128x32xf32>
      tpu.vector_store %arg8[%c0_25, %c0_26], %48 {strides = array<i32>} : memref<128x32xf32, #tpu.memory_space<vmem>>, vector<128x32xf32>,
    } else {
    }
    %c8_i32 = arith.constant 8 : i32
    %3 = arith.muli %arg1, %c8_i32 : i32
    %4 = tpu.assume_multiple %3, 8 : i32
    %c0 = arith.constant 0 : index
    %5 = arith.index_cast %4 : i32 to index
    %c0_1 = arith.constant 0 : index
    %c0_2 = arith.constant 0 : index
    %6 = vector.load %arg3[%c0, %5, %c0_1, %c0_2] : memref<1x18x18x128xbf16, #tpu.memory_space<vmem>>, vector<1x10x18x128xbf16>
    %7 = vector.shape_cast %6 : vector<1x10x18x128xbf16> to vector<10x18x128xbf16>
    %8 = vector.extract_strided_slice %7 {offsets = [0, 0, 0], sizes = [10, 16, 128], strides = [1, 1, 1]} : vector<10x18x128xbf16> to vector<10x16x128xbf16>
    %9 = vector.extract_strided_slice %8 {offsets = [0, 0, 0], sizes = [8, 16, 128], strides = [1, 1, 1]} : vector<10x16x128xbf16> to vector<8x16x128xbf16>
    %10 = vector.shape_cast %9 : vector<8x16x128xbf16> to vector<128x128xbf16>
    %c0_3 = arith.constant 0 : index
    %c0_4 = arith.constant 0 : index
    %11 = vector.load %arg9[%c0_3, %c0_4] : memref<128x1152xbf16, #tpu.memory_space<vmem>>, vector<128x128xbf16>
    tpu.vector_store %arg9[%c0_3, %c0_4], %10 {strides = array<i32>} : memref<128x1152xbf16, #tpu.memory_space<vmem>>, vector<128x128xbf16>,
    %12 = vector.extract_strided_slice %8 {offsets = [1, 0, 0], sizes = [8, 16, 128], strides = [1, 1, 1]} : vector<10x16x128xbf16> to vector<8x16x128xbf16>
    %13 = vector.shape_cast %12 : vector<8x16x128xbf16> to vector<128x128xbf16>
    %c0_5 = arith.constant 0 : index
    %c384 = arith.constant 384 : index
    %14 = vector.load %arg9[%c0_5, %c384] : memref<128x1152xbf16, #tpu.memory_space<vmem>>, vector<128x128xbf16>
    tpu.vector_store %arg9[%c0_5, %c384], %13 {strides = array<i32>} : memref<128x1152xbf16, #tpu.memory_space<vmem>>, vector<128x128xbf16>,
    %15 = vector.extract_strided_slice %8 {offsets = [2, 0, 0], sizes = [8, 16, 128], strides = [1, 1, 1]} : vector<10x16x128xbf16> to vector<8x16x128xbf16>
    %16 = vector.shape_cast %15 : vector<8x16x128xbf16> to vector<128x128xbf16>
    %c0_6 = arith.constant 0 : index
    %c768 = arith.constant 768 : index
    %17 = vector.load %arg9[%c0_6, %c768] : memref<128x1152xbf16, #tpu.memory_space<vmem>>, vector<128x128xbf16>
    tpu.vector_store %arg9[%c0_6, %c768], %16 {strides = array<i32>} : memref<128x1152xbf16, #tpu.memory_space<vmem>>, vector<128x128xbf16>,
    %18 = vector.extract_strided_slice %7 {offsets = [0, 1, 0], sizes = [10, 16, 128], strides = [1, 1, 1]} : vector<10x18x128xbf16> to vector<10x16x128xbf16>
    %19 = vector.extract_strided_slice %18 {offsets = [0, 0, 0], sizes = [8, 16, 128], strides = [1, 1, 1]} : vector<10x16x128xbf16> to vector<8x16x128xbf16>
    %20 = vector.shape_cast %19 : vector<8x16x128xbf16> to vector<128x128xbf16>
    %c0_7 = arith.constant 0 : index
    %c128 = arith.constant 128 : index
    %21 = vector.load %arg9[%c0_7, %c128] : memref<128x1152xbf16, #tpu.memory_space<vmem>>, vector<128x128xbf16>
    tpu.vector_store %arg9[%c0_7, %c128], %20 {strides = array<i32>} : memref<128x1152xbf16, #tpu.memory_space<vmem>>, vector<128x128xbf16>,
    %22 = vector.extract_strided_slice %18 {offsets = [1, 0, 0], sizes = [8, 16, 128], strides = [1, 1, 1]} : vector<10x16x128xbf16> to vector<8x16x128xbf16>
    %23 = vector.shape_cast %22 : vector<8x16x128xbf16> to vector<128x128xbf16>
    %c0_8 = arith.constant 0 : index
    %c512 = arith.constant 512 : index
    %24 = vector.load %arg9[%c0_8, %c512] : memref<128x1152xbf16, #tpu.memory_space<vmem>>, vector<128x128xbf16>
    tpu.vector_store %arg9[%c0_8, %c512], %23 {strides = array<i32>} : memref<128x1152xbf16, #tpu.memory_space<vmem>>, vector<128x128xbf16>,
    %25 = vector.extract_strided_slice %18 {offsets = [2, 0, 0], sizes = [8, 16, 128], strides = [1, 1, 1]} : vector<10x16x128xbf16> to vector<8x16x128xbf16>
    %26 = vector.shape_cast %25 : vector<8x16x128xbf16> to vector<128x128xbf16>
    %c0_9 = arith.constant 0 : index
    %c896 = arith.constant 896 : index
    %27 = vector.load %arg9[%c0_9, %c896] : memref<128x1152xbf16, #tpu.memory_space<vmem>>, vector<128x128xbf16>
    tpu.vector_store %arg9[%c0_9, %c896], %26 {strides = array<i32>} : memref<128x1152xbf16, #tpu.memory_space<vmem>>, vector<128x128xbf16>,
    %28 = vector.extract_strided_slice %7 {offsets = [0, 2, 0], sizes = [10, 16, 128], strides = [1, 1, 1]} : vector<10x18x128xbf16> to vector<10x16x128xbf16>
    %29 = vector.extract_strided_slice %28 {offsets = [0, 0, 0], sizes = [8, 16, 128], strides = [1, 1, 1]} : vector<10x16x128xbf16> to vector<8x16x128xbf16>
    %30 = vector.shape_cast %29 : vector<8x16x128xbf16> to vector<128x128xbf16>
    %c0_10 = arith.constant 0 : index
    %c256 = arith.constant 256 : index
    %31 = vector.load %arg9[%c0_10, %c256] : memref<128x1152xbf16, #tpu.memory_space<vmem>>, vector<128x128xbf16>
    tpu.vector_store %arg9[%c0_10, %c256], %30 {strides = array<i32>} : memref<128x1152xbf16, #tpu.memory_space<vmem>>, vector<128x128xbf16>,
    %32 = vector.extract_strided_slice %28 {offsets = [1, 0, 0], sizes = [8, 16, 128], strides = [1, 1, 1]} : vector<10x16x128xbf16> to vector<8x16x128xbf16>
    %33 = vector.shape_cast %32 : vector<8x16x128xbf16> to vector<128x128xbf16>
    %c0_11 = arith.constant 0 : index
    %c640 = arith.constant 640 : index
    %34 = vector.load %arg9[%c0_11, %c640] : memref<128x1152xbf16, #tpu.memory_space<vmem>>, vector<128x128xbf16>
    tpu.vector_store %arg9[%c0_11, %c640], %33 {strides = array<i32>} : memref<128x1152xbf16, #tpu.memory_space<vmem>>, vector<128x128xbf16>,
    %35 = vector.extract_strided_slice %28 {offsets = [2, 0, 0], sizes = [8, 16, 128], strides = [1, 1, 1]} : vector<10x16x128xbf16> to vector<8x16x128xbf16>
    %36 = vector.shape_cast %35 : vector<8x16x128xbf16> to vector<128x128xbf16>
    %c0_12 = arith.constant 0 : index
    %c1024 = arith.constant 1024 : index
    %37 = vector.load %arg9[%c0_12, %c1024] : memref<128x1152xbf16, #tpu.memory_space<vmem>>, vector<128x128xbf16>
    tpu.vector_store %arg9[%c0_12, %c1024], %36 {strides = array<i32>} : memref<128x1152xbf16, #tpu.memory_space<vmem>>, vector<128x128xbf16>,
    %c0_13 = arith.constant 0 : index
    %c0_14 = arith.constant 0 : index
    %38 = vector.load %arg8[%c0_13, %c0_14] : memref<128x32xf32, #tpu.memory_space<vmem>>, vector<128x32xf32>
    %c0_15 = arith.constant 0 : index
    %c0_16 = arith.constant 0 : index
    %39 = vector.load %arg9[%c0_15, %c0_16] : memref<128x1152xbf16, #tpu.memory_space<vmem>>, vector<128x1152xbf16>
    %c0_17 = arith.constant 0 : index
    %c0_18 = arith.constant 0 : index
    %c0_19 = arith.constant 0 : index
    %40 = vector.load %arg4[%c0_17, %c0_18, %c0_19] : memref<9x128x32xbf16, #tpu.memory_space<vmem>>, vector<9x128x32xbf16>
    %41 = vector.shape_cast %40 : vector<9x128x32xbf16> to vector<1152x32xbf16>
    %cst = arith.constant dense<0.000000e+00> : vector<128x32xf32>
    %42 = tpu.matmul %39, %41, %cst {dimension_numbers = #tpu.dot_dimension_numbers<[1], [0], [0], [1], [0, 0, 1, 1], [], []>} : vector<128x1152xbf16>, vector<1152x32xbf16>, vector<128x32xf32> -> vector<128x32xf32>
    %43 = arith.addf %38, %42 : vector<128x32xf32>
    %c0_20 = arith.constant 0 : index
    %c0_21 = arith.constant 0 : index
    %44 = vector.load %arg8[%c0_20, %c0_21] : memref<128x32xf32, #tpu.memory_space<vmem>>, vector<128x32xf32>
    tpu.vector_store %arg8[%c0_20, %c0_21], %43 {strides = array<i32>} : memref<128x32xf32, #tpu.memory_space<vmem>>, vector<128x32xf32>,
    %c0_i32_22 = arith.constant 0 : i32
    %45 = arith.cmpi eq, %arg2, %c0_i32_22 : i32
    %46 = arith.extui %45 : i1 to i32
    %c0_i32_23 = arith.constant 0 : i32
    %47 = arith.cmpi ne, %46, %c0_i32_23 : i32
    scf.if %47 {
      %c0_24 = arith.constant 0 : index
      %c0_25 = arith.constant 0 : index
      %48 = vector.load %arg8[%c0_24, %c0_25] : memref<128x32xf32, #tpu.memory_space<vmem>>, vector<128x32xf32>
      %c0_26 = arith.constant 0 : index
      %c0_27 = arith.constant 0 : index
      %49 = vector.load %arg5[%c0_26, %c0_27] : memref<1x32xf32, #tpu.memory_space<vmem>>, vector<1x32xf32>
      %50 = vector.broadcast %49 : vector<1x32xf32> to vector<128x32xf32>
      %51 = arith.mulf %48, %50 : vector<128x32xf32>
      %c0_28 = arith.constant 0 : index
      %c0_29 = arith.constant 0 : index
      %52 = vector.load %arg6[%c0_28, %c0_29] : memref<1x32xf32, #tpu.memory_space<vmem>>, vector<1x32xf32>
      %53 = vector.broadcast %52 : vector<1x32xf32> to vector<128x32xf32>
      %54 = arith.addf %51, %53 : vector<128x32xf32>
      %cst_30 = arith.constant 0.000000e+00 : f32
      %55 = vector.broadcast %cst_30 : f32 to vector<128x32xf32>
      %56 = arith.maximumf %54, %55 : vector<128x32xf32>
      %57 = vector.shape_cast %56 : vector<128x32xf32> to vector<8x16x32xf32>
      %58 = arith.truncf %57 : vector<8x16x32xf32> to vector<8x16x32xbf16>
      %c0_31 = arith.constant 0 : index
      %c0_32 = arith.constant 0 : index
      %c0_33 = arith.constant 0 : index
      %c0_34 = arith.constant 0 : index
      %59 = vector.load %arg7[%c0_31, %c0_32, %c0_33, %c0_34] : memref<1x8x16x32xbf16, #tpu.memory_space<vmem>>, vector<1x8x16x32xbf16>
      %60 = vector.shape_cast %59 : vector<1x8x16x32xbf16> to vector<8x16x32xbf16>
      %61 = vector.shape_cast %58 : vector<8x16x32xbf16> to vector<1x8x16x32xbf16>
      tpu.vector_store %arg7[%c0_31, %c0_32, %c0_33, %c0_34], %61 {strides = array<i32>} : memref<1x8x16x32xbf16, #tpu.memory_space<vmem>>, vector<1x8x16x32xbf16>,
    } else {
    }
    return
  }
  func.func @transform_0(%arg0: i32, %arg1: i32, %arg2: i32) -> (i32, i32, i32, i32) {
    %c0_i32 = arith.constant 0 : i32
    %c0_i32_0 = arith.constant 0 : i32
    %c0_i32_1 = arith.constant 0 : i32
    return %arg0, %c0_i32, %c0_i32_0, %arg2 : i32, i32, i32, i32
  }
  func.func @transform_1(%arg0: i32, %arg1: i32, %arg2: i32) -> (i32, i32, i32) {
    %c0_i32 = arith.constant 0 : i32
    %c0_i32_0 = arith.constant 0 : i32
    %c0_i32_1 = arith.constant 0 : i32
    return %c0_i32, %arg2, %c0_i32_0 : i32, i32, i32
  }
  func.func @transform_2(%arg0: i32, %arg1: i32, %arg2: i32) -> (i32, i32) {
    %c0_i32 = arith.constant 0 : i32
    %c0_i32_0 = arith.constant 0 : i32
    %c0_i32_1 = arith.constant 0 : i32
    return %c0_i32, %c0_i32_0 : i32, i32
  }
  func.func @transform_3(%arg0: i32, %arg1: i32, %arg2: i32) -> (i32, i32) {
    %c0_i32 = arith.constant 0 : i32
    %c0_i32_0 = arith.constant 0 : i32
    %c0_i32_1 = arith.constant 0 : i32
    return %c0_i32, %c0_i32_0 : i32, i32
  }
  func.func @transform_4(%arg0: i32, %arg1: i32, %arg2: i32) -> (i32, i32, i32, i32) {
    %c0_i32 = arith.constant 0 : i32
    %c0_i32_0 = arith.constant 0 : i32
    %c0_i32_1 = arith.constant 0 : i32
    return %arg0, %arg1, %c0_i32, %c0_i32_0 : i32, i32, i32, i32
  }
}

module attributes {stable_mosaic.version = 11 : i64} {
  func.func @_pam_small_kernel(%arg0: i32, %arg1: i32, %arg2: memref<1x256x32xbf16, #tpu.memory_space<vmem>>, %arg3: memref<1x256x4xbf16, #tpu.memory_space<vmem>>, %arg4: memref<1x256x4xbf16, #tpu.memory_space<vmem>>, %arg5: memref<1x256x32xbf16, #tpu.memory_space<vmem>>, %arg6: memref<1xf32, #tpu.memory_space<smem>>, %arg7: memref<1x256x32xbf16, #tpu.memory_space<vmem>>) attributes {dimension_semantics = [#tpu.dimension_semantics<parallel>, #tpu.dimension_semantics<parallel>], iteration_bounds = array<i64: 2, 1>, scalar_prefetch = 0 : i64, scratch_operands = 0 : i64, tpu.core_type = #tpu.core_type<tc>, window_params = [{transform_indices = @transform_0, window_bounds = array<i64: 1, 256, 32>}, {transform_indices = @transform_1, window_bounds = array<i64: 1, 256, 4>}, {transform_indices = @transform_2, window_bounds = array<i64: 1, 256, 4>}, {transform_indices = @transform_3, window_bounds = array<i64: 1, 256, 32>}, {transform_indices = @transform_4, window_bounds = array<i64: 1>}, {transform_indices = @transform_5, window_bounds = array<i64: 1, 256, 32>}]} {
    %c0 = arith.constant 0 : index
    %c0_0 = arith.constant 0 : index
    %c0_1 = arith.constant 0 : index
    %0 = vector.load %arg3[%c0, %c0_0, %c0_1] : memref<1x256x4xbf16, #tpu.memory_space<vmem>>, vector<1x256x4xbf16>
    %1 = vector.shape_cast %0 : vector<1x256x4xbf16> to vector<256x4xbf16>
    %c0_2 = arith.constant 0 : index
    %c0_3 = arith.constant 0 : index
    %c0_4 = arith.constant 0 : index
    %2 = vector.load %arg4[%c0_2, %c0_3, %c0_4] : memref<1x256x4xbf16, #tpu.memory_space<vmem>>, vector<1x256x4xbf16>
    %3 = vector.shape_cast %2 : vector<1x256x4xbf16> to vector<256x4xbf16>
    %c0_5 = arith.constant 0 : index
    %c0_6 = arith.constant 0 : index
    %c0_7 = arith.constant 0 : index
    %4 = vector.load %arg5[%c0_5, %c0_6, %c0_7] : memref<1x256x32xbf16, #tpu.memory_space<vmem>>, vector<1x256x32xbf16>
    %5 = vector.shape_cast %4 : vector<1x256x32xbf16> to vector<256x32xbf16>
    %cst = arith.constant dense<0.000000e+00> : vector<256x256xf32>
    %6 = tpu.matmul %1, %3, %cst {dimension_numbers = #tpu.dot_dimension_numbers<[1], [1], [0], [0], [0, 0, 1, 0], [], []>} : vector<256x4xbf16>, vector<256x4xbf16>, vector<256x256xf32> -> vector<256x256xf32>
    %cst_8 = arith.constant dense<0xFF800000> : vector<256xf32>
    %7 = vector.multi_reduction <maximumf>, %6, %cst_8 [1] : vector<256x256xf32> to vector<256xf32>
    %8 = vector.shape_cast %7 : vector<256xf32> to vector<256x1xf32>
    %9 = vector.broadcast %8 : vector<256x1xf32> to vector<256x256xf32>
    %10 = arith.subf %6, %9 : vector<256x256xf32>
    %11 = math.exp %10 : vector<256x256xf32>
    %cst_9 = arith.constant dense<0.000000e+00> : vector<256xf32>
    %12 = vector.multi_reduction <add>, %11, %cst_9 [1] : vector<256x256xf32> to vector<256xf32>
    %13 = vector.shape_cast %12 : vector<256xf32> to vector<256x1xf32>
    %14 = tpu.reciprocal %13 {approx = true} : vector<256x1xf32> -> vector<256x1xf32>
    %15 = vector.broadcast %14 : vector<256x1xf32> to vector<256x256xf32>
    %16 = arith.mulf %11, %15 : vector<256x256xf32>
    %17 = arith.truncf %16 : vector<256x256xf32> to vector<256x256xbf16>
    %cst_10 = arith.constant dense<0.000000e+00> : vector<256x32xf32>
    %18 = tpu.matmul %17, %5, %cst_10 {dimension_numbers = #tpu.dot_dimension_numbers<[1], [0], [0], [1], [0, 0, 1, 1], [], []>} : vector<256x256xbf16>, vector<256x32xbf16>, vector<256x32xf32> -> vector<256x32xf32>
    %c0_11 = arith.constant 0 : index
    %19 = memref.load %arg6[%c0_11] : memref<1xf32, #tpu.memory_space<smem>>
    %20 = vector.broadcast %19 : f32 to vector<256x32xf32>
    %21 = arith.mulf %20, %18 : vector<256x32xf32>
    %c0_12 = arith.constant 0 : index
    %c0_13 = arith.constant 0 : index
    %c0_14 = arith.constant 0 : index
    %22 = vector.load %arg2[%c0_12, %c0_13, %c0_14] : memref<1x256x32xbf16, #tpu.memory_space<vmem>>, vector<1x256x32xbf16>
    %23 = vector.shape_cast %22 : vector<1x256x32xbf16> to vector<256x32xbf16>
    %24 = arith.extf %23 : vector<256x32xbf16> to vector<256x32xf32>
    %25 = arith.addf %21, %24 : vector<256x32xf32>
    %26 = arith.truncf %25 : vector<256x32xf32> to vector<256x32xbf16>
    %c0_15 = arith.constant 0 : index
    %c0_16 = arith.constant 0 : index
    %c0_17 = arith.constant 0 : index
    %27 = vector.load %arg7[%c0_15, %c0_16, %c0_17] : memref<1x256x32xbf16, #tpu.memory_space<vmem>>, vector<1x256x32xbf16>
    %28 = vector.shape_cast %27 : vector<1x256x32xbf16> to vector<256x32xbf16>
    %29 = vector.shape_cast %26 : vector<256x32xbf16> to vector<1x256x32xbf16>
    tpu.vector_store %arg7[%c0_15, %c0_16, %c0_17], %29 {strides = array<i32>} : memref<1x256x32xbf16, #tpu.memory_space<vmem>>, vector<1x256x32xbf16>,
    return
  }
  func.func @transform_0(%arg0: i32, %arg1: i32) -> (i32, i32, i32) {
    %c0_i32 = arith.constant 0 : i32
    %c0_i32_0 = arith.constant 0 : i32
    return %arg0, %arg1, %c0_i32 : i32, i32, i32
  }
  func.func @transform_1(%arg0: i32, %arg1: i32) -> (i32, i32, i32) {
    %c0_i32 = arith.constant 0 : i32
    %c0_i32_0 = arith.constant 0 : i32
    return %arg0, %arg1, %c0_i32 : i32, i32, i32
  }
  func.func @transform_2(%arg0: i32, %arg1: i32) -> (i32, i32, i32) {
    %c0_i32 = arith.constant 0 : i32
    %c0_i32_0 = arith.constant 0 : i32
    %c0_i32_1 = arith.constant 0 : i32
    return %arg0, %c0_i32, %c0_i32_0 : i32, i32, i32
  }
  func.func @transform_3(%arg0: i32, %arg1: i32) -> (i32, i32, i32) {
    %c0_i32 = arith.constant 0 : i32
    %c0_i32_0 = arith.constant 0 : i32
    %c0_i32_1 = arith.constant 0 : i32
    return %arg0, %c0_i32, %c0_i32_0 : i32, i32, i32
  }
  func.func @transform_4(%arg0: i32, %arg1: i32) -> i32 {
    %c0_i32 = arith.constant 0 : i32
    %c0_i32_0 = arith.constant 0 : i32
    return %c0_i32 : i32
  }
  func.func @transform_5(%arg0: i32, %arg1: i32) -> (i32, i32, i32) {
    %c0_i32 = arith.constant 0 : i32
    %c0_i32_0 = arith.constant 0 : i32
    return %arg0, %arg1, %c0_i32 : i32, i32, i32
  }
}

module attributes {stable_mosaic.version = 11 : i64} {
  func.func @_conv3x3_bn_relu_kernel(%arg0: i32, %arg1: i32, %arg2: i32, %arg3: memref<1x18x18x32xbf16, #tpu.memory_space<vmem>>, %arg4: memref<9x32x32xbf16, #tpu.memory_space<vmem>>, %arg5: memref<1x32xf32, #tpu.memory_space<vmem>>, %arg6: memref<1x32xf32, #tpu.memory_space<vmem>>, %arg7: memref<1x8x16x32xbf16, #tpu.memory_space<vmem>>, %arg8: memref<128x32xf32, #tpu.memory_space<vmem>>, %arg9: memref<128x288xbf16, #tpu.memory_space<vmem>>) attributes {dimension_semantics = [#tpu.dimension_semantics<parallel>, #tpu.dimension_semantics<parallel>, #tpu.dimension_semantics<arbitrary>], iteration_bounds = array<i64: 2, 2, 1>, scalar_prefetch = 0 : i64, scratch_operands = 2 : i64, tpu.core_type = #tpu.core_type<tc>, window_params = [{transform_indices = @transform_0, window_bounds = array<i64: 1, 18, 18, 32>}, {transform_indices = @transform_1, window_bounds = array<i64: 9, 32, 32>}, {pipeline_mode = #tpu.pipeline_mode<synchronous>, transform_indices = @transform_2, window_bounds = array<i64: 1, 32>}, {pipeline_mode = #tpu.pipeline_mode<synchronous>, transform_indices = @transform_3, window_bounds = array<i64: 1, 32>}, {transform_indices = @transform_4, window_bounds = array<i64: 1, 8, 16, 32>}]} {
    %c0_i32 = arith.constant 0 : i32
    %0 = arith.cmpi eq, %arg2, %c0_i32 : i32
    %1 = arith.extui %0 : i1 to i32
    %c0_i32_0 = arith.constant 0 : i32
    %2 = arith.cmpi ne, %1, %c0_i32_0 : i32
    scf.if %2 {
      %cst_24 = arith.constant 0.000000e+00 : f32
      %48 = vector.broadcast %cst_24 : f32 to vector<128x32xf32>
      %c0_25 = arith.constant 0 : index
      %c0_26 = arith.constant 0 : index
      %49 = vector.load %arg8[%c0_25, %c0_26] : memref<128x32xf32, #tpu.memory_space<vmem>>, vector<128x32xf32>
      tpu.vector_store %arg8[%c0_25, %c0_26], %48 {strides = array<i32>} : memref<128x32xf32, #tpu.memory_space<vmem>>, vector<128x32xf32>,
    } else {
    }
    %c8_i32 = arith.constant 8 : i32
    %3 = arith.muli %arg1, %c8_i32 : i32
    %4 = tpu.assume_multiple %3, 8 : i32
    %c0 = arith.constant 0 : index
    %5 = arith.index_cast %4 : i32 to index
    %c0_1 = arith.constant 0 : index
    %c0_2 = arith.constant 0 : index
    %6 = vector.load %arg3[%c0, %5, %c0_1, %c0_2] : memref<1x18x18x32xbf16, #tpu.memory_space<vmem>>, vector<1x10x18x32xbf16>
    %7 = vector.shape_cast %6 : vector<1x10x18x32xbf16> to vector<10x18x32xbf16>
    %8 = vector.extract_strided_slice %7 {offsets = [0, 0, 0], sizes = [10, 16, 32], strides = [1, 1, 1]} : vector<10x18x32xbf16> to vector<10x16x32xbf16>
    %9 = vector.extract_strided_slice %8 {offsets = [0, 0, 0], sizes = [8, 16, 32], strides = [1, 1, 1]} : vector<10x16x32xbf16> to vector<8x16x32xbf16>
    %10 = vector.shape_cast %9 : vector<8x16x32xbf16> to vector<128x32xbf16>
    %c0_3 = arith.constant 0 : index
    %c0_4 = arith.constant 0 : index
    %11 = vector.load %arg9[%c0_3, %c0_4] : memref<128x288xbf16, #tpu.memory_space<vmem>>, vector<128x32xbf16>
    tpu.vector_store %arg9[%c0_3, %c0_4], %10 {strides = array<i32>} : memref<128x288xbf16, #tpu.memory_space<vmem>>, vector<128x32xbf16>,
    %12 = vector.extract_strided_slice %8 {offsets = [1, 0, 0], sizes = [8, 16, 32], strides = [1, 1, 1]} : vector<10x16x32xbf16> to vector<8x16x32xbf16>
    %13 = vector.shape_cast %12 : vector<8x16x32xbf16> to vector<128x32xbf16>
    %c0_5 = arith.constant 0 : index
    %c96 = arith.constant 96 : index
    %14 = vector.load %arg9[%c0_5, %c96] : memref<128x288xbf16, #tpu.memory_space<vmem>>, vector<128x32xbf16>
    tpu.vector_store %arg9[%c0_5, %c96], %13 {strides = array<i32>} : memref<128x288xbf16, #tpu.memory_space<vmem>>, vector<128x32xbf16>,
    %15 = vector.extract_strided_slice %8 {offsets = [2, 0, 0], sizes = [8, 16, 32], strides = [1, 1, 1]} : vector<10x16x32xbf16> to vector<8x16x32xbf16>
    %16 = vector.shape_cast %15 : vector<8x16x32xbf16> to vector<128x32xbf16>
    %c0_6 = arith.constant 0 : index
    %c192 = arith.constant 192 : index
    %17 = vector.load %arg9[%c0_6, %c192] : memref<128x288xbf16, #tpu.memory_space<vmem>>, vector<128x32xbf16>
    tpu.vector_store %arg9[%c0_6, %c192], %16 {strides = array<i32>} : memref<128x288xbf16, #tpu.memory_space<vmem>>, vector<128x32xbf16>,
    %18 = vector.extract_strided_slice %7 {offsets = [0, 1, 0], sizes = [10, 16, 32], strides = [1, 1, 1]} : vector<10x18x32xbf16> to vector<10x16x32xbf16>
    %19 = vector.extract_strided_slice %18 {offsets = [0, 0, 0], sizes = [8, 16, 32], strides = [1, 1, 1]} : vector<10x16x32xbf16> to vector<8x16x32xbf16>
    %20 = vector.shape_cast %19 : vector<8x16x32xbf16> to vector<128x32xbf16>
    %c0_7 = arith.constant 0 : index
    %c32 = arith.constant 32 : index
    %21 = vector.load %arg9[%c0_7, %c32] : memref<128x288xbf16, #tpu.memory_space<vmem>>, vector<128x32xbf16>
    tpu.vector_store %arg9[%c0_7, %c32], %20 {strides = array<i32>} : memref<128x288xbf16, #tpu.memory_space<vmem>>, vector<128x32xbf16>,
    %22 = vector.extract_strided_slice %18 {offsets = [1, 0, 0], sizes = [8, 16, 32], strides = [1, 1, 1]} : vector<10x16x32xbf16> to vector<8x16x32xbf16>
    %23 = vector.shape_cast %22 : vector<8x16x32xbf16> to vector<128x32xbf16>
    %c0_8 = arith.constant 0 : index
    %c128 = arith.constant 128 : index
    %24 = vector.load %arg9[%c0_8, %c128] : memref<128x288xbf16, #tpu.memory_space<vmem>>, vector<128x32xbf16>
    tpu.vector_store %arg9[%c0_8, %c128], %23 {strides = array<i32>} : memref<128x288xbf16, #tpu.memory_space<vmem>>, vector<128x32xbf16>,
    %25 = vector.extract_strided_slice %18 {offsets = [2, 0, 0], sizes = [8, 16, 32], strides = [1, 1, 1]} : vector<10x16x32xbf16> to vector<8x16x32xbf16>
    %26 = vector.shape_cast %25 : vector<8x16x32xbf16> to vector<128x32xbf16>
    %c0_9 = arith.constant 0 : index
    %c224 = arith.constant 224 : index
    %27 = vector.load %arg9[%c0_9, %c224] : memref<128x288xbf16, #tpu.memory_space<vmem>>, vector<128x32xbf16>
    tpu.vector_store %arg9[%c0_9, %c224], %26 {strides = array<i32>} : memref<128x288xbf16, #tpu.memory_space<vmem>>, vector<128x32xbf16>,
    %28 = vector.extract_strided_slice %7 {offsets = [0, 2, 0], sizes = [10, 16, 32], strides = [1, 1, 1]} : vector<10x18x32xbf16> to vector<10x16x32xbf16>
    %29 = vector.extract_strided_slice %28 {offsets = [0, 0, 0], sizes = [8, 16, 32], strides = [1, 1, 1]} : vector<10x16x32xbf16> to vector<8x16x32xbf16>
    %30 = vector.shape_cast %29 : vector<8x16x32xbf16> to vector<128x32xbf16>
    %c0_10 = arith.constant 0 : index
    %c64 = arith.constant 64 : index
    %31 = vector.load %arg9[%c0_10, %c64] : memref<128x288xbf16, #tpu.memory_space<vmem>>, vector<128x32xbf16>
    tpu.vector_store %arg9[%c0_10, %c64], %30 {strides = array<i32>} : memref<128x288xbf16, #tpu.memory_space<vmem>>, vector<128x32xbf16>,
    %32 = vector.extract_strided_slice %28 {offsets = [1, 0, 0], sizes = [8, 16, 32], strides = [1, 1, 1]} : vector<10x16x32xbf16> to vector<8x16x32xbf16>
    %33 = vector.shape_cast %32 : vector<8x16x32xbf16> to vector<128x32xbf16>
    %c0_11 = arith.constant 0 : index
    %c160 = arith.constant 160 : index
    %34 = vector.load %arg9[%c0_11, %c160] : memref<128x288xbf16, #tpu.memory_space<vmem>>, vector<128x32xbf16>
    tpu.vector_store %arg9[%c0_11, %c160], %33 {strides = array<i32>} : memref<128x288xbf16, #tpu.memory_space<vmem>>, vector<128x32xbf16>,
    %35 = vector.extract_strided_slice %28 {offsets = [2, 0, 0], sizes = [8, 16, 32], strides = [1, 1, 1]} : vector<10x16x32xbf16> to vector<8x16x32xbf16>
    %36 = vector.shape_cast %35 : vector<8x16x32xbf16> to vector<128x32xbf16>
    %c0_12 = arith.constant 0 : index
    %c256 = arith.constant 256 : index
    %37 = vector.load %arg9[%c0_12, %c256] : memref<128x288xbf16, #tpu.memory_space<vmem>>, vector<128x32xbf16>
    tpu.vector_store %arg9[%c0_12, %c256], %36 {strides = array<i32>} : memref<128x288xbf16, #tpu.memory_space<vmem>>, vector<128x32xbf16>,
    %c0_13 = arith.constant 0 : index
    %c0_14 = arith.constant 0 : index
    %38 = vector.load %arg8[%c0_13, %c0_14] : memref<128x32xf32, #tpu.memory_space<vmem>>, vector<128x32xf32>
    %c0_15 = arith.constant 0 : index
    %c0_16 = arith.constant 0 : index
    %39 = vector.load %arg9[%c0_15, %c0_16] : memref<128x288xbf16, #tpu.memory_space<vmem>>, vector<128x288xbf16>
    %c0_17 = arith.constant 0 : index
    %c0_18 = arith.constant 0 : index
    %c0_19 = arith.constant 0 : index
    %40 = vector.load %arg4[%c0_17, %c0_18, %c0_19] : memref<9x32x32xbf16, #tpu.memory_space<vmem>>, vector<9x32x32xbf16>
    %41 = vector.shape_cast %40 : vector<9x32x32xbf16> to vector<288x32xbf16>
    %cst = arith.constant dense<0.000000e+00> : vector<128x32xf32>
    %42 = tpu.matmul %39, %41, %cst {dimension_numbers = #tpu.dot_dimension_numbers<[1], [0], [0], [1], [0, 0, 1, 1], [], []>} : vector<128x288xbf16>, vector<288x32xbf16>, vector<128x32xf32> -> vector<128x32xf32>
    %43 = arith.addf %38, %42 : vector<128x32xf32>
    %c0_20 = arith.constant 0 : index
    %c0_21 = arith.constant 0 : index
    %44 = vector.load %arg8[%c0_20, %c0_21] : memref<128x32xf32, #tpu.memory_space<vmem>>, vector<128x32xf32>
    tpu.vector_store %arg8[%c0_20, %c0_21], %43 {strides = array<i32>} : memref<128x32xf32, #tpu.memory_space<vmem>>, vector<128x32xf32>,
    %c0_i32_22 = arith.constant 0 : i32
    %45 = arith.cmpi eq, %arg2, %c0_i32_22 : i32
    %46 = arith.extui %45 : i1 to i32
    %c0_i32_23 = arith.constant 0 : i32
    %47 = arith.cmpi ne, %46, %c0_i32_23 : i32
    scf.if %47 {
      %c0_24 = arith.constant 0 : index
      %c0_25 = arith.constant 0 : index
      %48 = vector.load %arg8[%c0_24, %c0_25] : memref<128x32xf32, #tpu.memory_space<vmem>>, vector<128x32xf32>
      %c0_26 = arith.constant 0 : index
      %c0_27 = arith.constant 0 : index
      %49 = vector.load %arg5[%c0_26, %c0_27] : memref<1x32xf32, #tpu.memory_space<vmem>>, vector<1x32xf32>
      %50 = vector.broadcast %49 : vector<1x32xf32> to vector<128x32xf32>
      %51 = arith.mulf %48, %50 : vector<128x32xf32>
      %c0_28 = arith.constant 0 : index
      %c0_29 = arith.constant 0 : index
      %52 = vector.load %arg6[%c0_28, %c0_29] : memref<1x32xf32, #tpu.memory_space<vmem>>, vector<1x32xf32>
      %53 = vector.broadcast %52 : vector<1x32xf32> to vector<128x32xf32>
      %54 = arith.addf %51, %53 : vector<128x32xf32>
      %cst_30 = arith.constant 0.000000e+00 : f32
      %55 = vector.broadcast %cst_30 : f32 to vector<128x32xf32>
      %56 = arith.maximumf %54, %55 : vector<128x32xf32>
      %57 = vector.shape_cast %56 : vector<128x32xf32> to vector<8x16x32xf32>
      %58 = arith.truncf %57 : vector<8x16x32xf32> to vector<8x16x32xbf16>
      %c0_31 = arith.constant 0 : index
      %c0_32 = arith.constant 0 : index
      %c0_33 = arith.constant 0 : index
      %c0_34 = arith.constant 0 : index
      %59 = vector.load %arg7[%c0_31, %c0_32, %c0_33, %c0_34] : memref<1x8x16x32xbf16, #tpu.memory_space<vmem>>, vector<1x8x16x32xbf16>
      %60 = vector.shape_cast %59 : vector<1x8x16x32xbf16> to vector<8x16x32xbf16>
      %61 = vector.shape_cast %58 : vector<8x16x32xbf16> to vector<1x8x16x32xbf16>
      tpu.vector_store %arg7[%c0_31, %c0_32, %c0_33, %c0_34], %61 {strides = array<i32>} : memref<1x8x16x32xbf16, #tpu.memory_space<vmem>>, vector<1x8x16x32xbf16>,
    } else {
    }
    return
  }
  func.func @transform_0(%arg0: i32, %arg1: i32, %arg2: i32) -> (i32, i32, i32, i32) {
    %c0_i32 = arith.constant 0 : i32
    %c0_i32_0 = arith.constant 0 : i32
    %c0_i32_1 = arith.constant 0 : i32
    return %arg0, %c0_i32, %c0_i32_0, %arg2 : i32, i32, i32, i32
  }
  func.func @transform_1(%arg0: i32, %arg1: i32, %arg2: i32) -> (i32, i32, i32) {
    %c0_i32 = arith.constant 0 : i32
    %c0_i32_0 = arith.constant 0 : i32
    %c0_i32_1 = arith.constant 0 : i32
    return %c0_i32, %arg2, %c0_i32_0 : i32, i32, i32
  }
  func.func @transform_2(%arg0: i32, %arg1: i32, %arg2: i32) -> (i32, i32) {
    %c0_i32 = arith.constant 0 : i32
    %c0_i32_0 = arith.constant 0 : i32
    %c0_i32_1 = arith.constant 0 : i32
    return %c0_i32, %c0_i32_0 : i32, i32
  }
  func.func @transform_3(%arg0: i32, %arg1: i32, %arg2: i32) -> (i32, i32) {
    %c0_i32 = arith.constant 0 : i32
    %c0_i32_0 = arith.constant 0 : i32
    %c0_i32_1 = arith.constant 0 : i32
    return %c0_i32, %c0_i32_0 : i32, i32
  }
  func.func @transform_4(%arg0: i32, %arg1: i32, %arg2: i32) -> (i32, i32, i32, i32) {
    %c0_i32 = arith.constant 0 : i32
    %c0_i32_0 = arith.constant 0 : i32
    %c0_i32_1 = arith.constant 0 : i32
    return %arg0, %arg1, %c0_i32, %c0_i32_0 : i32, i32, i32, i32
  }
}

module attributes {stable_mosaic.version = 11 : i64} {
  func.func @_cam_attn_kernel(%arg0: i32, %arg1: i32, %arg2: memref<1x256x32xbf16, #tpu.memory_space<vmem>>, %arg3: memref<1x32x32xbf16, #tpu.memory_space<vmem>>, %arg4: memref<32x32xf32, #tpu.memory_space<vmem>>) attributes {dimension_semantics = [#tpu.dimension_semantics<parallel>, #tpu.dimension_semantics<arbitrary>], iteration_bounds = array<i64: 2, 1>, scalar_prefetch = 0 : i64, scratch_operands = 1 : i64, tpu.core_type = #tpu.core_type<tc>, window_params = [{transform_indices = @transform_0, window_bounds = array<i64: 1, 256, 32>}, {transform_indices = @transform_1, window_bounds = array<i64: 1, 32, 32>}]} {
    %c0_i32 = arith.constant 0 : i32
    %0 = arith.cmpi eq, %arg1, %c0_i32 : i32
    %1 = arith.extui %0 : i1 to i32
    %c0_i32_0 = arith.constant 0 : i32
    %2 = arith.cmpi ne, %1, %c0_i32_0 : i32
    scf.if %2 {
      %cst_9 = arith.constant 0.000000e+00 : f32
      %12 = vector.broadcast %cst_9 : f32 to vector<32x32xf32>
      %c0_10 = arith.constant 0 : index
      %c0_11 = arith.constant 0 : index
      %13 = vector.load %arg4[%c0_10, %c0_11] : memref<32x32xf32, #tpu.memory_space<vmem>>, vector<32x32xf32>
      tpu.vector_store %arg4[%c0_10, %c0_11], %12 {strides = array<i32>} : memref<32x32xf32, #tpu.memory_space<vmem>>, vector<32x32xf32>,
    } else {
    }
    %c0 = arith.constant 0 : index
    %c0_1 = arith.constant 0 : index
    %c0_2 = arith.constant 0 : index
    %3 = vector.load %arg2[%c0, %c0_1, %c0_2] : memref<1x256x32xbf16, #tpu.memory_space<vmem>>, vector<1x256x32xbf16>
    %4 = vector.shape_cast %3 : vector<1x256x32xbf16> to vector<256x32xbf16>
    %c0_3 = arith.constant 0 : index
    %c0_4 = arith.constant 0 : index
    %5 = vector.load %arg4[%c0_3, %c0_4] : memref<32x32xf32, #tpu.memory_space<vmem>>, vector<32x32xf32>
    %cst = arith.constant dense<0.000000e+00> : vector<32x32xf32>
    %6 = tpu.matmul %4, %4, %cst {dimension_numbers = #tpu.dot_dimension_numbers<[0], [0], [1], [1], [0, 1, 1, 1], [], []>} : vector<256x32xbf16>, vector<256x32xbf16>, vector<32x32xf32> -> vector<32x32xf32>
    %7 = arith.addf %5, %6 : vector<32x32xf32>
    %c0_5 = arith.constant 0 : index
    %c0_6 = arith.constant 0 : index
    %8 = vector.load %arg4[%c0_5, %c0_6] : memref<32x32xf32, #tpu.memory_space<vmem>>, vector<32x32xf32>
    tpu.vector_store %arg4[%c0_5, %c0_6], %7 {strides = array<i32>} : memref<32x32xf32, #tpu.memory_space<vmem>>, vector<32x32xf32>,
    %c0_i32_7 = arith.constant 0 : i32
    %9 = arith.cmpi eq, %arg1, %c0_i32_7 : i32
    %10 = arith.extui %9 : i1 to i32
    %c0_i32_8 = arith.constant 0 : i32
    %11 = arith.cmpi ne, %10, %c0_i32_8 : i32
    scf.if %11 {
      %c0_9 = arith.constant 0 : index
      %c0_10 = arith.constant 0 : index
      %12 = vector.load %arg4[%c0_9, %c0_10] : memref<32x32xf32, #tpu.memory_space<vmem>>, vector<32x32xf32>
      %cst_11 = arith.constant dense<0xFF800000> : vector<32xf32>
      %13 = vector.multi_reduction <maximumf>, %12, %cst_11 [1] : vector<32x32xf32> to vector<32xf32>
      %14 = vector.shape_cast %13 : vector<32xf32> to vector<32x1xf32>
      %15 = vector.broadcast %14 : vector<32x1xf32> to vector<32x32xf32>
      %16 = arith.subf %15, %12 : vector<32x32xf32>
      %cst_12 = arith.constant dense<0xFF800000> : vector<32xf32>
      %17 = vector.multi_reduction <maximumf>, %16, %cst_12 [1] : vector<32x32xf32> to vector<32xf32>
      %18 = vector.shape_cast %17 : vector<32xf32> to vector<32x1xf32>
      %19 = vector.broadcast %18 : vector<32x1xf32> to vector<32x32xf32>
      %20 = arith.subf %16, %19 : vector<32x32xf32>
      %21 = math.exp %20 : vector<32x32xf32>
      %cst_13 = arith.constant dense<0.000000e+00> : vector<32xf32>
      %22 = vector.multi_reduction <add>, %21, %cst_13 [1] : vector<32x32xf32> to vector<32xf32>
      %23 = vector.shape_cast %22 : vector<32xf32> to vector<32x1xf32>
      %24 = tpu.reciprocal %23 {approx = true} : vector<32x1xf32> -> vector<32x1xf32>
      %25 = vector.broadcast %24 : vector<32x1xf32> to vector<32x32xf32>
      %26 = arith.mulf %21, %25 : vector<32x32xf32>
      %27 = arith.truncf %26 : vector<32x32xf32> to vector<32x32xbf16>
      %c0_14 = arith.constant 0 : index
      %c0_15 = arith.constant 0 : index
      %c0_16 = arith.constant 0 : index
      %28 = vector.load %arg3[%c0_14, %c0_15, %c0_16] : memref<1x32x32xbf16, #tpu.memory_space<vmem>>, vector<1x32x32xbf16>
      %29 = vector.shape_cast %28 : vector<1x32x32xbf16> to vector<32x32xbf16>
      %30 = vector.shape_cast %27 : vector<32x32xbf16> to vector<1x32x32xbf16>
      tpu.vector_store %arg3[%c0_14, %c0_15, %c0_16], %30 {strides = array<i32>} : memref<1x32x32xbf16, #tpu.memory_space<vmem>>, vector<1x32x32xbf16>,
    } else {
    }
    return
  }
  func.func @transform_0(%arg0: i32, %arg1: i32) -> (i32, i32, i32) {
    %c0_i32 = arith.constant 0 : i32
    %c0_i32_0 = arith.constant 0 : i32
    return %arg0, %arg1, %c0_i32 : i32, i32, i32
  }
  func.func @transform_1(%arg0: i32, %arg1: i32) -> (i32, i32, i32) {
    %c0_i32 = arith.constant 0 : i32
    %c0_i32_0 = arith.constant 0 : i32
    %c0_i32_1 = arith.constant 0 : i32
    return %arg0, %c0_i32, %c0_i32_0 : i32, i32, i32
  }
}

module attributes {stable_mosaic.version = 11 : i64} {
  func.func @_fuse_kernel(%arg0: i32, %arg1: memref<512x32xbf16, #tpu.memory_space<vmem>>, %arg2: memref<512x32xbf16, #tpu.memory_space<vmem>>, %arg3: memref<32x64xbf16, #tpu.memory_space<vmem>>, %arg4: memref<32x64xbf16, #tpu.memory_space<vmem>>, %arg5: memref<1x64xf32, #tpu.memory_space<vmem>>, %arg6: memref<512x64xf32, #tpu.memory_space<vmem>>) attributes {dimension_semantics = [#tpu.dimension_semantics<parallel>], iteration_bounds = array<i64: 1>, scalar_prefetch = 0 : i64, scratch_operands = 0 : i64, tpu.core_type = #tpu.core_type<tc>, window_params = [{transform_indices = @transform_0, window_bounds = array<i64: 512, 32>}, {transform_indices = @transform_1, window_bounds = array<i64: 512, 32>}, {pipeline_mode = #tpu.pipeline_mode<synchronous>, transform_indices = @transform_2, window_bounds = array<i64: 32, 64>}, {pipeline_mode = #tpu.pipeline_mode<synchronous>, transform_indices = @transform_3, window_bounds = array<i64: 32, 64>}, {pipeline_mode = #tpu.pipeline_mode<synchronous>, transform_indices = @transform_4, window_bounds = array<i64: 1, 64>}, {transform_indices = @transform_5, window_bounds = array<i64: 512, 64>}]} {
    %c0 = arith.constant 0 : index
    %c0_0 = arith.constant 0 : index
    %0 = vector.load %arg1[%c0, %c0_0] : memref<512x32xbf16, #tpu.memory_space<vmem>>, vector<512x32xbf16>
    %c0_1 = arith.constant 0 : index
    %c0_2 = arith.constant 0 : index
    %1 = vector.load %arg3[%c0_1, %c0_2] : memref<32x64xbf16, #tpu.memory_space<vmem>>, vector<32x64xbf16>
    %cst = arith.constant dense<0.000000e+00> : vector<512x64xf32>
    %2 = tpu.matmul %0, %1, %cst {dimension_numbers = #tpu.dot_dimension_numbers<[1], [0], [0], [1], [0, 0, 1, 1], [], []>} : vector<512x32xbf16>, vector<32x64xbf16>, vector<512x64xf32> -> vector<512x64xf32>
    %c0_3 = arith.constant 0 : index
    %c0_4 = arith.constant 0 : index
    %3 = vector.load %arg2[%c0_3, %c0_4] : memref<512x32xbf16, #tpu.memory_space<vmem>>, vector<512x32xbf16>
    %c0_5 = arith.constant 0 : index
    %c0_6 = arith.constant 0 : index
    %4 = vector.load %arg4[%c0_5, %c0_6] : memref<32x64xbf16, #tpu.memory_space<vmem>>, vector<32x64xbf16>
    %cst_7 = arith.constant dense<0.000000e+00> : vector<512x64xf32>
    %5 = tpu.matmul %3, %4, %cst_7 {dimension_numbers = #tpu.dot_dimension_numbers<[1], [0], [0], [1], [0, 0, 1, 1], [], []>} : vector<512x32xbf16>, vector<32x64xbf16>, vector<512x64xf32> -> vector<512x64xf32>
    %6 = arith.addf %2, %5 : vector<512x64xf32>
    %c0_8 = arith.constant 0 : index
    %c0_9 = arith.constant 0 : index
    %7 = vector.load %arg5[%c0_8, %c0_9] : memref<1x64xf32, #tpu.memory_space<vmem>>, vector<1x64xf32>
    %8 = vector.broadcast %7 : vector<1x64xf32> to vector<512x64xf32>
    %9 = arith.addf %6, %8 : vector<512x64xf32>
    %c0_10 = arith.constant 0 : index
    %c0_11 = arith.constant 0 : index
    %10 = vector.load %arg6[%c0_10, %c0_11] : memref<512x64xf32, #tpu.memory_space<vmem>>, vector<512x64xf32>
    tpu.vector_store %arg6[%c0_10, %c0_11], %9 {strides = array<i32>} : memref<512x64xf32, #tpu.memory_space<vmem>>, vector<512x64xf32>,
    return
  }
  func.func @transform_0(%arg0: i32) -> (i32, i32) {
    %c0_i32 = arith.constant 0 : i32
    %c0_i32_0 = arith.constant 0 : i32
    return %arg0, %c0_i32 : i32, i32
  }
  func.func @transform_1(%arg0: i32) -> (i32, i32) {
    %c0_i32 = arith.constant 0 : i32
    %c0_i32_0 = arith.constant 0 : i32
    return %arg0, %c0_i32 : i32, i32
  }
  func.func @transform_2(%arg0: i32) -> (i32, i32) {
    %c0_i32 = arith.constant 0 : i32
    %c0_i32_0 = arith.constant 0 : i32
    %c0_i32_1 = arith.constant 0 : i32
    return %c0_i32, %c0_i32_0 : i32, i32
  }
  func.func @transform_3(%arg0: i32) -> (i32, i32) {
    %c0_i32 = arith.constant 0 : i32
    %c0_i32_0 = arith.constant 0 : i32
    %c0_i32_1 = arith.constant 0 : i32
    return %c0_i32, %c0_i32_0 : i32, i32
  }
  func.func @transform_4(%arg0: i32) -> (i32, i32) {
    %c0_i32 = arith.constant 0 : i32
    %c0_i32_0 = arith.constant 0 : i32
    %c0_i32_1 = arith.constant 0 : i32
    return %c0_i32, %c0_i32_0 : i32, i32
  }
  func.func @transform_5(%arg0: i32) -> (i32, i32) {
    %c0_i32 = arith.constant 0 : i32
    %c0_i32_0 = arith.constant 0 : i32
    return %arg0, %c0_i32 : i32, i32
  }
}

module attributes {stable_mosaic.version = 11 : i64} {
  func.func @_cam_out_kernel(%arg0: i32, %arg1: i32, %arg2: memref<1x256x32xbf16, #tpu.memory_space<vmem>>, %arg3: memref<1x32x32xbf16, #tpu.memory_space<vmem>>, %arg4: memref<1xf32, #tpu.memory_space<smem>>, %arg5: memref<1x256x32xbf16, #tpu.memory_space<vmem>>) attributes {dimension_semantics = [#tpu.dimension_semantics<parallel>, #tpu.dimension_semantics<parallel>], iteration_bounds = array<i64: 2, 1>, scalar_prefetch = 0 : i64, scratch_operands = 0 : i64, tpu.core_type = #tpu.core_type<tc>, window_params = [{transform_indices = @transform_0, window_bounds = array<i64: 1, 256, 32>}, {transform_indices = @transform_1, window_bounds = array<i64: 1, 32, 32>}, {transform_indices = @transform_2, window_bounds = array<i64: 1>}, {transform_indices = @transform_3, window_bounds = array<i64: 1, 256, 32>}]} {
    %c0 = arith.constant 0 : index
    %c0_0 = arith.constant 0 : index
    %c0_1 = arith.constant 0 : index
    %0 = vector.load %arg2[%c0, %c0_0, %c0_1] : memref<1x256x32xbf16, #tpu.memory_space<vmem>>, vector<1x256x32xbf16>
    %1 = vector.shape_cast %0 : vector<1x256x32xbf16> to vector<256x32xbf16>
    %c0_2 = arith.constant 0 : index
    %c0_3 = arith.constant 0 : index
    %c0_4 = arith.constant 0 : index
    %2 = vector.load %arg3[%c0_2, %c0_3, %c0_4] : memref<1x32x32xbf16, #tpu.memory_space<vmem>>, vector<1x32x32xbf16>
    %3 = vector.shape_cast %2 : vector<1x32x32xbf16> to vector<32x32xbf16>
    %cst = arith.constant dense<0.000000e+00> : vector<256x32xf32>
    %4 = tpu.matmul %1, %3, %cst {dimension_numbers = #tpu.dot_dimension_numbers<[1], [1], [0], [0], [0, 0, 1, 0], [], []>} : vector<256x32xbf16>, vector<32x32xbf16>, vector<256x32xf32> -> vector<256x32xf32>
    %c0_5 = arith.constant 0 : index
    %5 = memref.load %arg4[%c0_5] : memref<1xf32, #tpu.memory_space<smem>>
    %6 = vector.broadcast %5 : f32 to vector<256x32xf32>
    %7 = arith.mulf %6, %4 : vector<256x32xf32>
    %8 = arith.extf %1 : vector<256x32xbf16> to vector<256x32xf32>
    %9 = arith.addf %7, %8 : vector<256x32xf32>
    %10 = arith.truncf %9 : vector<256x32xf32> to vector<256x32xbf16>
    %c0_6 = arith.constant 0 : index
    %c0_7 = arith.constant 0 : index
    %c0_8 = arith.constant 0 : index
    %11 = vector.load %arg5[%c0_6, %c0_7, %c0_8] : memref<1x256x32xbf16, #tpu.memory_space<vmem>>, vector<1x256x32xbf16>
    %12 = vector.shape_cast %11 : vector<1x256x32xbf16> to vector<256x32xbf16>
    %13 = vector.shape_cast %10 : vector<256x32xbf16> to vector<1x256x32xbf16>
    tpu.vector_store %arg5[%c0_6, %c0_7, %c0_8], %13 {strides = array<i32>} : memref<1x256x32xbf16, #tpu.memory_space<vmem>>, vector<1x256x32xbf16>,
    return
  }
  func.func @transform_0(%arg0: i32, %arg1: i32) -> (i32, i32, i32) {
    %c0_i32 = arith.constant 0 : i32
    %c0_i32_0 = arith.constant 0 : i32
    return %arg0, %arg1, %c0_i32 : i32, i32, i32
  }
  func.func @transform_1(%arg0: i32, %arg1: i32) -> (i32, i32, i32) {
    %c0_i32 = arith.constant 0 : i32
    %c0_i32_0 = arith.constant 0 : i32
    %c0_i32_1 = arith.constant 0 : i32
    return %arg0, %c0_i32, %c0_i32_0 : i32, i32, i32
  }
  func.func @transform_2(%arg0: i32, %arg1: i32) -> i32 {
    %c0_i32 = arith.constant 0 : i32
    %c0_i32_0 = arith.constant 0 : i32
    return %c0_i32 : i32
  }
  func.func @transform_3(%arg0: i32, %arg1: i32) -> (i32, i32, i32) {
    %c0_i32 = arith.constant 0 : i32
    %c0_i32_0 = arith.constant 0 : i32
    return %arg0, %arg1, %c0_i32 : i32, i32, i32
  }
}

</mosaic_0001>

<bundles_post_ra>
// kernel: dablock_forward.11
= control target key start
LH: loop header
LB: loop body
LE: loop exit
PB: predicated region body
PF: predicated region fallthrough
CT: control target
= control target key end

     0   :  { %s4229_s0 = inlined_call_operand.hbm [shape: bf16[2,256,32], index: 0, kind: input, shape index: {}]   ;;  %s4230_s1 = inlined_call_operand.hbm [shape: bf16[2,256,4], index: 1, kind: input, shape index: {}]   ;;  %s4231_s2 = inlined_call_operand.hbm [shape: bf16[2,256,4], index: 2, kind: input, shape index: {}]   ;;  %s4232_s3 = inlined_call_operand.hbm [shape: bf16[2,256,32], index: 3, kind: input, shape index: {}]   ;;  %s4233_s4 = inlined_call_operand.<no memory space> [shape: f32[1], index: 4, kind: input, shape index: {}]   ;;  %s4234_s5 = inlined_call_operand.hbm [shape: bf16[2,256,32], index: 5, kind: output, shape index: {}]  }
   0x1   :  { %4273 = sst [smem:[#allocation35_spill]] %s4229_s0 }
   0x2   :  { %4274 = sst [smem:[#allocation36_spill]] %s4230_s1 }
   0x3   :  { %10 = sst [smem:[#allocation2]] %s4233_s4 }
   0x4   :  { %11 = vsyncpa [#allocation4], 0 }
   0x5   :  { %13 = vsyncpa [#allocation4 + $0x1], 0 }
   0x6   :  { %14 = vsyncpa [#allocation7], 0 }
   0x7   :  { %16 = vsyncpa [#allocation7 + $0x1], 0 }
   0x8   :  { %17 = vsyncpa [#allocation10], 0 }
   0x9   :  { %19 = vsyncpa [#allocation10 + $0x1], 0 }
   0xa   :  { %20 = vsyncpa [#allocation5], 0 }
   0xb   :  { %22 = vsyncpa [#allocation5 + $0x1], 0  ;;  %s3147_s20 = smov 0   ;;  %s3149_s21 = smov 0  }
   0xc   :  { %s3151_s22 = smov 0   ;;  %s3153_s23 = smov 0  }
   0xd   :  { %s3155_s24 = smov 0   ;;  %s3157_s25 = smov 0  }
   0xe LB: > { %4275 = sst [smem:[#allocation16_spill]] %s3091_s22  ;;  %s3178_s4 = sadd.s32 4294967295, %s3103_s25   ;;  %s3103_s25 = sphi %s3157_s25, %s28_s25   ;;  %s3099_s24 = sphi %s3155_s24, %s4364_s24   ;;  %s3095_s23 = sphi %s3153_s23, %s4363_s23   ;;  %s3091_s22 = sphi %s3151_s22, %s4362_s22   ;;  %s3087_s21 = sphi %s3149_s21, %s4366_s21   ;;  %s3083_s20 = sphi %s3147_s20, %s4365_s20  }
   0xf   : > { %4276 = sst [smem:[#allocation17_spill]] %s3099_s24  ;;  %s2166_s26 = sadd.s32 4294967294, %s3103_s25  }
  0x10   : > { %4277 = sst [smem:[#allocation18_spill]] %s3103_s25  ;;  %s40_s27 = sadd.s32 1, %s3099_s24 }
  0x11   : > { %s49_s28 = sadd.s32 1, %s3091_s22  ;;  %p42_p0 = scmp.ge.s32.totalorder %s40_s27, 2 }
  0x12   : > { %p56_p1 = scmp.ne.s32.totalorder %s3091_s22, %s3087_s21  ;;  %p57_p2 = scmp.eq.s32.totalorder %s3103_s25, 0 }
  0x13   : > { %p62_p3 = scmp.ne.s32.totalorder %s3087_s21, %s3083_s20  ;;  %s4368_s27 = smov (%p42_p0, %s40_s27), 0 }
  0x14   : > { %4278 = sst [smem:[#allocation19_spill]] %s4368_s27  ;;  %p3190_p4 = por %p57_p2, %p56_p1 }
  0x15   : > { %p63_p5 = scmp.eq.s32.totalorder %s3178_s4, 0  ;;  %s44_s30 = ssub.s32 %s3099_s24, %s4368_s27 }
  0x16   : > { %p189_p6 = scmp.eq.s32.totalorder %s3178_s4, 1  ;;  %p47_p7 = scmp.eq.s32.totalorder %s44_s30, 0 }
  0x17   : > { %p3198_p8 = por %p63_p5, %p62_p3  ;;  %p195_p10 = scmp.eq.s32.totalorder %s2166_s26, 1 }
  0x18   : > { %p3202_p9 = por %p189_p6, %p56_p1  ;;  %p2599_p13 = scmp.lt.s32.totalorder %s3103_s25, 2 }
  0x19   : > { %s4280_s6 = scalar_select %p3198_p8, 1, 0 }
  0x1a   : > { %s4281_s7 = scalar_select %p3202_p9, 1, 0 }
  0x1b   : > { %s3207_s8 = scalar_select %p47_p7, %s3091_s22, %s49_s28  }
  0x1c   : > { %p3209_p11 = por %p195_p10, %p62_p3  ;;  %s3216_s10 = sand.u32 1, %s3091_s22  }
  0x1d   : > { %4282 = sst [smem:[#allocation20_spill]] %s3207_s8  ;;  %s3219_s11 = sshll.u32 %s3216_s10, 7 }
  0x1e   : > { %s4283_s9 = scalar_select %p3209_p11, 1, 0 }
  0x1f   : > { %s3222_s12 = sshll.u32 %s3099_s24, 11  ;;  %p3226_p0 = pnand %p2599_p13, %p3190_p4 }
  0x20   : > { %s241_s14 = sand.u32 1, %s3103_s25   ;;  %s4285_s1 = sld [smem:[#allocation36_spill]] }
  0x21   : > { %s245_s18 = scalar_lea.vmem [#allocation6], %s3219_s11  ;;  %s3242_s26 = scalar_lea.sflag [#allocation7], %s241_s14 }
  0x22   : > { %s254_s19 = sshll.u32 %s245_s18, 4  ;;  %p3248_p4 = pneg %p3226_p0  ;;  %s3239_s19 = int_to_ptr.vmem [resolvable:$true] %s254_s19 }
  0x26   : > { %s3235_s17 = scalar_lea.hbm %s4285_s1, %s3222_s12  ;;  %s2898_s16 = scalar_lea.hbm %s4285_s1, 4096 }
  0x27   : > { %s2893_s28 = scalar_lea.hbm %s3235_s17, 2048  ;;  %p2899_p7 = scmp.lt.u32.totalorder %s3235_s17, %s4285_s1 }
  0x28   : > { %p2894_p3 = scmp.ne.s32.totalorder %s3235_s17, %s2893_s28  ;;  %p2900_p10 = scmp.lt.u32.totalorder %s2898_s16, %s2893_s28 }
  0x29   : > { %p2902_p12 = scmp.lt.u32.totalorder %s2893_s28, %s3235_s17 }
  0x2a   : > { %p2896_p5 = pnand %p3248_p4, %p2894_p3  ;;  %p2901_p13 = por %p2900_p10, %p2899_p7 }
  0x2c   : > { %p2897_p6 = pneg %p2896_p5  ;;  %p2903_p1 = por %p2902_p12, %p2901_p13 }
  0x2e   : > { %p2904_p2 = pnand %p2903_p1, %p2897_p6 }
  0x30   : > { %2907 = shalt.err (!%p2904_p2)
}
  0x31   : > { %s2908_s14 = scalar_lea.vmem %s3239_s19, 2048  ;;  %s3105_s30 = smov [#allocation6]  }
  0x32   : > { %p2909_p3 = scmp.ne.s32.totalorder %s3239_s19, %s2908_s14  ;;  %s2913_s15 = sshll.u32 %s3105_s30, 4  ;;  %s2914_s15 = int_to_ptr.vmem [resolvable:$false] %s2913_s15 }
  0x33   : > { %s2915_s27 = scalar_lea.vmem %s2914_s15, 4096  ;;  %p2916_p9 = scmp.lt.s32.totalorder %s3239_s19, %s2914_s15 }
  0x34   : > { %p2911_p5 = pnand %p2909_p3, %p3248_p4  ;;  %p2917_p8 = scmp.lt.s32.totalorder %s2915_s27, %s2908_s14 }
  0x36   : > { %p2912_p11 = pneg %p2911_p5  ;;  %p2918_p7 = por %p2917_p8, %p2916_p9 }
  0x38   : > { %p2919_p10 = pnand %p2918_p7, %p2912_p11 }
  0x3a   : > { %2922 = shalt.err (!%p2919_p10)
}
  0x3b   : > { %s4238_s28 = smov 64   ;;  %s4240_s16 = smov 4  }
  0x3c   : > { %2588 = dma.hbm_to_vmem [thread:$0]  (!%p3226_p0), %s3235_s17, 2048, %s3239_s19, %s3242_s26, %s4238_s28, %s4238_s28, %s4240_s16  }
  0x3d   : > { %p4287_p8 = scmp.lt.s32.totalorder %s3103_s25, 3  ;;  %p4288_p9 = scmp.ge.s32.totalorder %s3103_s25, 1 }
  0x3e   : > { %s4290_s0 = sld [smem:[#allocation35_spill]]  ;;  %s222_s27 = scalar_lea.vmem [#allocation3], %s3219_s11 }
  0x3f   : > { %p3279_p11 = pnand %p4288_p9, %p4287_p8  ;;  %s231_s1 = sshll.u32 %s222_s27, 4  ;;  %s3290_s1 = int_to_ptr.vmem [resolvable:$true] %s231_s1 }
  0x40   : > { %s3296_s28 = scalar_lea.hbm %s4231_s2, %s3222_s12  ;;  %s219_s16 = scalar_lea.sflag [#allocation4], %s3216_s10 }
  0x41   : > { %s4289_s18 = scalar_select %p3279_p11, 1, 0 }
  0x44   : > { %s3287_s15 = scalar_lea.hbm %s4290_s0, %s3222_s12  ;;  %s2928_s8 = scalar_lea.hbm %s4290_s0, 4096 }
  0x45   : > { %s2923_s24 = scalar_lea.hbm %s3287_s15, 2048  ;;  %p2929_p6 = scmp.lt.u32.totalorder %s3287_s15, %s4290_s0 }
  0x46   : > { %p2924_p12 = scmp.ne.s32.totalorder %s3287_s15, %s2923_s24  ;;  %p2930_p13 = scmp.lt.u32.totalorder %s2928_s8, %s2923_s24 }
  0x47   : > { %p2932_p5 = scmp.lt.u32.totalorder %s2923_s24, %s3287_s15 }
  0x48   : > { %p2926_p1 = pnand %p2924_p12, %p3248_p4  ;;  %p2931_p3 = por %p2930_p13, %p2929_p6 }
  0x4a   : > { %p2927_p2 = pneg %p2926_p1  ;;  %p2933_p7 = por %p2932_p5, %p2931_p3 }
  0x4c   : > { %p2934_p10 = pnand %p2933_p7, %p2927_p2 }
  0x4e   : > { %2937 = shalt.err (!%p2934_p10)
}
  0x4f   : > { %s2938_s27 = scalar_lea.vmem %s3290_s1, 2048  ;;  %s3108_s17 = smov [#allocation3]  }
  0x50   : > { %p2939_p8 = scmp.ne.s32.totalorder %s3290_s1, %s2938_s27  ;;  %s2943_s19 = sshll.u32 %s3108_s17, 4  ;;  %s2944_s19 = int_to_ptr.vmem [resolvable:$false] %s2943_s19 }
  0x51   : > { %s2945_s22 = scalar_lea.vmem %s2944_s19, 4096  ;;  %p2946_p1 = scmp.lt.s32.totalorder %s3290_s1, %s2944_s19 }
  0x52   : > { %p2941_p9 = pnand %p2939_p8, %p3248_p4  ;;  %p2947_p11 = scmp.lt.s32.totalorder %s2945_s22, %s2938_s27 }
  0x54   : > { %p2942_p12 = pneg %p2941_p9  ;;  %p2948_p6 = por %p2947_p11, %p2946_p1 }
  0x56   : > { %p2949_p13 = pnand %p2948_p6, %p2942_p12 }
  0x58   : > { %2952 = shalt.err (!%p2949_p13)
}
  0x59   : > { %s4291_s24 = smov 4   ;;  %s4292_s25 = smov 64  }
  0x5a   : > { %2585 = dma.hbm_to_vmem [thread:$0]  (!%p3226_p0), %s3287_s15, 2048, %s3290_s1, %s219_s16, %s4292_s25, %s4292_s25, %s4291_s24  }
  0x5b   : > { %s268_s8 = scalar_lea.vmem [#allocation8], %s3219_s11  ;;  %s2953_s30 = scalar_lea.hbm %s3296_s28, 2048 }
  0x5c   : > { %s275_s14 = sshll.u32 %s268_s8, 4  ;;  %p2954_p11 = scmp.ne.s32.totalorder %s3296_s28, %s2953_s30  ;;  %s3326_s14 = int_to_ptr.vmem [resolvable:$true] %s275_s14 }
  0x5d   : > { %s2958_s19 = scalar_lea.hbm %s4231_s2, 4096  ;;  %p2959_p5 = scmp.lt.u32.totalorder %s3296_s28, %s4231_s2 }
  0x5e   : > { %p2956_p2 = pnand %p2954_p11, %p3248_p4  ;;  %p2960_p7 = scmp.lt.u32.totalorder %s2958_s19, %s2953_s30 }
  0x5f   : > { %p2962_p8 = scmp.lt.u32.totalorder %s2953_s30, %s3296_s28 }
  0x60   : > { %p2957_p3 = pneg %p2956_p2  ;;  %p2961_p10 = por %p2960_p7, %p2959_p5 }
  0x62   : > { %p2963_p9 = por %p2962_p8, %p2961_p10 }
  0x64   : > { %p2964_p12 = pnand %p2963_p9, %p2957_p3 }
  0x66   : > { %2967 = shalt.err (!%p2964_p12)
}
  0x67   : > { %s2968_s1 = scalar_lea.vmem %s3326_s14, 2048  ;;  %s3109_s16 = smov [#allocation8]  }
  0x68   : > { %p2969_p1 = scmp.ne.s32.totalorder %s3326_s14, %s2968_s1  ;;  %s2973_s15 = sshll.u32 %s3109_s16, 4  ;;  %s2974_s15 = int_to_ptr.vmem [resolvable:$false] %s2973_s15 }
  0x69   : > { %s2975_s0 = scalar_lea.vmem %s2974_s15, 4096  ;;  %p2976_p11 = scmp.lt.s32.totalorder %s3326_s14, %s2974_s15 }
  0x6a   : > { %p2971_p6 = pnand %p2969_p1, %p3248_p4  ;;  %p2977_p2 = scmp.lt.s32.totalorder %s2975_s0, %s2968_s1 }
  0x6c   : > { %p2972_p13 = pneg %p2971_p6  ;;  %p2978_p5 = por %p2977_p2, %p2976_p11 }
  0x6e   : > { %p2979_p7 = pnand %p2978_p5, %p2972_p13 }
  0x70   : > { %2982 = shalt.err (!%p2979_p7)
}
  0x71   : > { %2591 = dma.hbm_to_vmem [thread:$0]  (!%p3226_p0), %s3296_s28, 2048, %s3326_s14, %s3242_s26, %s4292_s25, %s4292_s25, %s4291_s24  }
  0x72   : > { %s3357_s27 = scalar_lea.hbm %s4232_s3, %s3222_s12  ;;  %s289_s17 = scalar_lea.vmem [#allocation9], %s3219_s11 }
  0x73   : > { %s296_s19 = sshll.u32 %s289_s17, 4  ;;  %s286_s22 = scalar_lea.sflag [#allocation10], %s3216_s10  ;;  %s3360_s19 = int_to_ptr.vmem [resolvable:$true] %s296_s19 }
  0x74   : > { %s2983_s1 = scalar_lea.hbm %s3357_s27, 2048  ;;  %s2988_s14 = scalar_lea.hbm %s4232_s3, 4096 }
  0x75   : > { %p2984_p3 = scmp.ne.s32.totalorder %s3357_s27, %s2983_s1  ;;  %p2989_p9 = scmp.lt.u32.totalorder %s3357_s27, %s4232_s3 }
  0x76   : > { %p2990_p12 = scmp.lt.u32.totalorder %s2988_s14, %s2983_s1  ;;  %p2992_p6 = scmp.lt.u32.totalorder %s2983_s1, %s3357_s27 }
  0x77   : > { %p2986_p10 = pnand %p2984_p3, %p3248_p4 }
  0x78   : > { %p2991_p1 = por %p2990_p12, %p2989_p9 }
  0x79   : > { %p2987_p8 = pneg %p2986_p10 }
  0x7a   : > { %p2993_p13 = por %p2992_p6, %p2991_p1 }
  0x7c   : > { %p2994_p11 = pnand %p2993_p13, %p2987_p8 }
  0x7e   : > { %2997 = shalt.err (!%p2994_p11)
}
  0x7f   : > { %s2998_s11 = scalar_lea.vmem %s3360_s19, 2048  ;;  %s3110_s15 = smov [#allocation9]  }
  0x80   : > { %p2999_p2 = scmp.ne.s32.totalorder %s3360_s19, %s2998_s11  ;;  %s3003_s0 = sshll.u32 %s3110_s15, 4  ;;  %s3004_s0 = int_to_ptr.vmem [resolvable:$false] %s3003_s0 }
  0x81   : > { %s3005_s8 = scalar_lea.vmem %s3004_s0, 4096  ;;  %p3006_p3 = scmp.lt.s32.totalorder %s3360_s19, %s3004_s0 }
  0x82   : > { %p3001_p5 = pnand %p2999_p2, %p3248_p4  ;;  %p3007_p10 = scmp.lt.s32.totalorder %s3005_s8, %s2998_s11 }
  0x84   : > { %p3002_p7 = pneg %p3001_p5  ;;  %p3008_p9 = por %p3007_p10, %p3006_p3 }
  0x86   : > { %p3009_p12 = pnand %p3008_p9, %p3002_p7 }
  0x88   : > { %3012 = shalt.err (!%p3009_p12)
}
  0x89   : > { %2594 = dma.hbm_to_vmem [thread:$0]  (!%p3226_p0), %s3357_s27, 2048, %s3360_s19, %s286_s22, %s4292_s25, %s4292_s25, %s4291_s24  }
  0x8a   : > { %p4293_p4 = scmp.ne.s32.totalorder %s4289_s18, 0 }
  0x8c   : > { %308 = sbr.rel (%p4293_p4) target bundleno = 1186 (0x4a2), region = 40 }
  0x93   : > { %s3392_s29 = sand.u32 1, %s3087_s21   ;;  %p4294_p8 = scmp.ne.s32.totalorder %s4280_s6, 0 }
  0x94   : > { %s3395_s30 = sshll.u32 %s3392_s29, 7  ;;  %s311_s13 = scalar_lea.sflag [#allocation4], %s3392_s29 }
  0x95   : > { %s3399_s17 = scalar_lea.vmem [#allocation3], %s3395_s30 }
  0x96   : > { %3066 = dma.done.wait (%p4294_p8), %s311_s13, 2048  }
  0x97   : > { %3068 = vsyncadd (%p4294_p8), %s311_s13, 4294965248  ;;  %s319_s10 = sand.u32 1, %s3178_s4   ;;  %s3407_s24 = scalar_lea.vmem [#allocation6], %s3395_s30 }
  0x98   : > { %s320_s18 = scalar_lea.sflag [#allocation7], %s319_s10 }
  0x99   : > { %3070 = dma.done.wait (%p4294_p8), %s320_s18, 4096  }
  0x9a   : > { %3072 = vsyncadd (%p4294_p8), %s320_s18, 4294963200  ;;  %s3414_s25 = scalar_lea.vmem [#allocation8], %s3395_s30  ;;  %s338_s27 = scalar_lea.sflag [#allocation10], %s3392_s29 }
  0x9b   : > { %s3418_s19 = scalar_lea.vmem [#allocation9], %s3395_s30 }
  0x9c   : > { %3074 = dma.done.wait (%p4294_p8), %s338_s27, 2048  }
  0x9d   : > { %3076 = vsyncadd (%p4294_p8), %s338_s27, 4294965248  ;;  %vm643_vm0 = vcmask 31744   ;;  %v2653_v0 = vld [vmem:[%s3414_s25 + $0x40] sm:$0xff]   ;;  %v2655_v2 = vld [vmem:[%s3414_s25 + $0x48] sm:$0xff]   ;;  %s1702_s4 = sld [smem:[#allocation2]]  ;;  %vm1960_vm1 = vcmask 257024  }
  0x9e   : > { %v2654_v1 = vld [vmem:[%s3414_s25] sm:$0xff]   ;;  %2564 = vmatprep.subr.msk.bf16.mxu0 %vm643_vm0, %v2653_v0  ;;  %v2656_v4 = vld [vmem:[%s3414_s25 + $0x8] sm:$0xff]   ;;  %v2657_v6 = vld [vmem:[%s3414_s25 + $0x50] sm:$0xff]   ;;  %s4063_s6 = scalar_lea.vmem [#allocation11], %s3395_s30  ;;  %s2324_s22 = sshll.u32 %s3095_s23, 11 }
  0x9f   : > { %v693_v3 = vsel %vm643_vm0, %v2654_v1, 0  ;;  %v696_v5 = vsel %vm643_vm0, %v2656_v4, 0  ;;  %v2658_v7 = vld [vmem:[%s3414_s25 + $0x10] sm:$0xff]   ;;  %v2669_v8 = vld [vmem:[%s3407_s24] sm:$0xff]   ;;  %v2659_v10 = vld [vmem:[%s3414_s25 + $0x58] sm:$0xff]   ;;  %s2009_s1 = sshll.u32 %s4063_s6, 4  ;;  %s4174_s14 = scalar_lea.hbm %s4234_s5, %s2324_s22  ;;  %s4176_s1 = int_to_ptr.vmem [resolvable:$true] %s2009_s1 }
  0xa0   : > { %2405 = vmatpush3.bf16.xpose.msra.mxu0 %v693_v3  ;;  %v699_v9 = vsel %vm643_vm0, %v2658_v7, 0  ;;  %2420 = vmatprep.mubr.msk.bf16.mxu0 %vm643_vm0, %v2669_v8  ;;  %v2660_v11 = vld [vmem:[%s3414_s25 + $0x18] sm:$0xff]   ;;  %v2662_v12 = vld [vmem:[%s3414_s25 + $0x20] sm:$0xff]   ;;  %v2664_v16 = vld [vmem:[%s3414_s25 + $0x28] sm:$0xff]   ;;  %s1994_s12 = scalar_lea.sflag [#allocation5], %s3392_s29  ;;  %s3013_s23 = scalar_lea.vmem %s4176_s1, 2048 }
  0xa1   : > { %2565 = vmatprep.subr.msk.bf16.mxu0 %vm643_vm0, %v2655_v2  ;;  %v702_v13 = vsel %vm643_vm0, %v2660_v11, 0  ;;  %v2661_v14 = vld [vmem:[%s3414_s25 + $0x60] sm:$0xff]   ;;  %v705_v15 = vsel %vm643_vm0, %v2662_v12, 0  ;;  %v2663_v17 = vld [vmem:[%s3414_s25 + $0x68] sm:$0xff]   ;;  %v708_v18 = vsel %vm643_vm0, %v2664_v16, 0  ;;  %v2665_v19 = vld [vmem:[%s3414_s25 + $0x70] sm:$0xff]   ;;  %p3014_p0 = scmp.ne.s32.totalorder %s4176_s1, %s3013_s23 }
  0xa2   : > { %v2666_v20 = vld [vmem:[%s3414_s25 + $0x30] sm:$0xff]   ;;  %v2667_v22 = vld [vmem:[%s3414_s25 + $0x78] sm:$0xff]   ;;  %v2670_v25 = vld [vmem:[%s3407_s24 + $0x8] sm:$0xff]   ;;  %p4357_p1 = scmp.ne.s32.totalorder %s4281_s7, 0  ;;  %s3111_s16 = smov [#allocation11]  }
  0xa3   : > { %v711_v21 = vsel %vm643_vm0, %v2666_v20, 0  ;;  %v2668_v23 = vld [vmem:[%s3414_s25 + $0x38] sm:$0xff]   ;;  %v2671_v26 = vld [vmem:[%s3407_s24 + $0x10] sm:$0xff]   ;;  %v2673_v28 = vld [vmem:[%s3407_s24 + $0x20] sm:$0xff]   ;;  %s3017_s11 = sshll.u32 %s3111_s16, 4  ;;  %s3018_s11 = int_to_ptr.vmem [resolvable:$false] %s3017_s11 }
  0xa4   : > { %v714_v24 = vsel %vm643_vm0, %v2668_v23, 0  ;;  %v2672_v27 = vld [vmem:[%s3407_s24 + $0x18] sm:$0xff]   ;;  %v2674_v29 = vld [vmem:[%s3407_s24 + $0x28] sm:$0xff]   ;;  %v2675_v30 = vld [vmem:[%s3407_s24 + $0x30] sm:$0xff]   ;;  %p3015_p6 = pnand %p3014_p0, %p4357_p1  ;;  %s3019_s15 = scalar_lea.vmem %s3018_s11, 4096 }
  0xa5   : > { %v2676_v31 = vld [vmem:[%s3407_s24 + $0x38] sm:$0xff]   ;;  %v2677_v32 = vld [vmem:[%s3407_s24 + $0x40] sm:$0xff]   ;;  %v2678_v33 = vld [vmem:[%s3407_s24 + $0x48] sm:$0xff]   ;;  %p3020_p11 = scmp.lt.s32.totalorder %s4176_s1, %s3018_s11  ;;  %p3021_p2 = scmp.lt.s32.totalorder %s3019_s15, %s3013_s23 }
  0xa6   : > { %v2679_v34 = vld [vmem:[%s3407_s24 + $0x50] sm:$0xff]   ;;  %v2680_v35 = vld [vmem:[%s3407_s24 + $0x58] sm:$0xff]   ;;  %v2681_v36 = vld [vmem:[%s3407_s24 + $0x60] sm:$0xff]   ;;  %p3016_p13 = pneg %p3015_p6 }
  0xa7   : > { %v2682_v37 = vld [vmem:[%s3407_s24 + $0x68] sm:$0xff]   ;;  %v2683_v38 = vld [vmem:[%s3407_s24 + $0x70] sm:$0xff]   ;;  %v2684_v39 = vld [vmem:[%s3407_s24 + $0x78] sm:$0xff]   ;;  %p3022_p5 = por %p3021_p2, %p3020_p11 }
  0xa8   : > { %2407 = vmatpush3.bf16.xpose.msra.mxu0 %v696_v5 }
  0xa9   : > { %2566 = vmatprep.subr.msk.bf16.mxu0 %vm643_vm0, %v2657_v6  ;;  %p3023_p7 = pnand %p3022_p5, %p3016_p13 }
  0xb0   : > { %2409 = vmatpush3.bf16.xpose.msra.mxu0 %v699_v9 }
  0xb1   : > { %2567 = vmatprep.subr.msk.bf16.mxu0 %vm643_vm0, %v2659_v10 }
  0xb8   : > { %2411 = vmatpush3.bf16.xpose.msra.mxu0 %v702_v13 }
  0xb9   : > { %2568 = vmatprep.subr.msk.bf16.mxu0 %vm643_vm0, %v2661_v14 }
  0xc0   : > { %2413 = vmatpush3.bf16.xpose.msra.mxu0 %v705_v15 }
  0xc1   : > { %2569 = vmatprep.subr.msk.bf16.mxu0 %vm643_vm0, %v2663_v17 }
  0xc8   : > { %2415 = vmatpush3.bf16.xpose.msra.mxu0 %v708_v18 }
  0xc9   : > { %2570 = vmatprep.subr.msk.bf16.mxu0 %vm643_vm0, %v2665_v19 }
  0xd0   : > { %2417 = vmatpush3.bf16.xpose.msra.mxu0 %v711_v21 }
  0xd1   : > { %2571 = vmatprep.subr.msk.bf16.mxu0 %vm643_vm0, %v2667_v22 }
  0xd8   : > { %2419 = vmatpush3.bf16.xpose.msra.mxu0 %v714_v24 }
  0xdf   : > { %2421 = vmatmul.mubr.msk.bf16.vlgmr.msra.gmra.mrb[0].mxu0 %vm643_vm0, %v2669_v8 }
  0xe0   : > { %2422 = vmatprep.mubr.msk.bf16.mxu0 %vm643_vm0, %v2670_v25 }
  0xe7   : > { %2423 = vmatmul.mubr.msk.bf16.gmra.mrb[4].mxu0 %vm643_vm0, %v2670_v25 }
  0xe8   : > { %2424 = vmatprep.mubr.msk.bf16.mxu0 %vm643_vm0, %v2671_v26 }
  0xef   : > { %2425 = vmatmul.mubr.msk.bf16.gmra.mrb[8].mxu0 %vm643_vm0, %v2671_v26 }
  0xf0   : > { %2426 = vmatprep.mubr.msk.bf16.mxu0 %vm643_vm0, %v2672_v27 }
  0xf7   : > { %2427 = vmatmul.mubr.msk.bf16.gmra.mrb[12].mxu0 %vm643_vm0, %v2672_v27 }
  0xf8   : > { %2428 = vmatprep.mubr.msk.bf16.mxu0 %vm643_vm0, %v2673_v28 }
  0xff   : > { %2429 = vmatmul.mubr.msk.bf16.gmra.mrb[16].mxu0 %vm643_vm0, %v2673_v28 }
 0x100   : > { %2430 = vmatprep.mubr.msk.bf16.mxu0 %vm643_vm0, %v2674_v29 }
 0x107   : > { %2431 = vmatmul.mubr.msk.bf16.gmra.mrb[20].mxu0 %vm643_vm0, %v2674_v29 }
 0x108   : > { %2432 = vmatprep.mubr.msk.bf16.mxu0 %vm643_vm0, %v2675_v30 }
 0x10f   : > { %2433 = vmatmul.mubr.msk.bf16.gmra.mrb[24].mxu0 %vm643_vm0, %v2675_v30 }
 0x110   : > { %2434 = vmatprep.mubr.msk.bf16.mxu0 %vm643_vm0, %v2676_v31 }
 0x117   : > { %2435 = vmatmul.mubr.msk.bf16.gmra.mrb[28].mxu0 %vm643_vm0, %v2676_v31 }
 0x118   : > { %2436 = vmatprep.mubr.msk.bf16.mxu0 %vm643_vm0, %v2677_v32 }
 0x11f   : > { %2437 = vmatmul.mubr.msk.bf16.gmra.mrb[32].mxu0 %vm643_vm0, %v2677_v32 }
 0x120   : > { %2438 = vmatprep.mubr.msk.bf16.mxu0 %vm643_vm0, %v2678_v33 }
 0x127   : > { %2439 = vmatmul.mubr.msk.bf16.gmra.mrb[36].mxu0 %vm643_vm0, %v2678_v33 }
 0x128   : > { %2440 = vmatprep.mubr.msk.bf16.mxu0 %vm643_vm0, %v2679_v34 }
 0x12f   : > { %2441 = vmatmul.mubr.msk.bf16.gmra.mrb[40].mxu0 %vm643_vm0, %v2679_v34 }
 0x130   : > { %2442 = vmatprep.mubr.msk.bf16.mxu0 %vm643_vm0, %v2680_v35 }
 0x137   : > { %2443 = vmatmul.mubr.msk.bf16.gmra.mrb[44].mxu0 %vm643_vm0, %v2680_v35 }
 0x138   : > { %2444 = vmatprep.mubr.msk.bf16.mxu0 %vm643_vm0, %v2681_v36 }
 0x13f   : > { %2445 = vmatmul.mubr.msk.bf16.gmra.mrb[48].mxu0 %vm643_vm0, %v2681_v36 }
 0x140   : > { %2446 = vmatprep.mubr.msk.bf16.mxu0 %vm643_vm0, %v2682_v37 }
 0x147   : > { %2447 = vmatmul.mubr.msk.bf16.gmra.mrb[52].mxu0 %vm643_vm0, %v2682_v37 }
 0x148   : > { %2448 = vmatprep.mubr.msk.bf16.mxu0 %vm643_vm0, %v2683_v38 }
 0x14f   : > { %2449 = vmatmul.mubr.msk.bf16.gmra.mrb[56].mxu0 %vm643_vm0, %v2683_v38 }
 0x150   : > { %2450 = vmatprep.mubr.msk.bf16.mxu0 %vm643_vm0, %v2684_v39 }
 0x157   : > { %2451 = vmatmul.mubr.msk.bf16.gmra.mrb[60].mxu0 %vm643_vm0, %v2684_v39 }
 0x1b2   : > { %v3504_v40 = vpop.f32.mrb[0].mxu0 }
 0x1b3   : > { %v3506_v41 = vpop.f32.mrb[1].mxu0 }
 0x1b4   : > { %v3508_v42 = vpop.f32.mrb[2].mxu0  ;;  %v933_v43 = vmax.f32 %v3504_v40, %v3506_v41 }
 0x1b5   : > { %v3512_v44 = vpop.f32.mrb[3].mxu0 }
 0x1b6   : > { %934 = vmax.xlane.f32.xlu0 %v933_v43  ;;  %v936_v45 = vmax.f32 %v3508_v42, %v3512_v44 }
 0x1ba   : > { %937 = vmax.xlane.f32.xlu0 %v936_v45  ;;  %v3516_v46 = vpop.f32.mrb[4].mxu0 }
 0x1bb   : > { %v3518_v47 = vpop.f32.mrb[5].mxu0 }
 0x1bc   : > { %v3520_v48 = vpop.f32.mrb[6].mxu0  ;;  %v939_v49 = vmax.f32 %v3516_v46, %v3518_v47 }
 0x1bd   : > { %v3524_v50 = vpop.f32.mrb[7].mxu0 }
 0x1be   : > { %940 = vmax.xlane.f32.xlu1 %v939_v49  ;;  %v942_v51 = vmax.f32 %v3520_v48, %v3524_v50 }
 0x1c2   : > { %943 = vmax.xlane.f32.xlu1 %v942_v51  ;;  %v3528_v52 = vpop.f32.mrb[8].mxu0 }
 0x1c3   : > { %v3530_v53 = vpop.f32.mrb[9].mxu0 }
 0x1c4   : > { %v3532_v54 = vpop.f32.mrb[10].mxu0  ;;  %v945_v55 = vmax.f32 %v3528_v52, %v3530_v53 }
 0x1c5   : > { %v3536_v56 = vpop.f32.mrb[11].mxu0 }
 0x1c6   : > { %946 = vmax.xlane.f32.xlu0 %v945_v55  ;;  %v948_v57 = vmax.f32 %v3532_v54, %v3536_v56 }
 0x1c8   : > { %949 = vmax.xlane.f32.xlu1 %v948_v57 }
 0x1ca   : > { %v3540_v58 = vpop.f32.mrb[12].mxu0 }
 0x1cb   : > { %v3542_v59 = vpop.f32.mrb[13].mxu0 }
 0x1cc   : > { %v3544_v60 = vpop.f32.mrb[14].mxu0  ;;  %v951_v61 = vmax.f32 %v3540_v58, %v3542_v59 }
 0x1cd   : > { %v3548_v62 = vpop.f32.mrb[15].mxu0 }
 0x1ce   : > { %952 = vmax.xlane.f32.xlu0 %v951_v61  ;;  %v954_v63 = vmax.f32 %v3544_v60, %v3548_v62 }
 0x1d0   : > { %955 = vmax.xlane.f32.xlu1 %v954_v63 }
 0x1d2   : > { %v3552_v0 = vpop.f32.mrb[16].mxu0 }
 0x1d3   : > { %v3554_v1 = vpop.f32.mrb[17].mxu0 }
 0x1d4   : > { %v3556_v2 = vpop.f32.mrb[18].mxu0  ;;  %v957_v3 = vmax.f32 %v3552_v0, %v3554_v1 }
 0x1d5   : > { %v3560_v4 = vpop.f32.mrb[19].mxu0 }
 0x1d6   : > { %958 = vmax.xlane.f32.xlu0 %v957_v3  ;;  %v960_v5 = vmax.f32 %v3556_v2, %v3560_v4 }
 0x1d8   : > { %961 = vmax.xlane.f32.xlu1 %v960_v5 }
 0x1da   : > { %v3564_v6 = vpop.f32.mrb[20].mxu0 }
 0x1db   : > { %v3566_v7 = vpop.f32.mrb[21].mxu0 }
 0x1dc   : > { %v3568_v8 = vpop.f32.mrb[22].mxu0  ;;  %v963_v9 = vmax.f32 %v3564_v6, %v3566_v7 }
 0x1dd   : > { %v3572_v10 = vpop.f32.mrb[23].mxu0 }
 0x1de   : > { %964 = vmax.xlane.f32.xlu0 %v963_v9  ;;  %v966_v11 = vmax.f32 %v3568_v8, %v3572_v10 }
 0x1e0   : > { %967 = vmax.xlane.f32.xlu1 %v966_v11 }
 0x1e2   : > { %v3576_v12 = vpop.f32.mrb[24].mxu0 }
 0x1e3   : > { %v3578_v13 = vpop.f32.mrb[25].mxu0 }
 0x1e4   : > { %v3580_v14 = vpop.f32.mrb[26].mxu0  ;;  %v969_v15 = vmax.f32 %v3576_v12, %v3578_v13 }
 0x1e5   : > { %v3584_v16 = vpop.f32.mrb[27].mxu0 }
 0x1e6   : > { %970 = vmax.xlane.f32.xlu0 %v969_v15  ;;  %v972_v17 = vmax.f32 %v3580_v14, %v3584_v16 }
 0x1e8   : > { %973 = vmax.xlane.f32.xlu1 %v972_v17 }
 0x1ea   : > { %v3588_v18 = vpop.f32.mrb[28].mxu0 }
 0x1eb   : > { %v3590_v19 = vpop.f32.mrb[29].mxu0 }
 0x1ec   : > { %v3592_v20 = vpop.f32.mrb[30].mxu0  ;;  %v975_v21 = vmax.f32 %v3588_v18, %v3590_v19 }
 0x1ed   : > { %v3596_v22 = vpop.f32.mrb[31].mxu0 }
 0x1ee   : > { %976 = vmax.xlane.f32.xlu0 %v975_v21  ;;  %v978_v23 = vmax.f32 %v3592_v20, %v3596_v22 }
 0x1f0   : > { %979 = vmax.xlane.f32.xlu1 %v978_v23 }
 0x1f2   : > { %v3600_v24 = vpop.f32.mrb[32].mxu0 }
 0x1f3   : > { %v3602_v25 = vpop.f32.mrb[33].mxu0 }
 0x1f4   : > { %v3604_v26 = vpop.f32.mrb[34].mxu0  ;;  %v981_v27 = vmax.f32 %v3600_v24, %v3602_v25 }
 0x1f5   : > { %v3608_v28 = vpop.f32.mrb[35].mxu0 }
 0x1f6   : > { %4295 = vst [vmem:[#allocation21_spill] sm:$0xff] %v3608_v28  ;;  %982 = vmax.xlane.f32.xlu0 %v981_v27  ;;  %v984_v29 = vmax.f32 %v3604_v26, %v3608_v28 }
 0x1f8   : > { %985 = vmax.xlane.f32.xlu1 %v984_v29  ;;  %v2688_v29 = vld [vmem:[%s3418_s19 + $0x8] sm:$0xff]  }
 0x1fa   : > { %v3612_v30 = vpop.f32.mrb[36].mxu0 }
 0x1fb   : > { %4296 = vst [vmem:[#allocation22_spill] sm:$0xff] %v3612_v30  ;;  %v3614_v31 = vpop.f32.mrb[37].mxu0 }
 0x1fc   : > { %4297 = vst [vmem:[#allocation23_spill] sm:$0xff] %v3614_v31  ;;  %v3616_v32 = vpop.f32.mrb[38].mxu0  ;;  %v987_v33 = vmax.f32 %v3612_v30, %v3614_v31 }
 0x1fd   : > { %4298 = vst [vmem:[#allocation24_spill] sm:$0xff] %v3616_v32  ;;  %v3620_v34 = vpop.f32.mrb[39].mxu0 }
 0x1fe   : > { %4299 = vst [vmem:[#allocation25_spill] sm:$0xff] %v3620_v34  ;;  %988 = vmax.xlane.f32.xlu0 %v987_v33  ;;  %v990_v35 = vmax.f32 %v3616_v32, %v3620_v34 }
 0x200   : > { %991 = vmax.xlane.f32.xlu1 %v990_v35 }
 0x202   : > { %v3624_v36 = vpop.f32.mrb[40].mxu0 }
 0x203   : > { %4300 = vst [vmem:[#allocation26_spill] sm:$0xff] %v3624_v36  ;;  %v3626_v37 = vpop.f32.mrb[41].mxu0 }
 0x204   : > { %4301 = vst [vmem:[#allocation27_spill] sm:$0xff] %v3626_v37  ;;  %v3628_v38 = vpop.f32.mrb[42].mxu0  ;;  %v993_v39 = vmax.f32 %v3624_v36, %v3626_v37  ;;  %v2689_v37 = vld [vmem:[%s3418_s19 + $0x50] sm:$0xff]  }
 0x205   : > { %4302 = vst [vmem:[#allocation28_spill] sm:$0xff] %v3628_v38  ;;  %v3632_v43 = vpop.f32.mrb[43].mxu0  ;;  %v2690_v36 = vld [vmem:[%s3418_s19 + $0x10] sm:$0xff]  }
 0x206   : > { %4303 = vst [vmem:[#allocation29_spill] sm:$0xff] %v3632_v43  ;;  %994 = vmax.xlane.f32.xlu0 %v993_v39  ;;  %v996_v45 = vmax.f32 %v3628_v38, %v3632_v43  ;;  %v2686_v43 = vld [vmem:[%s3418_s19] sm:$0xff]   ;;  %v2687_v38 = vld [vmem:[%s3418_s19 + $0x48] sm:$0xff]  }
 0x208   : > { %997 = vmax.xlane.f32.xlu1 %v996_v45 }
 0x20a   : > { %v3636_v49 = vpop.f32.mrb[44].mxu0 }
 0x20b   : > { %4304 = vst [vmem:[#allocation30_spill] sm:$0xff] %v3636_v49  ;;  %v3638_v51 = vpop.f32.mrb[45].mxu0 }
 0x20c   : > { %4305 = vst [vmem:[#allocation31_spill] sm:$0xff] %v3638_v51  ;;  %v3640_v55 = vpop.f32.mrb[46].mxu0  ;;  %v999_v57 = vmax.f32 %v3636_v49, %v3638_v51  ;;  %v2685_v49 = vld [vmem:[%s3418_s19 + $0x40] sm:$0xff]  }
 0x20d   : > { %4306 = vst [vmem:[#allocation32_spill] sm:$0xff] %v3640_v55  ;;  %v3644_v61 = vpop.f32.mrb[47].mxu0  ;;  %2452 = vmatprep.subr.bf16.mxu1 %v2685_v49 }
 0x20e   : > { %4307 = vst [vmem:[#allocation33_spill] sm:$0xff] %v3644_v61  ;;  %1000 = vmax.xlane.f32.xlu0 %v999_v57  ;;  %v1002_v63 = vmax.f32 %v3640_v55, %v3644_v61  ;;  %2453 = vmatpush3.bf16.msra.mxu1 %v2686_v43 }
 0x20f   : > { %2454 = vmatprep.subr.bf16.mxu1 %v2687_v38 }
 0x210   : > { %1003 = vmax.xlane.f32.xlu1 %v1002_v63 }
 0x212   : > { %v3648_v3 = vpop.f32.mrb[48].mxu0  ;;  %2455 = vmatpush3.bf16.msra.mxu1 %v2688_v29 }
 0x213   : > { %v3650_v5 = vpop.f32.mrb[49].mxu0  ;;  %2456 = vmatprep.subr.bf16.mxu1 %v2689_v37 }
 0x214   : > { %v3652_v9 = vpop.f32.mrb[50].mxu0 }
 0x215   : > { %v3656_v15 = vpop.f32.mrb[51].mxu0 }
 0x216   : > { %2457 = vmatpush3.bf16.msra.mxu1 %v2690_v36 }
 0x21a   : > { %v3660_v21 = vpop.f32.mrb[52].mxu0 }
 0x21b   : > { %v3662_v23 = vpop.f32.mrb[53].mxu0 }
 0x21c   : > { %v3664_v27 = vpop.f32.mrb[54].mxu0 }
 0x21d   : > { %v3668_v33 = vpop.f32.mrb[55].mxu0 }
 0x222   : > { %v3672_v39 = vpop.f32.mrb[56].mxu0 }
 0x223   : > { %v3674_v45 = vpop.f32.mrb[57].mxu0 }
 0x224   : > { %v3676_v57 = vpop.f32.mrb[58].mxu0 }
 0x225   : > { %v3680_v17 = vpop.f32.mrb[59].mxu0 }
 0x22a   : > { %v3684_v11 = vpop.f32.mrb[60].mxu0 }
 0x22b   : > { %v3686_v35 = vpop.f32.mrb[61].mxu0 }
 0x22c   : > { %v3688_v61 = vpop.f32.mrb[62].mxu0 }
 0x22d   : > { %v3692_v51 = vpop.f32.mrb[63].mxu0 }
 0x243   : > { %v935_v34 = vpop.xlane.xlu0 %934 }
 0x244   : > { %v1029_v55 = vsub.f32 %v3504_v40, %v935_v34  ;;  %v1030_v32 = vsub.f32 %v3506_v41, %v935_v34 }
 0x246   : > { %v1093_v31 = vmul.f32 1.442695, %v1029_v55  ;;  %v1095_v30 = vmul.f32 1.442695, %v1030_v32 }
 0x247   : > { %v938_v63 = vpop.xlane.xlu0 %937 }
 0x248   : > { %2701 = vpow2.f32 %v1093_v31  ;;  %v1031_v28 = vsub.f32 %v3508_v42, %v938_v63  ;;  %v1032_v43 = vsub.f32 %v3512_v44, %v938_v63 }
 0x249   : > { %2703 = vpow2.f32 %v1095_v30 }
 0x24a   : > { %v1097_v38 = vmul.f32 1.442695, %v1031_v28  ;;  %v1099_v49 = vmul.f32 1.442695, %v1032_v43 }
 0x24b   : > { %v941_v29 = vpop.xlane.xlu1 %940 }
 0x24c   : > { %2705 = vpow2.f32 %v1097_v38  ;;  %v1033_v36 = vsub.f32 %v3516_v46, %v941_v29  ;;  %v1034_v37 = vsub.f32 %v3518_v47, %v941_v29 }
 0x24d   : > { %2707 = vpow2.f32 %v1099_v49 }
 0x24e   : > { %v1101_v40 = vmul.f32 1.442695, %v1033_v36  ;;  %v1103_v41 = vmul.f32 1.442695, %v1034_v37 }
 0x24f   : > { %v944_v34 = vpop.xlane.xlu1 %943 }
 0x250   : > { %2709 = vpow2.f32 %v1101_v40  ;;  %v1035_v31 = vsub.f32 %v3520_v48, %v944_v34  ;;  %v1036_v42 = vsub.f32 %v3524_v50, %v944_v34 }
 0x251   : > { %2711 = vpow2.f32 %v1103_v41  ;;  %v4308_v41 = vmax.f32 %v3648_v3, %v3650_v5 }
 0x252   : > { %v3710_v44 = vpop.eup %2701  ;;  %v1105_v28 = vmul.f32 1.442695, %v1035_v31  ;;  %v1107_v30 = vmul.f32 1.442695, %v1036_v42 }
 0x253   : > { %v3712_v32 = vpop.eup %2703  ;;  %v947_v55 = vpop.xlane.xlu0 %946 }
 0x254   : > { %2713 = vpow2.f32 %v1105_v28  ;;  %v1037_v46 = vsub.f32 %v3528_v52, %v947_v55  ;;  %v1038_v47 = vsub.f32 %v3530_v53, %v947_v55  ;;  %v1221_v63 = vadd.f32 %v3712_v32, %v3710_v44 }
 0x255   : > { %2715 = vpow2.f32 %v1107_v30  ;;  %v950_v48 = vpop.xlane.xlu1 %949 }
 0x256   : > { %v3718_v43 = vpop.eup %2705  ;;  %v1109_v50 = vmul.f32 1.442695, %v1037_v46  ;;  %v1111_v38 = vmul.f32 1.442695, %v1038_v47  ;;  %v1039_v49 = vsub.f32 %v3532_v54, %v950_v48  ;;  %v1040_v29 = vsub.f32 %v3536_v56, %v950_v48  ;;  %1222 = vadd.xlane.f32.xlu0 %v1221_v63 }
 0x257   : > { %v3722_v36 = vpop.eup %2707  ;;  %v4309_v48 = vmax.f32 %v3652_v9, %v3656_v15 }
 0x258   : > { %2717 = vpow2.f32 %v1109_v50  ;;  %v1113_v52 = vmul.f32 1.442695, %v1039_v49  ;;  %v1115_v37 = vmul.f32 1.442695, %v1040_v29  ;;  %v1224_v53 = vadd.f32 %v3722_v36, %v3718_v43 }
 0x259   : > { %2719 = vpow2.f32 %v1111_v38 }
 0x25a   : > { %v3726_v40 = vpop.eup %2709  ;;  %2721 = vpow2.f32 %v1113_v52  ;;  %1225 = vadd.xlane.f32.xlu1 %v1224_v53  ;;  %1006 = vmax.xlane.f32.xlu0 %v4308_v41  ;;  %v2691_v52 = vld [vmem:[%s3418_s19 + $0x58] sm:$0xff]  }
 0x25b   : > { %v3731_v54 = vpop.eup %2711  ;;  %2723 = vpow2.f32 %v1115_v37  ;;  %v953_v56 = vpop.xlane.xlu0 %952  ;;  %2458 = vmatprep.subr.bf16.mxu1 %v2691_v52 }
 0x25c   : > { %v1041_v34 = vsub.f32 %v3540_v58, %v953_v56  ;;  %v1042_v31 = vsub.f32 %v3542_v59, %v953_v56  ;;  %v1227_v42 = vadd.f32 %v3731_v54, %v3726_v40 }
 0x25d   : > { %v956_v28 = vpop.xlane.xlu1 %955 }
 0x25e   : > { %v3737_v30 = vpop.eup %2713  ;;  %v1117_v55 = vmul.f32 1.442695, %v1041_v34  ;;  %v1119_v46 = vmul.f32 1.442695, %v1042_v31  ;;  %v1043_v47 = vsub.f32 %v3544_v60, %v956_v28  ;;  %v1044_v63 = vsub.f32 %v3548_v62, %v956_v28  ;;  %1228 = vadd.xlane.f32.xlu0 %v1227_v42  ;;  %1009 = vmax.xlane.f32.xlu1 %v4309_v48  ;;  %v2692_v34 = vld [vmem:[%s3418_s19 + $0x18] sm:$0xff]  }
 0x25f   : > { %v3744_v58 = vpop.eup %2715  ;;  %v4310_v60 = vmax.f32 %v3660_v21, %v3662_v23  ;;  %2459 = vmatpush3.bf16.msra.mxu1 %v2692_v34 }
 0x260   : > { %2725 = vpow2.f32 %v1117_v55  ;;  %v1121_v59 = vmul.f32 1.442695, %v1043_v47  ;;  %v1123_v50 = vmul.f32 1.442695, %v1044_v63  ;;  %v1230_v38 = vadd.f32 %v3744_v58, %v3737_v30 }
 0x261   : > { %2727 = vpow2.f32 %v1119_v46 }
 0x262   : > { %v3748_v49 = vpop.eup %2717  ;;  %2729 = vpow2.f32 %v1121_v59  ;;  %1231 = vadd.xlane.f32.xlu1 %v1230_v38  ;;  %1012 = vmax.xlane.f32.xlu0 %v4310_v60 }
 0x263   : > { %v3753_v62 = vpop.eup %2719  ;;  %2731 = vpow2.f32 %v1123_v50  ;;  %v959_v29 = vpop.xlane.xlu0 %958  ;;  %v2694_v50 = vld [vmem:[%s3418_s19 + $0x20] sm:$0xff]  }
 0x264   : > { %v3756_v37 = vpop.eup %2721  ;;  %v1045_v53 = vsub.f32 %v3552_v0, %v959_v29  ;;  %v1046_v41 = vsub.f32 %v3554_v1, %v959_v29  ;;  %v1233_v56 = vadd.f32 %v3753_v62, %v3748_v49  ;;  %v4311_v0 = vmax.f32 %v3664_v27, %v3668_v33  ;;  %v2693_v1 = vld [vmem:[%s3418_s19 + $0x60] sm:$0xff]  }
 0x265   : > { %v3763_v31 = vpop.eup %2723  ;;  %v962_v42 = vpop.xlane.xlu1 %961  ;;  %2460 = vmatprep.subr.bf16.mxu1 %v2693_v1 }
 0x266   : > { %v1125_v28 = vmul.f32 1.442695, %v1045_v53  ;;  %v1127_v55 = vmul.f32 1.442695, %v1046_v41  ;;  %v1047_v46 = vsub.f32 %v3556_v2, %v962_v42  ;;  %v1048_v47 = vsub.f32 %v3560_v4, %v962_v42  ;;  %1234 = vadd.xlane.f32.xlu0 %v1233_v56  ;;  %1015 = vmax.xlane.f32.xlu1 %v4311_v0  ;;  %v2695_v56 = vld [vmem:[%s3418_s19 + $0x68] sm:$0xff]  }
 0x267   : > { %v1236_v59 = vadd.f32 %v3763_v31, %v3756_v37  ;;  %v4312_v4 = vmax.f32 %v3672_v39, %v3674_v45  ;;  %2461 = vmatpush3.bf16.msra.mxu1 %v2694_v50 }
 0x268   : > { %2733 = vpow2.f32 %v1125_v28  ;;  %v1129_v63 = vmul.f32 1.442695, %v1047_v46  ;;  %v1131_v48 = vmul.f32 1.442695, %v1048_v47  ;;  %v2696_v28 = vld [vmem:[%s3418_s19 + $0x28] sm:$0xff]   ;;  %2462 = vmatprep.subr.bf16.mxu1 %v2695_v56  ;;  %v2699_v56 = vld [vmem:[%s3418_s19 + $0x78] sm:$0xff]  }
 0x269   : > { %2735 = vpow2.f32 %v1127_v55 }
 0x26a   : > { %v3774_v2 = vpop.eup %2725  ;;  %2737 = vpow2.f32 %v1129_v63  ;;  %1237 = vadd.xlane.f32.xlu1 %v1236_v59  ;;  %1018 = vmax.xlane.f32.xlu0 %v4312_v4  ;;  %v2698_v59 = vld [vmem:[%s3418_s19 + $0x30] sm:$0xff]  }
 0x26b   : > { %v3779_v38 = vpop.eup %2727  ;;  %2739 = vpow2.f32 %v1131_v48  ;;  %v965_v60 = vpop.xlane.xlu0 %964  ;;  %2463 = vmatpush3.bf16.msra.mxu1 %v2696_v28  ;;  %v2697_v48 = vld [vmem:[%s3418_s19 + $0x70] sm:$0xff]  }
 0x26c   : > { %v3781_v29 = vpop.eup %2729  ;;  %v1049_v52 = vsub.f32 %v3564_v6, %v965_v60  ;;  %v1050_v53 = vsub.f32 %v3566_v7, %v965_v60  ;;  %v1239_v41 = vadd.f32 %v3779_v38, %v3774_v2  ;;  %v4313_v6 = vmax.f32 %v3676_v57, %v3680_v17  ;;  %2464 = vmatprep.subr.bf16.mxu1 %v2697_v48 }
 0x26d   : > { %v3788_v34 = vpop.eup %2731  ;;  %v968_v42 = vpop.xlane.xlu1 %967 }
 0x26e   : > { %v1133_v55 = vmul.f32 1.442695, %v1049_v52  ;;  %v1135_v46 = vmul.f32 1.442695, %v1050_v53  ;;  %v1051_v47 = vsub.f32 %v3568_v8, %v968_v42  ;;  %v1052_v0 = vsub.f32 %v3572_v10, %v968_v42  ;;  %1240 = vadd.xlane.f32.xlu0 %v1239_v41  ;;  %1021 = vmax.xlane.f32.xlu1 %v4313_v6 }
 0x26f   : > { %v1242_v63 = vadd.f32 %v3788_v34, %v3781_v29  ;;  %v4314_v10 = vmax.f32 %v3684_v11, %v3686_v35  ;;  %2465 = vmatpush3.bf16.msra.mxu1 %v2698_v59 }
 0x270   : > { %2741 = vpow2.f32 %v1133_v55  ;;  %v1137_v7 = vmul.f32 1.442695, %v1051_v47  ;;  %v1139_v1 = vmul.f32 1.442695, %v1052_v0  ;;  %v2700_v55 = vld [vmem:[%s3418_s19 + $0x38] sm:$0xff]   ;;  %2466 = vmatprep.subr.bf16.mxu1 %v2699_v56 }
 0x271   : > { %2743 = vpow2.f32 %v1135_v46 }
 0x272   : > { %v3800_v8 = vpop.eup %2733  ;;  %2745 = vpow2.f32 %v1137_v7  ;;  %1243 = vadd.xlane.f32.xlu1 %v1242_v63  ;;  %1024 = vmax.xlane.f32.xlu0 %v4314_v10 }
 0x273   : > { %v3805_v50 = vpop.eup %2735  ;;  %2747 = vpow2.f32 %v1139_v1  ;;  %v971_v4 = vpop.xlane.xlu0 %970  ;;  %2467 = vmatpush3.bf16.msra.mxu1 %v2700_v55 }
 0x274   : > { %v3807_v60 = vpop.eup %2737  ;;  %v1053_v52 = vsub.f32 %v3576_v12, %v971_v4  ;;  %v1054_v53 = vsub.f32 %v3578_v13, %v971_v4  ;;  %v1245_v41 = vadd.f32 %v3805_v50, %v3800_v8  ;;  %v4315_v12 = vmax.f32 %v3688_v61, %v3692_v51 }
 0x275   : > { %v3814_v42 = vpop.eup %2739  ;;  %v974_v28 = vpop.xlane.xlu1 %973 }
 0x276   : > { %v1141_v46 = vmul.f32 1.442695, %v1053_v52  ;;  %v1143_v47 = vmul.f32 1.442695, %v1054_v53  ;;  %v1055_v0 = vsub.f32 %v3580_v14, %v974_v28  ;;  %v1056_v6 = vsub.f32 %v3584_v16, %v974_v28  ;;  %1246 = vadd.xlane.f32.xlu0 %v1245_v41  ;;  %1027 = vmax.xlane.f32.xlu1 %v4315_v12 }
 0x277   : > { %v1248_v1 = vadd.f32 %v3814_v42, %v3807_v60 }
 0x278   : > { %2749 = vpow2.f32 %v1141_v46  ;;  %v1145_v13 = vmul.f32 1.442695, %v1055_v0  ;;  %v1147_v7 = vmul.f32 1.442695, %v1056_v6 }
 0x279   : > { %2751 = vpow2.f32 %v1143_v47 }
 0x27a   : > { %v3824_v63 = vpop.eup %2741  ;;  %2753 = vpow2.f32 %v1145_v13  ;;  %1249 = vadd.xlane.f32.xlu1 %v1248_v1 }
 0x27b   : > { %v3826_v14 = vpop.eup %2743  ;;  %2755 = vpow2.f32 %v1147_v7  ;;  %v977_v16 = vpop.xlane.xlu0 %976 }
 0x27c   : > { %v3828_v48 = vpop.eup %2745  ;;  %v1057_v59 = vsub.f32 %v3588_v18, %v977_v16  ;;  %v1058_v10 = vsub.f32 %v3590_v19, %v977_v16  ;;  %v1251_v4 = vadd.f32 %v3826_v14, %v3824_v63 }
 0x27d   : > { %v3834_v52 = vpop.eup %2747  ;;  %v980_v53 = vpop.xlane.xlu1 %979 }
 0x27e   : > { %v1149_v41 = vmul.f32 1.442695, %v1057_v59  ;;  %v1151_v56 = vmul.f32 1.442695, %v1058_v10  ;;  %v1059_v28 = vsub.f32 %v3592_v20, %v980_v53  ;;  %v1060_v55 = vsub.f32 %v3596_v22, %v980_v53  ;;  %1252 = vadd.xlane.f32.xlu0 %v1251_v4  ;;  %v4316_v4 = vld [vmem:[#allocation21_spill] sm:$0xff] }
 0x27f   : > { %v1254_v46 = vadd.f32 %v3834_v52, %v3828_v48 }
 0x280   : > { %2757 = vpow2.f32 %v1149_v41  ;;  %v1153_v18 = vmul.f32 1.442695, %v1059_v28  ;;  %v1155_v47 = vmul.f32 1.442695, %v1060_v55 }
 0x281   : > { %2759 = vpow2.f32 %v1151_v56  ;;  %1255 = vadd.xlane.f32.xlu1 %v1254_v46 }
 0x282   : > { %v3840_v19 = vpop.eup %2749  ;;  %2761 = vpow2.f32 %v1153_v18 }
 0x283   : > { %v3842_v0 = vpop.eup %2751  ;;  %2763 = vpow2.f32 %v1155_v47  ;;  %v983_v6 = vpop.xlane.xlu0 %982  ;;  %v4320_v47 = vld [vmem:[#allocation23_spill] sm:$0xff] }
 0x284   : > { %v3844_v12 = vpop.eup %2753  ;;  %v1061_v20 = vsub.f32 %v3600_v24, %v983_v6  ;;  %v1062_v22 = vsub.f32 %v3602_v25, %v983_v6  ;;  %v1257_v13 = vadd.f32 %v3842_v0, %v3840_v19 }
 0x285   : > { %v3850_v7 = vpop.eup %2755  ;;  %v986_v1 = vpop.xlane.xlu1 %985 }
 0x286   : > { %v1157_v16 = vmul.f32 1.442695, %v1061_v20  ;;  %v1159_v59 = vmul.f32 1.442695, %v1062_v22  ;;  %v1063_v10 = vsub.f32 %v3604_v26, %v986_v1  ;;  %v1064_v53 = vsub.f32 %v4316_v4, %v986_v1  ;;  %1258 = vadd.xlane.f32.xlu0 %v1257_v13  ;;  %v4319_v26 = vld [vmem:[#allocation22_spill] sm:$0xff]  ;;  %v4323_v4 = vld [vmem:[#allocation25_spill] sm:$0xff] }
 0x287   : > { %v1260_v41 = vadd.f32 %v3850_v7, %v3844_v12 }
 0x288   : > { %2765 = vpow2.f32 %v1157_v16  ;;  %v1161_v24 = vmul.f32 1.442695, %v1063_v10  ;;  %v1163_v56 = vmul.f32 1.442695, %v1064_v53 }
 0x289   : > { %2767 = vpow2.f32 %v1159_v59  ;;  %1261 = vadd.xlane.f32.xlu1 %v1260_v41  ;;  %v4322_v59 = vld [vmem:[#allocation24_spill] sm:$0xff] }
 0x28a   : > { %v3856_v25 = vpop.eup %2757  ;;  %2769 = vpow2.f32 %v1161_v24 }
 0x28b   : > { %4317 = vst [vmem:[#allocation21_spill] sm:$0xff] %v3856_v25  ;;  %v3858_v28 = vpop.eup %2759  ;;  %2771 = vpow2.f32 %v1163_v56  ;;  %v989_v55 = vpop.xlane.xlu0 %988 }
 0x28c   : > { %v3860_v46 = vpop.eup %2761  ;;  %v1065_v18 = vsub.f32 %v4319_v26, %v989_v55  ;;  %v1066_v6 = vsub.f32 %v4320_v47, %v989_v55  ;;  %v1263_v20 = vadd.f32 %v3858_v28, %v3856_v25  ;;  %v4331_v25 = vld [vmem:[#allocation29_spill] sm:$0xff] }
 0x28d   : > { %4318 = vst [vmem:[#allocation34_spill] sm:$0xff] %v3860_v46  ;;  %v3866_v22 = vpop.eup %2763  ;;  %v992_v13 = vpop.xlane.xlu1 %991 }
 0x28e   : > { %4321 = vst [vmem:[#allocation22_spill] sm:$0xff] %v3866_v22  ;;  %v1165_v1 = vmul.f32 1.442695, %v1065_v18  ;;  %v1167_v16 = vmul.f32 1.442695, %v1066_v6  ;;  %v1067_v10 = vsub.f32 %v4322_v59, %v992_v13  ;;  %v1068_v53 = vsub.f32 %v4323_v4, %v992_v13  ;;  %1264 = vadd.xlane.f32.xlu0 %v1263_v20  ;;  %v4327_v6 = vld [vmem:[#allocation26_spill] sm:$0xff] }
 0x28f   : > { %v1266_v41 = vadd.f32 %v3866_v22, %v3860_v46  ;;  %v4328_v20 = vld [vmem:[#allocation27_spill] sm:$0xff] }
 0x290   : > { %2773 = vpow2.f32 %v1165_v1  ;;  %v1169_v24 = vmul.f32 1.442695, %v1067_v10  ;;  %v1171_v56 = vmul.f32 1.442695, %v1068_v53 }
 0x291   : > { %2775 = vpow2.f32 %v1167_v16  ;;  %1267 = vadd.xlane.f32.xlu1 %v1266_v41  ;;  %v4330_v41 = vld [vmem:[#allocation28_spill] sm:$0xff] }
 0x292   : > { %v3872_v55 = vpop.eup %2765  ;;  %2777 = vpow2.f32 %v1169_v24 }
 0x293   : > { %4324 = vst [vmem:[#allocation23_spill] sm:$0xff] %v3872_v55  ;;  %v3874_v26 = vpop.eup %2767  ;;  %2779 = vpow2.f32 %v1171_v56  ;;  %v995_v18 = vpop.xlane.xlu0 %994 }
 0x294   : > { %4325 = vst [vmem:[#allocation24_spill] sm:$0xff] %v3874_v26  ;;  %v3876_v47 = vpop.eup %2769  ;;  %v1069_v13 = vsub.f32 %v4327_v6, %v995_v18  ;;  %v1070_v59 = vsub.f32 %v4328_v20, %v995_v18  ;;  %v1269_v1 = vadd.f32 %v3874_v26, %v3872_v55  ;;  %v4334_v55 = vld [vmem:[#allocation32_spill] sm:$0xff] }
 0x295   : > { %4326 = vst [vmem:[#allocation25_spill] sm:$0xff] %v3876_v47  ;;  %v3882_v10 = vpop.eup %2771  ;;  %v998_v16 = vpop.xlane.xlu1 %997 }
 0x296   : > { %4329 = vst [vmem:[#allocation26_spill] sm:$0xff] %v3882_v10  ;;  %v1173_v4 = vmul.f32 1.442695, %v1069_v13  ;;  %v1175_v53 = vmul.f32 1.442695, %v1070_v59  ;;  %v1071_v24 = vsub.f32 %v4330_v41, %v998_v16  ;;  %v1072_v46 = vsub.f32 %v4331_v25, %v998_v16  ;;  %1270 = vadd.xlane.f32.xlu0 %v1269_v1  ;;  %v4332_v41 = vld [vmem:[#allocation30_spill] sm:$0xff] }
 0x297   : > { %v1272_v56 = vadd.f32 %v3882_v10, %v3876_v47  ;;  %v4333_v1 = vld [vmem:[#allocation31_spill] sm:$0xff]  ;;  %v4335_v47 = vld [vmem:[#allocation33_spill] sm:$0xff] }
 0x298   : > { %2781 = vpow2.f32 %v1173_v4  ;;  %v1177_v6 = vmul.f32 1.442695, %v1071_v24  ;;  %v1179_v22 = vmul.f32 1.442695, %v1072_v46 }
 0x299   : > { %2783 = vpow2.f32 %v1175_v53  ;;  %1273 = vadd.xlane.f32.xlu1 %v1272_v56 }
 0x29a   : > { %v3888_v18 = vpop.eup %2773  ;;  %2785 = vpow2.f32 %v1177_v6 }
 0x29b   : > { %v3890_v20 = vpop.eup %2775  ;;  %2787 = vpow2.f32 %v1179_v22  ;;  %v1001_v13 = vpop.xlane.xlu0 %1000 }
 0x29c   : > { %v3892_v59 = vpop.eup %2777  ;;  %v1073_v25 = vsub.f32 %v4332_v41, %v1001_v13  ;;  %v1074_v16 = vsub.f32 %v4333_v1, %v1001_v13  ;;  %v1275_v4 = vadd.f32 %v3890_v20, %v3888_v18 }
 0x29d   : > { %v3898_v24 = vpop.eup %2779  ;;  %v1004_v46 = vpop.xlane.xlu1 %1003 }
 0x29e   : > { %v1181_v53 = vmul.f32 1.442695, %v1073_v25  ;;  %v1183_v56 = vmul.f32 1.442695, %v1074_v16  ;;  %v1075_v6 = vsub.f32 %v4334_v55, %v1004_v46  ;;  %v1076_v10 = vsub.f32 %v4335_v47, %v1004_v46  ;;  %1276 = vadd.xlane.f32.xlu0 %v1275_v4 }
 0x29f   : > { %v1278_v22 = vadd.f32 %v3898_v24, %v3892_v59 }
 0x2a0   : > { %2789 = vpow2.f32 %v1181_v53  ;;  %v1185_v41 = vmul.f32 1.442695, %v1075_v6  ;;  %v1187_v26 = vmul.f32 1.442695, %v1076_v10 }
 0x2a1   : > { %2791 = vpow2.f32 %v1183_v56  ;;  %1279 = vadd.xlane.f32.xlu1 %v1278_v22 }
 0x2a2   : > { %v3904_v13 = vpop.eup %2781  ;;  %2793 = vpow2.f32 %v1185_v41 }
 0x2a3   : > { %4336 = vst [vmem:[#allocation27_spill] sm:$0xff] %v3904_v13  ;;  %v3906_v1 = vpop.eup %2783  ;;  %2795 = vpow2.f32 %v1187_v26 }
 0x2a4   : > { %v3908_v25 = vpop.eup %2785  ;;  %v1281_v55 = vadd.f32 %v3906_v1, %v3904_v13 }
 0x2a5   : > { %4337 = vst [vmem:[#allocation28_spill] sm:$0xff] %v3908_v25  ;;  %v3912_v47 = vpop.eup %2787 }
 0x2a6   : > { %4338 = vst [vmem:[#allocation29_spill] sm:$0xff] %v3912_v47  ;;  %1282 = vadd.xlane.f32.xlu0 %v1281_v55  ;;  %v1284_v16 = vadd.f32 %v3912_v47, %v3908_v25 }
 0x2a8   : > { %1285 = vadd.xlane.f32.xlu1 %v1284_v16 }
 0x2aa   : > { %v3916_v10 = vpop.eup %2789 }
 0x2ab   : > { %4339 = vst [vmem:[#allocation30_spill] sm:$0xff] %v3916_v10  ;;  %v3918_v4 = vpop.eup %2791 }
 0x2ac   : > { %4340 = vst [vmem:[#allocation31_spill] sm:$0xff] %v3918_v4  ;;  %v3920_v46 = vpop.eup %2793  ;;  %v1287_v26 = vadd.f32 %v3918_v4, %v3916_v10 }
 0x2ad   : > { %4341 = vst [vmem:[#allocation32_spill] sm:$0xff] %v3920_v46  ;;  %v3924_v53 = vpop.eup %2795 }
 0x2ae   : > { %4342 = vst [vmem:[#allocation33_spill] sm:$0xff] %v3924_v53  ;;  %1288 = vadd.xlane.f32.xlu0 %v1287_v26  ;;  %v1290_v56 = vadd.f32 %v3924_v53, %v3920_v46 }
 0x2b0   : > { %1291 = vadd.xlane.f32.xlu1 %v1290_v56 }
 0x2e3   : > { %v1223_v6 = vpop.xlane.xlu0 %1222 }
 0x2e4   : > { %2797 = vrcp.f32 %v1223_v6 }
 0x2e7   : > { %v1226_v22 = vpop.xlane.xlu1 %1225  ;;  %v1007_v41 = vpop.xlane.xlu0 %1006 }
 0x2e8   : > { %2799 = vrcp.f32 %v1226_v22  ;;  %v1077_v55 = vsub.f32 %v3648_v3, %v1007_v41  ;;  %v1078_v16 = vsub.f32 %v3650_v5, %v1007_v41 }
 0x2ea   : > { %v1189_v13 = vmul.f32 1.442695, %v1077_v55  ;;  %v1191_v25 = vmul.f32 1.442695, %v1078_v16 }
 0x2eb   : > { %v1229_v47 = vpop.xlane.xlu0 %1228  ;;  %v1010_v10 = vpop.xlane.xlu1 %1009 }
 0x2ec   : > { %2801 = vpow2.f32 %v1189_v13  ;;  %v1079_v26 = vsub.f32 %v3652_v9, %v1010_v10  ;;  %v1080_v4 = vsub.f32 %v3656_v15, %v1010_v10 }
 0x2ed   : > { %2803 = vpow2.f32 %v1191_v25 }
 0x2ee   : > { %2805 = vrcp.f32 %v1229_v47  ;;  %v1193_v56 = vmul.f32 1.442695, %v1079_v26  ;;  %v1195_v6 = vmul.f32 1.442695, %v1080_v4  ;;  %v2798_v22 = vpop.eup %2797 }
 0x2ef   : > { %v1232_v46 = vpop.xlane.xlu1 %1231  ;;  %v1013_v53 = vpop.xlane.xlu0 %1012  ;;  %v1350_v15 = vmul.f32 %v2798_v22, %v3712_v32  ;;  %v1349_v47 = vmul.f32 %v2798_v22, %v3710_v44 }
 0x2f0   : > { %2807 = vpow2.f32 %v1193_v56  ;;  %v1081_v3 = vsub.f32 %v3660_v21, %v1013_v53  ;;  %v1082_v5 = vsub.f32 %v3662_v23, %v1013_v53 }
 0x2f1   : > { %2809 = vpow2.f32 %v1195_v6 }
 0x2f2   : > { %v2800_v41 = vpop.eup %2799  ;;  %2811 = vrcp.f32 %v1232_v46  ;;  %v1197_v13 = vmul.f32 1.442695, %v1081_v3  ;;  %v1199_v55 = vmul.f32 1.442695, %v1082_v5 }
 0x2f3   : > { %v1235_v9 = vpop.xlane.xlu0 %1234  ;;  %v1016_v16 = vpop.xlane.xlu1 %1015  ;;  %v1352_v25 = vmul.f32 %v2800_v41, %v3722_v36  ;;  %v1351_v10 = vmul.f32 %v2800_v41, %v3718_v43 }
 0x2f4   : > { %2813 = vpow2.f32 %v1197_v13  ;;  %v1083_v21 = vsub.f32 %v3664_v27, %v1016_v16  ;;  %v1084_v23 = vsub.f32 %v3668_v33, %v1016_v16 }
 0x2f5   : > { %2815 = vpow2.f32 %v1199_v55  ;;  %v1414_v4 = vpack.c.bf16 %v1352_v25, %v1350_v15  ;;  %v1413_v46 = vpack.c.bf16 %v1351_v10, %v1349_v47 }
 0x2f6   : > { %v3940_v53 = vpop.eup %2801  ;;  %2817 = vrcp.f32 %v1235_v9  ;;  %v1201_v26 = vmul.f32 1.442695, %v1083_v21  ;;  %v1203_v56 = vmul.f32 1.442695, %v1084_v23 }
 0x2f7   : > { %v3942_v32 = vpop.eup %2803  ;;  %1573 = vmatprep.mubr.bf16.mxu1 %v1414_v4  ;;  %v1238_v36 = vpop.xlane.xlu1 %1237 }
 0x2f8   : > { %v1019_v44 = vpop.xlane.xlu0 %1018  ;;  %v2806_v6 = vpop.eup %2805  ;;  %2819 = vpow2.f32 %v1201_v26  ;;  %1574 = vmatmul.mubr.bf16.vlgmr.msra.gmra.mrb[0].mxu1 %v1413_v46  ;;  %v1293_v33 = vadd.f32 %v3942_v32, %v3940_v53 }
 0x2f9   : > { %v1085_v43 = vsub.f32 %v3672_v39, %v1019_v44  ;;  %v1086_v27 = vsub.f32 %v3674_v45, %v1019_v44  ;;  %2821 = vpow2.f32 %v1203_v56  ;;  %v1354_v9 = vmul.f32 %v2806_v6, %v3731_v54 }
 0x2fa   : > { %v3948_v22 = vpop.eup %2807  ;;  %2823 = vrcp.f32 %v1238_v36  ;;  %1294 = vadd.xlane.f32.xlu0 %v1293_v33  ;;  %v1353_v47 = vmul.f32 %v2806_v6, %v3726_v40 }
 0x2fb   : > { %v1205_v3 = vmul.f32 1.442695, %v1085_v43  ;;  %v1207_v5 = vmul.f32 1.442695, %v1086_v27  ;;  %v3950_v41 = vpop.eup %2809  ;;  %v1022_v55 = vpop.xlane.xlu1 %1021 }
 0x2fc   : > { %v1241_v13 = vpop.xlane.xlu0 %1240  ;;  %v2812_v39 = vpop.eup %2811  ;;  %v1087_v45 = vsub.f32 %v3676_v57, %v1022_v55  ;;  %v1088_v16 = vsub.f32 %v3680_v17, %v1022_v55  ;;  %v1296_v15 = vadd.f32 %v3950_v41, %v3948_v22 }
 0x2fd   : > { %2825 = vpow2.f32 %v1205_v3  ;;  %v1356_v25 = vmul.f32 %v2812_v39, %v3744_v58  ;;  %v1355_v10 = vmul.f32 %v2812_v39, %v3737_v30 }
 0x2fe   : > { %2827 = vpow2.f32 %v1207_v5  ;;  %v3960_v21 = vpop.eup %2813  ;;  %v1209_v23 = vmul.f32 1.442695, %v1087_v45  ;;  %v1211_v54 = vmul.f32 1.442695, %v1088_v16  ;;  %1297 = vadd.xlane.f32.xlu1 %v1296_v15 }
 0x2ff   : > { %v3962_v4 = vpop.eup %2815  ;;  %2829 = vrcp.f32 %v1241_v13  ;;  %v1416_v57 = vpack.c.bf16 %v1356_v25, %v1354_v9  ;;  %v1244_v17 = vpop.xlane.xlu1 %1243  ;;  %v1415_v26 = vpack.c.bf16 %v1355_v10, %v1353_v47 }
 0x300   : > { %v1025_v46 = vpop.xlane.xlu0 %1024  ;;  %v2818_v56 = vpop.eup %2817  ;;  %2831 = vpow2.f32 %v1209_v23  ;;  %v1299_v30 = vadd.f32 %v3962_v4, %v3960_v21 }
 0x301   : > { %v1089_v58 = vsub.f32 %v3684_v11, %v1025_v46  ;;  %v1090_v40 = vsub.f32 %v3686_v35, %v1025_v46  ;;  %2833 = vpow2.f32 %v1211_v54  ;;  %1581 = vmatprep.mubr.bf16.mxu1 %v1416_v57  ;;  %v1358_v33 = vmul.f32 %v2818_v56, %v3753_v62 }
 0x302   : > { %v3968_v36 = vpop.eup %2819  ;;  %2835 = vrcp.f32 %v1244_v17  ;;  %1582 = vmatmul.mubr.bf16.gmra.mrb[4].mxu1 %v1415_v26  ;;  %1300 = vadd.xlane.f32.xlu0 %v1299_v30  ;;  %v1357_v9 = vmul.f32 %v2818_v56, %v3748_v49 }
 0x303   : > { %v1213_v44 = vmul.f32 1.442695, %v1089_v58  ;;  %v1215_v6 = vmul.f32 1.442695, %v1090_v40  ;;  %v3970_v43 = vpop.eup %2821  ;;  %v1028_v27 = vpop.xlane.xlu1 %1027 }
 0x304   : > { %v2824_v11 = vpop.eup %2823  ;;  %v1247_v35 = vpop.xlane.xlu0 %1246  ;;  %v1091_v3 = vsub.f32 %v3688_v61, %v1028_v27  ;;  %v1092_v5 = vsub.f32 %v3692_v51, %v1028_v27  ;;  %v1302_v13 = vadd.f32 %v3970_v43, %v3968_v36 }
 0x305   : > { %2837 = vpow2.f32 %v1213_v44  ;;  %v1360_v55 = vmul.f32 %v2824_v11, %v3763_v31  ;;  %v1359_v39 = vmul.f32 %v2824_v11, %v3756_v37 }
 0x306   : > { %2839 = vpow2.f32 %v1215_v6  ;;  %v1217_v62 = vmul.f32 1.442695, %v1091_v3  ;;  %v1219_v16 = vmul.f32 1.442695, %v1092_v5  ;;  %1303 = vadd.xlane.f32.xlu1 %v1302_v13 }
 0x307   : > { %v3980_v45 = vpop.eup %2825  ;;  %2841 = vrcp.f32 %v1247_v35  ;;  %v1418_v61 = vpack.c.bf16 %v1360_v55, %v1358_v33  ;;  %v1250_v51 = vpop.xlane.xlu1 %1249  ;;  %v1417_v25 = vpack.c.bf16 %v1359_v39, %v1357_v9 }
 0x308   : > { %v3982_v15 = vpop.eup %2827  ;;  %2843 = vpow2.f32 %v1217_v62 }
 0x309   : > { %v1305_v47 = vadd.f32 %v3982_v15, %v3980_v45  ;;  %v2830_v31 = vpop.eup %2829  ;;  %2845 = vpow2.f32 %v1219_v16  ;;  %1589 = vmatprep.mubr.bf16.mxu1 %v1418_v61 }
 0x30a   : > { %v3986_v49 = vpop.eup %2831  ;;  %2847 = vrcp.f32 %v1250_v51  ;;  %1590 = vmatmul.mubr.bf16.gmra.mrb[8].mxu1 %v1417_v25  ;;  %v1362_v57 = vmul.f32 %v2830_v31, %v3779_v38  ;;  %v1361_v46 = vmul.f32 %v2830_v31, %v3774_v2 }
 0x30b   : > { %1306 = vadd.xlane.f32.xlu0 %v1305_v47  ;;  %v3988_v37 = vpop.eup %2833  ;;  %v1253_v10 = vpop.xlane.xlu0 %1252 }
 0x30c   : > { %v2836_v23 = vpop.eup %2835  ;;  %v1308_v54 = vadd.f32 %v3988_v37, %v3986_v49  ;;  %2849 = vrcp.f32 %v1253_v10 }
 0x30d   : > { %v1364_v17 = vmul.f32 %v2836_v23, %v3788_v34  ;;  %v1363_v26 = vmul.f32 %v2836_v23, %v3781_v29 }
 0x30e   : > { %1309 = vadd.xlane.f32.xlu1 %v1308_v54  ;;  %v1256_v58 = vpop.xlane.xlu1 %1255 }
 0x30f   : > { %v3996_v56 = vpop.eup %2837  ;;  %2851 = vrcp.f32 %v1256_v58  ;;  %v1420_v30 = vpack.c.bf16 %v1364_v17, %v1362_v57  ;;  %v1419_v44 = vpack.c.bf16 %v1363_v26, %v1361_v46  ;;  %v4343_v58 = vld [vmem:[#allocation22_spill] sm:$0xff] }
 0x310   : > { %v3998_v40 = vpop.eup %2839 }
 0x311   : > { %v1311_v6 = vadd.f32 %v3998_v40, %v3996_v56  ;;  %v2842_v38 = vpop.eup %2841  ;;  %1597 = vmatprep.mubr.bf16.mxu1 %v1420_v30 }
 0x312   : > { %v4002_v27 = vpop.eup %2843  ;;  %1598 = vmatmul.mubr.bf16.gmra.mrb[12].mxu1 %v1419_v44  ;;  %v1366_v11 = vmul.f32 %v2842_v38, %v3805_v50  ;;  %v1365_v3 = vmul.f32 %v2842_v38, %v3800_v8  ;;  %v4344_v44 = vld [vmem:[#allocation34_spill] sm:$0xff]  ;;  %v4345_v38 = vld [vmem:[#allocation21_spill] sm:$0xff] }
 0x313   : > { %1312 = vadd.xlane.f32.xlu0 %v1311_v6  ;;  %v4004_v2 = vpop.eup %2845  ;;  %v1259_v29 = vpop.xlane.xlu0 %1258 }
 0x314   : > { %v2848_v34 = vpop.eup %2847  ;;  %v1314_v33 = vadd.f32 %v4004_v2, %v4002_v27  ;;  %2853 = vrcp.f32 %v1259_v29 }
 0x315   : > { %v1368_v35 = vmul.f32 %v2848_v34, %v3814_v42  ;;  %v1367_v5 = vmul.f32 %v2848_v34, %v3807_v60 }
 0x316   : > { %1315 = vadd.xlane.f32.xlu1 %v1314_v33  ;;  %v1262_v13 = vpop.xlane.xlu1 %1261  ;;  %v2850_v55 = vpop.eup %2849 }
 0x317   : > { %2855 = vrcp.f32 %v1262_v13  ;;  %v1422_v9 = vpack.c.bf16 %v1368_v35, %v1366_v11  ;;  %v1421_v39 = vpack.c.bf16 %v1367_v5, %v1365_v3  ;;  %v1370_v16 = vmul.f32 %v2850_v55, %v3826_v14  ;;  %v4346_v11 = vld [vmem:[#allocation24_spill] sm:$0xff]  ;;  %v4347_v3 = vld [vmem:[#allocation26_spill] sm:$0xff] }
 0x318   : > { %v1369_v60 = vmul.f32 %v2850_v55, %v3824_v63  ;;  %v4348_v55 = vld [vmem:[#allocation25_spill] sm:$0xff] }
 0x319   : > { %v2852_v62 = vpop.eup %2851  ;;  %1605 = vmatprep.mubr.bf16.mxu1 %v1422_v9 }
 0x31a   : > { %1606 = vmatmul.mubr.bf16.gmra.mrb[16].mxu1 %v1421_v39  ;;  %v1372_v50 = vmul.f32 %v2852_v62, %v3834_v52  ;;  %v1371_v42 = vmul.f32 %v2852_v62, %v3828_v48  ;;  %v4349_v62 = vld [vmem:[#allocation23_spill] sm:$0xff] }
 0x31b   : > { %v1265_v61 = vpop.xlane.xlu0 %1264 }
 0x31c   : > { %v1424_v51 = vpack.c.bf16 %v1372_v50, %v1370_v16  ;;  %2857 = vrcp.f32 %v1265_v61  ;;  %v1423_v47 = vpack.c.bf16 %v1371_v42, %v1369_v60 }
 0x31e   : > { %1613 = vmatprep.mubr.bf16.mxu1 %v1424_v51  ;;  %v1268_v8 = vpop.xlane.xlu1 %1267  ;;  %v2854_v25 = vpop.eup %2853 }
 0x31f   : > { %2859 = vrcp.f32 %v1268_v8  ;;  %v1374_v10 = vmul.f32 %v2854_v25, %v3842_v0  ;;  %v1373_v57 = vmul.f32 %v2854_v25, %v3840_v19 }
 0x321   : > { %v2856_v31 = vpop.eup %2855 }
 0x322   : > { %1614 = vmatmul.mubr.bf16.gmra.mrb[20].mxu1 %v1423_v47  ;;  %v1376_v14 = vmul.f32 %v2856_v31, %v3850_v7  ;;  %v1375_v54 = vmul.f32 %v2856_v31, %v3844_v12 }
 0x323   : > { %v1271_v23 = vpop.xlane.xlu0 %1270 }
 0x324   : > { %v1426_v52 = vpack.c.bf16 %v1376_v14, %v1374_v10  ;;  %2861 = vrcp.f32 %v1271_v23  ;;  %v1425_v63 = vpack.c.bf16 %v1375_v54, %v1373_v57 }
 0x326   : > { %1621 = vmatprep.mubr.bf16.mxu1 %v1426_v52  ;;  %v1274_v48 = vpop.xlane.xlu1 %1273  ;;  %v2858_v17 = vpop.eup %2857 }
 0x327   : > { %2863 = vrcp.f32 %v1274_v48  ;;  %v1378_v26 = vmul.f32 %v2858_v17, %v3858_v28  ;;  %v1377_v29 = vmul.f32 %v2858_v17, %v4345_v38  ;;  %v4350_v48 = vld [vmem:[#allocation29_spill] sm:$0xff] }
 0x329   : > { %v2860_v46 = vpop.eup %2859 }
 0x32a   : > { %1622 = vmatmul.mubr.bf16.gmra.mrb[24].mxu1 %v1425_v63  ;;  %v1380_v0 = vmul.f32 %v2860_v46, %v4343_v58  ;;  %v1379_v6 = vmul.f32 %v2860_v46, %v4344_v44  ;;  %v4352_v46 = vld [vmem:[#allocation27_spill] sm:$0xff] }
 0x32b   : > { %v1277_v30 = vpop.xlane.xlu0 %1276 }
 0x32c   : > { %v1428_v7 = vpack.c.bf16 %v1380_v0, %v1378_v26  ;;  %2865 = vrcp.f32 %v1277_v30  ;;  %v1427_v19 = vpack.c.bf16 %v1379_v6, %v1377_v29  ;;  %v4353_v0 = vld [vmem:[#allocation31_spill] sm:$0xff]  ;;  %v4355_v6 = vld [vmem:[#allocation32_spill] sm:$0xff] }
 0x32e   : > { %1629 = vmatprep.mubr.bf16.mxu1 %v1428_v7  ;;  %v1280_v12 = vpop.xlane.xlu1 %1279  ;;  %v2862_v34 = vpop.eup %2861  ;;  %v4354_v7 = vld [vmem:[#allocation33_spill] sm:$0xff] }
 0x32f   : > { %2867 = vrcp.f32 %v1280_v12  ;;  %v1382_v35 = vmul.f32 %v2862_v34, %v4346_v11  ;;  %v1381_v16 = vmul.f32 %v2862_v34, %v4349_v62  ;;  %v4356_v12 = vld [vmem:[#allocation30_spill] sm:$0xff] }
 0x331   : > { %v2864_v33 = vpop.eup %2863 }
 0x332   : > { %1630 = vmatmul.mubr.bf16.gmra.mrb[28].mxu1 %v1427_v19  ;;  %v1384_v28 = vmul.f32 %v2864_v33, %v4347_v3  ;;  %v1383_v9 = vmul.f32 %v2864_v33, %v4348_v55 }
 0x333   : > { %v1283_v5 = vpop.xlane.xlu0 %1282 }
 0x334   : > { %2869 = vrcp.f32 %v1283_v5  ;;  %v1430_v13 = vpack.c.bf16 %v1384_v28, %v1382_v35  ;;  %v1429_v61 = vpack.c.bf16 %v1383_v9, %v1381_v16 }
 0x335   : > { %v1286_v39 = vpop.xlane.xlu1 %1285 }
 0x336   : > { %1637 = vmatprep.mubr.bf16.mxu1 %v1430_v13  ;;  %2871 = vrcp.f32 %v1286_v39  ;;  %v2866_v50 = vpop.eup %2865 }
 0x337   : > { %v1386_v42 = vmul.f32 %v2866_v50, %v3890_v20  ;;  %v1385_v14 = vmul.f32 %v2866_v50, %v3888_v18 }
 0x339   : > { %v2868_v51 = vpop.eup %2867 }
 0x33a   : > { %1638 = vmatmul.mubr.bf16.gmra.mrb[32].mxu1 %v1429_v61  ;;  %v1388_v8 = vmul.f32 %v2868_v51, %v3898_v24  ;;  %v1387_v47 = vmul.f32 %v2868_v51, %v3892_v59  ;;  %v4351_v24 = vld [vmem:[#allocation28_spill] sm:$0xff] }
 0x33b   : > { %v1289_v60 = vpop.xlane.xlu0 %1288 }
 0x33c   : > { %2873 = vrcp.f32 %v1289_v60  ;;  %v1432_v25 = vpack.c.bf16 %v1388_v8, %v1386_v42  ;;  %v1431_v52 = vpack.c.bf16 %v1387_v47, %v1385_v14 }
 0x33d   : > { %v1292_v31 = vpop.xlane.xlu1 %1291 }
 0x33e   : > { %v2870_v10 = vpop.eup %2869  ;;  %1645 = vmatprep.mubr.bf16.mxu1 %v1432_v25  ;;  %2875 = vrcp.f32 %v1292_v31 }
 0x33f   : > { %v1390_v54 = vmul.f32 %v2870_v10, %v3906_v1  ;;  %v1389_v59 = vmul.f32 %v2870_v10, %v4352_v46 }
 0x340   : > { %v2872_v23 = vpop.eup %2871 }
 0x341   : > { %v1392_v57 = vmul.f32 %v2872_v23, %v4350_v48  ;;  %v1391_v17 = vmul.f32 %v2872_v23, %v4351_v24  ;;  %v4057_v24 = vstv %s1702_s4 }
 0x342   : > { %1646 = vmatmul.mubr.bf16.gmra.mrb[36].mxu1 %v1431_v52 }
 0x343   : > { %v1434_v20 = vpack.c.bf16 %v1392_v57, %v1390_v54  ;;  %v1433_v58 = vpack.c.bf16 %v1391_v17, %v1389_v59 }
 0x345   : > { %1653 = vmatprep.mubr.bf16.mxu1 %v1434_v20 }
 0x346   : > { %v2874_v63 = vpop.eup %2873 }
 0x347   : > { %v1394_v30 = vmul.f32 %v2874_v63, %v4353_v0  ;;  %v1393_v38 = vmul.f32 %v2874_v63, %v4356_v12 }
 0x348   : > { %v2876_v26 = vpop.eup %2875 }
 0x349   : > { %v1396_v18 = vmul.f32 %v2876_v26, %v4354_v7  ;;  %v1395_v1 = vmul.f32 %v2876_v26, %v4355_v6 }
 0x34a   : > { %1654 = vmatmul.mubr.bf16.gmra.mrb[40].mxu1 %v1433_v58 }
 0x34b   : > { %v1436_v44 = vpack.c.bf16 %v1396_v18, %v1394_v30  ;;  %v1435_v29 = vpack.c.bf16 %v1395_v1, %v1393_v38  ;;  %v2389_v30 = vld [vmem:[%s3399_s17 + $0x8] sm:$0xff]  }
 0x34c   : > { %v2331_v1 = vunpack.c.l.bf16 %v2389_v30 }
 0x34d   : > { %1661 = vmatprep.mubr.bf16.mxu1 %v1436_v44 }
 0x352   : > { %1662 = vmatmul.mubr.bf16.gmra.mrb[44].mxu1 %v1435_v29 }
 0x387   : > { %v1295_v34 = vpop.xlane.xlu0 %1294 }
 0x388   : > { %2877 = vrcp.f32 %v1295_v34 }
 0x38b   : > { %v1298_v19 = vpop.xlane.xlu1 %1297 }
 0x38c   : > { %2879 = vrcp.f32 %v1298_v19  ;;  %v2332_v19 = vunpack.c.h.bf16 %v2389_v30 }
 0x38f   : > { %v1301_v33 = vpop.xlane.xlu0 %1300 }
 0x390   : > { %2881 = vrcp.f32 %v1301_v33 }
 0x392   : > { %v2878_v35 = vpop.eup %2877 }
 0x393   : > { %v1304_v11 = vpop.xlane.xlu1 %1303  ;;  %v1398_v5 = vmul.f32 %v2878_v35, %v3942_v32  ;;  %v1397_v55 = vmul.f32 %v2878_v35, %v3940_v53  ;;  %v2390_v35 = vld [vmem:[%s3399_s17 + $0x10] sm:$0xff]  }
 0x394   : > { %2883 = vrcp.f32 %v1304_v11 }
 0x396   : > { %v2880_v3 = vpop.eup %2879 }
 0x397   : > { %v1400_v13 = vmul.f32 %v2880_v3, %v3950_v41  ;;  %v1399_v9 = vmul.f32 %v2880_v3, %v3948_v22 }
 0x398   : > { %v1307_v28 = vpop.xlane.xlu0 %1306 }
 0x399   : > { %v1438_v39 = vpack.c.bf16 %v1400_v13, %v1398_v5  ;;  %v1437_v62 = vpack.c.bf16 %v1399_v9, %v1397_v55  ;;  %2885 = vrcp.f32 %v1307_v28 }
 0x39a   : > { %v2882_v50 = vpop.eup %2881 }
 0x39b   : > { %1669 = vmatprep.mubr.bf16.mxu1 %v1438_v39  ;;  %v1310_v16 = vpop.xlane.xlu1 %1309  ;;  %v1402_v42 = vmul.f32 %v2882_v50, %v3962_v4  ;;  %v1401_v41 = vmul.f32 %v2882_v50, %v3960_v21  ;;  %v2335_v39 = vunpack.c.l.bf16 %v2390_v35 }
 0x39c   : > { %2887 = vrcp.f32 %v1310_v16  ;;  %1670 = vmatmul.mubr.bf16.gmra.mrb[48].mxu1 %v1437_v62 }
 0x39e   : > { %v2884_v61 = vpop.eup %2883 }
 0x39f   : > { %v1404_v32 = vmul.f32 %v2884_v61, %v3970_v43  ;;  %v1403_v53 = vmul.f32 %v2884_v61, %v3968_v36 }
 0x3a0   : > { %v1313_v51 = vpop.xlane.xlu0 %1312 }
 0x3a1   : > { %v1440_v8 = vpack.c.bf16 %v1404_v32, %v1402_v42  ;;  %v1439_v22 = vpack.c.bf16 %v1403_v53, %v1401_v41  ;;  %2889 = vrcp.f32 %v1313_v51  ;;  %v2336_v51 = vunpack.c.h.bf16 %v2390_v35  ;;  %v2391_v41 = vld [vmem:[%s3399_s17 + $0x18] sm:$0xff]  }
 0x3a3   : > { %1677 = vmatprep.mubr.bf16.mxu1 %v1440_v8  ;;  %v1316_v60 = vpop.xlane.xlu1 %1315  ;;  %v2886_v25 = vpop.eup %2885 }
 0x3a4   : > { %2891 = vrcp.f32 %v1316_v60  ;;  %1678 = vmatmul.mubr.bf16.gmra.mrb[52].mxu1 %v1439_v22  ;;  %v1406_v31 = vmul.f32 %v2886_v25, %v3982_v15  ;;  %v1405_v4 = vmul.f32 %v2886_v25, %v3980_v45  ;;  %v2326_v45 = vld [vmem:[%s3399_s17] sm:$0xff]  }
 0x3a6   : > { %v2888_v47 = vpop.eup %2887 }
 0x3a7   : > { %v1408_v10 = vmul.f32 %v2888_v47, %v3988_v37  ;;  %v1407_v43 = vmul.f32 %v2888_v47, %v3986_v49 }
 0x3a9   : > { %v1442_v21 = vpack.c.bf16 %v1408_v10, %v1406_v31  ;;  %v1441_v36 = vpack.c.bf16 %v1407_v43, %v1405_v4  ;;  %v2339_v31 = vunpack.c.l.bf16 %v2391_v41 }
 0x3ab   : > { %1685 = vmatprep.mubr.bf16.mxu1 %v1442_v21  ;;  %v2890_v14 = vpop.eup %2889 }
 0x3ac   : > { %1686 = vmatmul.mubr.bf16.gmra.mrb[56].mxu1 %v1441_v36  ;;  %v1410_v52 = vmul.f32 %v2890_v14, %v3998_v40  ;;  %v1409_v48 = vmul.f32 %v2890_v14, %v3996_v56  ;;  %v2327_v40 = vunpack.c.l.bf16 %v2326_v45  ;;  %v2340_v36 = vunpack.c.h.bf16 %v2391_v41 }
 0x3ae   : > { %v2892_v23 = vpop.eup %2891 }
 0x3af   : > { %v1412_v54 = vmul.f32 %v2892_v23, %v4004_v2  ;;  %v1411_v15 = vmul.f32 %v2892_v23, %v4002_v27  ;;  %v2328_v27 = vunpack.c.h.bf16 %v2326_v45 }
 0x3b1   : > { %v1444_v37 = vpack.c.bf16 %v1412_v54, %v1410_v52  ;;  %v1443_v57 = vpack.c.bf16 %v1411_v15, %v1409_v48  ;;  %v2392_v52 = vld [vmem:[%s3399_s17 + $0x20] sm:$0xff]  }
 0x3b3   : > { %1693 = vmatprep.mubr.bf16.mxu1 %v1444_v37 }
 0x3b4   : > { %1694 = vmatmul.mubr.bf16.gmra.mrb[60].mxu1 %v1443_v57 }
 0x3cb   : > { %v2468_v49 = vpop.f32.mrb[0].mxu1 }
 0x3cc   : > { %v2469_v20 = vpop.f32.mrb[1].mxu1 }
 0x3cd   : > { %v2470_v17 = vadd.f32 %v2469_v20, %v2468_v49  ;;  %v2471_v63 = vpop.f32.mrb[2].mxu1  ;;  %v2343_v49 = vunpack.c.l.bf16 %v2392_v52 }
 0x3ce   : > { %v2472_v2 = vpop.f32.mrb[3].mxu1 }
 0x3cf   : > { %v1704_v56 = vmul.f32 %v2470_v17, %v4057_v24  ;;  %v2473_v46 = vadd.f32 %v2472_v2, %v2471_v63  ;;  %v2344_v2 = vunpack.c.h.bf16 %v2392_v52 }
 0x3d1   : > { %v1800_v59 = vadd.f32 %v2327_v40, %v1704_v56  ;;  %v1705_v26 = vmul.f32 %v2473_v46, %v4057_v24 }
 0x3d3   : > { %v2292_v58 = vpack.c.bf16 %v1800_v59, %v1800_v59  ;;  %v1801_v0 = vadd.f32 %v2328_v27, %v1705_v26  ;;  %v2393_v27 = vld [vmem:[%s3399_s17 + $0x28] sm:$0xff]  }
 0x3d5   : > { %1961 = vst.msk [vmem:[%s4063_s6] sm:$0xf] %vm1960_vm1, %v2292_v58  ;;  %v2293_v7 = vpack.c.bf16 %v1801_v0, %v1801_v0  ;;  %v2474_v18 = vpop.f32.mrb[4].mxu1 }
 0x3d6   : > { %v2475_v44 = vpop.f32.mrb[5].mxu1 }
 0x3d7   : > { %1962 = vst.msk [vmem:[%s4063_s6 + $0x4] sm:$0xf] %vm1960_vm1, %v2293_v7  ;;  %v2476_v6 = vadd.f32 %v2475_v44, %v2474_v18  ;;  %v2477_v12 = vpop.f32.mrb[6].mxu1  ;;  %v2347_v18 = vunpack.c.l.bf16 %v2393_v27 }
 0x3d8   : > { %v2478_v38 = vpop.f32.mrb[7].mxu1 }
 0x3d9   : > { %v1706_v29 = vmul.f32 %v2476_v6, %v4057_v24  ;;  %v2479_v34 = vadd.f32 %v2478_v38, %v2477_v12  ;;  %v2348_v38 = vunpack.c.h.bf16 %v2393_v27 }
 0x3db   : > { %v1802_v33 = vadd.f32 %v2331_v1, %v1706_v29  ;;  %v1707_v11 = vmul.f32 %v2479_v34, %v4057_v24 }
 0x3dd   : > { %v2294_v3 = vpack.c.bf16 %v1802_v33, %v1802_v33  ;;  %v1803_v28 = vadd.f32 %v2332_v19, %v1707_v11  ;;  %v2480_v5 = vpop.f32.mrb[8].mxu1  ;;  %v2394_v19 = vld [vmem:[%s3399_s17 + $0x30] sm:$0xff]  }
 0x3de   : > { %v2481_v13 = vpop.f32.mrb[9].mxu1 }
 0x3df   : > { %1963 = vst.msk [vmem:[%s4063_s6 + $0x8] sm:$0xf] %vm1960_vm1, %v2294_v3  ;;  %v2295_v55 = vpack.c.bf16 %v1803_v28, %v1803_v28  ;;  %v2482_v9 = vadd.f32 %v2481_v13, %v2480_v5  ;;  %v2483_v62 = vpop.f32.mrb[10].mxu1  ;;  %v2351_v13 = vunpack.c.l.bf16 %v2394_v19 }
 0x3e0   : > { %v2484_v16 = vpop.f32.mrb[11].mxu1 }
 0x3e1   : > { %1964 = vst.msk [vmem:[%s4063_s6 + $0xc] sm:$0xf] %vm1960_vm1, %v2295_v55  ;;  %v1708_v50 = vmul.f32 %v2482_v9, %v4057_v24  ;;  %v2485_v61 = vadd.f32 %v2484_v16, %v2483_v62  ;;  %v2352_v16 = vunpack.c.h.bf16 %v2394_v19 }
 0x3e3   : > { %v1804_v42 = vadd.f32 %v2335_v39, %v1708_v50  ;;  %v1709_v32 = vmul.f32 %v2485_v61, %v4057_v24 }
 0x3e5   : > { %v2296_v53 = vpack.c.bf16 %v1804_v42, %v1804_v42  ;;  %v1805_v8 = vadd.f32 %v2336_v51, %v1709_v32  ;;  %v2486_v22 = vpop.f32.mrb[12].mxu1  ;;  %v2395_v51 = vld [vmem:[%s3399_s17 + $0x38] sm:$0xff]  }
 0x3e6   : > { %v2487_v60 = vpop.f32.mrb[13].mxu1 }
 0x3e7   : > { %1965 = vst.msk [vmem:[%s4063_s6 + $0x10] sm:$0xf] %vm1960_vm1, %v2296_v53  ;;  %v2297_v25 = vpack.c.bf16 %v1805_v8, %v1805_v8  ;;  %v2488_v47 = vadd.f32 %v2487_v60, %v2486_v22  ;;  %v2489_v10 = vpop.f32.mrb[14].mxu1  ;;  %v2355_v60 = vunpack.c.l.bf16 %v2395_v51 }
 0x3e8   : > { %v2490_v4 = vpop.f32.mrb[15].mxu1 }
 0x3e9   : > { %1966 = vst.msk [vmem:[%s4063_s6 + $0x14] sm:$0xf] %vm1960_vm1, %v2297_v25  ;;  %v1710_v43 = vmul.f32 %v2488_v47, %v4057_v24  ;;  %v2491_v21 = vadd.f32 %v2490_v4, %v2489_v10  ;;  %v2356_v4 = vunpack.c.h.bf16 %v2395_v51 }
 0x3eb   : > { %v1806_v14 = vadd.f32 %v2339_v31, %v1710_v43  ;;  %v1711_v23 = vmul.f32 %v2491_v21, %v4057_v24 }
 0x3ed   : > { %v2298_v54 = vpack.c.bf16 %v1806_v14, %v1806_v14  ;;  %v1807_v48 = vadd.f32 %v2340_v36, %v1711_v23  ;;  %v2492_v15 = vpop.f32.mrb[16].mxu1  ;;  %v2396_v36 = vld [vmem:[%s3399_s17 + $0x40] sm:$0xff]  }
 0x3ee   : > { %v2493_v37 = vpop.f32.mrb[17].mxu1 }
 0x3ef   : > { %1967 = vst.msk [vmem:[%s4063_s6 + $0x18] sm:$0xf] %vm1960_vm1, %v2298_v54  ;;  %v2299_v57 = vpack.c.bf16 %v1807_v48, %v1807_v48  ;;  %v2494_v45 = vadd.f32 %v2493_v37, %v2492_v15  ;;  %v2495_v20 = vpop.f32.mrb[18].mxu1  ;;  %v2359_v37 = vunpack.c.l.bf16 %v2396_v36 }
 0x3f0   : > { %v2496_v17 = vpop.f32.mrb[19].mxu1 }
 0x3f1   : > { %1968 = vst.msk [vmem:[%s4063_s6 + $0x1c] sm:$0xf] %vm1960_vm1, %v2299_v57  ;;  %v1712_v40 = vmul.f32 %v2494_v45, %v4057_v24  ;;  %v2497_v63 = vadd.f32 %v2496_v17, %v2495_v20  ;;  %v2360_v17 = vunpack.c.h.bf16 %v2396_v36  ;;  %v2400_v36 = vld [vmem:[%s3399_s17 + $0x60] sm:$0xff]  }
 0x3f3   : > { %v1808_v56 = vadd.f32 %v2343_v49, %v1712_v40  ;;  %v1713_v46 = vmul.f32 %v2497_v63, %v4057_v24 }
 0x3f5   : > { %v2300_v59 = vpack.c.bf16 %v1808_v56, %v1808_v56  ;;  %v1809_v26 = vadd.f32 %v2344_v2, %v1713_v46  ;;  %v2498_v58 = vpop.f32.mrb[20].mxu1  ;;  %v2397_v2 = vld [vmem:[%s3399_s17 + $0x48] sm:$0xff]  }
 0x3f6   : > { %v2499_v0 = vpop.f32.mrb[21].mxu1 }
 0x3f7   : > { %1969 = vst.msk [vmem:[%s4063_s6 + $0x20] sm:$0xf] %vm1960_vm1, %v2300_v59  ;;  %v2301_v30 = vpack.c.bf16 %v1809_v26, %v1809_v26  ;;  %v2500_v7 = vadd.f32 %v2499_v0, %v2498_v58  ;;  %v2501_v44 = vpop.f32.mrb[22].mxu1  ;;  %v2363_v0 = vunpack.c.l.bf16 %v2397_v2 }
 0x3f8   : > { %v2502_v6 = vpop.f32.mrb[23].mxu1 }
 0x3f9   : > { %1970 = vst.msk [vmem:[%s4063_s6 + $0x24] sm:$0xf] %vm1960_vm1, %v2301_v30  ;;  %v1714_v1 = vmul.f32 %v2500_v7, %v4057_v24  ;;  %v2503_v12 = vadd.f32 %v2502_v6, %v2501_v44  ;;  %v2364_v6 = vunpack.c.h.bf16 %v2397_v2 }
 0x3fb   : > { %v1810_v29 = vadd.f32 %v2347_v18, %v1714_v1  ;;  %v1715_v34 = vmul.f32 %v2503_v12, %v4057_v24 }
 0x3fd   : > { %v2302_v33 = vpack.c.bf16 %v1810_v29, %v1810_v29  ;;  %v1811_v11 = vadd.f32 %v2348_v38, %v1715_v34  ;;  %v2504_v35 = vpop.f32.mrb[24].mxu1  ;;  %v2398_v38 = vld [vmem:[%s3399_s17 + $0x50] sm:$0xff]  }
 0x3fe   : > { %v2505_v3 = vpop.f32.mrb[25].mxu1 }
 0x3ff   : > { %1971 = vst.msk [vmem:[%s4063_s6 + $0x28] sm:$0xf] %vm1960_vm1, %v2302_v33  ;;  %v2303_v28 = vpack.c.bf16 %v1811_v11, %v1811_v11  ;;  %v2506_v5 = vadd.f32 %v2505_v3, %v2504_v35  ;;  %v2507_v55 = vpop.f32.mrb[26].mxu1  ;;  %v2367_v3 = vunpack.c.l.bf16 %v2398_v38 }
 0x400   : > { %v2508_v9 = vpop.f32.mrb[27].mxu1 }
 0x401   : > { %1972 = vst.msk [vmem:[%s4063_s6 + $0x2c] sm:$0xf] %vm1960_vm1, %v2303_v28  ;;  %v1716_v39 = vmul.f32 %v2506_v5, %v4057_v24  ;;  %v2509_v62 = vadd.f32 %v2508_v9, %v2507_v55  ;;  %v2368_v9 = vunpack.c.h.bf16 %v2398_v38 }
 0x403   : > { %v1812_v50 = vadd.f32 %v2351_v13, %v1716_v39  ;;  %v1717_v61 = vmul.f32 %v2509_v62, %v4057_v24 }
 0x405   : > { %v2304_v42 = vpack.c.bf16 %v1812_v50, %v1812_v50  ;;  %v1813_v32 = vadd.f32 %v2352_v16, %v1717_v61  ;;  %v2510_v41 = vpop.f32.mrb[28].mxu1  ;;  %v2399_v16 = vld [vmem:[%s3399_s17 + $0x58] sm:$0xff]  }
 0x406   : > { %v2511_v53 = vpop.f32.mrb[29].mxu1 }
 0x407   : > { %1973 = vst.msk [vmem:[%s4063_s6 + $0x30] sm:$0xf] %vm1960_vm1, %v2304_v42  ;;  %v2305_v8 = vpack.c.bf16 %v1813_v32, %v1813_v32  ;;  %v2512_v22 = vadd.f32 %v2511_v53, %v2510_v41  ;;  %v2513_v25 = vpop.f32.mrb[30].mxu1  ;;  %v2371_v53 = vunpack.c.l.bf16 %v2399_v16 }
 0x408   : > { %v2514_v47 = vpop.f32.mrb[31].mxu1 }
 0x409   : > { %1974 = vst.msk [vmem:[%s4063_s6 + $0x34] sm:$0xf] %vm1960_vm1, %v2305_v8  ;;  %v1718_v31 = vmul.f32 %v2512_v22, %v4057_v24  ;;  %v2515_v10 = vadd.f32 %v2514_v47, %v2513_v25  ;;  %v2372_v47 = vunpack.c.h.bf16 %v2399_v16 }
 0x40b   : > { %v1814_v43 = vadd.f32 %v2355_v60, %v1718_v31  ;;  %v1719_v21 = vmul.f32 %v2515_v10, %v4057_v24 }
 0x40d   : > { %v2306_v14 = vpack.c.bf16 %v1814_v43, %v1814_v43  ;;  %v1815_v23 = vadd.f32 %v2356_v4, %v1719_v21  ;;  %v2516_v52 = vpop.f32.mrb[32].mxu1 }
 0x40e   : > { %v2517_v54 = vpop.f32.mrb[33].mxu1 }
 0x40f   : > { %1975 = vst.msk [vmem:[%s4063_s6 + $0x38] sm:$0xf] %vm1960_vm1, %v2306_v14  ;;  %v2307_v48 = vpack.c.bf16 %v1815_v23, %v1815_v23  ;;  %v2518_v15 = vadd.f32 %v2517_v54, %v2516_v52  ;;  %v2519_v57 = vpop.f32.mrb[34].mxu1  ;;  %v2375_v54 = vunpack.c.l.bf16 %v2400_v36 }
 0x410   : > { %v2520_v45 = vpop.f32.mrb[35].mxu1 }
 0x411   : > { %1976 = vst.msk [vmem:[%s4063_s6 + $0x3c] sm:$0xf] %vm1960_vm1, %v2307_v48  ;;  %v1720_v49 = vmul.f32 %v2518_v15, %v4057_v24  ;;  %v2521_v20 = vadd.f32 %v2520_v45, %v2519_v57  ;;  %v2376_v45 = vunpack.c.h.bf16 %v2400_v36 }
 0x413   : > { %v1816_v40 = vadd.f32 %v2359_v37, %v1720_v49  ;;  %v1721_v63 = vmul.f32 %v2521_v20, %v4057_v24 }
 0x415   : > { %v2308_v56 = vpack.c.bf16 %v1816_v40, %v1816_v40  ;;  %v1817_v46 = vadd.f32 %v2360_v17, %v1721_v63  ;;  %v2522_v27 = vpop.f32.mrb[36].mxu1  ;;  %v2401_v17 = vld [vmem:[%s3399_s17 + $0x68] sm:$0xff]  }
 0x416   : > { %v2523_v59 = vpop.f32.mrb[37].mxu1 }
 0x417   : > { %1977 = vst.msk [vmem:[%s4063_s6 + $0x40] sm:$0xf] %vm1960_vm1, %v2308_v56  ;;  %v2309_v26 = vpack.c.bf16 %v1817_v46, %v1817_v46  ;;  %v2524_v58 = vadd.f32 %v2523_v59, %v2522_v27  ;;  %v2525_v30 = vpop.f32.mrb[38].mxu1  ;;  %v2379_v59 = vunpack.c.l.bf16 %v2401_v17 }
 0x418   : > { %v2526_v7 = vpop.f32.mrb[39].mxu1 }
 0x419   : > { %1978 = vst.msk [vmem:[%s4063_s6 + $0x44] sm:$0xf] %vm1960_vm1, %v2309_v26  ;;  %v1722_v18 = vmul.f32 %v2524_v58, %v4057_v24  ;;  %v2527_v44 = vadd.f32 %v2526_v7, %v2525_v30  ;;  %v2380_v7 = vunpack.c.h.bf16 %v2401_v17 }
 0x41b   : > { %v1818_v1 = vadd.f32 %v2363_v0, %v1722_v18  ;;  %v1723_v12 = vmul.f32 %v2527_v44, %v4057_v24 }
 0x41d   : > { %v2310_v29 = vpack.c.bf16 %v1818_v1, %v1818_v1  ;;  %v1819_v34 = vadd.f32 %v2364_v6, %v1723_v12  ;;  %v2528_v19 = vpop.f32.mrb[40].mxu1  ;;  %v2402_v6 = vld [vmem:[%s3399_s17 + $0x70] sm:$0xff]  }
 0x41e   : > { %v2529_v33 = vpop.f32.mrb[41].mxu1 }
 0x41f   : > { %1979 = vst.msk [vmem:[%s4063_s6 + $0x48] sm:$0xf] %vm1960_vm1, %v2310_v29  ;;  %v2311_v11 = vpack.c.bf16 %v1819_v34, %v1819_v34  ;;  %v2530_v35 = vadd.f32 %v2529_v33, %v2528_v19  ;;  %v2531_v28 = vpop.f32.mrb[42].mxu1  ;;  %v2383_v33 = vunpack.c.l.bf16 %v2402_v6 }
 0x420   : > { %v2532_v5 = vpop.f32.mrb[43].mxu1 }
 0x421   : > { %1980 = vst.msk [vmem:[%s4063_s6 + $0x4c] sm:$0xf] %vm1960_vm1, %v2311_v11  ;;  %v1724_v13 = vmul.f32 %v2530_v35, %v4057_v24  ;;  %v2533_v55 = vadd.f32 %v2532_v5, %v2531_v28  ;;  %v2384_v5 = vunpack.c.h.bf16 %v2402_v6 }
 0x423   : > { %v1820_v39 = vadd.f32 %v2367_v3, %v1724_v13  ;;  %v1725_v62 = vmul.f32 %v2533_v55, %v4057_v24 }
 0x425   : > { %v2312_v50 = vpack.c.bf16 %v1820_v39, %v1820_v39  ;;  %v1821_v61 = vadd.f32 %v2368_v9, %v1725_v62  ;;  %v2534_v51 = vpop.f32.mrb[44].mxu1  ;;  %v2403_v9 = vld [vmem:[%s3399_s17 + $0x78] sm:$0xff]  }
 0x426   : > { %v2535_v42 = vpop.f32.mrb[45].mxu1 }
 0x427   : > { %1981 = vst.msk [vmem:[%s4063_s6 + $0x50] sm:$0xf] %vm1960_vm1, %v2312_v50  ;;  %v2313_v32 = vpack.c.bf16 %v1821_v61, %v1821_v61  ;;  %v2536_v41 = vadd.f32 %v2535_v42, %v2534_v51  ;;  %v2537_v8 = vpop.f32.mrb[46].mxu1  ;;  %v2387_v42 = vunpack.c.l.bf16 %v2403_v9 }
 0x428   : > { %v2538_v22 = vpop.f32.mrb[47].mxu1 }
 0x429   : > { %1982 = vst.msk [vmem:[%s4063_s6 + $0x54] sm:$0xf] %vm1960_vm1, %v2313_v32  ;;  %v1726_v60 = vmul.f32 %v2536_v41, %v4057_v24  ;;  %v2539_v25 = vadd.f32 %v2538_v22, %v2537_v8  ;;  %v2388_v22 = vunpack.c.h.bf16 %v2403_v9 }
 0x42b   : > { %v1822_v31 = vadd.f32 %v2371_v53, %v1726_v60  ;;  %v1727_v10 = vmul.f32 %v2539_v25, %v4057_v24 }
 0x42d   : > { %v2314_v4 = vpack.c.bf16 %v1822_v31, %v1822_v31  ;;  %v1823_v43 = vadd.f32 %v2372_v47, %v1727_v10 }
 0x42f   : > { %1983 = vst.msk [vmem:[%s4063_s6 + $0x58] sm:$0xf] %vm1960_vm1, %v2314_v4  ;;  %v2315_v21 = vpack.c.bf16 %v1823_v43, %v1823_v43 }
 0x431   : > { %1984 = vst.msk [vmem:[%s4063_s6 + $0x5c] sm:$0xf] %vm1960_vm1, %v2315_v21 }
 0x46f   : > { %v2540_v14 = vpop.f32.mrb[48].mxu1 }
 0x470   : > { %v2541_v23 = vpop.f32.mrb[49].mxu1 }
 0x471   : > { %v2542_v52 = vadd.f32 %v2541_v23, %v2540_v14  ;;  %v2543_v48 = vpop.f32.mrb[50].mxu1 }
 0x472   : > { %v2544_v15 = vpop.f32.mrb[51].mxu1 }
 0x473   : > { %v1728_v37 = vmul.f32 %v2542_v52, %v4057_v24  ;;  %v2545_v57 = vadd.f32 %v2544_v15, %v2543_v48 }
 0x475   : > { %v1824_v49 = vadd.f32 %v2375_v54, %v1728_v37  ;;  %v1729_v20 = vmul.f32 %v2545_v57, %v4057_v24 }
 0x477   : > { %v2316_v40 = vpack.c.bf16 %v1824_v49, %v1824_v49  ;;  %v1825_v63 = vadd.f32 %v2376_v45, %v1729_v20  ;;  %v2546_v2 = vpop.f32.mrb[52].mxu1 }
 0x478   : > { %v2547_v56 = vpop.f32.mrb[53].mxu1 }
 0x479   : > { %1985 = vst.msk [vmem:[%s4063_s6 + $0x60] sm:$0xf] %vm1960_vm1, %v2316_v40  ;;  %v2317_v46 = vpack.c.bf16 %v1825_v63, %v1825_v63  ;;  %v2548_v27 = vadd.f32 %v2547_v56, %v2546_v2  ;;  %v2549_v26 = vpop.f32.mrb[54].mxu1 }
 0x47a   : > { %v2550_v58 = vpop.f32.mrb[55].mxu1 }
 0x47b   : > { %1986 = vst.msk [vmem:[%s4063_s6 + $0x64] sm:$0xf] %vm1960_vm1, %v2317_v46  ;;  %v1730_v0 = vmul.f32 %v2548_v27, %v4057_v24  ;;  %v2551_v30 = vadd.f32 %v2550_v58, %v2549_v26 }
 0x47d   : > { %v1826_v18 = vadd.f32 %v2379_v59, %v1730_v0  ;;  %v1731_v44 = vmul.f32 %v2551_v30, %v4057_v24 }
 0x47f   : > { %v2318_v1 = vpack.c.bf16 %v1826_v18, %v1826_v18  ;;  %v1827_v12 = vadd.f32 %v2380_v7, %v1731_v44  ;;  %v2552_v38 = vpop.f32.mrb[56].mxu1 }
 0x480   : > { %v2553_v29 = vpop.f32.mrb[57].mxu1 }
 0x481   : > { %1987 = vst.msk [vmem:[%s4063_s6 + $0x68] sm:$0xf] %vm1960_vm1, %v2318_v1  ;;  %v2319_v34 = vpack.c.bf16 %v1827_v12, %v1827_v12  ;;  %v2554_v19 = vadd.f32 %v2553_v29, %v2552_v38  ;;  %v2555_v11 = vpop.f32.mrb[58].mxu1 }
 0x482   : > { %v2556_v35 = vpop.f32.mrb[59].mxu1 }
 0x483   : > { %1988 = vst.msk [vmem:[%s4063_s6 + $0x6c] sm:$0xf] %vm1960_vm1, %v2319_v34  ;;  %v1732_v3 = vmul.f32 %v2554_v19, %v4057_v24  ;;  %v2557_v28 = vadd.f32 %v2556_v35, %v2555_v11 }
 0x485   : > { %v1828_v13 = vadd.f32 %v2383_v33, %v1732_v3  ;;  %v1733_v55 = vmul.f32 %v2557_v28, %v4057_v24 }
 0x487   : > { %v2320_v39 = vpack.c.bf16 %v1828_v13, %v1828_v13  ;;  %v1829_v62 = vadd.f32 %v2384_v5, %v1733_v55  ;;  %v2558_v16 = vpop.f32.mrb[60].mxu1 }
 0x488   : > { %v2559_v50 = vpop.f32.mrb[61].mxu1 }
 0x489   : > { %1989 = vst.msk [vmem:[%s4063_s6 + $0x70] sm:$0xf] %vm1960_vm1, %v2320_v39  ;;  %v2321_v61 = vpack.c.bf16 %v1829_v62, %v1829_v62  ;;  %v2560_v51 = vadd.f32 %v2559_v50, %v2558_v16  ;;  %v2561_v32 = vpop.f32.mrb[62].mxu1 }
 0x48a   : > { %v2562_v41 = vpop.f32.mrb[63].mxu1 }
 0x48b   : > { %1990 = vst.msk [vmem:[%s4063_s6 + $0x74] sm:$0xf] %vm1960_vm1, %v2321_v61  ;;  %v1734_v53 = vmul.f32 %v2560_v51, %v4057_v24  ;;  %v2563_v8 = vadd.f32 %v2562_v41, %v2561_v32 }
 0x48d   : > { %v1830_v60 = vadd.f32 %v2387_v42, %v1734_v53  ;;  %v1735_v25 = vmul.f32 %v2563_v8, %v4057_v24 }
 0x48f   : > { %v2322_v47 = vpack.c.bf16 %v1830_v60, %v1830_v60  ;;  %v1831_v31 = vadd.f32 %v2388_v22, %v1735_v25 }
 0x491   : > { %1991 = vst.msk [vmem:[%s4063_s6 + $0x78] sm:$0xf] %vm1960_vm1, %v2322_v47  ;;  %v2323_v10 = vpack.c.bf16 %v1831_v31, %v1831_v31 }
 0x493   : > { %1992 = vst.msk [vmem:[%s4063_s6 + $0x7c] sm:$0xf] %vm1960_vm1, %v2323_v10 }
 0x494   : > { %3026 = shalt.err (!%p3023_p7)
}
 0x495   : > { %s3027_s0 = scalar_lea.hbm %s4174_s14, 2048  ;;  %s3031_s13 = scalar_lea.hbm %s4234_s5, 4096 }
 0x496   : > { %p3028_p3 = scmp.ne.s32.totalorder %s4174_s14, %s3027_s0  ;;  %p3032_p12 = scmp.lt.u32.totalorder %s4174_s14, %s4234_s5 }
 0x497   : > { %p3033_p4 = scmp.lt.u32.totalorder %s3031_s13, %s3027_s0  ;;  %p3035_p0 = scmp.lt.u32.totalorder %s3027_s0, %s4174_s14 }
 0x498   : > { %p3029_p10 = pnand %p3028_p3, %p4357_p1 }
 0x499   : > { %p3034_p8 = por %p3033_p4, %p3032_p12 }
 0x49a   : > { %p3030_p9 = pneg %p3029_p10 }
 0x49b   : > { %p3036_p6 = por %p3035_p0, %p3034_p8 }
 0x49d   : > { %p3037_p13 = pnand %p3036_p6, %p3030_p9 }
 0x49f   : > { %3040 = shalt.err (!%p3037_p13)
}
 0x4a0   : > { %s3112_s18 = smov 64   ;;  %s3113_s24 = smov 4  }
 0x4a1   : > { %2580 = dma.vmem_to_hbm [thread:$0]  (%p4357_p1), %s4176_s1, 2048, %s4174_s14, %s1994_s12, %s3112_s18, %s3112_s18, %s3113_s24  }
 0x4a2 PF: > { %s4358_s25 = sld [smem:[#allocation18_spill]]  ;;  %s2024_s27 = sand.u32 1, %s3083_s20  }
 0x4a3   : > { %p4359_p11 = scmp.ne.s32.totalorder %s4283_s9, 0  ;;  %s2025_s19 = scalar_lea.sflag [#allocation5], %s2024_s27 }
 0x4a8   : > { %p4360_p2 = scmp.ge.s32.totalorder %s4358_s25, 2 }
 0x4aa   : > { %p2596_p5 = pnand %p4360_p2, %p4359_p11 }
 0x4ac   : > { %3078 = dma.done.wait (!%p2596_p5), %s2025_s19, 2048  }
 0x4ad   : > { %3080 = vsyncadd (!%p2596_p5), %s2025_s19, 4294965248  ;;  %s28_s25 = sadd.s32 1, %s4358_s25   ;;  %s4361_s4 = sld [smem:[#allocation16_spill]] }
 0x4ae   : > { %p25_p7 = scmp.ge.s32.totalorder %s28_s25, 4   ;;  %s4362_s22 = sld [smem:[#allocation20_spill]] }
 0x4af   : > { %s4363_s23 = sld [smem:[#allocation17_spill]]  ;;  %s4364_s24 = sld [smem:[#allocation19_spill]] }
 0x4b0   : > { %s4365_s20 = smov %s3087_s21  ;;  %27 = sbr.rel (!%p25_p7) target bundleno = 14 (0xe), region = 122 }
 0x4b3   : > { %s4366_s21 = smov %s4361_s4 }
 0x4b7   :  { %2030 = vsyncpa [#allocation4], 1 }
 0x4b8   :  { %2032 = vsyncpa [#allocation4 + $0x1], 1 }
 0x4b9   :  { %2033 = vsyncpa [#allocation7], 1 }
 0x4ba   :  { %2035 = vsyncpa [#allocation7 + $0x1], 1 }
 0x4bb   :  { %2036 = vsyncpa [#allocation10], 1 }
 0x4bc   :  { %2038 = vsyncpa [#allocation10 + $0x1], 1 }
 0x4bd   :  { %2039 = vsyncpa [#allocation5], 1 }
 0x4be   :  { %2041 = vsyncpa [#allocation5 + $0x1], 1 }

// kernel: dablock_forward.10
= control target key start
LH: loop header
LB: loop body
LE: loop exit
PB: predicated region body
PF: predicated region fallthrough
CT: control target
= control target key end

     0   :  { %15 = vsyncpa [#allocation3], 0  ;;  %s4319_s0 = inlined_call_operand.hbm [shape: bf16[512,32], index: 0, kind: input, shape index: {}]   ;;  %s4320_s1 = inlined_call_operand.hbm [shape: bf16[32,4], index: 1, kind: input, shape index: {}]   ;;  %s4321_s2 = inlined_call_operand.hbm [shape: bf16[32,4], index: 2, kind: input, shape index: {}]   ;;  %s4322_s3 = inlined_call_operand.hbm [shape: bf16[32,32], index: 3, kind: input, shape index: {}]   ;;  %s4323_s4 = inlined_call_operand.hbm [shape: f32[1,4], index: 4, kind: input, shape index: {}]   ;;  %s4324_s5 = inlined_call_operand.hbm [shape: f32[1,4], index: 5, kind: input, shape index: {}]   ;;  %s4325_s6 = inlined_call_operand.hbm [shape: f32[1,32], index: 6, kind: input, shape index: {}]   ;;  %s4326_s7 = inlined_call_operand.hbm [shape: bf16[512,4], index: 7, kind: output, shape index: {0}]   ;;  %s4327_s8 = inlined_call_operand.hbm [shape: bf16[512,4], index: 8, kind: output, shape index: {1}]   ;;  %s4328_s9 = inlined_call_operand.hbm [shape: bf16[512,32], index: 9, kind: output, shape index: {2}]  }
   0x1   :  { %16 = vsyncpa [#allocation6], 0 }
   0x2   :  { %17 = vsyncpa [#allocation9], 0 }
   0x3   :  { %18 = vsyncpa [#allocation12], 0 }
   0x4   :  { %19 = vsyncpa [#allocation4], 0 }
   0x5   :  { %20 = vsyncpa [#allocation16], 0  ;;  %s3506_s30 = smov [#allocation5]   ;;  %s3507_s11 = smov [#allocation8]  }
   0x6   :  { %s38_s10 = sshll.u32 %s3506_s30, 4  ;;  %s62_s12 = sshll.u32 %s3507_s11, 4  ;;  %s39_s10 = int_to_ptr.vmem [resolvable:$true] %s38_s10  ;;  %s3568_s12 = int_to_ptr.vmem [resolvable:$true] %s62_s12 }
   0x7   :  { %s3274_s15 = scalar_lea.hbm %s4320_s1, 256 }
   0x8   :  { %p3275_p0 = scmp.ne.s32.totalorder %s4320_s1, %s3274_s15  ;;  %p3278_p1 = scmp.lt.u32.totalorder %s3274_s15, %s4320_s1 }
   0xa   :  { %p3280_p2 = pnand %p3278_p1, %p3275_p0 }
   0xc   :  { %3283 = shalt.err (!%p3280_p2)
}
   0xd   :  { %s3284_s20 = scalar_lea.vmem %s39_s10, 256  ;;  %p3289_p4 = scmp.lt.s32.totalorder %s39_s10, %s39_s10 }
   0xe   :  { %p3285_p3 = scmp.ne.s32.totalorder %s39_s10, %s3284_s20  ;;  %p3290_p5 = scmp.lt.s32.totalorder %s3284_s20, %s3284_s20 }
  0x10   :  { %p3291_p6 = por %p3290_p5, %p3289_p4 }
  0x12   :  { %p3292_p7 = pnand %p3291_p6, %p3285_p3 }
  0x14   :  { %3295 = shalt.err (!%p3292_p7)
}
  0x15   :  { %s3508_s21 = smov 64   ;;  %s3509_s22 = smov 4  }
  0x16   :  { %44 = dma.hbm_to_vmem [thread:$0]  %s4320_s1, 256, %s39_s10, [#allocation6], %s3508_s21, %s3508_s21, %s3509_s22  }
  0x17   :  { %s3296_s27 = scalar_lea.hbm %s4322_s3, 256 }
  0x18   :  { %p3297_p8 = scmp.ne.s32.totalorder %s4322_s3, %s3296_s27  ;;  %p3300_p9 = scmp.lt.u32.totalorder %s3296_s27, %s4322_s3 }
  0x1a   :  { %p3302_p10 = pnand %p3300_p9, %p3297_p8 }
  0x1c   :  { %3305 = shalt.err (!%p3302_p10)
}
  0x1d   :  { %s3306_s13 = scalar_lea.vmem %s3568_s12, 256  ;;  %p3311_p12 = scmp.lt.s32.totalorder %s3568_s12, %s3568_s12 }
  0x1e   :  { %p3307_p11 = scmp.ne.s32.totalorder %s3568_s12, %s3306_s13  ;;  %p3312_p13 = scmp.lt.s32.totalorder %s3306_s13, %s3306_s13 }
  0x20   :  { %p3313_p0 = por %p3312_p13, %p3311_p12 }
  0x22   :  { %p3314_p1 = pnand %p3313_p0, %p3307_p11 }
  0x24   :  { %3317 = shalt.err (!%p3314_p1)
}
  0x25   :  { %68 = dma.hbm_to_vmem [thread:$0]  %s4322_s3, 256, %s3568_s12, [#allocation9], %s3508_s21, %s3508_s21, %s3509_s22  }
  0x26   :  { %s3510_s14 = smov [#allocation11]   ;;  %s3511_s16 = smov [#allocation2]  }
  0x27   :  { %s85_s15 = sshll.u32 %s3510_s14, 4  ;;  %s26_s17 = sshll.u32 %s3511_s16, 4  ;;  %s86_s15 = int_to_ptr.vmem [resolvable:$true] %s85_s15  ;;  %s3605_s17 = int_to_ptr.vmem [resolvable:$true] %s26_s17 }
  0x28   :  { %s3318_s20 = scalar_lea.hbm %s4324_s5, 16 }
  0x29   :  { %p3319_p2 = scmp.ne.s32.totalorder %s4324_s5, %s3318_s20  ;;  %p3322_p3 = scmp.lt.u32.totalorder %s3318_s20, %s4324_s5 }
  0x2b   :  { %p3324_p4 = pnand %p3322_p3, %p3319_p2 }
  0x2d   :  { %3327 = shalt.err (!%p3324_p4)
}
  0x2e   :  { %s3328_s3 = scalar_lea.vmem %s86_s15, 16  ;;  %s3332_s12 = scalar_lea.vmem %s86_s15, 32 }
  0x2f   :  { %p3329_p5 = scmp.ne.s32.totalorder %s86_s15, %s3328_s3  ;;  %p3333_p6 = scmp.lt.s32.totalorder %s86_s15, %s86_s15 }
  0x30   :  { %p3334_p7 = scmp.lt.s32.totalorder %s3332_s12, %s3328_s3 }
  0x32   :  { %p3335_p8 = por %p3334_p7, %p3333_p6 }
  0x34   :  { %p3336_p9 = pnand %p3335_p8, %p3329_p5 }
  0x36   :  { %3339 = shalt.err (!%p3336_p9)
}
  0x37   :  { %88 = dma.hbm_to_vmem [thread:$0]  %s4324_s5, 16, %s86_s15, [#allocation12]  }
  0x38   :  { %s3340_s11 = scalar_lea.hbm %s4319_s0, 4096 }
  0x39   :  { %p3341_p10 = scmp.ne.s32.totalorder %s4319_s0, %s3340_s11  ;;  %p3344_p11 = scmp.lt.u32.totalorder %s3340_s11, %s4319_s0 }
  0x3b   :  { %p3346_p12 = pnand %p3344_p11, %p3341_p10 }
  0x3d   :  { %3349 = shalt.err (!%p3346_p12)
}
  0x3e   :  { %s3350_s16 = scalar_lea.vmem %s3605_s17, 4096  ;;  %p3355_p0 = scmp.lt.s32.totalorder %s3605_s17, %s3605_s17 }
  0x3f   :  { %p3351_p13 = scmp.ne.s32.totalorder %s3605_s17, %s3350_s16  ;;  %p3356_p1 = scmp.lt.s32.totalorder %s3350_s16, %s3350_s16 }
  0x41   :  { %p3357_p2 = por %p3356_p1, %p3355_p0 }
  0x43   :  { %p3358_p3 = pnand %p3357_p2, %p3351_p13 }
  0x45   :  { %3361 = shalt.err (!%p3358_p3)
}
  0x46   :  { %32 = dma.hbm_to_vmem [thread:$0]  %s4319_s0, 4096, %s3605_s17, [#allocation3], %s3508_s21, %s3508_s21, %s3509_s22  }
  0x47   :  { %s3512_s18 = smov [#allocation7]   ;;  %s3513_s20 = smov [#allocation10]  }
  0x48   :  { %s50_s19 = sshll.u32 %s3512_s18, 4  ;;  %s75_s23 = sshll.u32 %s3513_s20, 4  ;;  %s51_s19 = int_to_ptr.vmem [resolvable:$true] %s50_s19  ;;  %s76_s23 = int_to_ptr.vmem [resolvable:$true] %s75_s23 }
  0x49   :  { %s3362_s26 = scalar_lea.hbm %s4321_s2, 256 }
  0x4a   :  { %p3363_p4 = scmp.ne.s32.totalorder %s4321_s2, %s3362_s26  ;;  %p3366_p5 = scmp.lt.u32.totalorder %s3362_s26, %s4321_s2 }
  0x4c   :  { %p3368_p6 = pnand %p3366_p5, %p3363_p4 }
  0x4e   :  { %3371 = shalt.err (!%p3368_p6)
}
  0x4f   :  { %s3372_s0 = scalar_lea.vmem %s51_s19, 256  ;;  %p3377_p8 = scmp.lt.s32.totalorder %s51_s19, %s51_s19 }
  0x50   :  { %p3373_p7 = scmp.ne.s32.totalorder %s51_s19, %s3372_s0  ;;  %p3378_p9 = scmp.lt.s32.totalorder %s3372_s0, %s3372_s0 }
  0x52   :  { %p3379_p10 = por %p3378_p9, %p3377_p8 }
  0x54   :  { %p3380_p11 = pnand %p3379_p10, %p3373_p7 }
  0x56   :  { %3383 = shalt.err (!%p3380_p11)
}
  0x57   :  { %56 = dma.hbm_to_vmem [thread:$0]  %s4321_s2, 256, %s51_s19, [#allocation6], %s3508_s21, %s3508_s21, %s3509_s22  }
  0x58   :  { %s3384_s13 = scalar_lea.hbm %s4323_s4, 16 }
  0x59   :  { %p3385_p12 = scmp.ne.s32.totalorder %s4323_s4, %s3384_s13  ;;  %p3388_p13 = scmp.lt.u32.totalorder %s3384_s13, %s4323_s4 }
  0x5b   :  { %p3390_p0 = pnand %p3388_p13, %p3385_p12 }
  0x5d   :  { %3393 = shalt.err (!%p3390_p0)
}
  0x5e   :  { %s3394_s5 = scalar_lea.vmem %s76_s23, 16  ;;  %s3398_s15 = scalar_lea.vmem %s76_s23, 32 }
  0x5f   :  { %p3395_p1 = scmp.ne.s32.totalorder %s76_s23, %s3394_s5  ;;  %p3399_p2 = scmp.lt.s32.totalorder %s76_s23, %s76_s23 }
  0x60   :  { %p3400_p3 = scmp.lt.s32.totalorder %s3398_s15, %s3394_s5 }
  0x62   :  { %p3401_p4 = por %p3400_p3, %p3399_p2 }
  0x64   :  { %p3402_p5 = pnand %p3401_p4, %p3395_p1 }
  0x66   :  { %3405 = shalt.err (!%p3402_p5)
}
  0x67   :  { %78 = dma.hbm_to_vmem [thread:$0]  %s4323_s4, 16, %s76_s23, [#allocation9]  }
  0x68   :  { %s3514_s19 = smov [#allocation13]   ;;  %s3406_s26 = scalar_lea.hbm %s4325_s6, 16 }
  0x69   :  { %s95_s20 = sshll.u32 %s3514_s19, 4  ;;  %p3407_p6 = scmp.ne.s32.totalorder %s4325_s6, %s3406_s26  ;;  %s96_s20 = int_to_ptr.vmem [resolvable:$true] %s95_s20 }
  0x6a   :  { %p3410_p7 = scmp.lt.u32.totalorder %s3406_s26, %s4325_s6 }
  0x6c   :  { %p3412_p8 = pnand %p3410_p7, %p3407_p6 }
  0x6e   :  { %3415 = shalt.err (!%p3412_p8)
}
  0x6f   :  { %s3416_s0 = scalar_lea.vmem %s96_s20, 16  ;;  %s3420_s4 = scalar_lea.vmem %s96_s20, 32 }
  0x70   :  { %p3417_p9 = scmp.ne.s32.totalorder %s96_s20, %s3416_s0  ;;  %p3421_p10 = scmp.lt.s32.totalorder %s96_s20, %s96_s20 }
  0x71   :  { %p3422_p11 = scmp.lt.s32.totalorder %s3420_s4, %s3416_s0 }
  0x73   :  { %p3423_p12 = por %p3422_p11, %p3421_p10 }
  0x75   :  { %p3424_p13 = pnand %p3423_p12, %p3417_p9 }
  0x77   :  { %3427 = shalt.err (!%p3424_p13)
}
  0x78   :  { %98 = dma.hbm_to_vmem [thread:$0]  %s4325_s6, 16, %s96_s20, [#allocation12]  }
  0x79   :  { %3494 = dma.done.wait [#allocation3], 4096  }
  0x7a   :  { %3495 = vsyncadd [#allocation3], 4294963200 }
  0x7b   :  { %3496 = dma.done.wait [#allocation6], 512  }
  0x7c   :  { %3497 = vsyncadd [#allocation6], 4294966784 }
  0x7d   :  { %3498 = dma.done.wait [#allocation9], 272  }
  0x7e   :  { %3499 = vsyncadd [#allocation9], 4294967024 }
  0x7f   :  { %3500 = dma.done.wait [#allocation12], 32  }
  0x80   :  { %3501 = vsyncadd [#allocation12], 4294967264  ;;  %v3234_v0 = vld [vmem:[#allocation5] sm:$0xff]   ;;  %v3235_v1 = vld [vmem:[#allocation5 + $0x8] sm:$0xff]   ;;  %vm368_vm0 = vcmask 261120   ;;  %vm1010_vm1 = vcmask 27648  }
  0x81   :  { %3014 = vmatprep.subr.bf16.mxu0 %v3234_v0  ;;  %3218 = vmatprep.subr.bf16.mxu1 %v3234_v0  ;;  %v3678_v2 = vld [vmem:[#allocation2] sm:$0xff]   ;;  %v3682_v4 = vld [vmem:[#allocation2 + $0x8] sm:$0xff]   ;;  %v3240_v6 = vld [vmem:[#allocation7] sm:$0xff]   ;;  %s3515_s6 = smov [#allocation14]   ;;  %vm2275_vm2 = vcmask 257024  }
  0x82   :  { %3015 = vmatpush3.bf16.msra.mxu0 %v3234_v0  ;;  %3220 = vmatpush3.bf16.msra.mxu1 %v3234_v0  ;;  %v3680_v3 = vld [vmem:[#allocation2 + $0x80] sm:$0xff]   ;;  %v3688_v5 = vld [vmem:[#allocation2 + $0x88] sm:$0xff]   ;;  %v3690_v8 = vld [vmem:[#allocation2 + $0x10] sm:$0xff]   ;;  %s2345_s29 = sshll.u32 %s3515_s6, 4  ;;  %s2346_s29 = int_to_ptr.vmem [resolvable:$true] %s2345_s29 }
  0x83   :  { %3016 = vmatprep.subr.bf16.mxu0 %v3235_v1  ;;  %3219 = vmatprep.subr.bf16.mxu1 %v3235_v1  ;;  %v3241_v7 = vld [vmem:[#allocation8] sm:$0xff]   ;;  %v3692_v9 = vld [vmem:[#allocation2 + $0x90] sm:$0xff]   ;;  %v3702_v10 = vld [vmem:[#allocation2 + $0x18] sm:$0xff]   ;;  %s3428_s30 = scalar_lea.vmem %s2346_s29, 4096  ;;  %p3433_p1 = scmp.lt.s32.totalorder %s2346_s29, %s2346_s29 }
  0x84   :  { %3018 = vmatprep.mubr.msk.bf16.mxu0 %vm368_vm0, %v3678_v2  ;;  %3050 = vmatprep.mubr.msk.bf16.mxu1 %vm368_vm0, %v3680_v3  ;;  %v3704_v11 = vld [vmem:[#allocation2 + $0x98] sm:$0xff]   ;;  %v3706_v12 = vld [vmem:[#allocation2 + $0x20] sm:$0xff]   ;;  %v3248_v14 = vld [vmem:[#allocation2 + $0x28] sm:$0xff]   ;;  %p3429_p0 = scmp.ne.s32.totalorder %s2346_s29, %s3428_s30  ;;  %p3434_p2 = scmp.lt.s32.totalorder %s3428_s30, %s3428_s30 }
  0x85   :  { %v3708_v13 = vld [vmem:[#allocation2 + $0xa0] sm:$0xff]   ;;  %v3718_v15 = vld [vmem:[#allocation2 + $0xa8] sm:$0xff]   ;;  %v3250_v16 = vld [vmem:[#allocation2 + $0x30] sm:$0xff]  }
  0x86   :  { %3017 = vmatpush3.bf16.msra.mxu0 %v3235_v1  ;;  %3221 = vmatpush3.bf16.msra.mxu1 %v3235_v1  ;;  %v3720_v17 = vld [vmem:[#allocation2 + $0xb0] sm:$0xff]   ;;  %v3258_v18 = vld [vmem:[#allocation7 + $0x8] sm:$0xff]   ;;  %v3259_v19 = vld [vmem:[#allocation8 + $0x8] sm:$0xff]   ;;  %p3435_p3 = por %p3434_p2, %p3433_p1 }
  0x87   :  { %3082 = vmatprep.subr.bf16.mxu1 %v3240_v6  ;;  %3150 = vmatprep.subr.bf16.mxu0 %v3241_v7  ;;  %v3252_v20 = vld [vmem:[#allocation2 + $0x38] sm:$0xff]   ;;  %v3254_v22 = vld [vmem:[#allocation2 + $0x40] sm:$0xff]   ;;  %v3256_v24 = vld [vmem:[#allocation2 + $0x48] sm:$0xff]  }
  0x88   :  { %v3728_v21 = vld [vmem:[#allocation2 + $0xb8] sm:$0xff]   ;;  %v3730_v23 = vld [vmem:[#allocation2 + $0xc0] sm:$0xff]   ;;  %v3738_v25 = vld [vmem:[#allocation2 + $0xc8] sm:$0xff]   ;;  %p3436_p4 = pnand %p3435_p3, %p3429_p0 }
  0x89   :  { %3019 = vmatmul.mubr.msk.bf16.vlgmr.msra.gmra.mrb[0].mxu0 %vm368_vm0, %v3682_v4  ;;  %3051 = vmatmul.mubr.msk.bf16.vlgmr.msra.gmra.mrb[0].mxu1 %vm368_vm0, %v3688_v5  ;;  %v3260_v26 = vld [vmem:[#allocation2 + $0x50] sm:$0xff]   ;;  %v3262_v28 = vld [vmem:[#allocation2 + $0x58] sm:$0xff]   ;;  %v3264_v30 = vld [vmem:[#allocation2 + $0x60] sm:$0xff]  }
  0x8a   :  { %3083 = vmatpush3.bf16.msra.mxu1 %v3240_v6  ;;  %3151 = vmatpush3.bf16.msra.mxu0 %v3241_v7  ;;  %v3740_v27 = vld [vmem:[#allocation2 + $0xd0] sm:$0xff]   ;;  %v3748_v29 = vld [vmem:[#allocation2 + $0xd8] sm:$0xff]   ;;  %v3750_v31 = vld [vmem:[#allocation2 + $0xe0] sm:$0xff]  }
  0x8b   :  { %3022 = vmatprep.mubr.msk.bf16.mxu0 %vm368_vm0, %v3690_v8  ;;  %3054 = vmatprep.mubr.msk.bf16.mxu1 %vm368_vm0, %v3692_v9  ;;  %v3266_v32 = vld [vmem:[#allocation2 + $0x68] sm:$0xff]   ;;  %v3268_v34 = vld [vmem:[#allocation2 + $0x70] sm:$0xff]   ;;  %v3270_v36 = vld [vmem:[#allocation2 + $0x78] sm:$0xff]  }
  0x8c   :  { %3084 = vmatprep.subr.bf16.mxu1 %v3258_v18  ;;  %3152 = vmatprep.subr.bf16.mxu0 %v3259_v19  ;;  %v3758_v33 = vld [vmem:[#allocation2 + $0xe8] sm:$0xff]   ;;  %v3760_v35 = vld [vmem:[#allocation2 + $0xf0] sm:$0xff]   ;;  %v3768_v37 = vld [vmem:[#allocation2 + $0xf8] sm:$0xff]  }
  0x8d   :  { %v3879_v38 = vld [vmem:[#allocation10] ss:$0 sm:$0xff] }
  0x8e   :  { %3085 = vmatpush3.bf16.msra.mxu1 %v3258_v18  ;;  %3153 = vmatpush3.bf16.msra.mxu0 %v3259_v19 }
  0x91   :  { %3023 = vmatmul.mubr.msk.bf16.gmra.mrb[4].mxu0 %vm368_vm0, %v3702_v10  ;;  %3055 = vmatmul.mubr.msk.bf16.gmra.mrb[4].mxu1 %vm368_vm0, %v3704_v11 }
  0x92   :  { %3026 = vmatprep.mubr.msk.bf16.mxu0 %vm368_vm0, %v3706_v12  ;;  %3058 = vmatprep.mubr.msk.bf16.mxu1 %vm368_vm0, %v3708_v13 }
  0x99   :  { %3027 = vmatmul.mubr.msk.bf16.gmra.mrb[8].mxu0 %vm368_vm0, %v3248_v14  ;;  %3059 = vmatmul.mubr.msk.bf16.gmra.mrb[8].mxu1 %vm368_vm0, %v3718_v15 }
  0x9a   :  { %3030 = vmatprep.mubr.msk.bf16.mxu0 %vm368_vm0, %v3250_v16  ;;  %3062 = vmatprep.mubr.msk.bf16.mxu1 %vm368_vm0, %v3720_v17 }
  0xa1   :  { %3031 = vmatmul.mubr.msk.bf16.gmra.mrb[12].mxu0 %vm368_vm0, %v3252_v20  ;;  %3063 = vmatmul.mubr.msk.bf16.gmra.mrb[12].mxu1 %vm368_vm0, %v3728_v21 }
  0xa2   :  { %3034 = vmatprep.mubr.msk.bf16.mxu0 %vm368_vm0, %v3254_v22  ;;  %3066 = vmatprep.mubr.msk.bf16.mxu1 %vm368_vm0, %v3730_v23 }
  0xa9   :  { %3035 = vmatmul.mubr.msk.bf16.gmra.mrb[16].mxu0 %vm368_vm0, %v3256_v24  ;;  %3067 = vmatmul.mubr.msk.bf16.gmra.mrb[16].mxu1 %vm368_vm0, %v3738_v25 }
  0xaa   :  { %3038 = vmatprep.mubr.msk.bf16.mxu0 %vm368_vm0, %v3260_v26  ;;  %3070 = vmatprep.mubr.msk.bf16.mxu1 %vm368_vm0, %v3740_v27 }
  0xb1   :  { %3039 = vmatmul.mubr.msk.bf16.gmra.mrb[20].mxu0 %vm368_vm0, %v3262_v28  ;;  %3071 = vmatmul.mubr.msk.bf16.gmra.mrb[20].mxu1 %vm368_vm0, %v3748_v29 }
  0xb2   :  { %3042 = vmatprep.mubr.msk.bf16.mxu0 %vm368_vm0, %v3264_v30  ;;  %3074 = vmatprep.mubr.msk.bf16.mxu1 %vm368_vm0, %v3750_v31 }
  0xb9   :  { %3043 = vmatmul.mubr.msk.bf16.gmra.mrb[24].mxu0 %vm368_vm0, %v3266_v32  ;;  %3075 = vmatmul.mubr.msk.bf16.gmra.mrb[24].mxu1 %vm368_vm0, %v3758_v33 }
  0xba   :  { %3046 = vmatprep.mubr.msk.bf16.mxu0 %vm368_vm0, %v3268_v34  ;;  %3078 = vmatprep.mubr.msk.bf16.mxu1 %vm368_vm0, %v3760_v35 }
  0xc1   :  { %3047 = vmatmul.mubr.msk.bf16.gmra.mrb[28].mxu0 %vm368_vm0, %v3270_v36  ;;  %3079 = vmatmul.mubr.msk.bf16.gmra.mrb[28].mxu1 %vm368_vm0, %v3768_v37 }
  0xc2   :  { %3086 = vmatprep.mubr.msk.bf16.mxu1 %vm368_vm0, %v3678_v2  ;;  %3154 = vmatprep.mubr.msk.bf16.mxu0 %vm368_vm0, %v3678_v2 }
  0xc9   :  { %3087 = vmatmul.mubr.msk.bf16.vlgmr.msra.gmra.mrb[32].mxu1 %vm368_vm0, %v3682_v4  ;;  %3155 = vmatmul.mubr.msk.bf16.vlgmr.msra.gmra.mrb[32].mxu0 %vm368_vm0, %v3682_v4 }
  0xca   :  { %3090 = vmatprep.mubr.msk.bf16.mxu1 %vm368_vm0, %v3690_v8  ;;  %3158 = vmatprep.mubr.msk.bf16.mxu0 %vm368_vm0, %v3690_v8 }
  0xd1   :  { %3091 = vmatmul.mubr.msk.bf16.gmra.mrb[36].mxu1 %vm368_vm0, %v3702_v10  ;;  %3159 = vmatmul.mubr.msk.bf16.gmra.mrb[36].mxu0 %vm368_vm0, %v3702_v10 }
  0xd2   :  { %3094 = vmatprep.mubr.msk.bf16.mxu1 %vm368_vm0, %v3706_v12  ;;  %3162 = vmatprep.mubr.msk.bf16.mxu0 %vm368_vm0, %v3706_v12 }
  0xd9   :  { %3095 = vmatmul.mubr.msk.bf16.gmra.mrb[40].mxu1 %vm368_vm0, %v3248_v14  ;;  %3163 = vmatmul.mubr.msk.bf16.gmra.mrb[40].mxu0 %vm368_vm0, %v3248_v14 }
  0xda   :  { %3098 = vmatprep.mubr.msk.bf16.mxu1 %vm368_vm0, %v3250_v16  ;;  %3166 = vmatprep.mubr.msk.bf16.mxu0 %vm368_vm0, %v3250_v16 }
  0xe1   :  { %3099 = vmatmul.mubr.msk.bf16.gmra.mrb[44].mxu1 %vm368_vm0, %v3252_v20  ;;  %3167 = vmatmul.mubr.msk.bf16.gmra.mrb[44].mxu0 %vm368_vm0, %v3252_v20 }
  0xe2   :  { %3102 = vmatprep.mubr.msk.bf16.mxu1 %vm368_vm0, %v3254_v22  ;;  %3170 = vmatprep.mubr.msk.bf16.mxu0 %vm368_vm0, %v3254_v22 }
  0xe9   :  { %3103 = vmatmul.mubr.msk.bf16.gmra.mrb[48].mxu1 %vm368_vm0, %v3256_v24  ;;  %3171 = vmatmul.mubr.msk.bf16.gmra.mrb[48].mxu0 %vm368_vm0, %v3256_v24 }
  0xea   :  { %3106 = vmatprep.mubr.msk.bf16.mxu1 %vm368_vm0, %v3260_v26  ;;  %3174 = vmatprep.mubr.msk.bf16.mxu0 %vm368_vm0, %v3260_v26 }
  0xf1   :  { %3107 = vmatmul.mubr.msk.bf16.gmra.mrb[52].mxu1 %vm368_vm0, %v3262_v28  ;;  %3175 = vmatmul.mubr.msk.bf16.gmra.mrb[52].mxu0 %vm368_vm0, %v3262_v28 }
  0xf2   :  { %3110 = vmatprep.mubr.msk.bf16.mxu1 %vm368_vm0, %v3264_v30  ;;  %3178 = vmatprep.mubr.msk.bf16.mxu0 %vm368_vm0, %v3264_v30 }
  0xf9   :  { %3111 = vmatmul.mubr.msk.bf16.gmra.mrb[56].mxu1 %vm368_vm0, %v3266_v32  ;;  %3179 = vmatmul.mubr.msk.bf16.gmra.mrb[56].mxu0 %vm368_vm0, %v3266_v32 }
  0xfa   :  { %3114 = vmatprep.mubr.msk.bf16.mxu1 %vm368_vm0, %v3268_v34  ;;  %3182 = vmatprep.mubr.msk.bf16.mxu0 %vm368_vm0, %v3268_v34 }
 0x101   :  { %3115 = vmatmul.mubr.msk.bf16.gmra.mrb[60].mxu1 %vm368_vm0, %v3270_v36  ;;  %3183 = vmatmul.mubr.msk.bf16.gmra.mrb[60].mxu0 %vm368_vm0, %v3270_v36 }
 0x102   :  { %3118 = vmatprep.mubr.msk.bf16.mxu1 %vm368_vm0, %v3680_v3  ;;  %3186 = vmatprep.mubr.msk.bf16.mxu0 %vm368_vm0, %v3680_v3 }
 0x109   :  { %3119 = vmatmul.mubr.msk.bf16.gmra.mrb[64].mxu1 %vm368_vm0, %v3688_v5  ;;  %3187 = vmatmul.mubr.msk.bf16.gmra.mrb[64].mxu0 %vm368_vm0, %v3688_v5 }
 0x10a   :  { %3122 = vmatprep.mubr.msk.bf16.mxu1 %vm368_vm0, %v3692_v9  ;;  %3190 = vmatprep.mubr.msk.bf16.mxu0 %vm368_vm0, %v3692_v9 }
 0x111   :  { %3123 = vmatmul.mubr.msk.bf16.gmra.mrb[68].mxu1 %vm368_vm0, %v3704_v11  ;;  %3191 = vmatmul.mubr.msk.bf16.gmra.mrb[68].mxu0 %vm368_vm0, %v3704_v11 }
 0x112   :  { %3126 = vmatprep.mubr.msk.bf16.mxu1 %vm368_vm0, %v3708_v13  ;;  %3194 = vmatprep.mubr.msk.bf16.mxu0 %vm368_vm0, %v3708_v13 }
 0x119   :  { %3127 = vmatmul.mubr.msk.bf16.gmra.mrb[72].mxu1 %vm368_vm0, %v3718_v15  ;;  %3195 = vmatmul.mubr.msk.bf16.gmra.mrb[72].mxu0 %vm368_vm0, %v3718_v15 }
 0x11a   :  { %3130 = vmatprep.mubr.msk.bf16.mxu1 %vm368_vm0, %v3720_v17  ;;  %3198 = vmatprep.mubr.msk.bf16.mxu0 %vm368_vm0, %v3720_v17 }
 0x121   :  { %3131 = vmatmul.mubr.msk.bf16.gmra.mrb[76].mxu1 %vm368_vm0, %v3728_v21  ;;  %3199 = vmatmul.mubr.msk.bf16.gmra.mrb[76].mxu0 %vm368_vm0, %v3728_v21 }
 0x122   :  { %3134 = vmatprep.mubr.msk.bf16.mxu1 %vm368_vm0, %v3730_v23  ;;  %3202 = vmatprep.mubr.msk.bf16.mxu0 %vm368_vm0, %v3730_v23 }
 0x129   :  { %3135 = vmatmul.mubr.msk.bf16.gmra.mrb[80].mxu1 %vm368_vm0, %v3738_v25  ;;  %3203 = vmatmul.mubr.msk.bf16.gmra.mrb[80].mxu0 %vm368_vm0, %v3738_v25 }
 0x12a   :  { %3138 = vmatprep.mubr.msk.bf16.mxu1 %vm368_vm0, %v3740_v27  ;;  %3206 = vmatprep.mubr.msk.bf16.mxu0 %vm368_vm0, %v3740_v27 }
 0x131   :  { %3139 = vmatmul.mubr.msk.bf16.gmra.mrb[84].mxu1 %vm368_vm0, %v3748_v29  ;;  %3207 = vmatmul.mubr.msk.bf16.gmra.mrb[84].mxu0 %vm368_vm0, %v3748_v29 }
 0x132   :  { %3142 = vmatprep.mubr.msk.bf16.mxu1 %vm368_vm0, %v3750_v31  ;;  %3210 = vmatprep.mubr.msk.bf16.mxu0 %vm368_vm0, %v3750_v31 }
 0x139   :  { %3143 = vmatmul.mubr.msk.bf16.gmra.mrb[88].mxu1 %vm368_vm0, %v3758_v33  ;;  %3211 = vmatmul.mubr.msk.bf16.gmra.mrb[88].mxu0 %vm368_vm0, %v3758_v33 }
 0x13a   :  { %3146 = vmatprep.mubr.msk.bf16.mxu1 %vm368_vm0, %v3760_v35  ;;  %3214 = vmatprep.mubr.msk.bf16.mxu0 %vm368_vm0, %v3760_v35 }
 0x141   :  { %3147 = vmatmul.mubr.msk.bf16.gmra.mrb[92].mxu1 %vm368_vm0, %v3768_v37  ;;  %3215 = vmatmul.mubr.msk.bf16.gmra.mrb[92].mxu0 %vm368_vm0, %v3768_v37 }
 0x15c   :  { %v3020_v39 = vpop.f32.mrb[0].mxu0  ;;  %v3052_v40 = vpop.f32.mrb[0].mxu1 }
 0x15d   :  { %v508_v41 = vadd.f32 %v3020_v39, %v3879_v38  ;;  %v636_v42 = vadd.f32 %v3052_v40, %v3879_v38  ;;  %v499_v43 = vpop.f32.mrb[1].mxu0  ;;  %v627_v44 = vpop.f32.mrb[1].mxu1 }
 0x15e   :  { %v500_v45 = vadd.f32 %v3879_v38, %v499_v43  ;;  %v628_v46 = vadd.f32 %v3879_v38, %v627_v44  ;;  %v3021_v47 = vpop.f32.mrb[2].mxu0  ;;  %v3053_v48 = vpop.f32.mrb[2].mxu1 }
 0x15f   :  { %v2722_v49 = vpack.c.bf16 %v508_v41, %v508_v41  ;;  %v2754_v50 = vpack.c.bf16 %v636_v42, %v636_v42  ;;  %v511_v51 = vadd.f32 %v3021_v47, %v3879_v38  ;;  %v639_v52 = vadd.f32 %v3053_v48, %v3879_v38  ;;  %v502_v53 = vpop.f32.mrb[3].mxu0  ;;  %v630_v54 = vpop.f32.mrb[3].mxu1 }
 0x160   :  { %v2720_v55 = vpack.c.bf16 %v500_v45, %v500_v45  ;;  %v2752_v56 = vpack.c.bf16 %v628_v46, %v628_v46  ;;  %v503_v57 = vadd.f32 %v3879_v38, %v502_v53  ;;  %v631_v58 = vadd.f32 %v3879_v38, %v630_v54 }
 0x161   :  { %1013 = vst.msk [vmem:[#allocation14 + $0x8] sm:$0xf] %vm1010_vm1, %v2722_v49  ;;  %1045 = vst.msk [vmem:[#allocation14 + $0x88] sm:$0xf] %vm1010_vm1, %v2754_v50  ;;  %v2723_v59 = vpack.c.bf16 %v511_v51, %v511_v51  ;;  %v2755_v60 = vpack.c.bf16 %v639_v52, %v639_v52 }
 0x162   :  { %1011 = vst.msk [vmem:[#allocation14] sm:$0xf] %vm1010_vm1, %v2720_v55  ;;  %1043 = vst.msk [vmem:[#allocation14 + $0x80] sm:$0xf] %vm1010_vm1, %v2752_v56  ;;  %v2721_v61 = vpack.c.bf16 %v503_v57, %v503_v57  ;;  %v2753_v62 = vpack.c.bf16 %v631_v58, %v631_v58 }
 0x163   :  { %1014 = vst.msk [vmem:[#allocation14 + $0xc] sm:$0xf] %vm1010_vm1, %v2723_v59  ;;  %1046 = vst.msk [vmem:[#allocation14 + $0x8c] sm:$0xf] %vm1010_vm1, %v2755_v60 }
 0x164   :  { %1012 = vst.msk [vmem:[#allocation14 + $0x4] sm:$0xf] %vm1010_vm1, %v2721_v61  ;;  %1044 = vst.msk [vmem:[#allocation14 + $0x84] sm:$0xf] %vm1010_vm1, %v2753_v62  ;;  %v3024_v63 = vpop.f32.mrb[4].mxu0  ;;  %v3056_v0 = vpop.f32.mrb[4].mxu1 }
 0x165   :  { %v524_v1 = vadd.f32 %v3024_v63, %v3879_v38  ;;  %v652_v2 = vadd.f32 %v3056_v0, %v3879_v38  ;;  %v515_v3 = vpop.f32.mrb[5].mxu0  ;;  %v643_v4 = vpop.f32.mrb[5].mxu1 }
 0x166   :  { %v516_v5 = vadd.f32 %v3879_v38, %v515_v3  ;;  %v644_v6 = vadd.f32 %v3879_v38, %v643_v4  ;;  %v3025_v7 = vpop.f32.mrb[6].mxu0  ;;  %v3057_v8 = vpop.f32.mrb[6].mxu1 }
 0x167   :  { %v2726_v9 = vpack.c.bf16 %v524_v1, %v524_v1  ;;  %v2758_v10 = vpack.c.bf16 %v652_v2, %v652_v2  ;;  %v527_v11 = vadd.f32 %v3025_v7, %v3879_v38  ;;  %v655_v12 = vadd.f32 %v3057_v8, %v3879_v38  ;;  %v518_v13 = vpop.f32.mrb[7].mxu0  ;;  %v646_v14 = vpop.f32.mrb[7].mxu1 }
 0x168   :  { %v2724_v15 = vpack.c.bf16 %v516_v5, %v516_v5  ;;  %v2756_v16 = vpack.c.bf16 %v644_v6, %v644_v6  ;;  %v519_v17 = vadd.f32 %v3879_v38, %v518_v13  ;;  %v647_v18 = vadd.f32 %v3879_v38, %v646_v14 }
 0x169   :  { %1017 = vst.msk [vmem:[#allocation14 + $0x18] sm:$0xf] %vm1010_vm1, %v2726_v9  ;;  %1049 = vst.msk [vmem:[#allocation14 + $0x98] sm:$0xf] %vm1010_vm1, %v2758_v10  ;;  %v2727_v19 = vpack.c.bf16 %v527_v11, %v527_v11  ;;  %v2759_v20 = vpack.c.bf16 %v655_v12, %v655_v12 }
 0x16a   :  { %1015 = vst.msk [vmem:[#allocation14 + $0x10] sm:$0xf] %vm1010_vm1, %v2724_v15  ;;  %1047 = vst.msk [vmem:[#allocation14 + $0x90] sm:$0xf] %vm1010_vm1, %v2756_v16  ;;  %v2725_v21 = vpack.c.bf16 %v519_v17, %v519_v17  ;;  %v2757_v22 = vpack.c.bf16 %v647_v18, %v647_v18 }
 0x16b   :  { %1018 = vst.msk [vmem:[#allocation14 + $0x1c] sm:$0xf] %vm1010_vm1, %v2727_v19  ;;  %1050 = vst.msk [vmem:[#allocation14 + $0x9c] sm:$0xf] %vm1010_vm1, %v2759_v20 }
 0x16c   :  { %1016 = vst.msk [vmem:[#allocation14 + $0x14] sm:$0xf] %vm1010_vm1, %v2725_v21  ;;  %1048 = vst.msk [vmem:[#allocation14 + $0x94] sm:$0xf] %vm1010_vm1, %v2757_v22  ;;  %v3028_v23 = vpop.f32.mrb[8].mxu0  ;;  %v3060_v24 = vpop.f32.mrb[8].mxu1 }
 0x16d   :  { %v540_v25 = vadd.f32 %v3028_v23, %v3879_v38  ;;  %v668_v26 = vadd.f32 %v3060_v24, %v3879_v38  ;;  %v531_v27 = vpop.f32.mrb[9].mxu0  ;;  %v659_v28 = vpop.f32.mrb[9].mxu1 }
 0x16e   :  { %v532_v29 = vadd.f32 %v3879_v38, %v531_v27  ;;  %v660_v30 = vadd.f32 %v3879_v38, %v659_v28  ;;  %v3029_v31 = vpop.f32.mrb[10].mxu0  ;;  %v3061_v32 = vpop.f32.mrb[10].mxu1 }
 0x16f   :  { %v2730_v33 = vpack.c.bf16 %v540_v25, %v540_v25  ;;  %v2762_v34 = vpack.c.bf16 %v668_v26, %v668_v26  ;;  %v543_v35 = vadd.f32 %v3029_v31, %v3879_v38  ;;  %v671_v36 = vadd.f32 %v3061_v32, %v3879_v38  ;;  %v534_v37 = vpop.f32.mrb[11].mxu0  ;;  %v662_v39 = vpop.f32.mrb[11].mxu1 }
 0x170   :  { %v2728_v40 = vpack.c.bf16 %v532_v29, %v532_v29  ;;  %v2760_v41 = vpack.c.bf16 %v660_v30, %v660_v30  ;;  %v535_v42 = vadd.f32 %v3879_v38, %v534_v37  ;;  %v663_v43 = vadd.f32 %v3879_v38, %v662_v39 }
 0x171   :  { %1021 = vst.msk [vmem:[#allocation14 + $0x28] sm:$0xf] %vm1010_vm1, %v2730_v33  ;;  %1053 = vst.msk [vmem:[#allocation14 + $0xa8] sm:$0xf] %vm1010_vm1, %v2762_v34  ;;  %v2731_v44 = vpack.c.bf16 %v543_v35, %v543_v35  ;;  %v2763_v45 = vpack.c.bf16 %v671_v36, %v671_v36 }
 0x172   :  { %1019 = vst.msk [vmem:[#allocation14 + $0x20] sm:$0xf] %vm1010_vm1, %v2728_v40  ;;  %1051 = vst.msk [vmem:[#allocation14 + $0xa0] sm:$0xf] %vm1010_vm1, %v2760_v41  ;;  %v2729_v46 = vpack.c.bf16 %v535_v42, %v535_v42  ;;  %v2761_v47 = vpack.c.bf16 %v663_v43, %v663_v43 }
 0x173   :  { %1022 = vst.msk [vmem:[#allocation14 + $0x2c] sm:$0xf] %vm1010_vm1, %v2731_v44  ;;  %1054 = vst.msk [vmem:[#allocation14 + $0xac] sm:$0xf] %vm1010_vm1, %v2763_v45 }
 0x174   :  { %1020 = vst.msk [vmem:[#allocation14 + $0x24] sm:$0xf] %vm1010_vm1, %v2729_v46  ;;  %1052 = vst.msk [vmem:[#allocation14 + $0xa4] sm:$0xf] %vm1010_vm1, %v2761_v47  ;;  %v3032_v48 = vpop.f32.mrb[12].mxu0  ;;  %v3064_v49 = vpop.f32.mrb[12].mxu1 }
 0x175   :  { %v556_v50 = vadd.f32 %v3032_v48, %v3879_v38  ;;  %v684_v51 = vadd.f32 %v3064_v49, %v3879_v38  ;;  %v547_v52 = vpop.f32.mrb[13].mxu0  ;;  %v675_v53 = vpop.f32.mrb[13].mxu1 }
 0x176   :  { %v548_v54 = vadd.f32 %v3879_v38, %v547_v52  ;;  %v676_v55 = vadd.f32 %v3879_v38, %v675_v53  ;;  %v3033_v56 = vpop.f32.mrb[14].mxu0  ;;  %v3065_v57 = vpop.f32.mrb[14].mxu1 }
 0x177   :  { %v2734_v58 = vpack.c.bf16 %v556_v50, %v556_v50  ;;  %v2766_v59 = vpack.c.bf16 %v684_v51, %v684_v51  ;;  %v559_v60 = vadd.f32 %v3033_v56, %v3879_v38  ;;  %v687_v61 = vadd.f32 %v3065_v57, %v3879_v38  ;;  %v550_v62 = vpop.f32.mrb[15].mxu0  ;;  %v678_v63 = vpop.f32.mrb[15].mxu1 }
 0x178   :  { %v2732_v0 = vpack.c.bf16 %v548_v54, %v548_v54  ;;  %v2764_v1 = vpack.c.bf16 %v676_v55, %v676_v55  ;;  %v551_v2 = vadd.f32 %v3879_v38, %v550_v62  ;;  %v679_v3 = vadd.f32 %v3879_v38, %v678_v63 }
 0x179   :  { %1025 = vst.msk [vmem:[#allocation14 + $0x38] sm:$0xf] %vm1010_vm1, %v2734_v58  ;;  %1057 = vst.msk [vmem:[#allocation14 + $0xb8] sm:$0xf] %vm1010_vm1, %v2766_v59  ;;  %v2735_v4 = vpack.c.bf16 %v559_v60, %v559_v60  ;;  %v2767_v5 = vpack.c.bf16 %v687_v61, %v687_v61 }
 0x17a   :  { %1023 = vst.msk [vmem:[#allocation14 + $0x30] sm:$0xf] %vm1010_vm1, %v2732_v0  ;;  %1055 = vst.msk [vmem:[#allocation14 + $0xb0] sm:$0xf] %vm1010_vm1, %v2764_v1  ;;  %v2733_v6 = vpack.c.bf16 %v551_v2, %v551_v2  ;;  %v2765_v7 = vpack.c.bf16 %v679_v3, %v679_v3 }
 0x17b   :  { %1026 = vst.msk [vmem:[#allocation14 + $0x3c] sm:$0xf] %vm1010_vm1, %v2735_v4  ;;  %1058 = vst.msk [vmem:[#allocation14 + $0xbc] sm:$0xf] %vm1010_vm1, %v2767_v5 }
 0x17c   :  { %1024 = vst.msk [vmem:[#allocation14 + $0x34] sm:$0xf] %vm1010_vm1, %v2733_v6  ;;  %1056 = vst.msk [vmem:[#allocation14 + $0xb4] sm:$0xf] %vm1010_vm1, %v2765_v7  ;;  %v3036_v8 = vpop.f32.mrb[16].mxu0  ;;  %v3068_v9 = vpop.f32.mrb[16].mxu1 }
 0x17d   :  { %v572_v10 = vadd.f32 %v3036_v8, %v3879_v38  ;;  %v700_v11 = vadd.f32 %v3068_v9, %v3879_v38  ;;  %v563_v12 = vpop.f32.mrb[17].mxu0  ;;  %v691_v13 = vpop.f32.mrb[17].mxu1 }
 0x17e   :  { %v564_v14 = vadd.f32 %v3879_v38, %v563_v12  ;;  %v692_v15 = vadd.f32 %v3879_v38, %v691_v13  ;;  %v3037_v16 = vpop.f32.mrb[18].mxu0  ;;  %v3069_v17 = vpop.f32.mrb[18].mxu1 }
 0x17f   :  { %v2738_v18 = vpack.c.bf16 %v572_v10, %v572_v10  ;;  %v2770_v19 = vpack.c.bf16 %v700_v11, %v700_v11  ;;  %v575_v20 = vadd.f32 %v3037_v16, %v3879_v38  ;;  %v703_v21 = vadd.f32 %v3069_v17, %v3879_v38  ;;  %v566_v22 = vpop.f32.mrb[19].mxu0  ;;  %v694_v23 = vpop.f32.mrb[19].mxu1 }
 0x180   :  { %v2736_v24 = vpack.c.bf16 %v564_v14, %v564_v14  ;;  %v2768_v25 = vpack.c.bf16 %v692_v15, %v692_v15  ;;  %v567_v26 = vadd.f32 %v3879_v38, %v566_v22  ;;  %v695_v27 = vadd.f32 %v3879_v38, %v694_v23 }
 0x181   :  { %1029 = vst.msk [vmem:[#allocation14 + $0x48] sm:$0xf] %vm1010_vm1, %v2738_v18  ;;  %1061 = vst.msk [vmem:[#allocation14 + $0xc8] sm:$0xf] %vm1010_vm1, %v2770_v19  ;;  %v2739_v28 = vpack.c.bf16 %v575_v20, %v575_v20  ;;  %v2771_v29 = vpack.c.bf16 %v703_v21, %v703_v21 }
 0x182   :  { %1027 = vst.msk [vmem:[#allocation14 + $0x40] sm:$0xf] %vm1010_vm1, %v2736_v24  ;;  %1059 = vst.msk [vmem:[#allocation14 + $0xc0] sm:$0xf] %vm1010_vm1, %v2768_v25  ;;  %v2737_v30 = vpack.c.bf16 %v567_v26, %v567_v26  ;;  %v2769_v31 = vpack.c.bf16 %v695_v27, %v695_v27 }
 0x183   :  { %1030 = vst.msk [vmem:[#allocation14 + $0x4c] sm:$0xf] %vm1010_vm1, %v2739_v28  ;;  %1062 = vst.msk [vmem:[#allocation14 + $0xcc] sm:$0xf] %vm1010_vm1, %v2771_v29 }
 0x184   :  { %1028 = vst.msk [vmem:[#allocation14 + $0x44] sm:$0xf] %vm1010_vm1, %v2737_v30  ;;  %1060 = vst.msk [vmem:[#allocation14 + $0xc4] sm:$0xf] %vm1010_vm1, %v2769_v31  ;;  %v3040_v32 = vpop.f32.mrb[20].mxu0  ;;  %v3072_v33 = vpop.f32.mrb[20].mxu1 }
 0x185   :  { %v588_v34 = vadd.f32 %v3040_v32, %v3879_v38  ;;  %v716_v35 = vadd.f32 %v3072_v33, %v3879_v38  ;;  %v579_v36 = vpop.f32.mrb[21].mxu0  ;;  %v707_v37 = vpop.f32.mrb[21].mxu1 }
 0x186   :  { %v580_v39 = vadd.f32 %v3879_v38, %v579_v36  ;;  %v708_v40 = vadd.f32 %v3879_v38, %v707_v37  ;;  %v3041_v41 = vpop.f32.mrb[22].mxu0  ;;  %v3073_v42 = vpop.f32.mrb[22].mxu1 }
 0x187   :  { %v2742_v43 = vpack.c.bf16 %v588_v34, %v588_v34  ;;  %v2774_v44 = vpack.c.bf16 %v716_v35, %v716_v35  ;;  %v591_v45 = vadd.f32 %v3041_v41, %v3879_v38  ;;  %v719_v46 = vadd.f32 %v3073_v42, %v3879_v38  ;;  %v582_v47 = vpop.f32.mrb[23].mxu0  ;;  %v710_v48 = vpop.f32.mrb[23].mxu1  ;;  %v4005_v42 = vld [vmem:[#allocation11] ss:$0 sm:$0xff] }
 0x188   :  { %v2740_v49 = vpack.c.bf16 %v580_v39, %v580_v39  ;;  %v2772_v50 = vpack.c.bf16 %v708_v40, %v708_v40  ;;  %v583_v51 = vadd.f32 %v3879_v38, %v582_v47  ;;  %v711_v52 = vadd.f32 %v3879_v38, %v710_v48 }
 0x189   :  { %1033 = vst.msk [vmem:[#allocation14 + $0x58] sm:$0xf] %vm1010_vm1, %v2742_v43  ;;  %1065 = vst.msk [vmem:[#allocation14 + $0xd8] sm:$0xf] %vm1010_vm1, %v2774_v44  ;;  %v2743_v53 = vpack.c.bf16 %v591_v45, %v591_v45  ;;  %v2775_v54 = vpack.c.bf16 %v719_v46, %v719_v46  ;;  %v4007_v43 = vld [vmem:[#allocation13] ss:$0 sm:$0xff] }
 0x18a   :  { %1031 = vst.msk [vmem:[#allocation14 + $0x50] sm:$0xf] %vm1010_vm1, %v2740_v49  ;;  %1063 = vst.msk [vmem:[#allocation14 + $0xd0] sm:$0xf] %vm1010_vm1, %v2772_v50  ;;  %v2741_v55 = vpack.c.bf16 %v583_v51, %v583_v51  ;;  %v2773_v56 = vpack.c.bf16 %v711_v52, %v711_v52 }
 0x18b   :  { %1034 = vst.msk [vmem:[#allocation14 + $0x5c] sm:$0xf] %vm1010_vm1, %v2743_v53  ;;  %1066 = vst.msk [vmem:[#allocation14 + $0xdc] sm:$0xf] %vm1010_vm1, %v2775_v54 }
 0x18c   :  { %1032 = vst.msk [vmem:[#allocation14 + $0x54] sm:$0xf] %vm1010_vm1, %v2741_v55  ;;  %1064 = vst.msk [vmem:[#allocation14 + $0xd4] sm:$0xf] %vm1010_vm1, %v2773_v56  ;;  %v3044_v57 = vpop.f32.mrb[24].mxu0  ;;  %v3076_v58 = vpop.f32.mrb[24].mxu1 }
 0x18d   :  { %v604_v59 = vadd.f32 %v3044_v57, %v3879_v38  ;;  %v732_v60 = vadd.f32 %v3076_v58, %v3879_v38  ;;  %v595_v61 = vpop.f32.mrb[25].mxu0  ;;  %v723_v62 = vpop.f32.mrb[25].mxu1 }
 0x18e   :  { %v596_v63 = vadd.f32 %v3879_v38, %v595_v61  ;;  %v724_v0 = vadd.f32 %v3879_v38, %v723_v62  ;;  %v3045_v1 = vpop.f32.mrb[26].mxu0  ;;  %v3077_v2 = vpop.f32.mrb[26].mxu1 }
 0x18f   :  { %v2746_v3 = vpack.c.bf16 %v604_v59, %v604_v59  ;;  %v2778_v4 = vpack.c.bf16 %v732_v60, %v732_v60  ;;  %v607_v5 = vadd.f32 %v3045_v1, %v3879_v38  ;;  %v735_v6 = vadd.f32 %v3077_v2, %v3879_v38  ;;  %v598_v7 = vpop.f32.mrb[27].mxu0  ;;  %v726_v8 = vpop.f32.mrb[27].mxu1 }
 0x190   :  { %v2744_v9 = vpack.c.bf16 %v596_v63, %v596_v63  ;;  %v2776_v10 = vpack.c.bf16 %v724_v0, %v724_v0  ;;  %v599_v11 = vadd.f32 %v3879_v38, %v598_v7  ;;  %v727_v12 = vadd.f32 %v3879_v38, %v726_v8 }
 0x191   :  { %1037 = vst.msk [vmem:[#allocation14 + $0x68] sm:$0xf] %vm1010_vm1, %v2746_v3  ;;  %1069 = vst.msk [vmem:[#allocation14 + $0xe8] sm:$0xf] %vm1010_vm1, %v2778_v4  ;;  %v2747_v13 = vpack.c.bf16 %v607_v5, %v607_v5  ;;  %v2779_v14 = vpack.c.bf16 %v735_v6, %v735_v6 }
 0x192   :  { %1035 = vst.msk [vmem:[#allocation14 + $0x60] sm:$0xf] %vm1010_vm1, %v2744_v9  ;;  %1067 = vst.msk [vmem:[#allocation14 + $0xe0] sm:$0xf] %vm1010_vm1, %v2776_v10  ;;  %v2745_v15 = vpack.c.bf16 %v599_v11, %v599_v11  ;;  %v2777_v16 = vpack.c.bf16 %v727_v12, %v727_v12 }
 0x193   :  { %1038 = vst.msk [vmem:[#allocation14 + $0x6c] sm:$0xf] %vm1010_vm1, %v2747_v13  ;;  %1070 = vst.msk [vmem:[#allocation14 + $0xec] sm:$0xf] %vm1010_vm1, %v2779_v14 }
 0x194   :  { %1036 = vst.msk [vmem:[#allocation14 + $0x64] sm:$0xf] %vm1010_vm1, %v2745_v15  ;;  %1068 = vst.msk [vmem:[#allocation14 + $0xe4] sm:$0xf] %vm1010_vm1, %v2777_v16  ;;  %v3048_v17 = vpop.f32.mrb[28].mxu0  ;;  %v3080_v18 = vpop.f32.mrb[28].mxu1 }
 0x195   :  { %v620_v19 = vadd.f32 %v3048_v17, %v3879_v38  ;;  %v748_v20 = vadd.f32 %v3080_v18, %v3879_v38  ;;  %v611_v21 = vpop.f32.mrb[29].mxu0  ;;  %v739_v22 = vpop.f32.mrb[29].mxu1 }
 0x196   :  { %v612_v23 = vadd.f32 %v3879_v38, %v611_v21  ;;  %v740_v24 = vadd.f32 %v3879_v38, %v739_v22  ;;  %v3049_v25 = vpop.f32.mrb[30].mxu0  ;;  %v3081_v26 = vpop.f32.mrb[30].mxu1 }
 0x197   :  { %v2750_v27 = vpack.c.bf16 %v620_v19, %v620_v19  ;;  %v2782_v28 = vpack.c.bf16 %v748_v20, %v748_v20  ;;  %v623_v29 = vadd.f32 %v3049_v25, %v3879_v38  ;;  %v751_v30 = vadd.f32 %v3081_v26, %v3879_v38  ;;  %v614_v31 = vpop.f32.mrb[31].mxu0  ;;  %v742_v32 = vpop.f32.mrb[31].mxu1 }
 0x198   :  { %v2748_v33 = vpack.c.bf16 %v612_v23, %v612_v23  ;;  %v2780_v34 = vpack.c.bf16 %v740_v24, %v740_v24  ;;  %v615_v35 = vadd.f32 %v3879_v38, %v614_v31  ;;  %v743_v36 = vadd.f32 %v3879_v38, %v742_v32 }
 0x199   :  { %1041 = vst.msk [vmem:[#allocation14 + $0x78] sm:$0xf] %vm1010_vm1, %v2750_v27  ;;  %1073 = vst.msk [vmem:[#allocation14 + $0xf8] sm:$0xf] %vm1010_vm1, %v2782_v28  ;;  %v2751_v37 = vpack.c.bf16 %v623_v29, %v623_v29  ;;  %v2783_v39 = vpack.c.bf16 %v751_v30, %v751_v30 }
 0x19a   :  { %1039 = vst.msk [vmem:[#allocation14 + $0x70] sm:$0xf] %vm1010_vm1, %v2748_v33  ;;  %1071 = vst.msk [vmem:[#allocation14 + $0xf0] sm:$0xf] %vm1010_vm1, %v2780_v34  ;;  %v2749_v40 = vpack.c.bf16 %v615_v35, %v615_v35  ;;  %v2781_v41 = vpack.c.bf16 %v743_v36, %v743_v36 }
 0x19b   :  { %1042 = vst.msk [vmem:[#allocation14 + $0x7c] sm:$0xf] %vm1010_vm1, %v2751_v37  ;;  %1074 = vst.msk [vmem:[#allocation14 + $0xfc] sm:$0xf] %vm1010_vm1, %v2783_v39 }
 0x19c   :  { %1040 = vst.msk [vmem:[#allocation14 + $0x74] sm:$0xf] %vm1010_vm1, %v2749_v40  ;;  %1072 = vst.msk [vmem:[#allocation14 + $0xf4] sm:$0xf] %vm1010_vm1, %v2781_v41  ;;  %v3088_v38 = vpop.f32.mrb[32].mxu1  ;;  %v3156_v44 = vpop.f32.mrb[32].mxu0 }
 0x19d   :  { %v1141_v45 = vadd.f32 %v3088_v38, %v4005_v42  ;;  %v1773_v46 = vadd.f32 %v3156_v44, %v4007_v43  ;;  %v1132_v47 = vpop.f32.mrb[33].mxu1  ;;  %v1764_v48 = vpop.f32.mrb[33].mxu0 }
 0x19e   :  { %v1133_v49 = vadd.f32 %v4005_v42, %v1132_v47  ;;  %v1765_v50 = vadd.f32 %v4007_v43, %v1764_v48  ;;  %v3089_v51 = vpop.f32.mrb[34].mxu1  ;;  %v3157_v52 = vpop.f32.mrb[34].mxu0 }
 0x19f   :  { %3439 = shalt.err (!%p3436_p4)
}
 0x1a0   :  { %s3440_s1 = scalar_lea.hbm %s4326_s7, 4096 }
 0x1a1   :  { %p3441_p5 = scmp.ne.s32.totalorder %s4326_s7, %s3440_s1  ;;  %p3444_p6 = scmp.lt.u32.totalorder %s3440_s1, %s4326_s7 }
 0x1a3   :  { %p3446_p7 = pnand %p3444_p6, %p3441_p5 }
 0x1a5   :  { %3449 = shalt.err (!%p3446_p7)
}
 0x1a6   :  { %2351 = dma.vmem_to_hbm [thread:$0]  %s2346_s29, 4096, %s4326_s7, [#allocation4], %s3508_s21, %s3508_s21, %s3509_s22   ;;  %v2786_v53 = vpack.c.bf16 %v1141_v45, %v1141_v45  ;;  %v2850_v54 = vpack.c.bf16 %v1773_v46, %v1773_v46  ;;  %v1144_v55 = vadd.f32 %v3089_v51, %v4005_v42  ;;  %v1776_v56 = vadd.f32 %v3157_v52, %v4007_v43  ;;  %v1135_v57 = vpop.f32.mrb[35].mxu1  ;;  %v1767_v58 = vpop.f32.mrb[35].mxu0 }
 0x1a7   :  { %v2784_v59 = vpack.c.bf16 %v1133_v49, %v1133_v49  ;;  %v2848_v60 = vpack.c.bf16 %v1765_v50, %v1765_v50  ;;  %v1136_v61 = vadd.f32 %v4005_v42, %v1135_v57  ;;  %v1768_v62 = vadd.f32 %v4007_v43, %v1767_v58  ;;  %v3092_v3 = vpop.f32.mrb[36].mxu1  ;;  %v3160_v4 = vpop.f32.mrb[36].mxu0  ;;  %s3516_s7 = smov [#allocation15]   ;;  %s3517_s19 = smov [#allocation17]  }
 0x1a8   :  { %1645 = vst.msk [vmem:[#allocation15 + $0x8] sm:$0xf] %vm1010_vm1, %v2786_v53  ;;  %v2787_v63 = vpack.c.bf16 %v1144_v55, %v1144_v55  ;;  %v2851_v0 = vpack.c.bf16 %v1776_v56, %v1776_v56  ;;  %v1157_v5 = vadd.f32 %v3092_v3, %v4005_v42  ;;  %v1789_v6 = vadd.f32 %v3160_v4, %v4007_v43  ;;  %v1148_v7 = vpop.f32.mrb[37].mxu1  ;;  %v1780_v8 = vpop.f32.mrb[37].mxu0  ;;  %s2357_s18 = sshll.u32 %s3516_s7, 4  ;;  %s2369_s20 = sshll.u32 %s3517_s19, 4  ;;  %s2358_s18 = int_to_ptr.vmem [resolvable:$true] %s2357_s18  ;;  %s4280_s20 = int_to_ptr.vmem [resolvable:$true] %s2369_s20 }
 0x1a9   :  { %2278 = vst.msk [vmem:[#allocation17 + $0x8] sm:$0xf] %vm2275_vm2, %v2850_v54  ;;  %2276 = vst.msk [vmem:[#allocation17] sm:$0xf] %vm2275_vm2, %v2848_v60  ;;  %v2785_v1 = vpack.c.bf16 %v1136_v61, %v1136_v61  ;;  %v2849_v2 = vpack.c.bf16 %v1768_v62, %v1768_v62  ;;  %v1149_v9 = vadd.f32 %v4005_v42, %v1148_v7  ;;  %v3093_v11 = vpop.f32.mrb[38].mxu1  ;;  %v3161_v12 = vpop.f32.mrb[38].mxu0  ;;  %p3455_p9 = scmp.lt.s32.totalorder %s2358_s18, %s2358_s18 }
 0x1aa   :  { %1643 = vst.msk [vmem:[#allocation15] sm:$0xf] %vm1010_vm1, %v2784_v59  ;;  %1646 = vst.msk [vmem:[#allocation15 + $0xc] sm:$0xf] %vm1010_vm1, %v2787_v63  ;;  %v1781_v10 = vadd.f32 %v4007_v43, %v1780_v8  ;;  %v2790_v13 = vpack.c.bf16 %v1157_v5, %v1157_v5  ;;  %v2854_v14 = vpack.c.bf16 %v1789_v6, %v1789_v6  ;;  %v1151_v17 = vpop.f32.mrb[39].mxu1  ;;  %v1783_v18 = vpop.f32.mrb[39].mxu0 }
 0x1ab   :  { %2279 = vst.msk [vmem:[#allocation17 + $0xc] sm:$0xf] %vm2275_vm2, %v2851_v0  ;;  %2277 = vst.msk [vmem:[#allocation17 + $0x4] sm:$0xf] %vm2275_vm2, %v2849_v2  ;;  %v1160_v15 = vadd.f32 %v3093_v11, %v4005_v42  ;;  %v1792_v16 = vadd.f32 %v3161_v12, %v4007_v43  ;;  %v2788_v19 = vpack.c.bf16 %v1149_v9, %v1149_v9  ;;  %s3450_s24 = scalar_lea.vmem %s2358_s18, 4096 }
 0x1ac   :  { %1644 = vst.msk [vmem:[#allocation15 + $0x4] sm:$0xf] %vm1010_vm1, %v2785_v1  ;;  %v2852_v20 = vpack.c.bf16 %v1781_v10, %v1781_v10  ;;  %v1152_v21 = vadd.f32 %v4005_v42, %v1151_v17  ;;  %v1784_v22 = vadd.f32 %v4007_v43, %v1783_v18  ;;  %1649 = vst.msk [vmem:[#allocation15 + $0x18] sm:$0xf] %vm1010_vm1, %v2790_v13  ;;  %v3096_v27 = vpop.f32.mrb[40].mxu1  ;;  %v3164_v28 = vpop.f32.mrb[40].mxu0  ;;  %p3451_p8 = scmp.ne.s32.totalorder %s2358_s18, %s3450_s24  ;;  %p3456_p10 = scmp.lt.s32.totalorder %s3450_s24, %s3450_s24 }
 0x1ad   :  { %2282 = vst.msk [vmem:[#allocation17 + $0x18] sm:$0xf] %vm2275_vm2, %v2854_v14  ;;  %v2791_v23 = vpack.c.bf16 %v1160_v15, %v1160_v15  ;;  %v2855_v24 = vpack.c.bf16 %v1792_v16, %v1792_v16  ;;  %v1173_v29 = vadd.f32 %v3096_v27, %v4005_v42  ;;  %v1805_v30 = vadd.f32 %v3164_v28, %v4007_v43  ;;  %v1164_v31 = vpop.f32.mrb[41].mxu1  ;;  %v1796_v32 = vpop.f32.mrb[41].mxu0 }
 0x1ae   :  { %1647 = vst.msk [vmem:[#allocation15 + $0x10] sm:$0xf] %vm1010_vm1, %v2788_v19  ;;  %v2789_v25 = vpack.c.bf16 %v1152_v21, %v1152_v21  ;;  %v2853_v26 = vpack.c.bf16 %v1784_v22, %v1784_v22  ;;  %v1165_v33 = vadd.f32 %v4005_v42, %v1164_v31  ;;  %v1797_v34 = vadd.f32 %v4007_v43, %v1796_v32  ;;  %v3097_v35 = vpop.f32.mrb[42].mxu1  ;;  %v3165_v36 = vpop.f32.mrb[42].mxu0  ;;  %p3457_p11 = por %p3456_p10, %p3455_p9 }
 0x1af   :  { %2280 = vst.msk [vmem:[#allocation17 + $0x10] sm:$0xf] %vm2275_vm2, %v2852_v20  ;;  %2283 = vst.msk [vmem:[#allocation17 + $0x1c] sm:$0xf] %vm2275_vm2, %v2855_v24  ;;  %v2794_v37 = vpack.c.bf16 %v1173_v29, %v1173_v29  ;;  %v2858_v39 = vpack.c.bf16 %v1805_v30, %v1805_v30  ;;  %v1176_v40 = vadd.f32 %v3097_v35, %v4005_v42  ;;  %v1167_v38 = vpop.f32.mrb[43].mxu1  ;;  %v1799_v44 = vpop.f32.mrb[43].mxu0 }
 0x1b0   :  { %1650 = vst.msk [vmem:[#allocation15 + $0x1c] sm:$0xf] %vm1010_vm1, %v2791_v23  ;;  %1648 = vst.msk [vmem:[#allocation15 + $0x14] sm:$0xf] %vm1010_vm1, %v2789_v25  ;;  %v1808_v41 = vadd.f32 %v3165_v36, %v4007_v43  ;;  %v2792_v45 = vpack.c.bf16 %v1165_v33, %v1165_v33  ;;  %v2856_v46 = vpack.c.bf16 %v1797_v34, %v1797_v34  ;;  %p3458_p12 = pnand %p3457_p11, %p3451_p8 }
 0x1b1   :  { %2281 = vst.msk [vmem:[#allocation17 + $0x14] sm:$0xf] %vm2275_vm2, %v2853_v26  ;;  %v1168_v47 = vadd.f32 %v4005_v42, %v1167_v38  ;;  %v1800_v48 = vadd.f32 %v4007_v43, %v1799_v44  ;;  %2286 = vst.msk [vmem:[#allocation17 + $0x28] sm:$0xf] %vm2275_vm2, %v2858_v39  ;;  %v2795_v49 = vpack.c.bf16 %v1176_v40, %v1176_v40 }
 0x1b2   :  { %1653 = vst.msk [vmem:[#allocation15 + $0x28] sm:$0xf] %vm1010_vm1, %v2794_v37  ;;  %v2859_v50 = vpack.c.bf16 %v1808_v41, %v1808_v41  ;;  %1651 = vst.msk [vmem:[#allocation15 + $0x20] sm:$0xf] %vm1010_vm1, %v2792_v45 }
 0x1b3   :  { %2284 = vst.msk [vmem:[#allocation17 + $0x20] sm:$0xf] %vm2275_vm2, %v2856_v46  ;;  %v2793_v51 = vpack.c.bf16 %v1168_v47, %v1168_v47  ;;  %v2857_v52 = vpack.c.bf16 %v1800_v48, %v1800_v48 }
 0x1b4   :  { %1654 = vst.msk [vmem:[#allocation15 + $0x2c] sm:$0xf] %vm1010_vm1, %v2795_v49  ;;  %v3100_v53 = vpop.f32.mrb[44].mxu1  ;;  %v3168_v54 = vpop.f32.mrb[44].mxu0 }
 0x1b5   :  { %2287 = vst.msk [vmem:[#allocation17 + $0x2c] sm:$0xf] %vm2275_vm2, %v2859_v50  ;;  %2285 = vst.msk [vmem:[#allocation17 + $0x24] sm:$0xf] %vm2275_vm2, %v2857_v52  ;;  %v1189_v55 = vadd.f32 %v3100_v53, %v4005_v42  ;;  %v1821_v56 = vadd.f32 %v3168_v54, %v4007_v43  ;;  %v1180_v57 = vpop.f32.mrb[45].mxu1  ;;  %v1812_v58 = vpop.f32.mrb[45].mxu0 }
 0x1b6   :  { %1652 = vst.msk [vmem:[#allocation15 + $0x24] sm:$0xf] %vm1010_vm1, %v2793_v51  ;;  %v1181_v59 = vadd.f32 %v4005_v42, %v1180_v57  ;;  %v1813_v60 = vadd.f32 %v4007_v43, %v1812_v58  ;;  %v3101_v61 = vpop.f32.mrb[46].mxu1  ;;  %v3169_v62 = vpop.f32.mrb[46].mxu0 }
 0x1b7   :  { %v2798_v63 = vpack.c.bf16 %v1189_v55, %v1189_v55  ;;  %v2862_v0 = vpack.c.bf16 %v1821_v56, %v1821_v56  ;;  %v1192_v1 = vadd.f32 %v3101_v61, %v4005_v42  ;;  %v1824_v2 = vadd.f32 %v3169_v62, %v4007_v43  ;;  %v1183_v3 = vpop.f32.mrb[47].mxu1  ;;  %v1815_v4 = vpop.f32.mrb[47].mxu0 }
 0x1b8   :  { %v2796_v5 = vpack.c.bf16 %v1181_v59, %v1181_v59  ;;  %v2860_v6 = vpack.c.bf16 %v1813_v60, %v1813_v60  ;;  %v1184_v7 = vadd.f32 %v4005_v42, %v1183_v3  ;;  %v1816_v8 = vadd.f32 %v4007_v43, %v1815_v4 }
 0x1b9   :  { %1657 = vst.msk [vmem:[#allocation15 + $0x38] sm:$0xf] %vm1010_vm1, %v2798_v63  ;;  %v2799_v9 = vpack.c.bf16 %v1192_v1, %v1192_v1  ;;  %v2863_v10 = vpack.c.bf16 %v1824_v2, %v1824_v2 }
 0x1ba   :  { %2290 = vst.msk [vmem:[#allocation17 + $0x38] sm:$0xf] %vm2275_vm2, %v2862_v0  ;;  %2288 = vst.msk [vmem:[#allocation17 + $0x30] sm:$0xf] %vm2275_vm2, %v2860_v6  ;;  %v2797_v11 = vpack.c.bf16 %v1184_v7, %v1184_v7  ;;  %v2861_v12 = vpack.c.bf16 %v1816_v8, %v1816_v8 }
 0x1bb   :  { %1655 = vst.msk [vmem:[#allocation15 + $0x30] sm:$0xf] %vm1010_vm1, %v2796_v5  ;;  %1658 = vst.msk [vmem:[#allocation15 + $0x3c] sm:$0xf] %vm1010_vm1, %v2799_v9 }
 0x1bc   :  { %2291 = vst.msk [vmem:[#allocation17 + $0x3c] sm:$0xf] %vm2275_vm2, %v2863_v10  ;;  %2289 = vst.msk [vmem:[#allocation17 + $0x34] sm:$0xf] %vm2275_vm2, %v2861_v12  ;;  %v3104_v13 = vpop.f32.mrb[48].mxu1  ;;  %v3172_v14 = vpop.f32.mrb[48].mxu0 }
 0x1bd   :  { %1656 = vst.msk [vmem:[#allocation15 + $0x34] sm:$0xf] %vm1010_vm1, %v2797_v11  ;;  %v1205_v15 = vadd.f32 %v3104_v13, %v4005_v42  ;;  %v1837_v16 = vadd.f32 %v3172_v14, %v4007_v43  ;;  %v1196_v17 = vpop.f32.mrb[49].mxu1  ;;  %v1828_v18 = vpop.f32.mrb[49].mxu0 }
 0x1be   :  { %v1197_v19 = vadd.f32 %v4005_v42, %v1196_v17  ;;  %v1829_v20 = vadd.f32 %v4007_v43, %v1828_v18  ;;  %v3105_v21 = vpop.f32.mrb[50].mxu1  ;;  %v3173_v22 = vpop.f32.mrb[50].mxu0 }
 0x1bf   :  { %v2802_v23 = vpack.c.bf16 %v1205_v15, %v1205_v15  ;;  %v2866_v24 = vpack.c.bf16 %v1837_v16, %v1837_v16  ;;  %v1208_v25 = vadd.f32 %v3105_v21, %v4005_v42  ;;  %v1840_v26 = vadd.f32 %v3173_v22, %v4007_v43  ;;  %v1199_v27 = vpop.f32.mrb[51].mxu1  ;;  %v1831_v28 = vpop.f32.mrb[51].mxu0 }
 0x1c0   :  { %v2800_v29 = vpack.c.bf16 %v1197_v19, %v1197_v19  ;;  %v2864_v30 = vpack.c.bf16 %v1829_v20, %v1829_v20  ;;  %v1200_v31 = vadd.f32 %v4005_v42, %v1199_v27  ;;  %v1832_v32 = vadd.f32 %v4007_v43, %v1831_v28 }
 0x1c1   :  { %1661 = vst.msk [vmem:[#allocation15 + $0x48] sm:$0xf] %vm1010_vm1, %v2802_v23  ;;  %v2803_v33 = vpack.c.bf16 %v1208_v25, %v1208_v25  ;;  %v2867_v34 = vpack.c.bf16 %v1840_v26, %v1840_v26 }
 0x1c2   :  { %2294 = vst.msk [vmem:[#allocation17 + $0x48] sm:$0xf] %vm2275_vm2, %v2866_v24  ;;  %2292 = vst.msk [vmem:[#allocation17 + $0x40] sm:$0xf] %vm2275_vm2, %v2864_v30  ;;  %v2801_v35 = vpack.c.bf16 %v1200_v31, %v1200_v31  ;;  %v2865_v36 = vpack.c.bf16 %v1832_v32, %v1832_v32 }
 0x1c3   :  { %1659 = vst.msk [vmem:[#allocation15 + $0x40] sm:$0xf] %vm1010_vm1, %v2800_v29  ;;  %1662 = vst.msk [vmem:[#allocation15 + $0x4c] sm:$0xf] %vm1010_vm1, %v2803_v33 }
 0x1c4   :  { %2295 = vst.msk [vmem:[#allocation17 + $0x4c] sm:$0xf] %vm2275_vm2, %v2867_v34  ;;  %2293 = vst.msk [vmem:[#allocation17 + $0x44] sm:$0xf] %vm2275_vm2, %v2865_v36  ;;  %v3108_v37 = vpop.f32.mrb[52].mxu1  ;;  %v3176_v39 = vpop.f32.mrb[52].mxu0 }
 0x1c5   :  { %1660 = vst.msk [vmem:[#allocation15 + $0x44] sm:$0xf] %vm1010_vm1, %v2801_v35  ;;  %v1221_v40 = vadd.f32 %v3108_v37, %v4005_v42  ;;  %v1853_v41 = vadd.f32 %v3176_v39, %v4007_v43  ;;  %v1212_v38 = vpop.f32.mrb[53].mxu1  ;;  %v1844_v44 = vpop.f32.mrb[53].mxu0 }
 0x1c6   :  { %v1213_v45 = vadd.f32 %v4005_v42, %v1212_v38  ;;  %v1845_v46 = vadd.f32 %v4007_v43, %v1844_v44  ;;  %v3109_v47 = vpop.f32.mrb[54].mxu1  ;;  %v3177_v48 = vpop.f32.mrb[54].mxu0 }
 0x1c7   :  { %v2806_v49 = vpack.c.bf16 %v1221_v40, %v1221_v40  ;;  %v2870_v50 = vpack.c.bf16 %v1853_v41, %v1853_v41  ;;  %v1224_v51 = vadd.f32 %v3109_v47, %v4005_v42  ;;  %v1856_v52 = vadd.f32 %v3177_v48, %v4007_v43  ;;  %v1215_v53 = vpop.f32.mrb[55].mxu1  ;;  %v1847_v54 = vpop.f32.mrb[55].mxu0 }
 0x1c8   :  { %v2804_v55 = vpack.c.bf16 %v1213_v45, %v1213_v45  ;;  %v2868_v56 = vpack.c.bf16 %v1845_v46, %v1845_v46  ;;  %v1216_v57 = vadd.f32 %v4005_v42, %v1215_v53  ;;  %v1848_v58 = vadd.f32 %v4007_v43, %v1847_v54 }
 0x1c9   :  { %1665 = vst.msk [vmem:[#allocation15 + $0x58] sm:$0xf] %vm1010_vm1, %v2806_v49  ;;  %v2807_v59 = vpack.c.bf16 %v1224_v51, %v1224_v51  ;;  %v2871_v60 = vpack.c.bf16 %v1856_v52, %v1856_v52 }
 0x1ca   :  { %2298 = vst.msk [vmem:[#allocation17 + $0x58] sm:$0xf] %vm2275_vm2, %v2870_v50  ;;  %2296 = vst.msk [vmem:[#allocation17 + $0x50] sm:$0xf] %vm2275_vm2, %v2868_v56  ;;  %v2805_v61 = vpack.c.bf16 %v1216_v57, %v1216_v57  ;;  %v2869_v62 = vpack.c.bf16 %v1848_v58, %v1848_v58 }
 0x1cb   :  { %1663 = vst.msk [vmem:[#allocation15 + $0x50] sm:$0xf] %vm1010_vm1, %v2804_v55  ;;  %1666 = vst.msk [vmem:[#allocation15 + $0x5c] sm:$0xf] %vm1010_vm1, %v2807_v59 }
 0x1cc   :  { %2299 = vst.msk [vmem:[#allocation17 + $0x5c] sm:$0xf] %vm2275_vm2, %v2871_v60  ;;  %2297 = vst.msk [vmem:[#allocation17 + $0x54] sm:$0xf] %vm2275_vm2, %v2869_v62  ;;  %v3112_v63 = vpop.f32.mrb[56].mxu1  ;;  %v3180_v0 = vpop.f32.mrb[56].mxu0 }
 0x1cd   :  { %1664 = vst.msk [vmem:[#allocation15 + $0x54] sm:$0xf] %vm1010_vm1, %v2805_v61  ;;  %v1237_v1 = vadd.f32 %v3112_v63, %v4005_v42  ;;  %v1869_v2 = vadd.f32 %v3180_v0, %v4007_v43  ;;  %v1228_v3 = vpop.f32.mrb[57].mxu1  ;;  %v1860_v4 = vpop.f32.mrb[57].mxu0 }
 0x1ce   :  { %v1229_v5 = vadd.f32 %v4005_v42, %v1228_v3  ;;  %v1861_v6 = vadd.f32 %v4007_v43, %v1860_v4  ;;  %v3113_v7 = vpop.f32.mrb[58].mxu1  ;;  %v3181_v8 = vpop.f32.mrb[58].mxu0 }
 0x1cf   :  { %v2810_v9 = vpack.c.bf16 %v1237_v1, %v1237_v1  ;;  %v2874_v10 = vpack.c.bf16 %v1869_v2, %v1869_v2  ;;  %v1240_v11 = vadd.f32 %v3113_v7, %v4005_v42  ;;  %v1872_v12 = vadd.f32 %v3181_v8, %v4007_v43  ;;  %v1231_v13 = vpop.f32.mrb[59].mxu1  ;;  %v1863_v14 = vpop.f32.mrb[59].mxu0 }
 0x1d0   :  { %v2808_v15 = vpack.c.bf16 %v1229_v5, %v1229_v5  ;;  %v2872_v16 = vpack.c.bf16 %v1861_v6, %v1861_v6  ;;  %v1232_v17 = vadd.f32 %v4005_v42, %v1231_v13  ;;  %v1864_v18 = vadd.f32 %v4007_v43, %v1863_v14 }
 0x1d1   :  { %1669 = vst.msk [vmem:[#allocation15 + $0x68] sm:$0xf] %vm1010_vm1, %v2810_v9  ;;  %v2811_v19 = vpack.c.bf16 %v1240_v11, %v1240_v11  ;;  %v2875_v20 = vpack.c.bf16 %v1872_v12, %v1872_v12 }
 0x1d2   :  { %2302 = vst.msk [vmem:[#allocation17 + $0x68] sm:$0xf] %vm2275_vm2, %v2874_v10  ;;  %2300 = vst.msk [vmem:[#allocation17 + $0x60] sm:$0xf] %vm2275_vm2, %v2872_v16  ;;  %v2809_v21 = vpack.c.bf16 %v1232_v17, %v1232_v17  ;;  %v2873_v22 = vpack.c.bf16 %v1864_v18, %v1864_v18 }
 0x1d3   :  { %1667 = vst.msk [vmem:[#allocation15 + $0x60] sm:$0xf] %vm1010_vm1, %v2808_v15  ;;  %1670 = vst.msk [vmem:[#allocation15 + $0x6c] sm:$0xf] %vm1010_vm1, %v2811_v19 }
 0x1d4   :  { %2303 = vst.msk [vmem:[#allocation17 + $0x6c] sm:$0xf] %vm2275_vm2, %v2875_v20  ;;  %2301 = vst.msk [vmem:[#allocation17 + $0x64] sm:$0xf] %vm2275_vm2, %v2873_v22  ;;  %v3116_v23 = vpop.f32.mrb[60].mxu1  ;;  %v3184_v24 = vpop.f32.mrb[60].mxu0 }
 0x1d5   :  { %1668 = vst.msk [vmem:[#allocation15 + $0x64] sm:$0xf] %vm1010_vm1, %v2809_v21  ;;  %v1253_v25 = vadd.f32 %v3116_v23, %v4005_v42  ;;  %v1885_v26 = vadd.f32 %v3184_v24, %v4007_v43  ;;  %v1244_v27 = vpop.f32.mrb[61].mxu1  ;;  %v1876_v28 = vpop.f32.mrb[61].mxu0 }
 0x1d6   :  { %v1245_v29 = vadd.f32 %v4005_v42, %v1244_v27  ;;  %v1877_v30 = vadd.f32 %v4007_v43, %v1876_v28  ;;  %v3117_v31 = vpop.f32.mrb[62].mxu1  ;;  %v3185_v32 = vpop.f32.mrb[62].mxu0 }
 0x1d7   :  { %v2814_v33 = vpack.c.bf16 %v1253_v25, %v1253_v25  ;;  %v2878_v34 = vpack.c.bf16 %v1885_v26, %v1885_v26  ;;  %v1256_v35 = vadd.f32 %v3117_v31, %v4005_v42  ;;  %v1888_v36 = vadd.f32 %v3185_v32, %v4007_v43  ;;  %v1247_v37 = vpop.f32.mrb[63].mxu1  ;;  %v1879_v39 = vpop.f32.mrb[63].mxu0 }
 0x1d8   :  { %v2812_v40 = vpack.c.bf16 %v1245_v29, %v1245_v29  ;;  %v2876_v41 = vpack.c.bf16 %v1877_v30, %v1877_v30  ;;  %v1248_v38 = vadd.f32 %v4005_v42, %v1247_v37  ;;  %v1880_v44 = vadd.f32 %v4007_v43, %v1879_v39 }
 0x1d9   :  { %1673 = vst.msk [vmem:[#allocation15 + $0x78] sm:$0xf] %vm1010_vm1, %v2814_v33  ;;  %v2815_v45 = vpack.c.bf16 %v1256_v35, %v1256_v35  ;;  %v2879_v46 = vpack.c.bf16 %v1888_v36, %v1888_v36 }
 0x1da   :  { %2306 = vst.msk [vmem:[#allocation17 + $0x78] sm:$0xf] %vm2275_vm2, %v2878_v34  ;;  %2304 = vst.msk [vmem:[#allocation17 + $0x70] sm:$0xf] %vm2275_vm2, %v2876_v41  ;;  %v2813_v47 = vpack.c.bf16 %v1248_v38, %v1248_v38  ;;  %v2877_v48 = vpack.c.bf16 %v1880_v44, %v1880_v44 }
 0x1db   :  { %1671 = vst.msk [vmem:[#allocation15 + $0x70] sm:$0xf] %vm1010_vm1, %v2812_v40  ;;  %1674 = vst.msk [vmem:[#allocation15 + $0x7c] sm:$0xf] %vm1010_vm1, %v2815_v45 }
 0x1dc   :  { %2307 = vst.msk [vmem:[#allocation17 + $0x7c] sm:$0xf] %vm2275_vm2, %v2879_v46  ;;  %2305 = vst.msk [vmem:[#allocation17 + $0x74] sm:$0xf] %vm2275_vm2, %v2877_v48  ;;  %v3120_v49 = vpop.f32.mrb[64].mxu1  ;;  %v3188_v50 = vpop.f32.mrb[64].mxu0 }
 0x1dd   :  { %1672 = vst.msk [vmem:[#allocation15 + $0x74] sm:$0xf] %vm1010_vm1, %v2813_v47  ;;  %v1269_v51 = vadd.f32 %v3120_v49, %v4005_v42  ;;  %v1901_v52 = vadd.f32 %v3188_v50, %v4007_v43  ;;  %v1260_v53 = vpop.f32.mrb[65].mxu1  ;;  %v1892_v54 = vpop.f32.mrb[65].mxu0 }
 0x1de   :  { %v1261_v55 = vadd.f32 %v4005_v42, %v1260_v53  ;;  %v1893_v56 = vadd.f32 %v4007_v43, %v1892_v54  ;;  %v3121_v57 = vpop.f32.mrb[66].mxu1  ;;  %v3189_v58 = vpop.f32.mrb[66].mxu0 }
 0x1df   :  { %v2818_v59 = vpack.c.bf16 %v1269_v51, %v1269_v51  ;;  %v2882_v60 = vpack.c.bf16 %v1901_v52, %v1901_v52  ;;  %v1272_v61 = vadd.f32 %v3121_v57, %v4005_v42  ;;  %v1904_v62 = vadd.f32 %v3189_v58, %v4007_v43  ;;  %v1263_v63 = vpop.f32.mrb[67].mxu1  ;;  %v1895_v0 = vpop.f32.mrb[67].mxu0 }
 0x1e0   :  { %v2816_v1 = vpack.c.bf16 %v1261_v55, %v1261_v55  ;;  %v2880_v2 = vpack.c.bf16 %v1893_v56, %v1893_v56  ;;  %v1264_v3 = vadd.f32 %v4005_v42, %v1263_v63  ;;  %v1896_v4 = vadd.f32 %v4007_v43, %v1895_v0 }
 0x1e1   :  { %1677 = vst.msk [vmem:[#allocation15 + $0x88] sm:$0xf] %vm1010_vm1, %v2818_v59  ;;  %v2819_v5 = vpack.c.bf16 %v1272_v61, %v1272_v61  ;;  %v2883_v6 = vpack.c.bf16 %v1904_v62, %v1904_v62 }
 0x1e2   :  { %2310 = vst.msk [vmem:[#allocation17 + $0x88] sm:$0xf] %vm2275_vm2, %v2882_v60  ;;  %2308 = vst.msk [vmem:[#allocation17 + $0x80] sm:$0xf] %vm2275_vm2, %v2880_v2  ;;  %v2817_v7 = vpack.c.bf16 %v1264_v3, %v1264_v3  ;;  %v2881_v8 = vpack.c.bf16 %v1896_v4, %v1896_v4 }
 0x1e3   :  { %1675 = vst.msk [vmem:[#allocation15 + $0x80] sm:$0xf] %vm1010_vm1, %v2816_v1  ;;  %1678 = vst.msk [vmem:[#allocation15 + $0x8c] sm:$0xf] %vm1010_vm1, %v2819_v5 }
 0x1e4   :  { %2311 = vst.msk [vmem:[#allocation17 + $0x8c] sm:$0xf] %vm2275_vm2, %v2883_v6  ;;  %2309 = vst.msk [vmem:[#allocation17 + $0x84] sm:$0xf] %vm2275_vm2, %v2881_v8  ;;  %v3124_v9 = vpop.f32.mrb[68].mxu1  ;;  %v3192_v10 = vpop.f32.mrb[68].mxu0 }
 0x1e5   :  { %1676 = vst.msk [vmem:[#allocation15 + $0x84] sm:$0xf] %vm1010_vm1, %v2817_v7  ;;  %v1285_v11 = vadd.f32 %v3124_v9, %v4005_v42  ;;  %v1917_v12 = vadd.f32 %v3192_v10, %v4007_v43  ;;  %v1276_v13 = vpop.f32.mrb[69].mxu1  ;;  %v1908_v14 = vpop.f32.mrb[69].mxu0 }
 0x1e6   :  { %v1277_v15 = vadd.f32 %v4005_v42, %v1276_v13  ;;  %v1909_v16 = vadd.f32 %v4007_v43, %v1908_v14  ;;  %v3125_v17 = vpop.f32.mrb[70].mxu1  ;;  %v3193_v18 = vpop.f32.mrb[70].mxu0 }
 0x1e7   :  { %v2822_v19 = vpack.c.bf16 %v1285_v11, %v1285_v11  ;;  %v2886_v20 = vpack.c.bf16 %v1917_v12, %v1917_v12  ;;  %v1288_v21 = vadd.f32 %v3125_v17, %v4005_v42  ;;  %v1920_v22 = vadd.f32 %v3193_v18, %v4007_v43  ;;  %v1279_v23 = vpop.f32.mrb[71].mxu1  ;;  %v1911_v24 = vpop.f32.mrb[71].mxu0 }
 0x1e8   :  { %v2820_v25 = vpack.c.bf16 %v1277_v15, %v1277_v15  ;;  %v2884_v26 = vpack.c.bf16 %v1909_v16, %v1909_v16  ;;  %v1280_v27 = vadd.f32 %v4005_v42, %v1279_v23  ;;  %v1912_v28 = vadd.f32 %v4007_v43, %v1911_v24 }
 0x1e9   :  { %1681 = vst.msk [vmem:[#allocation15 + $0x98] sm:$0xf] %vm1010_vm1, %v2822_v19  ;;  %v2823_v29 = vpack.c.bf16 %v1288_v21, %v1288_v21  ;;  %v2887_v30 = vpack.c.bf16 %v1920_v22, %v1920_v22 }
 0x1ea   :  { %2314 = vst.msk [vmem:[#allocation17 + $0x98] sm:$0xf] %vm2275_vm2, %v2886_v20  ;;  %2312 = vst.msk [vmem:[#allocation17 + $0x90] sm:$0xf] %vm2275_vm2, %v2884_v26  ;;  %v2821_v31 = vpack.c.bf16 %v1280_v27, %v1280_v27  ;;  %v2885_v32 = vpack.c.bf16 %v1912_v28, %v1912_v28 }
 0x1eb   :  { %1679 = vst.msk [vmem:[#allocation15 + $0x90] sm:$0xf] %vm1010_vm1, %v2820_v25  ;;  %1682 = vst.msk [vmem:[#allocation15 + $0x9c] sm:$0xf] %vm1010_vm1, %v2823_v29 }
 0x1ec   :  { %2315 = vst.msk [vmem:[#allocation17 + $0x9c] sm:$0xf] %vm2275_vm2, %v2887_v30  ;;  %2313 = vst.msk [vmem:[#allocation17 + $0x94] sm:$0xf] %vm2275_vm2, %v2885_v32  ;;  %v3128_v33 = vpop.f32.mrb[72].mxu1  ;;  %v3196_v34 = vpop.f32.mrb[72].mxu0 }
 0x1ed   :  { %1680 = vst.msk [vmem:[#allocation15 + $0x94] sm:$0xf] %vm1010_vm1, %v2821_v31  ;;  %v1301_v35 = vadd.f32 %v3128_v33, %v4005_v42  ;;  %v1933_v36 = vadd.f32 %v3196_v34, %v4007_v43  ;;  %v1292_v37 = vpop.f32.mrb[73].mxu1  ;;  %v1924_v39 = vpop.f32.mrb[73].mxu0 }
 0x1ee   :  { %v1293_v40 = vadd.f32 %v4005_v42, %v1292_v37  ;;  %v1925_v41 = vadd.f32 %v4007_v43, %v1924_v39  ;;  %v3129_v38 = vpop.f32.mrb[74].mxu1  ;;  %v3197_v44 = vpop.f32.mrb[74].mxu0 }
 0x1ef   :  { %v2826_v45 = vpack.c.bf16 %v1301_v35, %v1301_v35  ;;  %v2890_v46 = vpack.c.bf16 %v1933_v36, %v1933_v36  ;;  %v1304_v47 = vadd.f32 %v3129_v38, %v4005_v42  ;;  %v1936_v48 = vadd.f32 %v3197_v44, %v4007_v43  ;;  %v1295_v49 = vpop.f32.mrb[75].mxu1  ;;  %v1927_v50 = vpop.f32.mrb[75].mxu0 }
 0x1f0   :  { %v2824_v51 = vpack.c.bf16 %v1293_v40, %v1293_v40  ;;  %v2888_v52 = vpack.c.bf16 %v1925_v41, %v1925_v41  ;;  %v1296_v53 = vadd.f32 %v4005_v42, %v1295_v49  ;;  %v1928_v54 = vadd.f32 %v4007_v43, %v1927_v50 }
 0x1f1   :  { %1685 = vst.msk [vmem:[#allocation15 + $0xa8] sm:$0xf] %vm1010_vm1, %v2826_v45  ;;  %v2827_v55 = vpack.c.bf16 %v1304_v47, %v1304_v47  ;;  %v2891_v56 = vpack.c.bf16 %v1936_v48, %v1936_v48 }
 0x1f2   :  { %2318 = vst.msk [vmem:[#allocation17 + $0xa8] sm:$0xf] %vm2275_vm2, %v2890_v46  ;;  %2316 = vst.msk [vmem:[#allocation17 + $0xa0] sm:$0xf] %vm2275_vm2, %v2888_v52  ;;  %v2825_v57 = vpack.c.bf16 %v1296_v53, %v1296_v53  ;;  %v2889_v58 = vpack.c.bf16 %v1928_v54, %v1928_v54 }
 0x1f3   :  { %1683 = vst.msk [vmem:[#allocation15 + $0xa0] sm:$0xf] %vm1010_vm1, %v2824_v51  ;;  %1686 = vst.msk [vmem:[#allocation15 + $0xac] sm:$0xf] %vm1010_vm1, %v2827_v55 }
 0x1f4   :  { %2319 = vst.msk [vmem:[#allocation17 + $0xac] sm:$0xf] %vm2275_vm2, %v2891_v56  ;;  %2317 = vst.msk [vmem:[#allocation17 + $0xa4] sm:$0xf] %vm2275_vm2, %v2889_v58  ;;  %v3132_v59 = vpop.f32.mrb[76].mxu1  ;;  %v3200_v60 = vpop.f32.mrb[76].mxu0 }
 0x1f5   :  { %1684 = vst.msk [vmem:[#allocation15 + $0xa4] sm:$0xf] %vm1010_vm1, %v2825_v57  ;;  %v1317_v61 = vadd.f32 %v3132_v59, %v4005_v42  ;;  %v1949_v62 = vadd.f32 %v3200_v60, %v4007_v43  ;;  %v1308_v63 = vpop.f32.mrb[77].mxu1  ;;  %v1940_v0 = vpop.f32.mrb[77].mxu0 }
 0x1f6   :  { %v1309_v1 = vadd.f32 %v4005_v42, %v1308_v63  ;;  %v1941_v2 = vadd.f32 %v4007_v43, %v1940_v0  ;;  %v3133_v3 = vpop.f32.mrb[78].mxu1  ;;  %v3201_v4 = vpop.f32.mrb[78].mxu0 }
 0x1f7   :  { %v2830_v5 = vpack.c.bf16 %v1317_v61, %v1317_v61  ;;  %v2894_v6 = vpack.c.bf16 %v1949_v62, %v1949_v62  ;;  %v1320_v7 = vadd.f32 %v3133_v3, %v4005_v42  ;;  %v1952_v8 = vadd.f32 %v3201_v4, %v4007_v43  ;;  %v1311_v9 = vpop.f32.mrb[79].mxu1  ;;  %v1943_v10 = vpop.f32.mrb[79].mxu0 }
 0x1f8   :  { %v2828_v11 = vpack.c.bf16 %v1309_v1, %v1309_v1  ;;  %v2892_v12 = vpack.c.bf16 %v1941_v2, %v1941_v2  ;;  %v1312_v13 = vadd.f32 %v4005_v42, %v1311_v9  ;;  %v1944_v14 = vadd.f32 %v4007_v43, %v1943_v10 }
 0x1f9   :  { %1689 = vst.msk [vmem:[#allocation15 + $0xb8] sm:$0xf] %vm1010_vm1, %v2830_v5  ;;  %v2831_v15 = vpack.c.bf16 %v1320_v7, %v1320_v7  ;;  %v2895_v16 = vpack.c.bf16 %v1952_v8, %v1952_v8 }
 0x1fa   :  { %2322 = vst.msk [vmem:[#allocation17 + $0xb8] sm:$0xf] %vm2275_vm2, %v2894_v6  ;;  %2320 = vst.msk [vmem:[#allocation17 + $0xb0] sm:$0xf] %vm2275_vm2, %v2892_v12  ;;  %v2829_v17 = vpack.c.bf16 %v1312_v13, %v1312_v13  ;;  %v2893_v18 = vpack.c.bf16 %v1944_v14, %v1944_v14 }
 0x1fb   :  { %1687 = vst.msk [vmem:[#allocation15 + $0xb0] sm:$0xf] %vm1010_vm1, %v2828_v11  ;;  %1690 = vst.msk [vmem:[#allocation15 + $0xbc] sm:$0xf] %vm1010_vm1, %v2831_v15 }
 0x1fc   :  { %2323 = vst.msk [vmem:[#allocation17 + $0xbc] sm:$0xf] %vm2275_vm2, %v2895_v16  ;;  %2321 = vst.msk [vmem:[#allocation17 + $0xb4] sm:$0xf] %vm2275_vm2, %v2893_v18  ;;  %v3136_v19 = vpop.f32.mrb[80].mxu1  ;;  %v3204_v20 = vpop.f32.mrb[80].mxu0 }
 0x1fd   :  { %1688 = vst.msk [vmem:[#allocation15 + $0xb4] sm:$0xf] %vm1010_vm1, %v2829_v17  ;;  %v1333_v21 = vadd.f32 %v3136_v19, %v4005_v42  ;;  %v1965_v22 = vadd.f32 %v3204_v20, %v4007_v43  ;;  %v1324_v23 = vpop.f32.mrb[81].mxu1  ;;  %v1956_v24 = vpop.f32.mrb[81].mxu0 }
 0x1fe   :  { %v1325_v25 = vadd.f32 %v4005_v42, %v1324_v23  ;;  %v1957_v26 = vadd.f32 %v4007_v43, %v1956_v24  ;;  %v3137_v27 = vpop.f32.mrb[82].mxu1  ;;  %v3205_v28 = vpop.f32.mrb[82].mxu0 }
 0x1ff   :  { %v2834_v29 = vpack.c.bf16 %v1333_v21, %v1333_v21  ;;  %v2898_v30 = vpack.c.bf16 %v1965_v22, %v1965_v22  ;;  %v1336_v31 = vadd.f32 %v3137_v27, %v4005_v42  ;;  %v1968_v32 = vadd.f32 %v3205_v28, %v4007_v43  ;;  %v1327_v33 = vpop.f32.mrb[83].mxu1  ;;  %v1959_v34 = vpop.f32.mrb[83].mxu0 }
 0x200   :  { %v2832_v35 = vpack.c.bf16 %v1325_v25, %v1325_v25  ;;  %v2896_v36 = vpack.c.bf16 %v1957_v26, %v1957_v26  ;;  %v1328_v37 = vadd.f32 %v4005_v42, %v1327_v33  ;;  %v1960_v39 = vadd.f32 %v4007_v43, %v1959_v34 }
 0x201   :  { %1693 = vst.msk [vmem:[#allocation15 + $0xc8] sm:$0xf] %vm1010_vm1, %v2834_v29  ;;  %v2835_v40 = vpack.c.bf16 %v1336_v31, %v1336_v31  ;;  %v2899_v41 = vpack.c.bf16 %v1968_v32, %v1968_v32 }
 0x202   :  { %2326 = vst.msk [vmem:[#allocation17 + $0xc8] sm:$0xf] %vm2275_vm2, %v2898_v30  ;;  %2324 = vst.msk [vmem:[#allocation17 + $0xc0] sm:$0xf] %vm2275_vm2, %v2896_v36  ;;  %v2833_v38 = vpack.c.bf16 %v1328_v37, %v1328_v37  ;;  %v2897_v44 = vpack.c.bf16 %v1960_v39, %v1960_v39 }
 0x203   :  { %1691 = vst.msk [vmem:[#allocation15 + $0xc0] sm:$0xf] %vm1010_vm1, %v2832_v35  ;;  %1694 = vst.msk [vmem:[#allocation15 + $0xcc] sm:$0xf] %vm1010_vm1, %v2835_v40 }
 0x204   :  { %2327 = vst.msk [vmem:[#allocation17 + $0xcc] sm:$0xf] %vm2275_vm2, %v2899_v41  ;;  %2325 = vst.msk [vmem:[#allocation17 + $0xc4] sm:$0xf] %vm2275_vm2, %v2897_v44  ;;  %v3140_v45 = vpop.f32.mrb[84].mxu1  ;;  %v3208_v46 = vpop.f32.mrb[84].mxu0 }
 0x205   :  { %1692 = vst.msk [vmem:[#allocation15 + $0xc4] sm:$0xf] %vm1010_vm1, %v2833_v38  ;;  %v1349_v47 = vadd.f32 %v3140_v45, %v4005_v42  ;;  %v1981_v48 = vadd.f32 %v3208_v46, %v4007_v43  ;;  %v1340_v49 = vpop.f32.mrb[85].mxu1  ;;  %v1972_v50 = vpop.f32.mrb[85].mxu0 }
 0x206   :  { %v1341_v51 = vadd.f32 %v4005_v42, %v1340_v49  ;;  %v1973_v52 = vadd.f32 %v4007_v43, %v1972_v50  ;;  %v3141_v53 = vpop.f32.mrb[86].mxu1  ;;  %v3209_v54 = vpop.f32.mrb[86].mxu0  ;;  %v3272_v49 = vld [vmem:[#allocation11] ss:$0 sm:$0xff] }
 0x207   :  { %v2838_v55 = vpack.c.bf16 %v1349_v47, %v1349_v47  ;;  %v2902_v56 = vpack.c.bf16 %v1981_v48, %v1981_v48  ;;  %v1352_v57 = vadd.f32 %v3141_v53, %v4005_v42  ;;  %v1984_v58 = vadd.f32 %v3209_v54, %v4007_v43  ;;  %v1343_v59 = vpop.f32.mrb[87].mxu1  ;;  %v1975_v60 = vpop.f32.mrb[87].mxu0 }
 0x208   :  { %v2836_v61 = vpack.c.bf16 %v1341_v51, %v1341_v51  ;;  %v2900_v62 = vpack.c.bf16 %v1973_v52, %v1973_v52  ;;  %v1344_v63 = vadd.f32 %v4005_v42, %v1343_v59  ;;  %v1976_v0 = vadd.f32 %v4007_v43, %v1975_v60  ;;  %v3273_v51 = vld [vmem:[#allocation13] ss:$0 sm:$0xff] }
 0x209   :  { %1697 = vst.msk [vmem:[#allocation15 + $0xd8] sm:$0xf] %vm1010_vm1, %v2838_v55  ;;  %v2839_v1 = vpack.c.bf16 %v1352_v57, %v1352_v57  ;;  %v2903_v2 = vpack.c.bf16 %v1984_v58, %v1984_v58 }
 0x20a   :  { %2330 = vst.msk [vmem:[#allocation17 + $0xd8] sm:$0xf] %vm2275_vm2, %v2902_v56  ;;  %2328 = vst.msk [vmem:[#allocation17 + $0xd0] sm:$0xf] %vm2275_vm2, %v2900_v62  ;;  %v2837_v3 = vpack.c.bf16 %v1344_v63, %v1344_v63  ;;  %v2901_v4 = vpack.c.bf16 %v1976_v0, %v1976_v0 }
 0x20b   :  { %1695 = vst.msk [vmem:[#allocation15 + $0xd0] sm:$0xf] %vm1010_vm1, %v2836_v61  ;;  %1698 = vst.msk [vmem:[#allocation15 + $0xdc] sm:$0xf] %vm1010_vm1, %v2839_v1 }
 0x20c   :  { %2331 = vst.msk [vmem:[#allocation17 + $0xdc] sm:$0xf] %vm2275_vm2, %v2903_v2  ;;  %2329 = vst.msk [vmem:[#allocation17 + $0xd4] sm:$0xf] %vm2275_vm2, %v2901_v4  ;;  %v3144_v5 = vpop.f32.mrb[88].mxu1  ;;  %v3212_v6 = vpop.f32.mrb[88].mxu0 }
 0x20d   :  { %1696 = vst.msk [vmem:[#allocation15 + $0xd4] sm:$0xf] %vm1010_vm1, %v2837_v3  ;;  %v1365_v7 = vadd.f32 %v3144_v5, %v4005_v42  ;;  %v1997_v8 = vadd.f32 %v3212_v6, %v4007_v43  ;;  %v1356_v9 = vpop.f32.mrb[89].mxu1  ;;  %v1988_v10 = vpop.f32.mrb[89].mxu0 }
 0x20e   :  { %v1357_v11 = vadd.f32 %v4005_v42, %v1356_v9  ;;  %v1989_v12 = vadd.f32 %v4007_v43, %v1988_v10  ;;  %v3145_v13 = vpop.f32.mrb[90].mxu1  ;;  %v3213_v14 = vpop.f32.mrb[90].mxu0 }
 0x20f   :  { %v2842_v15 = vpack.c.bf16 %v1365_v7, %v1365_v7  ;;  %v2906_v16 = vpack.c.bf16 %v1997_v8, %v1997_v8  ;;  %v1368_v17 = vadd.f32 %v3145_v13, %v4005_v42  ;;  %v2000_v18 = vadd.f32 %v3213_v14, %v4007_v43  ;;  %v1359_v19 = vpop.f32.mrb[91].mxu1  ;;  %v1991_v20 = vpop.f32.mrb[91].mxu0 }
 0x210   :  { %v2840_v21 = vpack.c.bf16 %v1357_v11, %v1357_v11  ;;  %v2904_v22 = vpack.c.bf16 %v1989_v12, %v1989_v12  ;;  %v1360_v23 = vadd.f32 %v4005_v42, %v1359_v19  ;;  %v1992_v24 = vadd.f32 %v4007_v43, %v1991_v20 }
 0x211   :  { %1701 = vst.msk [vmem:[#allocation15 + $0xe8] sm:$0xf] %vm1010_vm1, %v2842_v15  ;;  %v2843_v25 = vpack.c.bf16 %v1368_v17, %v1368_v17  ;;  %v2907_v26 = vpack.c.bf16 %v2000_v18, %v2000_v18 }
 0x212   :  { %2334 = vst.msk [vmem:[#allocation17 + $0xe8] sm:$0xf] %vm2275_vm2, %v2906_v16  ;;  %2332 = vst.msk [vmem:[#allocation17 + $0xe0] sm:$0xf] %vm2275_vm2, %v2904_v22  ;;  %v2841_v27 = vpack.c.bf16 %v1360_v23, %v1360_v23  ;;  %v2905_v28 = vpack.c.bf16 %v1992_v24, %v1992_v24 }
 0x213   :  { %1699 = vst.msk [vmem:[#allocation15 + $0xe0] sm:$0xf] %vm1010_vm1, %v2840_v21  ;;  %1702 = vst.msk [vmem:[#allocation15 + $0xec] sm:$0xf] %vm1010_vm1, %v2843_v25 }
 0x214   :  { %2335 = vst.msk [vmem:[#allocation17 + $0xec] sm:$0xf] %vm2275_vm2, %v2907_v26  ;;  %2333 = vst.msk [vmem:[#allocation17 + $0xe4] sm:$0xf] %vm2275_vm2, %v2905_v28  ;;  %v3148_v29 = vpop.f32.mrb[92].mxu1  ;;  %v3216_v30 = vpop.f32.mrb[92].mxu0 }
 0x215   :  { %1700 = vst.msk [vmem:[#allocation15 + $0xe4] sm:$0xf] %vm1010_vm1, %v2841_v27  ;;  %v1381_v31 = vadd.f32 %v3148_v29, %v4005_v42  ;;  %v2013_v32 = vadd.f32 %v3216_v30, %v4007_v43  ;;  %v1372_v33 = vpop.f32.mrb[93].mxu1  ;;  %v2004_v34 = vpop.f32.mrb[93].mxu0 }
 0x216   :  { %v1373_v35 = vadd.f32 %v4005_v42, %v1372_v33  ;;  %v2005_v36 = vadd.f32 %v4007_v43, %v2004_v34  ;;  %v3149_v37 = vpop.f32.mrb[94].mxu1  ;;  %v3217_v39 = vpop.f32.mrb[94].mxu0 }
 0x217   :  { %v2846_v40 = vpack.c.bf16 %v1381_v31, %v1381_v31  ;;  %v2910_v41 = vpack.c.bf16 %v2013_v32, %v2013_v32  ;;  %v1384_v38 = vadd.f32 %v3149_v37, %v4005_v42  ;;  %v2016_v44 = vadd.f32 %v3217_v39, %v4007_v43  ;;  %v1375_v45 = vpop.f32.mrb[95].mxu1  ;;  %v2007_v46 = vpop.f32.mrb[95].mxu0 }
 0x218   :  { %v2844_v47 = vpack.c.bf16 %v1373_v35, %v1373_v35  ;;  %v2908_v48 = vpack.c.bf16 %v2005_v36, %v2005_v36  ;;  %v1376_v50 = vadd.f32 %v3272_v49, %v1375_v45  ;;  %v2008_v52 = vadd.f32 %v3273_v51, %v2007_v46 }
 0x219   :  { %1705 = vst.msk [vmem:[#allocation15 + $0xf8] sm:$0xf] %vm1010_vm1, %v2846_v40  ;;  %v2847_v53 = vpack.c.bf16 %v1384_v38, %v1384_v38  ;;  %v2911_v42 = vpack.c.bf16 %v2016_v44, %v2016_v44 }
 0x21a   :  { %2338 = vst.msk [vmem:[#allocation17 + $0xf8] sm:$0xf] %vm2275_vm2, %v2910_v41  ;;  %2336 = vst.msk [vmem:[#allocation17 + $0xf0] sm:$0xf] %vm2275_vm2, %v2908_v48  ;;  %v2845_v43 = vpack.c.bf16 %v1376_v50, %v1376_v50  ;;  %v2909_v54 = vpack.c.bf16 %v2008_v52, %v2008_v52 }
 0x21b   :  { %1703 = vst.msk [vmem:[#allocation15 + $0xf0] sm:$0xf] %vm1010_vm1, %v2844_v47  ;;  %1706 = vst.msk [vmem:[#allocation15 + $0xfc] sm:$0xf] %vm1010_vm1, %v2847_v53 }
 0x21c   :  { %2339 = vst.msk [vmem:[#allocation17 + $0xfc] sm:$0xf] %vm2275_vm2, %v2911_v42  ;;  %2337 = vst.msk [vmem:[#allocation17 + $0xf4] sm:$0xf] %vm2275_vm2, %v2909_v54 }
 0x21d   :  { %1704 = vst.msk [vmem:[#allocation15 + $0xf4] sm:$0xf] %vm1010_vm1, %v2845_v43 }
 0x21e   :  { %3461 = shalt.err (!%p3458_p12)
}
 0x21f   :  { %s3462_s3 = scalar_lea.hbm %s4327_s8, 4096 }
 0x220   :  { %p3463_p13 = scmp.ne.s32.totalorder %s4327_s8, %s3462_s3  ;;  %p3466_p0 = scmp.lt.u32.totalorder %s3462_s3, %s4327_s8 }
 0x222   :  { %p3468_p1 = pnand %p3466_p0, %p3463_p13 }
 0x224   :  { %3471 = shalt.err (!%p3468_p1)
}
 0x225   :  { %2363 = dma.vmem_to_hbm [thread:$0]  %s2358_s18, 4096, %s4327_s8, [#allocation16], %s3508_s21, %s3508_s21, %s3509_s22  }
 0x226   :  { %s3472_s17 = scalar_lea.vmem %s4280_s20, 4096  ;;  %p3477_p3 = scmp.lt.s32.totalorder %s4280_s20, %s4280_s20 }
 0x227   :  { %p3473_p2 = scmp.ne.s32.totalorder %s4280_s20, %s3472_s17  ;;  %p3478_p4 = scmp.lt.s32.totalorder %s3472_s17, %s3472_s17 }
 0x229   :  { %p3479_p5 = por %p3478_p4, %p3477_p3 }
 0x22b   :  { %p3480_p6 = pnand %p3479_p5, %p3473_p2 }
 0x22d   :  { %3483 = shalt.err (!%p3480_p6)
}
 0x22e   :  { %s3484_s30 = scalar_lea.hbm %s4328_s9, 4096 }
 0x22f   :  { %p3485_p7 = scmp.ne.s32.totalorder %s4328_s9, %s3484_s30  ;;  %p3488_p8 = scmp.lt.u32.totalorder %s3484_s30, %s4328_s9 }
 0x231   :  { %p3490_p9 = pnand %p3488_p8, %p3485_p7 }
 0x233   :  { %3493 = shalt.err (!%p3490_p9)
}
 0x234   :  { %2375 = dma.vmem_to_hbm [thread:$0]  %s4280_s20, 4096, %s4328_s9, [#allocation16], %s3508_s21, %s3508_s21, %s3509_s22  }
 0x235   :  { %3502 = dma.done.wait [#allocation4], 4096  }
 0x236   :  { %3503 = vsyncadd [#allocation4], 4294963200 }
 0x237   :  { %3504 = dma.done.wait [#allocation16], 8192  }
 0x238   :  { %3505 = vsyncadd [#allocation16], 4294959104 }
 0x239   :  { %2385 = vsyncpa [#allocation3], 1 }
 0x23a   :  { %2386 = vsyncpa [#allocation6], 1 }
 0x23b   :  { %2387 = vsyncpa [#allocation9], 1 }
 0x23c   :  { %2388 = vsyncpa [#allocation12], 1 }
 0x23d   :  { %2389 = vsyncpa [#allocation4], 1 }
 0x23e   :  { %2390 = vsyncpa [#allocation16], 1 }

// kernel: dablock_forward.12
= control target key start
LH: loop header
LB: loop body
LE: loop exit
PB: predicated region body
PF: predicated region fallthrough
CT: control target
= control target key end

     0   :  { %s3419_s0 = inlined_call_operand.hbm [shape: bf16[2,18,18,32], index: 0, kind: input, shape index: {}]   ;;  %s3420_s1 = inlined_call_operand.hbm [shape: bf16[9,32,32], index: 1, kind: input, shape index: {}]   ;;  %s3421_s2 = inlined_call_operand.hbm [shape: f32[1,32], index: 2, kind: input, shape index: {}]   ;;  %s3422_s3 = inlined_call_operand.hbm [shape: f32[1,32], index: 3, kind: input, shape index: {}]   ;;  %s3423_s4 = inlined_call_operand.hbm [shape: bf16[2,16,16,32], index: 4, kind: output, shape index: {}]  }
   0x1   :  { %3436 = sst [smem:[#allocation21_spill]] %s3420_s1 }
   0x2   :  { %3437 = sst [smem:[#allocation22_spill]] %s3421_s2 }
   0x3   :  { %3438 = sst [smem:[#allocation23_spill]] %s3423_s4 }
   0x4   :  { %9 = vsyncpa [#allocation5], 0 }
   0x5   :  { %11 = vsyncpa [#allocation5 + $0x1], 0 }
   0x6   :  { %12 = vsyncpa [#allocation8], 0 }
   0x7   :  { %13 = vsyncpa [#allocation11], 0 }
   0x8   :  { %14 = vsyncpa [#allocation6], 0 }
   0x9   :  { %16 = vsyncpa [#allocation6 + $0x1], 0  ;;  %s2451_s15 = smov 0   ;;  %s2453_s16 = smov 0  }
   0xa   :  { %s2455_s17 = smov 0   ;;  %s2457_s18 = smov 0  }
   0xb   :  { %s2459_s19 = smov 0   ;;  %s2461_s20 = smov 0  }
   0xc   :  { %s2463_s21 = smov 0   ;;  %s2465_s22 = smov 0  }
   0xd   :  { %s2467_s23 = smov 0   ;;  %s2469_s24 = smov 0  }
   0xe   :  { %s2471_s25 = smov 0  }
   0xf LB: > { %3439 = sst [smem:[#allocation17_spill]] %s2372_s15  ;;  %s1764_s26 = sadd.s32 4294967295, %s2412_s25   ;;  %s2412_s25 = sphi %s2471_s25, %s22_s25   ;;  %s2408_s24 = sphi %s2469_s24, %s3481_s24   ;;  %s2404_s23 = sphi %s2467_s23, %s3480_s23   ;;  %s2400_s22 = sphi %s2465_s22, %s3479_s22   ;;  %s2396_s21 = sphi %s2463_s21, %s3478_s21   ;;  %s2392_s20 = sphi %s2461_s20, %s3477_s20   ;;  %s2388_s19 = sphi %s2459_s19, %s3476_s19   ;;  %s2384_s18 = sphi %s2457_s18, %s3475_s18   ;;  %s2380_s17 = sphi %s2455_s17, %s3474_s17   ;;  %s2376_s16 = sphi %s2453_s16, %s3473_s16   ;;  %s2372_s15 = sphi %s2451_s15, %s3472_s15  }
  0x10   : > { %3440 = sst [smem:[#allocation18_spill]] %s2400_s22  ;;  %s1765_s27 = sadd.s32 4294967294, %s2412_s25  }
  0x11   : > { %p63_p0 = scmp.ne.s32.totalorder %s2388_s19, %s2384_s18  ;;  %p2507_p1 = scmp.eq.s32.totalorder %s1764_s26, 0 }
  0x12   : > { %p156_p2 = scmp.ne.s32.totalorder %s2380_s17, %s2376_s16  ;;  %p157_p4 = scmp.eq.s32.totalorder %s1764_s26, 3 }
  0x13   : > { %s3441_s28 = scalar_select %p2507_p1, 1, 0 }
  0x14   : > { %p2516_p3 = por %p2507_p1, %p63_p0  ;;  %p162_p5 = scmp.ne.s32.totalorder %s2376_s16, %s2372_s15 }
  0x15   : > { %p163_p6 = scmp.eq.s32.totalorder %s1765_s27, 3  ;;  %p2522_p7 = por %p157_p4, %p156_p2 }
  0x16   : > { %s3442_s30 = scalar_select %p2516_p3, 1, 0 }
  0x17   : > { %s3443_s5 = scalar_select %p2522_p7, 1, 0 }
  0x18   : > { %p1766_p8 = scmp.ge.s32.totalorder %s2412_s25, 1  ;;  %p2527_p9 = por %p163_p6, %p162_p5 }
  0x19   : > { %3444 = sst [smem:[#allocation19_spill]] %s3443_s5  ;;  %p170_p10 = scmp.lt.s32.totalorder %s2412_s25, 5 }
  0x1a   : > { %s3445_s6 = scalar_select %p2527_p9, 1, 0 }
  0x1b   : > { %p2532_p11 = pnand %p1766_p8, %p170_p10  ;;  %s2414_s8 = smov [#allocation7]  }
  0x1c   : > { %3446 = sst [smem:[#allocation20_spill]] %s3445_s6  ;;  %s185_s9 = sshll.u32 %s2414_s8, 4  ;;  %s2536_s9 = int_to_ptr.vmem [resolvable:$true] %s185_s9 }
  0x1d   : > { %s3447_s7 = scalar_select %p2532_p11, 1, 0 }
  0x1e   : > { %p2018_p12 = pneg %p2532_p11  ;;  %s2415_s11 = smov [#allocation9]  }
  0x1f   : > { %s199_s12 = sshll.u32 %s2415_s11, 4  ;;  %s2416_s13 = smov [#allocation10]   ;;  %s2546_s12 = int_to_ptr.vmem [resolvable:$true] %s199_s12 }
  0x20   : > { %p2542_p13 = pnand %p2018_p12, %p2507_p1  ;;  %s2548_s14 = sshll.u32 %s2416_s13, 4  ;;  %s211_s14 = int_to_ptr.vmem [resolvable:$true] %s2548_s14 }
  0x21   : > { %s3449_s1 = sld [smem:[#allocation21_spill]] }
  0x22   : > { %p2558_p2 = pneg %p2542_p13 }
  0x27   : > { %s2168_s27 = scalar_lea.hbm %s3449_s1, 2304 }
  0x28   : > { %p2169_p0 = scmp.ne.s32.totalorder %s3449_s1, %s2168_s27  ;;  %p2175_p6 = scmp.lt.u32.totalorder %s2168_s27, %s3449_s1 }
  0x2a   : > { %p2171_p4 = pnand %p2558_p2, %p2169_p0 }
  0x2c   : > { %p2172_p5 = pneg %p2171_p4 }
  0x2e   : > { %p2177_p8 = pnand %p2175_p6, %p2172_p5 }
  0x30   : > { %2180 = shalt.err (!%p2177_p8)
}
  0x31   : > { %s2181_s29 = scalar_lea.vmem %s2536_s9, 2304  ;;  %p2189_p7 = scmp.lt.s32.totalorder %s2536_s9, %s2536_s9 }
  0x32   : > { %p2182_p10 = scmp.ne.s32.totalorder %s2536_s9, %s2181_s29  ;;  %p2190_p1 = scmp.lt.s32.totalorder %s2181_s29, %s2181_s29 }
  0x34   : > { %p2184_p12 = pnand %p2182_p10, %p2558_p2  ;;  %p2191_p0 = por %p2190_p1, %p2189_p7 }
  0x36   : > { %p2185_p9 = pneg %p2184_p12 }
  0x38   : > { %p2192_p4 = pnand %p2191_p0, %p2185_p9 }
  0x3a   : > { %2195 = shalt.err (!%p2192_p4)
}
  0x3b   : > { %s3434_s18 = smov 64   ;;  %s3435_s26 = smov 4  }
  0x3c   : > { %2021 = dma.hbm_to_vmem [thread:$0]  (!%p2542_p13), %s3449_s1, 2304, %s2536_s9, [#allocation8], %s3434_s18, %s3434_s18, %s3435_s26  }
  0x3d   : > { %s3451_s2 = sld [smem:[#allocation22_spill]] }
  0x43   : > { %s2196_s29 = scalar_lea.hbm %s3451_s2, 16 }
  0x44   : > { %p2197_p1 = scmp.ne.s32.totalorder %s3451_s2, %s2196_s29  ;;  %p2203_p5 = scmp.lt.u32.totalorder %s2196_s29, %s3451_s2 }
  0x46   : > { %p2199_p7 = pnand %p2197_p1, %p2558_p2 }
  0x48   : > { %p2200_p9 = pneg %p2199_p7 }
  0x4a   : > { %p2205_p6 = pnand %p2203_p5, %p2200_p9 }
  0x4c   : > { %2208 = shalt.err (!%p2205_p6)
}
  0x4d   : > { %s2209_s9 = scalar_lea.vmem %s2546_s12, 16  ;;  %s2216_s4 = scalar_lea.vmem %s2546_s12, 32 }
  0x4e   : > { %p2210_p8 = scmp.ne.s32.totalorder %s2546_s12, %s2209_s9  ;;  %p2217_p0 = scmp.lt.s32.totalorder %s2546_s12, %s2546_s12 }
  0x4f   : > { %p2218_p4 = scmp.lt.s32.totalorder %s2216_s4, %s2209_s9 }
  0x50   : > { %p2212_p10 = pnand %p2210_p8, %p2558_p2 }
  0x51   : > { %p2219_p1 = por %p2218_p4, %p2217_p0 }
  0x52   : > { %p2213_p12 = pneg %p2212_p10 }
  0x54   : > { %p2220_p7 = pnand %p2219_p1, %p2213_p12 }
  0x56   : > { %2223 = shalt.err (!%p2220_p7)
}
  0x57   : > { %2024 = dma.hbm_to_vmem [thread:$0]  (!%p2542_p13), %s3451_s2, 16, %s2546_s12, [#allocation8]  }
  0x58   : > { %s2224_s8 = scalar_lea.hbm %s3422_s3, 16 }
  0x59   : > { %p2225_p9 = scmp.ne.s32.totalorder %s3422_s3, %s2224_s8  ;;  %p2231_p8 = scmp.lt.u32.totalorder %s2224_s8, %s3422_s3 }
  0x5b   : > { %p2227_p5 = pnand %p2225_p9, %p2558_p2 }
  0x5d   : > { %p2228_p6 = pneg %p2227_p5 }
  0x5f   : > { %p2233_p10 = pnand %p2231_p8, %p2228_p6 }
  0x61   : > { %2236 = shalt.err (!%p2233_p10)
}
  0x62   : > { %s2237_s4 = scalar_lea.vmem %s211_s14, 16  ;;  %s2244_s12 = scalar_lea.vmem %s211_s14, 32 }
  0x63   : > { %p2238_p12 = scmp.ne.s32.totalorder %s211_s14, %s2237_s4  ;;  %p2245_p1 = scmp.lt.s32.totalorder %s211_s14, %s211_s14 }
  0x64   : > { %p2246_p7 = scmp.lt.s32.totalorder %s2244_s12, %s2237_s4 }
  0x65   : > { %p2240_p0 = pnand %p2238_p12, %p2558_p2 }
  0x66   : > { %p2247_p3 = por %p2246_p7, %p2245_p1 }
  0x67   : > { %p2241_p4 = pneg %p2240_p0 }
  0x69   : > { %p2248_p11 = pnand %p2247_p3, %p2241_p4 }
  0x6b   : > { %2251 = shalt.err (!%p2248_p11)
}
  0x6c   : > { %2027 = dma.hbm_to_vmem [thread:$0]  (!%p2542_p13), %s3422_s3, 16, %s211_s14, [#allocation11]  }
  0x6d   : > { %s37_s6 = sadd.s32 1, %s2404_s23  ;;  %s41_s5 = sadd.s32 1, %s2408_s24 }
  0x6e   : > { %p39_p3 = scmp.ge.s32.totalorder %s37_s6, 2  ;;  %s50_s10 = sadd.s32 1, %s2392_s20 }
  0x6f   : > { %p57_p11 = scmp.ne.s32.totalorder %s2392_s20, %s2388_s19  ;;  %p58_p2 = scmp.eq.s32.totalorder %s2412_s25, 0 }
  0x70   : > { %s3483_s6 = smov (%p39_p3, %s37_s6), 0  ;;  %s3485_s5 = smov (!%p39_p3, %s41_s5), %s2408_s24 }
  0x71   : > { %s142_s27 = ssub.s32 %s2404_s23, %s3483_s6  ;;  %p43_p9 = scmp.ge.s32.totalorder %s3485_s5, 2 }
  0x72   : > { %p2039_p5 = scmp.lt.s32.totalorder %s2412_s25, 4  ;;  %p2637_p13 = por %p58_p2, %p57_p11 }
  0x73   : > { %s221_s8 = sand.u32 1, %s2392_s20   ;;  %s3487_s5 = smov (%p43_p9, %s3485_s5), 0 }
  0x74   : > { %s1999_s11 = smul.u32 216, %s221_s8  ;;  %s45_s13 = ssub.s32 %s2408_s24, %s3487_s5 }
  0x75   : > { %s2000_s29 = smul.u32 3456, %s2408_s24  ;;  %p48_p6 = scmp.eq.s32.totalorder %s45_s13, 0 }
  0x76   : > { %s143_s9 = sor.u32 %s142_s27, %s45_s13  ;;  %s3453_s12 = sadd.s32 1, %s2380_s17 }
  0x77   : > { %p144_p8 = scmp.eq.s32.totalorder %s143_s9, 0  ;;  %s2658_s26 = scalar_lea.hbm %s3419_s0, %s2000_s29 }
  0x78   : > { %s2648_s4 = scalar_select %p48_p6, %s2392_s20, %s50_s10  }
  0x79   : > { %s2653_s15 = scalar_select %p144_p8, %s2380_s17, %s3453_s12  }
  0x7a   : > { %s225_s1 = scalar_lea.vmem [#allocation4], %s1999_s11  ;;  %p2666_p10 = pnand %p2039_p5, %p2637_p13 }
  0x7b   : > { %s233_s2 = sshll.u32 %s225_s1, 4  ;;  %s2670_s27 = scalar_lea.sflag [#allocation5], %s221_s8  ;;  %s2660_s2 = int_to_ptr.vmem [resolvable:$true] %s233_s2 }
  0x7c   : > { %s2252_s18 = scalar_lea.hbm %s2658_s26, 3456  ;;  %p2254_p0 = pneg %p2666_p10 }
  0x7d   : > { %p2253_p12 = scmp.ne.s32.totalorder %s2658_s26, %s2252_s18  ;;  %s2257_s14 = scalar_lea.hbm %s3419_s0, 6912 }
  0x7e   : > { %p2258_p7 = scmp.lt.u32.totalorder %s2658_s26, %s3419_s0  ;;  %p2259_p3 = scmp.lt.u32.totalorder %s2257_s14, %s2252_s18 }
  0x7f   : > { %p2255_p4 = pnand %p2254_p0, %p2253_p12  ;;  %p2261_p2 = scmp.lt.u32.totalorder %s2252_s18, %s2658_s26 }
  0x80   : > { %p2260_p11 = por %p2259_p3, %p2258_p7 }
  0x81   : > { %p2256_p1 = pneg %p2255_p4 }
  0x82   : > { %p2262_p9 = por %p2261_p2, %p2260_p11 }
  0x84   : > { %p2263_p5 = pnand %p2262_p9, %p2256_p1 }
  0x86   : > { %2266 = shalt.err (!%p2263_p5)
}
  0x87   : > { %s2267_s8 = scalar_lea.vmem %s2660_s2, 3456  ;;  %s2419_s9 = smov [#allocation4]  }
  0x88   : > { %p2268_p13 = scmp.ne.s32.totalorder %s2660_s2, %s2267_s8  ;;  %s2272_s12 = sshll.u32 %s2419_s9, 4  ;;  %s2273_s12 = int_to_ptr.vmem [resolvable:$false] %s2272_s12 }
  0x89   : > { %s2274_s22 = scalar_lea.vmem %s2273_s12, 6912  ;;  %p2275_p12 = scmp.lt.s32.totalorder %s2660_s2, %s2273_s12 }
  0x8a   : > { %p2270_p6 = pnand %p2268_p13, %p2254_p0  ;;  %p2276_p4 = scmp.lt.s32.totalorder %s2274_s22, %s2267_s8 }
  0x8c   : > { %p2271_p8 = pneg %p2270_p6  ;;  %p2277_p7 = por %p2276_p4, %p2275_p12 }
  0x8e   : > { %p2278_p3 = pnand %p2277_p7, %p2271_p8 }
  0x90   : > { %2281 = shalt.err (!%p2278_p3)
}
  0x91   : > { %s3455_s18 = smov 4   ;;  %s3456_s1 = smov 64  }
  0x92   : > { %2031 = dma.hbm_to_vmem [thread:$0]  (!%p2666_p10), %s2658_s26, 3456, %s2660_s2, %s2670_s27, %s3456_s1, %s3456_s1, %s3455_s18  }
  0x93   : > { %p3457_p0 = scmp.ne.s32.totalorder %s3447_s7, 0 }
  0x94   : > { %s247_s11 = sand.u32 (!%p3457_p0), 1, %s2388_s19   ;;  %p3458_p1 = scmp.ne.s32.totalorder (!%p3457_p0), %s3442_s30, 0 }
  0x95   : > { %245 = sbr.rel (%p3457_p0) target bundleno = 646 (0x286), region = 36  ;;  %s248_s13 = scalar_lea.sflag (!%p3457_p0), [#allocation5], %s247_s11 }
  0x96   : > { %s2001_s14 = smul.u32 (!%p3457_p0), 216, %s247_s11 }
  0x98   : > { %s251_s29 = scalar_lea.vmem (!%p3457_p0), [#allocation4], %s2001_s14 }
  0x9c   : > { %2355 = dma.done.wait (%p3458_p1), %s248_s13, 3456  }
  0x9d   : > { %2357 = vsyncadd (%p3458_p1), %s248_s13, 4294963840  ;;  %p3459_p11 = scmp.ne.s32.totalorder %s3441_s28, 0 }
  0x9f   : > { %2359 = dma.done.wait (%p3459_p11), [#allocation8], 2320  }
  0xa0   : > { %2361 = vsyncadd (%p3459_p11), [#allocation8], 4294964976 }
  0xa1   : > { %2363 = dma.done.wait (%p3459_p11), [#allocation11], 16  }
  0xa2   : > { %2365 = vsyncadd (%p3459_p11), [#allocation11], 4294967280  ;;  %s1871_s2 = smul.u32 96, %s2396_s21  ;;  %vm841_vm0 = vcmask 1042432   ;;  %vm842_vm1 = vcmask 1046532   ;;  %vm295_vm2 = vcmask 261120  }
  0xa3   : > { %vm479_vm3 = vsmask.f32 3328  ;;  %vm480_vm4 = vsmask.f32 7440  ;;  %v2150_v8 = vld [vmem:[#allocation7 + $0x40] sm:$0xff]   ;;  %s2420_s28 = smov 64   ;;  %vm2769_vm5 = vmor %vm841_vm0, %vm842_vm1 }
  0xa4   : > { %s2717_s7 = scalar_lea.vmem %s251_s29, %s1871_s2 [#allocation4]  ;;  %v2151_v14 = vld [vmem:[#allocation7] sm:$0xff]   ;;  %1889 = vmatprep.subr.bf16.mxu0 %v2150_v8  ;;  %v2152_v26 = vld [vmem:[#allocation7 + $0x48] sm:$0xff]   ;;  %1983 = vmatprep.subr.bf16.mxu1 %v2150_v8  ;;  %s2421_s30 = smov 96   ;;  %vm2821_vm6 = vmor %vm479_vm3, %vm480_vm4  ;;  %vm470_vm7 = vcmask 785920   ;;  %vm432_vm8 = vcmask 1048320   ;;  %vm722_vm9 = vcmask 523520  }
  0xa5   : > { %v2720_v0 = vld [vmem:[%s2717_s7 + $0x18] sm:$0xf]  ;;  %v2723_v1 = vld [vmem:[%s2717_s7 + $0x1c] sm:$0xf]  ;;  %v2726_v2 = vld [vmem:[%s2717_s7 + $0x60] sm:$0xf]  ;;  %1890 = vmatpush3.bf16.msra.mxu0 %v2151_v14  ;;  %1991 = vmatpush3.bf16.msra.mxu1 %v2151_v14 }
  0xa6   : > { %v2730_v3 = vcombine.low %v2720_v0, %v2723_v1  ;;  %v531_v4 = vshrl.u32 %v2720_v0, 16  ;;  %v534_v5 = vshll.u32 %v2720_v0, 16  ;;  %v544_v6 = vshrl.u32 %v2723_v1, 16  ;;  %v2736_v7 = vld [vmem:[%s2717_s7 + $0x64] sm:$0xf]  ;;  %1891 = vmatprep.subr.bf16.mxu0 %v2152_v26  ;;  %1984 = vmatprep.subr.bf16.mxu1 %v2152_v26  ;;  %v2153_v53 = vld [vmem:[#allocation7 + $0x8] sm:$0xff]  }
  0xa7   : > { %v2740_v9 = vcombine.low %v2726_v2, %v2736_v7  ;;  %v732_v10 = vshrl.u32 %v2726_v2, 16  ;;  %v735_v11 = vshll.u32 %v2726_v2, 16  ;;  %v741_v12 = vshll.u32 %v2736_v7, 16  ;;  %v2746_v13 = vld [vmem:[%s2717_s7 + $0xc] sm:$0xf]  ;;  %v2154_v63 = vld [vmem:[#allocation7 + $0x50] sm:$0xff]  }
  0xa8   : > { %446 = vrot.lane.b32.xlu0 %v2730_v3, %s2420_s28  ;;  %v745_v15 = vshrl.u32 %v2736_v7, 16  ;;  %v2752_v16 = vld [vmem:[%s2717_s7 + $0x10] sm:$0xf]  ;;  %v507_v17 = vshrl.u32 %v2746_v13, 16  ;;  %v510_v18 = vshll.u32 %v2746_v13, 16  ;;  %v1801_v19 = vrot.slane %v2746_v13, 9 }
  0xa9   : > { %397 = vst.msk [vmem:[#allocation3 + $0x30] sm:$0xff] %vm295_vm2, %v2730_v3  ;;  %v734_v20 = vrot.slane %v732_v10, 4  ;;  %v737_v21 = vrot.slane %v735_v11, 5  ;;  %458 = vrot.lane.b32.xlu1 %v2740_v9, %s2420_s28  ;;  %v1781_v22 = vcombine.low %v2746_v13, %v2752_v16  ;;  %v520_v23 = vshrl.u32 %v2752_v16, 16  ;;  %v2765_v24 = vld [vmem:[%s2717_s7 + $0x14] sm:$0x1]  ;;  %1892 = vmatpush3.bf16.msra.mxu0 %v2153_v53 }
  0xaa   : > { %v2773_v27 = vrot.slane %v745_v15, 4  ;;  %v853_v28 = vrot.slane %v2752_v16, 5  ;;  %v856_v29 = vrot.slane %v2765_v24, 5  ;;  %v2778_v30 = vld [vmem:[%s2717_s7 + $0x54] sm:$0xf]  ;;  %v533_v31 = vrot.slane %v531_v4, 4  ;;  %1992 = vmatpush3.bf16.msra.mxu1 %v2153_v53  ;;  %1893 = vmatprep.subr.bf16.mxu0 %v2154_v63 }
  0xab   : > { %v2781_v32 = vld [vmem:[%s2717_s7 + $0x58] sm:$0xf]  ;;  %v651_v33 = vshrl.u32 %v2778_v30, 16  ;;  %v654_v34 = vshll.u32 %v2778_v30, 16  ;;  %v2786_v35 = vld [vmem:[%s2717_s7 + $0x20] sm:$0x1]  ;;  %v738_v36 = vor.u32 %v737_v21, %v734_v20  ;;  %1985 = vmatprep.subr.bf16.mxu1 %v2154_v63 }
  0xac   : > { %396 = vst.msk [vmem:[#allocation3 + $0x18] sm:$0xff] %vm295_vm2, %v1781_v22  ;;  %408 = vrot.lane.b32.xlu0 %v1781_v22, %s2421_s30  ;;  %v854_v37 = vsel %vm2769_vm5, %v1801_v19, %v853_v28  ;;  %v855_v38 = vrot.slane %v853_v28, 4  ;;  %v2794_v39 = vcombine.low %v2778_v30, %v2781_v32  ;;  %v664_v40 = vshrl.u32 %v2781_v32, 16  ;;  %v2798_v41 = vld [vmem:[%s2717_s7] sm:$0xf]  ;;  %s2422_s26 = smov 32  }
  0xad   : > { %v2801_v42 = vld [vmem:[%s2717_s7 + $0x4] sm:$0xf]  ;;  %v536_v43 = vrot.slane %v534_v5, 5  ;;  %v540_v44 = vshll.u32 %v2723_v1, 16  ;;  %v546_v45 = vrot.slane %v544_v6, 4  ;;  %v550_v46 = vshll.u32 %v2786_v35, 16 }
  0xae   : > { %v318_v47 = vld [vmem:[%s2717_s7 + $0x8] sm:$0x1]  ;;  %v857_v48 = vsel %vm2769_vm5, %v855_v38, %v856_v29  ;;  %v1800_v49 = vrot.slane %v2798_v41, 9  ;;  %v846_v50 = vrot.slane %v2801_v42, 5  ;;  %402 = vst.msk [vmem:[#allocation3 + $0xa8] sm:$0xff] %vm295_vm2, %v2794_v39  ;;  %v739_v61 = vrot.slane %v738_v36, 4 }
  0xaf   : > { %v849_v51 = vrot.slane %v318_v47, 5  ;;  %v2811_v52 = vld [vmem:[%s2717_s7 + $0x68] sm:$0x1]  ;;  %v2815_v54 = vcombine.low %v854_v37, %v857_v48  ;;  %v537_v55 = vor.u32 %v536_v43, %v533_v31  ;;  %v542_v56 = vrot.slane %v540_v44, 5  ;;  %v2155_v10 = vld [vmem:[#allocation7 + $0x10] sm:$0xff]   ;;  %s285_s10 = sand.u32 1, %s2376_s16  }
  0xb0   : > { %v552_v57 = vrot.slane %v550_v46, 5  ;;  %420 = vrot.lane.b32.xlu0 %v2794_v39, %s2421_s30  ;;  %v847_v59 = vsel %vm2769_vm5, %v1800_v49, %v846_v50  ;;  %v848_v60 = vrot.slane %v846_v50, 4  ;;  %v743_v62 = vrot.slane %v741_v12, 5  ;;  %v2840_v19 = vld [vmem:[%s2717_s7 + $0x48] sm:$0xf]  ;;  %1894 = vmatpush3.bf16.msra.mxu0 %v2155_v10  ;;  %s1776_s27 = sshll.u32 %s285_s10, 6 }
  0xb1   : > { %967 = vrot.lane.b32.xlu1 %v2815_v54, %s2422_s26  ;;  %v538_v4 = vrot.slane %v537_v55, 4  ;;  %v547_v5 = vor.u32 %v546_v45, %v542_v56  ;;  %v751_v6 = vshll.u32 %v2811_v52, 16  ;;  %v483_v8 = vshrl.u32 %v2798_v41, 16  ;;  %v2156_v20 = vld [vmem:[#allocation7 + $0x58] sm:$0xff]   ;;  %v2858_v53 = vld [vmem:[%s2717_s7 + $0x50] sm:$0x1]  ;;  %1993 = vmatpush3.bf16.msra.mxu1 %v2155_v10 }
  0xb2   : > { %v850_v11 = vsel %vm2769_vm5, %v848_v60, %v849_v51  ;;  %v744_v12 = vsel %vm2821_vm6, %v739_v61, %v743_v62  ;;  %v748_v14 = vor.u32 %v2773_v27, %v743_v62  ;;  %v486_v15 = vshll.u32 %v2798_v41, 16  ;;  %v2850_v44 = vld [vmem:[%s2717_s7 + $0x4c] sm:$0xf]  ;;  %1895 = vmatprep.subr.bf16.mxu0 %v2156_v20  ;;  %v2158_v55 = vld [vmem:[#allocation7 + $0x60] sm:$0xff]   ;;  %1986 = vmatprep.subr.bf16.mxu1 %v2156_v20  ;;  %s3268_s8 = scalar_lea.vmem [#allocation12], %s1776_s27  ;;  %s3464_s9 = sld [smem:[#allocation18_spill]] }
  0xb3   : > { %v543_v21 = vsel %vm2821_vm6, %v538_v4, %v542_v56  ;;  %v548_v22 = vrot.slane %v547_v5, 4  ;;  %v1808_v26 = vcombine.low %v847_v59, %v850_v11  ;;  %v753_v28 = vrot.slane %v751_v6, 5  ;;  %v2157_v46 = vld [vmem:[#allocation7 + $0x18] sm:$0xff]   ;;  %v2159_v4 = vld [vmem:[#allocation7 + $0x20] sm:$0xff]   ;;  %s1888_s12 = sshll.u32 %s2396_s21, 4  ;;  %s3465_s1 = sld [smem:[#allocation19_spill]] }
  0xb4   : > { %v749_v29 = vrot.slane %v748_v14, 4  ;;  %v485_v31 = vrot.slane %v483_v8, 4  ;;  %v488_v36 = vrot.slane %v486_v15, 5  ;;  %v492_v27 = vshll.u32 %v2801_v42, 16  ;;  %1896 = vmatpush3.bf16.msra.mxu0 %v2157_v46  ;;  %v2869_v8 = vld [vmem:[%s2717_s7 + $0x5c] sm:$0x1] }
  0xb5   : > { %v553_v37 = vsel %vm2821_vm6, %v548_v22, %v552_v57  ;;  %924 = vrot.lane.b32.xlu0 %v1808_v26, %s2420_s28  ;;  %v496_v38 = vshrl.u32 %v2801_v42, 16  ;;  %v502_v43 = vshll.u32 %v318_v47, 16  ;;  %v627_v45 = vshrl.u32 %v2840_v19, 16  ;;  %1897 = vmatprep.subr.bf16.mxu0 %v2158_v55  ;;  %v2876_v22 = vld [vmem:[%s2717_s7 + $0x24] sm:$0xf]  ;;  %v2165_v13 = vld [vmem:[#allocation7 + $0x38] sm:$0xff]  }
  0xb6   : > { %v2853_v48 = vcombine.low %v543_v21, %v553_v37  ;;  %v754_v49 = vsel %vm2821_vm6, %v749_v29, %v753_v28  ;;  %v489_v50 = vor.u32 %v488_v36, %v485_v31  ;;  %v494_v51 = vrot.slane %v492_v27, 5  ;;  %v2879_v26 = vld [vmem:[%s2717_s7 + $0x28] sm:$0xf]  ;;  %1994 = vmatpush3.bf16.msra.mxu1 %v2157_v46  ;;  %v2161_v28 = vld [vmem:[#allocation7 + $0x28] sm:$0xff]   ;;  %v2162_v37 = vld [vmem:[#allocation7 + $0x70] sm:$0xff]   ;;  %s1639_s14 = sshll.u32 %s3268_s8, 4  ;;  %s3350_s14 = int_to_ptr.vmem [resolvable:$true] %s1639_s14 }
  0xb7   : > { %v2860_v56 = vcombine.low %v744_v12, %v754_v49  ;;  %v498_v47 = vrot.slane %v496_v38, 4  ;;  %v504_v57 = vrot.slane %v502_v43, 5  ;;  %v629_v59 = vrot.slane %v627_v45, 4  ;;  %v2160_v12 = vld [vmem:[#allocation7 + $0x68] sm:$0xff]   ;;  %1987 = vmatprep.subr.bf16.mxu1 %v2158_v55  ;;  %v2891_v46 = vld [vmem:[%s2717_s7 + $0x70] sm:$0xf] }
  0xb8   : > { %801 = vrot.lane.b32.xlu1 %v2853_v48, %s2421_s30  ;;  %v490_v60 = vrot.slane %v489_v50, 4  ;;  %v630_v61 = vshll.u32 %v2840_v19, 16  ;;  %v636_v62 = vshll.u32 %v2850_v44, 16  ;;  %v640_v63 = vshrl.u32 %v2850_v44, 16  ;;  %v2888_v50 = vld [vmem:[%s2717_s7 + $0x6c] sm:$0xf]  ;;  %1898 = vmatpush3.bf16.msra.mxu0 %v2159_v4 }
  0xb9   : > { %v499_v5 = vor.u32 %v498_v47, %v494_v51  ;;  %v646_v6 = vshll.u32 %v2858_v53, 16  ;;  %v1807_v10 = vrot.slane %v2778_v30, 9  ;;  %v895_v11 = vrot.slane %v2781_v32, 5  ;;  %1899 = vmatprep.subr.bf16.mxu0 %v2160_v12  ;;  %s1867_s22 = sshll.u32 %s3464_s9, 5  ;;  %s3466_s29 = sld [smem:[#allocation23_spill]] }
  0xba   : > { %v495_v14 = vsel %vm2821_vm6, %v490_v60, %v494_v51  ;;  %v632_v15 = vrot.slane %v630_v61, 5  ;;  %v638_v20 = vrot.slane %v636_v62, 5  ;;  %v642_v21 = vrot.slane %v640_v63, 4  ;;  %1995 = vmatpush3.bf16.msra.mxu1 %v2159_v4  ;;  %s1636_s18 = sadd.s32 %s1888_s12, %s1867_s22  ;;  %p3467_p2 = scmp.ne.s32.totalorder %s3465_s1, 0 }
  0xbb   : > { %v500_v29 = vrot.slane %v499_v5, 4  ;;  %v648_v31 = vrot.slane %v646_v6, 5  ;;  %v896_v36 = vsel %vm2769_vm5, %v1807_v10, %v895_v11  ;;  %v897_v27 = vrot.slane %v895_v11, 4  ;;  %v2911_v10 = vld [vmem:[%s2717_s7 + $0x2c] sm:$0x1]  ;;  %1988 = vmatprep.subr.bf16.mxu1 %v2160_v12  ;;  %s1868_s11 = sshll.u32 %s1636_s18, 6 }
  0xbc   : > { %813 = vrot.lane.b32.xlu1 %v2860_v56, %s2421_s30  ;;  %v633_v38 = vor.u32 %v632_v15, %v629_v59  ;;  %v643_v43 = vor.u32 %v642_v21, %v638_v20  ;;  %v898_v45 = vrot.slane %v2869_v8, 5  ;;  %v1806_v49 = vrot.slane %v2840_v19, 9  ;;  %1900 = vmatpush3.bf16.msra.mxu0 %v2161_v28 }
  0xbd   : > { %v505_v51 = vsel %vm2821_vm6, %v500_v29, %v504_v57  ;;  %v888_v55 = vrot.slane %v2850_v44, 5  ;;  %v891_v47 = vrot.slane %v2858_v53, 5  ;;  %v2899_v59 = vcombine.low %v2876_v22, %v2879_v26  ;;  %1901 = vmatprep.subr.bf16.mxu0 %v2162_v37 }
  0xbe   : > { %v1790_v60 = vcombine.low %v495_v14, %v505_v51  ;;  %v634_v61 = vrot.slane %v633_v38, 4  ;;  %v644_v62 = vrot.slane %v643_v43, 4  ;;  %v899_v63 = vsel %vm2769_vm5, %v897_v27, %v898_v45  ;;  %1996 = vmatpush3.bf16.msra.mxu1 %v2161_v28  ;;  %v2164_v45 = vld [vmem:[#allocation7 + $0x78] sm:$0xff]  }
  0xbf   : > { %v2903_v5 = vcombine.low %v896_v36, %v899_v63  ;;  %v889_v57 = vsel %vm2769_vm5, %v1806_v49, %v888_v55  ;;  %v890_v6 = vrot.slane %v888_v55, 4  ;;  %v555_v53 = vshrl.u32 %v2876_v22, 16  ;;  %398 = vst.msk [vmem:[#allocation3 + $0x48] sm:$0xff] %vm295_vm2, %v2899_v59  ;;  %1989 = vmatprep.subr.bf16.mxu1 %v2162_v37  ;;  %s3348_s2 = scalar_lea.hbm %s3466_s29, %s1868_s11 }
  0xc0   : > { %698 = vrot.lane.b32.xlu0 %v1790_v60, %s2422_s26  ;;  %v639_v11 = vsel %vm2821_vm6, %v634_v61, %v638_v20  ;;  %v649_v4 = vsel %vm2821_vm6, %v644_v62, %v648_v31  ;;  %v558_v14 = vshll.u32 %v2876_v22, 16  ;;  %v568_v15 = vshrl.u32 %v2879_v26, 16  ;;  %v2163_v31 = vld [vmem:[#allocation7 + $0x30] sm:$0xff]  }
  0xc1   : > { %v2920_v21 = vcombine.low %v639_v11, %v649_v4  ;;  %1023 = vst.msk [vmem:[#allocation3 + $0x88] sm:$0xff] %vm295_vm2, %v2903_v5  ;;  %v892_v12 = vsel %vm2769_vm5, %v890_v6, %v891_v47  ;;  %v1789_v29 = vcombine.low %v2888_v50, %v2891_v46  ;;  %v775_v20 = vshrl.u32 %v2888_v50, 16  ;;  %1902 = vmatpush3.bf16.msra.mxu0 %v2163_v31 }
  0xc2   : > { %v2929_v36 = vcombine.low %v889_v57, %v892_v12  ;;  %v778_v27 = vshll.u32 %v2888_v50, 16  ;;  %v788_v38 = vshrl.u32 %v2891_v46, 16  ;;  %v1818_v43 = vrot.slane %v2888_v50, 9  ;;  %1903 = vmatprep.subr.bf16.mxu0 %v2164_v45  ;;  %1997 = vmatpush3.bf16.msra.mxu1 %v2163_v31  ;;  %v345_v12 = vld [vmem:[%s2717_s7 + $0x74] sm:$0x1] }
  0xc3   : > { %710 = vrot.lane.b32.xlu1 %v2920_v21, %s2422_s26  ;;  %v1002_v49 = vrot.slane %v2891_v46, 5  ;;  %v557_v51 = vrot.slane %v555_v53, 4  ;;  %v560_v55 = vrot.slane %v558_v14, 5  ;;  %v564_v47 = vshll.u32 %v2879_v26, 16  ;;  %1990 = vmatprep.subr.bf16.mxu1 %v2164_v45 }
  0xc4   : > { %979 = vrot.lane.b32.xlu0 %v2903_v5, %s2422_s26  ;;  %1022 = vst.msk [vmem:[#allocation3 + $0x70] sm:$0xff] %vm295_vm2, %v2929_v36  ;;  %v570_v60 = vrot.slane %v568_v15, 4  ;;  %v574_v28 = vshll.u32 %v2911_v10, 16  ;;  %v509_v50 = vrot.slane %v507_v17, 4  ;;  %v512_v61 = vrot.slane %v510_v18, 5 }
  0xc5   : > { %v2949_v62 = vsel %vm2769_vm5, %v1818_v43, %v1002_v49  ;;  %v1004_v37 = vrot.slane %v1002_v49, 4  ;;  %v561_v63 = vor.u32 %v560_v55, %v557_v51  ;;  %v566_v57 = vrot.slane %v564_v47, 5  ;;  %1904 = vmatpush3.bf16.msra.mxu0 %v2165_v13 }
  0xc6   : > { %v576_v6 = vrot.slane %v574_v28, 5  ;;  %v513_v53 = vor.u32 %v512_v61, %v509_v50  ;;  %v516_v11 = vshll.u32 %v2752_v16, 16  ;;  %v522_v17 = vrot.slane %v520_v23, 4  ;;  %1998 = vmatpush3.bf16.msra.mxu1 %v2165_v13 }
  0xc7   : > { %936 = vrot.lane.b32.xlu1 %v2929_v36, %s2420_s28  ;;  %v562_v18 = vrot.slane %v561_v63, 4  ;;  %v571_v4 = vor.u32 %v570_v60, %v566_v57  ;;  %v526_v14 = vshll.u32 %v2765_v24, 16  ;;  %v1802_v15 = vrot.slane %v2720_v0, 9 }
  0xc8   : > { %448 = vrot.lane.b32.xlu0 %v2899_v59, %s2420_s28  ;;  %v514_v43 = vrot.slane %v513_v53, 4  ;;  %v518_v49 = vrot.slane %v516_v11, 5  ;;  %v860_v16 = vrot.slane %v2723_v1, 5  ;;  %v863_v23 = vrot.slane %v2786_v35, 5 }
  0xc9   : > { %v567_v31 = vsel %vm2821_vm6, %v562_v18, %v566_v57  ;;  %v572_v51 = vrot.slane %v571_v4, 4  ;;  %v528_v55 = vrot.slane %v526_v14, 5  ;;  %v777_v24 = vrot.slane %v775_v20, 4 }
  0xca   : > { %v519_v0 = vsel %vm2821_vm6, %v514_v43, %v518_v49  ;;  %v523_v45 = vor.u32 %v522_v17, %v518_v49  ;;  %v861_v47 = vsel %vm2769_vm5, %v1802_v15, %v860_v16  ;;  %v862_v60 = vrot.slane %v860_v16, 4 }
  0xcb   : > { %410 = vrot.lane.b32.xlu1 %v2730_v3, %s2421_s30  ;;  %v577_v1 = vsel %vm2821_vm6, %v572_v51, %v576_v6  ;;  %v780_v35 = vrot.slane %v778_v27, 5  ;;  %v784_v28 = vshll.u32 %v2891_v46, 16  ;;  %v790_v20 = vrot.slane %v788_v38, 4  ;;  %v2988_v6 = vld [vmem:[%s2717_s7 + $0x30] sm:$0xf] }
  0xcc   : > { %460 = vrot.lane.b32.xlu0 %v1789_v29, %s2420_s28  ;;  %v2975_v50 = vcombine.low %v567_v31, %v577_v1  ;;  %v524_v61 = vrot.slane %v523_v45, 4  ;;  %v864_v63 = vsel %vm2769_vm5, %v862_v60, %v863_v23  ;;  %v794_v57 = vshll.u32 %v345_v12, 16 }
  0xcd   : > { %v2979_v53 = vcombine.low %v861_v47, %v864_v63  ;;  %v781_v3 = vor.u32 %v780_v35, %v777_v24  ;;  %v786_v11 = vrot.slane %v784_v28, 5  ;;  %v1005_v17 = vrot.slane %v345_v12, 5  ;;  %v3003_v12 = vld [vmem:[%s2717_s7 + $0x34] sm:$0xf] }
  0xce   : > { %v529_v27 = vsel %vm2821_vm6, %v524_v61, %v528_v55  ;;  %v796_v46 = vrot.slane %v794_v57, 5  ;;  %v653_v29 = vrot.slane %v651_v33, 4  ;;  %v656_v38 = vrot.slane %v654_v34, 5  ;;  %v3024_v55 = vld [vmem:[%s2717_s7 + $0x38] sm:$0x1] }
  0xcf   : > { %803 = vrot.lane.b32.xlu1 %v2975_v50, %s2421_s30  ;;  %v2992_v13 = vcombine.low %v519_v0, %v529_v27  ;;  %1018 = vst.msk [vmem:[#allocation3 + $0x10] sm:$0xff] %vm295_vm2, %v2979_v53  ;;  %v782_v18 = vrot.slane %v781_v3, 4  ;;  %v791_v4 = vor.u32 %v790_v20, %v786_v11  ;;  %v1006_v14 = vsel %vm2769_vm5, %v1004_v37, %v1005_v17 }
  0xd0   : > { %v1819_v33 = vcombine.low %v2949_v62, %v1006_v14  ;;  %v657_v15 = vor.u32 %v656_v38, %v653_v29  ;;  %v660_v30 = vshll.u32 %v2781_v32, 16  ;;  %v666_v34 = vrot.slane %v664_v40, 4  ;;  %v332_v38 = vld [vmem:[%s2717_s7 + $0x40] sm:$0xf] }
  0xd1   : > { %700 = vrot.lane.b32.xlu0 %v2992_v13, %s2422_s26  ;;  %v787_v43 = vsel %vm2821_vm6, %v782_v18, %v786_v11  ;;  %v792_v49 = vrot.slane %v791_v4, 4  ;;  %v670_v37 = vshll.u32 %v2869_v8, 16  ;;  %v1816_v62 = vrot.slane %v2726_v2, 9  ;;  %v331_v11 = vld [vmem:[%s2717_s7 + $0x3c] sm:$0xf]  ;;  %v3047_v18 = vld [vmem:[#allocation7 + $0x80] sm:$0xff]  }
  0xd2   : > { %1025 = vst.msk [vmem:[#allocation3 + $0xb8] sm:$0xff] %vm295_vm2, %v1819_v33  ;;  %v658_v16 = vrot.slane %v657_v15, 4  ;;  %v662_v23 = vrot.slane %v660_v30, 5  ;;  %v959_v32 = vrot.slane %v2736_v7, 5  ;;  %v962_v40 = vrot.slane %v2811_v52, 5  ;;  %1963 = vmatprep.subr.bf16.mxu1 %v3047_v18 }
  0xd3   : > { %969 = vrot.lane.b32.xlu1 %v2979_v53, %s2422_s26  ;;  %v797_v31 = vsel %vm2821_vm6, %v792_v49, %v796_v46  ;;  %v672_v51 = vrot.slane %v670_v37, 5  ;;  %v3020_v8 = vcombine.low %v2988_v6, %v3003_v12  ;;  %v579_v2 = vshrl.u32 %v2988_v6, 16 }
  0xd4   : > { %v1799_v24 = vcombine.low %v787_v43, %v797_v31  ;;  %v663_v7 = vsel %vm2821_vm6, %v658_v16, %v662_v23  ;;  %v667_v52 = vor.u32 %v666_v34, %v662_v23  ;;  %v960_v0 = vsel %vm2769_vm5, %v1816_v62, %v959_v32 }
  0xd5   : > { %422 = vrot.lane.b32.xlu0 %v2740_v9, %s2421_s30  ;;  %v961_v45 = vrot.slane %v959_v32, 4  ;;  %v582_v47 = vshll.u32 %v2988_v6, 16  ;;  %v592_v60 = vshrl.u32 %v3003_v12, 16  ;;  %399 = vst.msk [vmem:[#allocation3 + $0x60] sm:$0xff] %vm295_vm2, %v3020_v8  ;;  %v581_v1 = vrot.slane %v579_v2, 4 }
  0xd6   : > { %v668_v35 = vrot.slane %v667_v52, 4  ;;  %v588_v28 = vshll.u32 %v3003_v12, 16  ;;  %v598_v20 = vshll.u32 %v3024_v55, 16  ;;  %v1803_v61 = vrot.slane %v2876_v22, 9 }
  0xd7   : > { %815 = vrot.lane.b32.xlu1 %v1799_v24, %s2421_s30  ;;  %v963_v9 = vsel %vm2769_vm5, %v961_v45, %v962_v40  ;;  %v584_v63 = vrot.slane %v582_v47, 5  ;;  %v594_v57 = vrot.slane %v592_v60, 4  ;;  %v867_v3 = vrot.slane %v2879_v26, 5 }
  0xd8   : > { %v673_v17 = vsel %vm2821_vm6, %v668_v35, %v672_v51  ;;  %v1817_v27 = vcombine.low %v960_v0, %v963_v9  ;;  %v590_v46 = vrot.slane %v588_v28, 5  ;;  %v600_v29 = vrot.slane %v598_v20, 5 }
  0xd9   : > { %926 = vrot.lane.b32.xlu0 %v2815_v54, %s2420_s28  ;;  %v3051_v22 = vcombine.low %v663_v7, %v673_v17  ;;  %v585_v4 = vor.u32 %v584_v63, %v581_v1  ;;  %v868_v14 = vsel %vm2769_vm5, %v1803_v61, %v867_v3  ;;  %v869_v26 = vrot.slane %v867_v3, 4 }
  0xda   : > { %1024 = vst.msk [vmem:[#allocation3 + $0xa0] sm:$0xff] %vm295_vm2, %v1817_v27  ;;  %v595_v33 = vor.u32 %v594_v57, %v590_v46  ;;  %v870_v15 = vrot.slane %v2911_v10, 5  ;;  %v3057_v30 = vcombine.low %v331_v11, %v332_v38  ;;  %v603_v34 = vshrl.u32 %v331_v11, 16  ;;  %v333_v10 = vld [vmem:[%s2717_s7 + $0x44] sm:$0x1]  ;;  %s3356_s7 = scalar_lea.sflag [#allocation6], %s285_s10 }
  0xdb   : > { %712 = vrot.lane.b32.xlu1 %v3051_v22, %s2422_s26  ;;  %v586_v54 = vrot.slane %v585_v4, 4  ;;  %v606_v43 = vshll.u32 %v331_v11, 16  ;;  %v616_v49 = vshrl.u32 %v332_v38, 16  ;;  %v612_v37 = vshll.u32 %v332_v38, 16 }
  0xdc   : > { %v596_v62 = vrot.slane %v595_v33, 4  ;;  %v871_v16 = vsel %vm2769_vm5, %v869_v26, %v870_v15  ;;  %400 = vst.msk [vmem:[#allocation3 + $0x78] sm:$0xff] %vm295_vm2, %v3057_v30  ;;  %v605_v40 = vrot.slane %v603_v34, 4  ;;  %v1804_v7 = vrot.slane %v2988_v6, 9  ;;  %v2167_v34 = vld [vmem:[#allocation7 + $0x88] sm:$0xff]  }
  0xdd   : > { %981 = vrot.lane.b32.xlu0 %v1817_v27, %s2422_s26  ;;  %v591_v23 = vsel %vm2821_vm6, %v586_v54, %v590_v46  ;;  %v1811_v32 = vcombine.low %v868_v14, %v871_v16  ;;  %v608_v31 = vrot.slane %v606_v43, 5  ;;  %v614_v2 = vrot.slane %v612_v37, 5 }
  0xde   : > { %v601_v51 = vsel %vm2821_vm6, %v596_v62, %v600_v29  ;;  %v618_v24 = vrot.slane %v616_v49, 4  ;;  %v622_v52 = vshll.u32 %v333_v10, 16  ;;  %v874_v0 = vrot.slane %v3003_v12, 5 }
  0xdf   : > { %938 = vrot.lane.b32.xlu1 %v2903_v5, %s2420_s28  ;;  %1019 = vst.msk [vmem:[#allocation3 + $0x28] sm:$0xff] %vm295_vm2, %v1811_v32  ;;  %v877_v45 = vrot.slane %v3024_v55, 5  ;;  %v3078_v47 = vcombine.low %v591_v23, %v601_v51  ;;  %v1786_v60 = vcombine.low %v2840_v19, %v2850_v44  ;;  %v1805_v1 = vrot.slane %v331_v11, 9 }
  0xe0   : > { %v881_v35 = vrot.slane %v332_v38, 5  ;;  %v609_v6 = vor.u32 %v608_v31, %v605_v40  ;;  %v875_v5 = vsel %vm2769_vm5, %v1804_v7, %v874_v0  ;;  %v876_v28 = vrot.slane %v874_v0, 4 }
  0xe1   : > { %450 = vrot.lane.b32.xlu0 %v3020_v8, %s2420_s28  ;;  %v884_v20 = vrot.slane %v333_v10, 5  ;;  %v619_v61 = vor.u32 %v618_v24, %v614_v2  ;;  %401 = vst.msk [vmem:[#allocation3 + $0x90] sm:$0xff] %vm295_vm2, %v1786_v60  ;;  %v1780_v19 = vcombine.low %v2798_v41, %v2801_v42  ;;  %v624_v17 = vrot.slane %v622_v52, 5  ;;  %v1044_v24 = vld [vmem:[#allocation3 + $0x10] sm:$0xff] }
  0xe2   : > { %v882_v12 = vsel %vm2769_vm5, %v1805_v1, %v881_v35  ;;  %v883_v55 = vrot.slane %v881_v35, 4  ;;  %v878_v44 = vsel %vm2769_vm5, %v876_v28, %v877_v45  ;;  %v610_v3 = vrot.slane %v609_v6, 4 }
  0xe3   : > { %412 = vrot.lane.b32.xlu1 %v2899_v59, %s2421_s30  ;;  %v1812_v9 = vcombine.low %v875_v5, %v878_v44  ;;  %395 = vst.msk [vmem:[#allocation3] sm:$0xff] %vm295_vm2, %v1780_v19  ;;  %v620_v11 = vrot.slane %v619_v61, 4  ;;  %vm1605_vm10 = vcmask 257024  }
  0xe4   : > { %v885_v63 = vsel %vm2769_vm5, %v883_v55, %v884_v20  ;;  %v615_v25 = vsel %vm2821_vm6, %v610_v3, %v614_v2  ;;  %v1062_v3 = vld [vmem:[#allocation3 + $0xa0] sm:$0xff] }
  0xe5   : > { %805 = vrot.lane.b32.xlu0 %v3078_v47, %s2421_s30  ;;  %v1813_v57 = vcombine.low %v882_v12, %v885_v63  ;;  %1020 = vst.msk [vmem:[#allocation3 + $0x40] sm:$0xff] %vm295_vm2, %v1812_v9  ;;  %v625_v41 = vsel %vm2821_vm6, %v620_v11, %v624_v17 }
  0xe6   : > { %v3113_v42 = vcombine.low %v615_v25, %v625_v41 }
  0xe7   : > { %702 = vrot.lane.b32.xlu1 %v2853_v48, %s2422_s26  ;;  %1021 = vst.msk [vmem:[#allocation3 + $0x58] sm:$0xff] %vm295_vm2, %v1813_v57 }
  0xe9   : > { %971 = vrot.lane.b32.xlu0 %v1811_v32, %s2422_s26 }
  0xeb   : > { %928 = vrot.lane.b32.xlu1 %v2979_v53, %s2420_s28 }
  0xec   : > { %v1050_v1 = vld [vmem:[#allocation3 + $0x40] sm:$0xff] }
  0xed   : > { %452 = vrot.lane.b32.xlu0 %v3057_v30, %s2420_s28 }
  0xee   : > { %v1053_v12 = vld [vmem:[#allocation3 + $0x58] sm:$0xff] }
  0xef   : > { %414 = vrot.lane.b32.xlu1 %v3020_v8, %s2421_s30 }
  0xf1   : > { %807 = vrot.lane.b32.xlu0 %v3113_v42, %s2421_s30 }
  0xf3   : > { %704 = vrot.lane.b32.xlu1 %v2975_v50, %s2422_s26 }
  0xf5   : > { %973 = vrot.lane.b32.xlu0 %v1812_v9, %s2422_s26 }
  0xf7   : > { %930 = vrot.lane.b32.xlu1 %v1811_v32, %s2420_s28 }
  0xf9   : > { %454 = vrot.lane.b32.xlu0 %v1786_v60, %s2420_s28 }
  0xfb   : > { %416 = vrot.lane.b32.xlu1 %v3057_v30, %s2421_s30 }
  0xfd   : > { %809 = vrot.lane.b32.xlu0 %v2920_v21, %s2421_s30 }
  0xff   : > { %706 = vrot.lane.b32.xlu1 %v3078_v47, %s2422_s26 }
 0x101   : > { %975 = vrot.lane.b32.xlu0 %v1813_v57, %s2422_s26 }
 0x103   : > { %932 = vrot.lane.b32.xlu1 %v1812_v9, %s2420_s28 }
 0x105   : > { %456 = vrot.lane.b32.xlu0 %v2794_v39, %s2420_s28 }
 0x107   : > { %418 = vrot.lane.b32.xlu1 %v1786_v60, %s2421_s30  ;;  %v1047_v60 = vld [vmem:[#allocation3 + $0x28] sm:$0xff] }
 0x109   : > { %811 = vrot.lane.b32.xlu0 %v3051_v22, %s2421_s30  ;;  %s2282_s30 = scalar_lea.vmem %s3350_s14, 1024 }
 0x10a   : > { %p2283_p10 = scmp.ne.s32.totalorder %s3350_s14, %s2282_s30 }
 0x10b   : > { %708 = vrot.lane.b32.xlu1 %v3113_v42, %s2422_s26 }
 0x10c   : > { %p2284_p9 = pnand %p2283_p10, %p3467_p2 }
 0x10d   : > { %977 = vrot.lane.b32.xlu0 %v2929_v36, %s2422_s26  ;;  %s2424_s26 = smov [#allocation12]  }
 0x10e   : > { %p2285_p5 = pneg %p2284_p9  ;;  %s2286_s27 = sshll.u32 %s2424_s26, 4  ;;  %s2287_s27 = int_to_ptr.vmem [resolvable:$false] %s2286_s27 }
 0x10f   : > { %934 = vrot.lane.b32.xlu1 %v1813_v57, %s2420_s28  ;;  %v1059_v57 = vld [vmem:[#allocation3 + $0x88] sm:$0xff]  ;;  %s2288_s9 = scalar_lea.vmem %s2287_s27, 2048  ;;  %p2289_p13 = scmp.lt.s32.totalorder %s3350_s14, %s2287_s27 }
 0x110   : > { %p2290_p6 = scmp.lt.s32.totalorder %s2288_s9, %s2282_s30 }
 0x112   : > { %p2291_p8 = por %p2290_p6, %p2289_p13 }
 0x114   : > { %p2292_p12 = pnand %p2291_p8, %p2285_p5 }
 0x11a   : > { %v447_v58 = vpop.permute.xlu0 %446 }
 0x11b   : > { %471 = vst.msk [vmem:[#allocation3 + $0x8] sm:$0xff] %vm470_vm7, %v447_v58  ;;  %v459_v59 = vpop.permute.xlu1 %458  ;;  %v1065_v58 = vld [vmem:[#allocation3 + $0xb8] sm:$0xff] }
 0x11c   : > { %766 = vst.msk [vmem:[#allocation3 + $0x8] sm:$0xff] %vm295_vm2, %v2992_v13 }
 0x11d   : > { %477 = vst.msk [vmem:[#allocation3 + $0x98] sm:$0xff] %vm470_vm7, %v459_v59 }
 0x11e   : > { %772 = vst.msk [vmem:[#allocation3 + $0x98] sm:$0xff] %vm295_vm2, %v3051_v22  ;;  %v409_v39 = vpop.permute.xlu0 %408 }
 0x11f   : > { %433 = vst.msk [vmem:[#allocation3] sm:$0xff] %vm432_vm8, %v409_v39 }
 0x122   : > { %v421_v36 = vpop.permute.xlu0 %420 }
 0x123   : > { %439 = vst.msk [vmem:[#allocation3 + $0x90] sm:$0xff] %vm432_vm8, %v421_v36  ;;  %v968_v53 = vpop.permute.xlu1 %967 }
 0x127   : > { %v925_v13 = vpop.permute.xlu0 %924 }
 0x12a   : > { %v802_v8 = vpop.permute.xlu1 %801 }
 0x12b   : > { %825 = vst.msk [vmem:[#allocation3 + $0x8] sm:$0xff] %vm432_vm8, %v802_v8 }
 0x12c   : > { %991 = vst.msk [vmem:[#allocation3 + $0x8] sm:$0xff] %vm722_vm9, %v968_v53 }
 0x12e   : > { %v814_v27 = vpop.permute.xlu1 %813 }
 0x12f   : > { %831 = vst.msk [vmem:[#allocation3 + $0x98] sm:$0xff] %vm432_vm8, %v814_v27 }
 0x132   : > { %v699_v46 = vpop.permute.xlu0 %698 }
 0x133   : > { %723 = vst.msk [vmem:[#allocation3] sm:$0xff] %vm722_vm9, %v699_v46  ;;  %v1043_v29 = vld [vmem:[#allocation3 + $0x8] sm:$0xff] }
 0x134   : > { %948 = vst.msk [vmem:[#allocation3] sm:$0xff] %vm470_vm7, %v925_v13  ;;  %1266 = vmatprep.mubr.bf16.mxu0 %v1043_v29  ;;  %v2423_v29 = vmov 0.0  }
 0x135   : > { %v711_v38 = vpop.permute.xlu1 %710  ;;  %298 = vst.msk [vmem:[#allocation2 + $0x10] sm:$0xff] %vm295_vm2, %v2423_v29  ;;  %296 = vst.msk [vmem:[#allocation2] sm:$0xff] %vm295_vm2, %v2423_v29 }
 0x136   : > { %729 = vst.msk [vmem:[#allocation3 + $0x90] sm:$0xff] %vm722_vm9, %v711_v38  ;;  %v980_v22 = vpop.permute.xlu0 %979 }
 0x137   : > { %997 = vst.msk [vmem:[#allocation3 + $0x98] sm:$0xff] %vm722_vm9, %v980_v22 }
 0x138   : > { %297 = vst.msk [vmem:[#allocation2 + $0x8] sm:$0xff] %vm295_vm2, %v2423_v29  ;;  %299 = vst.msk [vmem:[#allocation2 + $0x18] sm:$0xff] %vm295_vm2, %v2423_v29 }
 0x139   : > { %v937_v4 = vpop.permute.xlu1 %936  ;;  %300 = vst.msk [vmem:[#allocation2 + $0x20] sm:$0xff] %vm295_vm2, %v2423_v29  ;;  %301 = vst.msk [vmem:[#allocation2 + $0x28] sm:$0xff] %vm295_vm2, %v2423_v29 }
 0x13a   : > { %954 = vst.msk [vmem:[#allocation3 + $0x90] sm:$0xff] %vm470_vm7, %v937_v4  ;;  %v449_v14 = vpop.permute.xlu0 %448 }
 0x13b   : > { %472 = vst.msk [vmem:[#allocation3 + $0x20] sm:$0xff] %vm470_vm7, %v449_v14  ;;  %v1042_v26 = vld [vmem:[#allocation3] sm:$0xff] }
 0x13c   : > { %767 = vst.msk [vmem:[#allocation3 + $0x20] sm:$0xff] %vm295_vm2, %v2853_v48  ;;  %1267 = vmatmul.mubr.bf16.vlgmr.msra.gmra.mrb[0].mxu0 %v1042_v26  ;;  %302 = vst.msk [vmem:[#allocation2 + $0x30] sm:$0xff] %vm295_vm2, %v2423_v29 }
 0x13d   : > { %v411_v33 = vpop.permute.xlu1 %410  ;;  %303 = vst.msk [vmem:[#allocation2 + $0x38] sm:$0xff] %vm295_vm2, %v2423_v29  ;;  %304 = vst.msk [vmem:[#allocation2 + $0x40] sm:$0xff] %vm295_vm2, %v2423_v29 }
 0x13e   : > { %434 = vst.msk [vmem:[#allocation3 + $0x18] sm:$0xff] %vm432_vm8, %v411_v33  ;;  %v461_v15 = vpop.permute.xlu0 %460  ;;  %v1061_v30 = vld [vmem:[#allocation3 + $0x98] sm:$0xff] }
 0x13f   : > { %478 = vst.msk [vmem:[#allocation3 + $0xb0] sm:$0xff] %vm470_vm7, %v461_v15  ;;  %1314 = vmatprep.mubr.bf16.mxu1 %v1061_v30 }
 0x140   : > { %773 = vst.msk [vmem:[#allocation3 + $0xb0] sm:$0xff] %vm295_vm2, %v2860_v56  ;;  %305 = vst.msk [vmem:[#allocation2 + $0x48] sm:$0xff] %vm295_vm2, %v2423_v29 }
 0x141   : > { %v804_v54 = vpop.permute.xlu1 %803  ;;  %v1060_v43 = vld [vmem:[#allocation3 + $0x90] sm:$0xff]  ;;  %306 = vst.msk [vmem:[#allocation2 + $0x50] sm:$0xff] %vm295_vm2, %v2423_v29  ;;  %307 = vst.msk [vmem:[#allocation2 + $0x58] sm:$0xff] %vm295_vm2, %v2423_v29 }
 0x142   : > { %826 = vst.msk [vmem:[#allocation3 + $0x20] sm:$0xff] %vm432_vm8, %v804_v54  ;;  %1315 = vmatmul.mubr.bf16.vlgmr.msra.gmra.mrb[0].mxu1 %v1060_v43 }
 0x143   : > { %v701_v49 = vpop.permute.xlu0 %700  ;;  %1964 = vmatpush3.bf16.msra.mxu1 %v3047_v18  ;;  %308 = vst.msk [vmem:[#allocation2 + $0x60] sm:$0xff] %vm295_vm2, %v2423_v29  ;;  %309 = vst.msk [vmem:[#allocation2 + $0x68] sm:$0xff] %vm295_vm2, %v2423_v29 }
 0x144   : > { %724 = vst.msk [vmem:[#allocation3 + $0x18] sm:$0xff] %vm722_vm9, %v701_v49  ;;  %1965 = vmatprep.subr.bf16.mxu1 %v2167_v34 }
 0x145   : > { %v970_v48 = vpop.permute.xlu1 %969  ;;  %310 = vst.msk [vmem:[#allocation2 + $0x70] sm:$0xff] %vm295_vm2, %v2423_v29  ;;  %311 = vst.msk [vmem:[#allocation2 + $0x78] sm:$0xff] %vm295_vm2, %v2423_v29 }
 0x146   : > { %992 = vst.msk [vmem:[#allocation3 + $0x20] sm:$0xff] %vm722_vm9, %v970_v48 }
 0x147   : > { %v423_v37 = vpop.permute.xlu0 %422  ;;  %1966 = vmatpush3.bf16.msra.mxu1 %v2167_v34 }
 0x148   : > { %440 = vst.msk [vmem:[#allocation3 + $0xa8] sm:$0xff] %vm432_vm8, %v423_v37 }
 0x149   : > { %v816_v56 = vpop.permute.xlu1 %815 }
 0x14a   : > { %832 = vst.msk [vmem:[#allocation3 + $0xb0] sm:$0xff] %vm432_vm8, %v816_v56 }
 0x14b   : > { %v927_v62 = vpop.permute.xlu0 %926 }
 0x14c   : > { %949 = vst.msk [vmem:[#allocation3 + $0x18] sm:$0xff] %vm470_vm7, %v927_v62 }
 0x14d   : > { %v713_v16 = vpop.permute.xlu1 %712  ;;  %v1046_v10 = vld [vmem:[#allocation3 + $0x20] sm:$0xff] }
 0x14e   : > { %730 = vst.msk [vmem:[#allocation3 + $0xa8] sm:$0xff] %vm722_vm9, %v713_v16  ;;  %1274 = vmatprep.mubr.bf16.mxu0 %v1046_v10 }
 0x14f   : > { %v982_v18 = vpop.permute.xlu0 %981 }
 0x150   : > { %998 = vst.msk [vmem:[#allocation3 + $0xb0] sm:$0xff] %vm722_vm9, %v982_v18 }
 0x151   : > { %v939_v23 = vpop.permute.xlu1 %938 }
 0x152   : > { %955 = vst.msk [vmem:[#allocation3 + $0xa8] sm:$0xff] %vm470_vm7, %v939_v23 }
 0x153   : > { %v451_v32 = vpop.permute.xlu0 %450  ;;  %v1045_v40 = vld [vmem:[#allocation3 + $0x18] sm:$0xff] }
 0x154   : > { %473 = vst.msk [vmem:[#allocation3 + $0x38] sm:$0xff] %vm470_vm7, %v451_v32  ;;  %1275 = vmatmul.mubr.bf16.gmra.mrb[4].mxu0 %v1045_v40 }
 0x155   : > { %768 = vst.msk [vmem:[#allocation3 + $0x38] sm:$0xff] %vm295_vm2, %v2975_v50  ;;  %v413_v31 = vpop.permute.xlu1 %412 }
 0x156   : > { %435 = vst.msk [vmem:[#allocation3 + $0x30] sm:$0xff] %vm432_vm8, %v413_v31 }
 0x157   : > { %v806_v51 = vpop.permute.xlu0 %805  ;;  %v1064_v2 = vld [vmem:[#allocation3 + $0xb0] sm:$0xff] }
 0x158   : > { %827 = vst.msk [vmem:[#allocation3 + $0x38] sm:$0xff] %vm432_vm8, %v806_v51  ;;  %1322 = vmatprep.mubr.bf16.mxu1 %v1064_v2  ;;  %v1028_v2 = vld [vmem:[#allocation2 + $0x10] sm:$0xff] }
 0x159   : > { %v703_v7 = vpop.permute.xlu1 %702  ;;  %v1063_v52 = vld [vmem:[#allocation3 + $0xa8] sm:$0xff] }
 0x15a   : > { %725 = vst.msk [vmem:[#allocation3 + $0x30] sm:$0xff] %vm722_vm9, %v703_v7  ;;  %1323 = vmatmul.mubr.bf16.gmra.mrb[4].mxu1 %v1063_v52  ;;  %v1026_v52 = vld [vmem:[#allocation2] sm:$0xff] }
 0x15b   : > { %v972_v0 = vpop.permute.xlu0 %971  ;;  %1967 = vmatprep.mubr.msk.bf16.mxu1 %vm295_vm2, %v1044_v24 }
 0x15c   : > { %993 = vst.msk [vmem:[#allocation3 + $0x38] sm:$0xff] %vm722_vm9, %v972_v0 }
 0x15d   : > { %v929_v50 = vpop.permute.xlu1 %928 }
 0x15e   : > { %950 = vst.msk [vmem:[#allocation3 + $0x30] sm:$0xff] %vm470_vm7, %v929_v50 }
 0x15f   : > { %v453_v45 = vpop.permute.xlu0 %452 }
 0x160   : > { %474 = vst.msk [vmem:[#allocation3 + $0x50] sm:$0xff] %vm470_vm7, %v453_v45  ;;  %v1029_v45 = vld [vmem:[#allocation2 + $0x18] sm:$0xff] }
 0x161   : > { %769 = vst.msk [vmem:[#allocation3 + $0x50] sm:$0xff] %vm295_vm2, %v3078_v47  ;;  %v415_v35 = vpop.permute.xlu1 %414  ;;  %v1056_v47 = vld [vmem:[#allocation3 + $0x70] sm:$0xff] }
 0x162   : > { %436 = vst.msk [vmem:[#allocation3 + $0x48] sm:$0xff] %vm432_vm8, %v415_v35  ;;  %1968 = vmatmul.mubr.msk.bf16.vlgmr.msra.gmra.mrb[8].mxu1 %vm295_vm2, %v1047_v60 }
 0x163   : > { %v808_v6 = vpop.permute.xlu0 %807  ;;  %v1049_v5 = vld [vmem:[#allocation3 + $0x38] sm:$0xff]  ;;  %1971 = vmatprep.mubr.msk.bf16.mxu1 %vm295_vm2, %v1050_v1 }
 0x164   : > { %828 = vst.msk [vmem:[#allocation3 + $0x50] sm:$0xff] %vm432_vm8, %v808_v6  ;;  %1282 = vmatprep.mubr.bf16.mxu0 %v1049_v5  ;;  %v1027_v6 = vld [vmem:[#allocation2 + $0x8] sm:$0xff] }
 0x165   : > { %v705_v28 = vpop.permute.xlu1 %704  ;;  %v1048_v20 = vld [vmem:[#allocation3 + $0x30] sm:$0xff] }
 0x166   : > { %726 = vst.msk [vmem:[#allocation3 + $0x48] sm:$0xff] %vm722_vm9, %v705_v28  ;;  %1283 = vmatmul.mubr.bf16.gmra.mrb[8].mxu0 %v1048_v20 }
 0x167   : > { %v974_v61 = vpop.permute.xlu0 %973 }
 0x168   : > { %994 = vst.msk [vmem:[#allocation3 + $0x50] sm:$0xff] %vm722_vm9, %v974_v61 }
 0x169   : > { %v931_v55 = vpop.permute.xlu1 %930 }
 0x16a   : > { %951 = vst.msk [vmem:[#allocation3 + $0x48] sm:$0xff] %vm470_vm7, %v931_v55  ;;  %1972 = vmatmul.mubr.msk.bf16.gmra.mrb[12].mxu1 %vm295_vm2, %v1053_v12 }
 0x16b   : > { %v455_v19 = vpop.permute.xlu0 %454  ;;  %1975 = vmatprep.mubr.msk.bf16.mxu1 %vm295_vm2, %v1056_v47 }
 0x16c   : > { %475 = vst.msk [vmem:[#allocation3 + $0x68] sm:$0xff] %vm470_vm7, %v455_v19 }
 0x16d   : > { %770 = vst.msk [vmem:[#allocation3 + $0x68] sm:$0xff] %vm295_vm2, %v3113_v42  ;;  %v417_v44 = vpop.permute.xlu1 %416 }
 0x16e   : > { %437 = vst.msk [vmem:[#allocation3 + $0x60] sm:$0xff] %vm432_vm8, %v417_v44 }
 0x16f   : > { %v810_v9 = vpop.permute.xlu0 %809  ;;  %v1052_v63 = vld [vmem:[#allocation3 + $0x50] sm:$0xff] }
 0x170   : > { %829 = vst.msk [vmem:[#allocation3 + $0x68] sm:$0xff] %vm432_vm8, %v810_v9  ;;  %1290 = vmatprep.mubr.bf16.mxu0 %v1052_v63 }
 0x171   : > { %v707_v11 = vpop.permute.xlu1 %706  ;;  %v1051_v17 = vld [vmem:[#allocation3 + $0x48] sm:$0xff] }
 0x172   : > { %727 = vst.msk [vmem:[#allocation3 + $0x60] sm:$0xff] %vm722_vm9, %v707_v11  ;;  %1291 = vmatmul.mubr.bf16.gmra.mrb[12].mxu0 %v1051_v17  ;;  %1976 = vmatmul.mubr.msk.bf16.gmra.mrb[16].mxu1 %vm295_vm2, %v1059_v57  ;;  %v3243_v17 = vld [vmem:[#allocation9] ss:$0 sm:$0xff] }
 0x173   : > { %v976_v25 = vpop.permute.xlu0 %975  ;;  %1979 = vmatprep.mubr.msk.bf16.mxu1 %vm295_vm2, %v1062_v3  ;;  %v1030_v3 = vld [vmem:[#allocation2 + $0x20] sm:$0xff] }
 0x174   : > { %995 = vst.msk [vmem:[#allocation3 + $0x68] sm:$0xff] %vm722_vm9, %v976_v25 }
 0x175   : > { %v933_v41 = vpop.permute.xlu1 %932 }
 0x176   : > { %952 = vst.msk [vmem:[#allocation3 + $0x60] sm:$0xff] %vm470_vm7, %v933_v41 }
 0x177   : > { %v457_v42 = vpop.permute.xlu0 %456 }
 0x178   : > { %476 = vst.msk [vmem:[#allocation3 + $0x80] sm:$0xff] %vm470_vm7, %v457_v42  ;;  %v1031_v42 = vld [vmem:[#allocation2 + $0x28] sm:$0xff] }
 0x179   : > { %771 = vst.msk [vmem:[#allocation3 + $0x80] sm:$0xff] %vm295_vm2, %v2920_v21  ;;  %v419_v59 = vpop.permute.xlu1 %418 }
 0x17a   : > { %438 = vst.msk [vmem:[#allocation3 + $0x78] sm:$0xff] %vm432_vm8, %v419_v59  ;;  %1980 = vmatmul.mubr.msk.bf16.gmra.mrb[20].mxu1 %vm295_vm2, %v1065_v58 }
 0x17b   : > { %v812_v39 = vpop.permute.xlu0 %811  ;;  %v1055_v36 = vld [vmem:[#allocation3 + $0x68] sm:$0xff] }
 0x17c   : > { %830 = vst.msk [vmem:[#allocation3 + $0x80] sm:$0xff] %vm432_vm8, %v812_v39  ;;  %1298 = vmatprep.mubr.bf16.mxu0 %v1055_v36  ;;  %v3246_v39 = vld [vmem:[#allocation10] ss:$0 sm:$0xff] }
 0x17d   : > { %v709_v53 = vpop.permute.xlu1 %708  ;;  %v1054_v8 = vld [vmem:[#allocation3 + $0x60] sm:$0xff] }
 0x17e   : > { %728 = vst.msk [vmem:[#allocation3 + $0x78] sm:$0xff] %vm722_vm9, %v709_v53  ;;  %1299 = vmatmul.mubr.bf16.gmra.mrb[16].mxu0 %v1054_v8 }
 0x17f   : > { %v978_v13 = vpop.permute.xlu0 %977 }
 0x180   : > { %996 = vst.msk [vmem:[#allocation3 + $0x80] sm:$0xff] %vm722_vm9, %v978_v13 }
 0x181   : > { %v935_v27 = vpop.permute.xlu1 %934 }
 0x182   : > { %953 = vst.msk [vmem:[#allocation3 + $0x78] sm:$0xff] %vm470_vm7, %v935_v27 }
 0x187   : > { %v1058_v21 = vld [vmem:[#allocation3 + $0x80] sm:$0xff] }
 0x188   : > { %1306 = vmatprep.mubr.bf16.mxu0 %v1058_v21 }
 0x189   : > { %v1057_v46 = vld [vmem:[#allocation3 + $0x78] sm:$0xff] }
 0x18a   : > { %1307 = vmatmul.mubr.bf16.gmra.mrb[20].mxu0 %v1057_v46 }
 0x20f   : > { %v1905_v38 = vpop.f32.mrb[0].mxu0 }
 0x210   : > { %v1906_v22 = vpop.f32.mrb[1].mxu0 }
 0x211   : > { %v1907_v4 = vadd.f32 %v1906_v22, %v1905_v38  ;;  %v1908_v14 = vpop.f32.mrb[2].mxu0 }
 0x212   : > { %v1909_v26 = vpop.f32.mrb[3].mxu0 }
 0x213   : > { %v1910_v33 = vadd.f32 %v1909_v26, %v1908_v14 }
 0x215   : > { %v1941_v15 = vpop.f32.mrb[0].mxu1 }
 0x216   : > { %v1942_v30 = vpop.f32.mrb[1].mxu1 }
 0x217   : > { %v3231_v34 = vadd.f32 %v1942_v30, %v1941_v15  ;;  %v1944_v54 = vpop.f32.mrb[2].mxu1 }
 0x218   : > { %v1945_v43 = vpop.f32.mrb[3].mxu1 }
 0x219   : > { %v3233_v49 = vadd.f32 %v1945_v43, %v1944_v54 }
 0x227   : > { %v1911_v48 = vpop.f32.mrb[4].mxu0 }
 0x228   : > { %v1912_v37 = vpop.f32.mrb[5].mxu0 }
 0x229   : > { %v1913_v56 = vadd.f32 %v1912_v37, %v1911_v48  ;;  %v1914_v62 = vpop.f32.mrb[6].mxu0 }
 0x22a   : > { %v1915_v16 = vpop.f32.mrb[7].mxu0 }
 0x22b   : > { %v1916_v10 = vadd.f32 %v1915_v16, %v1914_v62 }
 0x22d   : > { %v1947_v18 = vpop.f32.mrb[4].mxu1 }
 0x22e   : > { %v1948_v23 = vpop.f32.mrb[5].mxu1 }
 0x22f   : > { %v3235_v32 = vadd.f32 %v1948_v23, %v1947_v18  ;;  %v1950_v40 = vpop.f32.mrb[6].mxu1  ;;  %v1032_v23 = vld [vmem:[#allocation2 + $0x30] sm:$0xff] }
 0x230   : > { %v1951_v31 = vpop.f32.mrb[7].mxu1 }
 0x231   : > { %v3237_v51 = vadd.f32 %v1951_v31, %v1950_v40 }
 0x235   : > { %v1969_v24 = vpop.f32.mrb[8].mxu1 }
 0x236   : > { %v1374_v7 = vadd.f32 %v1969_v24, %v1913_v56  ;;  %v1365_v0 = vpop.f32.mrb[9].mxu1 }
 0x237   : > { %v1366_v50 = vadd.f32 %v1907_v4, %v1365_v0  ;;  %v1970_v60 = vpop.f32.mrb[10].mxu1 }
 0x238   : > { %v1430_v1 = vadd.f32 %v1374_v7, %v1028_v2  ;;  %v1377_v35 = vadd.f32 %v1970_v60, %v1916_v10  ;;  %v1368_v5 = vpop.f32.mrb[11].mxu1 }
 0x239   : > { %v1428_v28 = vadd.f32 %v1366_v50, %v1026_v52  ;;  %v1369_v20 = vadd.f32 %v1910_v33, %v1368_v5  ;;  %v1917_v61 = vpop.f32.mrb[8].mxu0 }
 0x23a   : > { %1446 = vst.msk [vmem:[#allocation2 + $0x10] sm:$0xff] %vm295_vm2, %v1430_v1  ;;  %v1431_v12 = vadd.f32 %v1377_v35, %v1029_v45  ;;  %v1918_v47 = vpop.f32.mrb[9].mxu0  ;;  %v1033_v45 = vld [vmem:[#allocation2 + $0x38] sm:$0xff] }
 0x23b   : > { %1444 = vst.msk [vmem:[#allocation2] sm:$0xff] %vm295_vm2, %v1428_v28  ;;  %v1429_v55 = vadd.f32 %v1369_v20, %v1027_v6  ;;  %v1919_v19 = vadd.f32 %v1918_v47, %v1917_v61  ;;  %v1920_v44 = vpop.f32.mrb[10].mxu0 }
 0x23c   : > { %1447 = vst.msk [vmem:[#allocation2 + $0x18] sm:$0xff] %vm295_vm2, %v1431_v12  ;;  %v1921_v9 = vpop.f32.mrb[11].mxu0  ;;  %v1040_v12 = vld [vmem:[#allocation2 + $0x70] sm:$0xff] }
 0x23d   : > { %1445 = vst.msk [vmem:[#allocation2 + $0x8] sm:$0xff] %vm295_vm2, %v1429_v55  ;;  %v1922_v63 = vadd.f32 %v1921_v9, %v1920_v44  ;;  %v1973_v57 = vpop.f32.mrb[12].mxu1 }
 0x23e   : > { %v1381_v11 = vpop.f32.mrb[13].mxu1 }
 0x23f   : > { %v1382_v25 = vadd.f32 %v1919_v19, %v1381_v11  ;;  %v1974_v41 = vpop.f32.mrb[14].mxu1  ;;  %v1038_v19 = vld [vmem:[#allocation2 + $0x60] sm:$0xff] }
 0x240   : > { %v1384_v58 = vpop.f32.mrb[15].mxu1 }
 0x241   : > { %v1465_v59 = vld [vmem:[#allocation2 + $0x10] sm:$0xff]  ;;  %v1432_v36 = vadd.f32 %v1382_v25, %v1030_v3  ;;  %v1385_v53 = vadd.f32 %v1922_v63, %v1384_v58  ;;  %v1041_v3 = vld [vmem:[#allocation2 + $0x78] sm:$0xff] }
 0x242   : > { %v1488_v8 = vmul.f32 %v3243_v17, %v1465_v59  ;;  %v1463_v13 = vld [vmem:[#allocation2] sm:$0xff] }
 0x243   : > { %v1486_v27 = vmul.f32 %v3243_v17, %v1463_v13  ;;  %v1466_v21 = vld [vmem:[#allocation2 + $0x18] sm:$0xff]  ;;  %1448 = vst.msk [vmem:[#allocation2 + $0x20] sm:$0xff] %vm295_vm2, %v1432_v36  ;;  %v1433_v46 = vadd.f32 %v1385_v53, %v1031_v42  ;;  %v1039_v42 = vld [vmem:[#allocation2 + $0x68] sm:$0xff] }
 0x244   : > { %v1511_v29 = vadd.f32 %v3246_v39, %v1488_v8  ;;  %v1489_v38 = vmul.f32 %v3243_v17, %v1466_v21  ;;  %v1464_v22 = vld [vmem:[#allocation2 + $0x8] sm:$0xff] }
 0x245   : > { %v1509_v4 = vadd.f32 %v3246_v39, %v1486_v27  ;;  %v1487_v14 = vmul.f32 %v3243_v17, %v1464_v22  ;;  %1449 = vst.msk [vmem:[#allocation2 + $0x28] sm:$0xff] %vm295_vm2, %v1433_v46  ;;  %v1923_v26 = vpop.f32.mrb[12].mxu0  ;;  %v3258_v33 = vpop.f32.mrb[16].mxu1 }
 0x246   : > { %v1527_v15 = vmax.f32 %v1511_v29, 0.0  ;;  %v1512_v30 = vadd.f32 %v3246_v39, %v1489_v38  ;;  %v1924_v54 = vpop.f32.mrb[13].mxu0  ;;  %v3261_v43 = vpop.f32.mrb[17].mxu1  ;;  %v1034_v38 = vld [vmem:[#allocation2 + $0x40] sm:$0xff] }
 0x247   : > { %v1525_v48 = vmax.f32 %v1509_v4, 0.0  ;;  %v1510_v37 = vadd.f32 %v3246_v39, %v1487_v14  ;;  %v1925_v56 = vadd.f32 %v1924_v54, %v1923_v26  ;;  %v1926_v62 = vpop.f32.mrb[14].mxu0  ;;  %v3264_v16 = vpop.f32.mrb[18].mxu1 }
 0x248   : > { %v1874_v10 = vpack.c.bf16 %v1527_v15, %v1527_v15  ;;  %v1528_v18 = vmax.f32 %v1512_v30, 0.0  ;;  %v1927_v40 = vpop.f32.mrb[15].mxu0  ;;  %v3266_v31 = vpop.f32.mrb[19].mxu1  ;;  %v1035_v15 = vld [vmem:[#allocation2 + $0x48] sm:$0xff] }
 0x249   : > { %v1872_v2 = vpack.c.bf16 %v1525_v48, %v1525_v48  ;;  %v1526_v24 = vmax.f32 %v1510_v37, 0.0  ;;  %v1390_v7 = vadd.f32 %v1973_v57, %v1925_v56  ;;  %v1928_v52 = vadd.f32 %v1927_v40, %v1926_v62 }
 0x24a   : > { %1608 = vst.msk [vmem:[%s3268_s8 + $0x8] sm:$0xf] %vm1605_vm10, %v1874_v10  ;;  %v1875_v0 = vpack.c.bf16 %v1528_v18, %v1528_v18  ;;  %v1467_v50 = vld [vmem:[#allocation2 + $0x20] sm:$0xff] }
 0x24b   : > { %1606 = vst.msk [vmem:[%s3268_s8] sm:$0xf] %vm1605_vm10, %v1872_v2  ;;  %v1873_v60 = vpack.c.bf16 %v1526_v24, %v1526_v24  ;;  %v1490_v1 = vmul.f32 %v3243_v17, %v1467_v50  ;;  %v1434_v35 = vadd.f32 %v1390_v7, %v1032_v23  ;;  %v1393_v6 = vadd.f32 %v1974_v41, %v1928_v52 }
 0x24c   : > { %1609 = vst.msk [vmem:[%s3268_s8 + $0xc] sm:$0xf] %vm1605_vm10, %v1875_v0  ;;  %v1468_v5 = vld [vmem:[#allocation2 + $0x28] sm:$0xff] }
 0x24d   : > { %1607 = vst.msk [vmem:[%s3268_s8 + $0x4] sm:$0xf] %vm1605_vm10, %v1873_v60  ;;  %v1513_v28 = vadd.f32 %v3246_v39, %v1490_v1  ;;  %v1491_v20 = vmul.f32 %v3243_v17, %v1468_v5  ;;  %v1435_v61 = vadd.f32 %v1393_v6, %v1033_v45  ;;  %v1981_v47 = vpop.f32.mrb[20].mxu1 }
 0x24e   : > { %1450 = vst.msk [vmem:[#allocation2 + $0x30] sm:$0xff] %vm295_vm2, %v1434_v35  ;;  %v1422_v55 = vadd.f32 %v1981_v47, %v3235_v32  ;;  %v1413_v44 = vpop.f32.mrb[21].mxu1 }
 0x24f   : > { %v1529_v9 = vmax.f32 %v1513_v28, 0.0  ;;  %v1514_v63 = vadd.f32 %v3246_v39, %v1491_v20  ;;  %1451 = vst.msk [vmem:[#allocation2 + $0x38] sm:$0xff] %vm295_vm2, %v1435_v61  ;;  %v1414_v57 = vadd.f32 %v3231_v34, %v1413_v44  ;;  %v1982_v11 = vpop.f32.mrb[22].mxu1  ;;  %v1036_v44 = vld [vmem:[#allocation2 + $0x50] sm:$0xff] }
 0x250   : > { %v1442_v25 = vadd.f32 %v1422_v55, %v1040_v12  ;;  %v1425_v41 = vadd.f32 %v1982_v11, %v3237_v51  ;;  %v1416_v58 = vpop.f32.mrb[23].mxu1 }
 0x251   : > { %v1876_v59 = vpack.c.bf16 %v1529_v9, %v1529_v9  ;;  %v1530_v36 = vmax.f32 %v1514_v63, 0.0  ;;  %v1440_v32 = vadd.f32 %v1414_v57, %v1038_v19  ;;  %v1417_v53 = vadd.f32 %v3233_v49, %v1416_v58  ;;  %v1929_v8 = vpop.f32.mrb[16].mxu0 }
 0x252   : > { %1458 = vst.msk [vmem:[#allocation2 + $0x70] sm:$0xff] %vm295_vm2, %v1442_v25  ;;  %v1443_v13 = vadd.f32 %v1425_v41, %v1041_v3  ;;  %v1930_v27 = vpop.f32.mrb[17].mxu0 }
 0x253   : > { %1610 = vst.msk [vmem:[%s3268_s8 + $0x10] sm:$0xf] %vm1605_vm10, %v1876_v59  ;;  %v1877_v34 = vpack.c.bf16 %v1530_v36, %v1530_v36  ;;  %v1441_v21 = vadd.f32 %v1417_v53, %v1039_v42  ;;  %v1931_v51 = vadd.f32 %v1930_v27, %v1929_v8  ;;  %v1932_v46 = vpop.f32.mrb[18].mxu0  ;;  %v1037_v53 = vld [vmem:[#allocation2 + $0x58] sm:$0xff] }
 0x254   : > { %1456 = vst.msk [vmem:[#allocation2 + $0x60] sm:$0xff] %vm295_vm2, %v1440_v32  ;;  %1459 = vst.msk [vmem:[#allocation2 + $0x78] sm:$0xff] %vm295_vm2, %v1443_v13  ;;  %v1933_v22 = vpop.f32.mrb[19].mxu0 }
 0x255   : > { %v1469_v29 = vld [vmem:[#allocation2 + $0x30] sm:$0xff]  ;;  %1611 = vst.msk [vmem:[%s3268_s8 + $0x14] sm:$0xf] %vm1605_vm10, %v1877_v34  ;;  %v1398_v4 = vadd.f32 %v1931_v51, %v3261_v43  ;;  %v1934_v14 = vadd.f32 %v1933_v22, %v1932_v46 }
 0x256   : > { %v1492_v49 = vmul.f32 %v3243_v17, %v1469_v29  ;;  %1457 = vst.msk [vmem:[#allocation2 + $0x68] sm:$0xff] %vm295_vm2, %v1441_v21  ;;  %v1470_v26 = vld [vmem:[#allocation2 + $0x38] sm:$0xff] }
 0x257   : > { %v1493_v54 = vmul.f32 %v3243_v17, %v1470_v26  ;;  %v1436_v48 = vadd.f32 %v1398_v4, %v1034_v38  ;;  %v1401_v37 = vadd.f32 %v1934_v14, %v3266_v31 }
 0x258   : > { %v1515_v30 = vadd.f32 %v3246_v39, %v1492_v49 }
 0x259   : > { %v1516_v62 = vadd.f32 %v3246_v39, %v1493_v54  ;;  %v1477_v10 = vld [vmem:[#allocation2 + $0x70] sm:$0xff]  ;;  %1452 = vst.msk [vmem:[#allocation2 + $0x40] sm:$0xff] %vm295_vm2, %v1436_v48  ;;  %v1437_v18 = vadd.f32 %v1401_v37, %v1035_v15 }
 0x25a   : > { %v1531_v56 = vmax.f32 %v1515_v30, 0.0  ;;  %v1500_v43 = vmul.f32 %v3243_v17, %v1477_v10 }
 0x25b   : > { %v1475_v23 = vld [vmem:[#allocation2 + $0x60] sm:$0xff]  ;;  %v1532_v2 = vmax.f32 %v1516_v62, 0.0  ;;  %v1478_v7 = vld [vmem:[#allocation2 + $0x78] sm:$0xff]  ;;  %1453 = vst.msk [vmem:[#allocation2 + $0x48] sm:$0xff] %vm295_vm2, %v1437_v18 }
 0x25c   : > { %v1878_v40 = vpack.c.bf16 %v1531_v56, %v1531_v56  ;;  %v1498_v24 = vmul.f32 %v3243_v17, %v1475_v23  ;;  %v1523_v31 = vadd.f32 %v3246_v39, %v1500_v43  ;;  %v1501_v52 = vmul.f32 %v3243_v17, %v1478_v7 }
 0x25d   : > { %v1476_v0 = vld [vmem:[#allocation2 + $0x68] sm:$0xff]  ;;  %v1879_v50 = vpack.c.bf16 %v1532_v2, %v1532_v2  ;;  %v1935_v1 = vpop.f32.mrb[20].mxu0 }
 0x25e   : > { %1612 = vst.msk [vmem:[%s3268_s8 + $0x18] sm:$0xf] %vm1605_vm10, %v1878_v40  ;;  %v1521_v45 = vadd.f32 %v3246_v39, %v1498_v24  ;;  %v1499_v60 = vmul.f32 %v3243_v17, %v1476_v0  ;;  %v1539_v35 = vmax.f32 %v1523_v31, 0.0  ;;  %v1524_v6 = vadd.f32 %v3246_v39, %v1501_v52  ;;  %v1936_v5 = vpop.f32.mrb[21].mxu0 }
 0x25f   : > { %1613 = vst.msk [vmem:[%s3268_s8 + $0x1c] sm:$0xf] %vm1605_vm10, %v1879_v50  ;;  %v1937_v61 = vadd.f32 %v1936_v5, %v1935_v1  ;;  %v1938_v12 = vpop.f32.mrb[22].mxu0 }
 0x260   : > { %v1537_v28 = vmax.f32 %v1521_v45, 0.0  ;;  %v1522_v20 = vadd.f32 %v3246_v39, %v1499_v60  ;;  %v1886_v47 = vpack.c.bf16 %v1539_v35, %v1539_v35  ;;  %v1540_v55 = vmax.f32 %v1524_v6, 0.0  ;;  %v1471_v19 = vld [vmem:[#allocation2 + $0x40] sm:$0xff]  ;;  %v1939_v9 = vpop.f32.mrb[23].mxu0 }
 0x261   : > { %v1494_v3 = vmul.f32 %v3243_v17, %v1471_v19  ;;  %v1406_v11 = vadd.f32 %v3258_v33, %v1937_v61  ;;  %v1940_v42 = vadd.f32 %v1939_v9, %v1938_v12 }
 0x262   : > { %v1884_v63 = vpack.c.bf16 %v1537_v28, %v1537_v28  ;;  %v1538_v57 = vmax.f32 %v1522_v20, 0.0  ;;  %1620 = vst.msk [vmem:[%s3268_s8 + $0x38] sm:$0xf] %vm1605_vm10, %v1886_v47  ;;  %v1887_v25 = vpack.c.bf16 %v1540_v55, %v1540_v55  ;;  %v1472_v41 = vld [vmem:[#allocation2 + $0x48] sm:$0xff] }
 0x263   : > { %v1517_v59 = vadd.f32 %v3246_v39, %v1494_v3  ;;  %v1495_v36 = vmul.f32 %v3243_v17, %v1472_v41  ;;  %v1438_v32 = vadd.f32 %v1406_v11, %v1036_v44  ;;  %v1409_v33 = vadd.f32 %v3264_v16, %v1940_v42 }
 0x264   : > { %1618 = vst.msk [vmem:[%s3268_s8 + $0x30] sm:$0xf] %vm1605_vm10, %v1884_v63  ;;  %v1885_v58 = vpack.c.bf16 %v1538_v57, %v1538_v57  ;;  %1621 = vst.msk [vmem:[%s3268_s8 + $0x3c] sm:$0xf] %vm1605_vm10, %v1887_v25 }
 0x265   : > { %v1533_v8 = vmax.f32 %v1517_v59, 0.0  ;;  %v1518_v13 = vadd.f32 %v3246_v39, %v1495_v36  ;;  %1454 = vst.msk [vmem:[#allocation2 + $0x50] sm:$0xff] %vm295_vm2, %v1438_v32  ;;  %v1439_v27 = vadd.f32 %v1409_v33, %v1037_v53 }
 0x266   : > { %1619 = vst.msk [vmem:[%s3268_s8 + $0x34] sm:$0xf] %vm1605_vm10, %v1885_v58 }
 0x267   : > { %v1880_v34 = vpack.c.bf16 %v1533_v8, %v1533_v8  ;;  %v1534_v21 = vmax.f32 %v1518_v13, 0.0  ;;  %1455 = vst.msk [vmem:[#allocation2 + $0x58] sm:$0xff] %vm295_vm2, %v1439_v27 }
 0x269   : > { %1614 = vst.msk [vmem:[%s3268_s8 + $0x20] sm:$0xf] %vm1605_vm10, %v1880_v34  ;;  %v1881_v51 = vpack.c.bf16 %v1534_v21, %v1534_v21 }
 0x26b   : > { %1615 = vst.msk [vmem:[%s3268_s8 + $0x24] sm:$0xf] %vm1605_vm10, %v1881_v51 }
 0x26c   : > { %v1473_v16 = vld [vmem:[#allocation2 + $0x50] sm:$0xff] }
 0x26d   : > { %v1496_v46 = vmul.f32 %v3243_v17, %v1473_v16 }
 0x26e   : > { %v1474_v38 = vld [vmem:[#allocation2 + $0x58] sm:$0xff] }
 0x26f   : > { %v1519_v29 = vadd.f32 %v3246_v39, %v1496_v46  ;;  %v1497_v22 = vmul.f32 %v3243_v17, %v1474_v38 }
 0x271   : > { %v1535_v49 = vmax.f32 %v1519_v29, 0.0  ;;  %v1520_v4 = vadd.f32 %v3246_v39, %v1497_v22 }
 0x273   : > { %v1882_v14 = vpack.c.bf16 %v1535_v49, %v1535_v49  ;;  %v1536_v26 = vmax.f32 %v1520_v4, 0.0 }
 0x275   : > { %1616 = vst.msk [vmem:[%s3268_s8 + $0x28] sm:$0xf] %vm1605_vm10, %v1882_v14  ;;  %v1883_v15 = vpack.c.bf16 %v1536_v26, %v1536_v26 }
 0x277   : > { %1617 = vst.msk [vmem:[%s3268_s8 + $0x2c] sm:$0xf] %vm1605_vm10, %v1883_v15 }
 0x278   : > { %2295 = shalt.err (!%p2292_p12)
}
 0x279   : > { %s2296_s10 = scalar_lea.hbm %s3348_s2, 1024  ;;  %s2300_s22 = scalar_lea.hbm %s3466_s29, 4096 }
 0x27a   : > { %p2297_p4 = scmp.ne.s32.totalorder %s3348_s2, %s2296_s10  ;;  %p2301_p0 = scmp.lt.u32.totalorder %s3348_s2, %s3466_s29 }
 0x27b   : > { %p2302_p1 = scmp.lt.u32.totalorder %s2300_s22, %s2296_s10  ;;  %p2304_p10 = scmp.lt.u32.totalorder %s2296_s10, %s3348_s2 }
 0x27c   : > { %p2298_p7 = pnand %p2297_p4, %p3467_p2 }
 0x27d   : > { %p2303_p11 = por %p2302_p1, %p2301_p0 }
 0x27e   : > { %p2299_p3 = pneg %p2298_p7 }
 0x27f   : > { %p2305_p9 = por %p2304_p10, %p2303_p11 }
 0x281   : > { %p2306_p5 = pnand %p2305_p9, %p2299_p3 }
 0x283   : > { %2309 = shalt.err (!%p2306_p5)
}
 0x284   : > { %s2425_s21 = smov 4  }
 0x285   : > { %2016 = dma.vmem_to_hbm [thread:$0]  (%p3467_p2), %s3350_s14, 1024, %s3348_s2, %s3356_s7, %s2420_s28, %s2420_s28, %s2425_s21  }
 0x286 PF: > { %s3468_s13 = sld [smem:[#allocation17_spill]]  ;;  %s3469_s30 = sld [smem:[#allocation20_spill]] }
 0x287   : > { %p2043_p13 = scmp.ge.s32.totalorder %s2412_s25, 2 }
 0x28c   : > { %s1654_s26 = sand.u32 1, %s3468_s13   ;;  %p3470_p6 = scmp.ne.s32.totalorder %s3469_s30, 0 }
 0x28d   : > { %s1655_s27 = scalar_lea.sflag [#allocation6], %s1654_s26 }
 0x28e   : > { %p2033_p8 = pnand %p2043_p13, %p3470_p6 }
 0x290   : > { %2367 = dma.done.wait (!%p2033_p8), %s1655_s27, 1024  }
 0x291   : > { %2369 = vsyncadd (!%p2033_p8), %s1655_s27, 4294966272  ;;  %s22_s25 = sadd.s32 1, %s2412_s25   ;;  %s3471_s1 = smov %s2653_s15 }
 0x292   : > { %p19_p12 = scmp.ge.s32.totalorder %s22_s25, 6   ;;  %s3472_s15 = smov %s2376_s16 }
 0x293   : > { %s3473_s16 = smov %s2380_s17  ;;  %s3474_s17 = smov %s3471_s1 }
 0x294   : > { %s3475_s18 = smov %s2388_s19  ;;  %s3476_s19 = smov %s2392_s20 }
 0x295   : > { %s3477_s20 = smov %s2648_s4  ;;  %s3478_s21 = smov %s2404_s23 }
 0x296   : > { %s3479_s22 = smov %s2408_s24  ;;  %s3480_s23 = smov %s3483_s6 }
 0x297   : > { %s3481_s24 = smov %s3487_s5  ;;  %21 = sbr.rel (!%p19_p12) target bundleno = 15 (0xf), region = 103 }
 0x29e   :  { %1660 = vsyncpa [#allocation5], 1 }
 0x29f   :  { %1662 = vsyncpa [#allocation5 + $0x1], 1 }
 0x2a0   :  { %1663 = vsyncpa [#allocation8], 1 }
 0x2a1   :  { %1664 = vsyncpa [#allocation11], 1 }
 0x2a2   :  { %1665 = vsyncpa [#allocation6], 1 }
 0x2a3   :  { %1667 = vsyncpa [#allocation6 + $0x1], 1 }

// kernel: dablock_forward.9
= control target key start
LH: loop header
LB: loop body
LE: loop exit
PB: predicated region body
PF: predicated region fallthrough
CT: control target
= control target key end

     0   :  { %s4244_s0 = inlined_call_operand.hbm [shape: bf16[2,18,18,128], index: 0, kind: input, shape index: {}]   ;;  %s4245_s1 = inlined_call_operand.hbm [shape: bf16[9,128,32], index: 1, kind: input, shape index: {}]   ;;  %s4246_s2 = inlined_call_operand.hbm [shape: f32[1,32], index: 2, kind: input, shape index: {}]   ;;  %s4247_s3 = inlined_call_operand.hbm [shape: f32[1,32], index: 3, kind: input, shape index: {}]   ;;  %s4248_s4 = inlined_call_operand.hbm [shape: bf16[2,16,16,32], index: 4, kind: output, shape index: {}]  }
   0x1   :  { %4261 = sst [smem:[#allocation21_spill]] %s4245_s1 }
   0x2   :  { %4262 = sst [smem:[#allocation22_spill]] %s4246_s2 }
   0x3   :  { %4263 = sst [smem:[#allocation23_spill]] %s4248_s4 }
   0x4   :  { %9 = vsyncpa [#allocation5], 0 }
   0x5   :  { %11 = vsyncpa [#allocation5 + $0x1], 0 }
   0x6   :  { %12 = vsyncpa [#allocation8], 0 }
   0x7   :  { %13 = vsyncpa [#allocation11], 0 }
   0x8   :  { %14 = vsyncpa [#allocation6], 0 }
   0x9   :  { %16 = vsyncpa [#allocation6 + $0x1], 0  ;;  %s3365_s15 = smov 0   ;;  %s3367_s16 = smov 0  }
   0xa   :  { %s3369_s17 = smov 0   ;;  %s3371_s18 = smov 0  }
   0xb   :  { %s3373_s19 = smov 0   ;;  %s3375_s20 = smov 0  }
   0xc   :  { %s3377_s21 = smov 0   ;;  %s3379_s22 = smov 0  }
   0xd   :  { %s3381_s23 = smov 0   ;;  %s3383_s24 = smov 0  }
   0xe   :  { %s3385_s25 = smov 0  }
   0xf LB: > { %4264 = sst [smem:[#allocation17_spill]] %s3288_s15  ;;  %s2370_s26 = sadd.s32 4294967295, %s3328_s25   ;;  %s3328_s25 = sphi %s3385_s25, %s22_s25   ;;  %s3324_s24 = sphi %s3383_s24, %s4306_s24   ;;  %s3320_s23 = sphi %s3381_s23, %s4305_s23   ;;  %s3316_s22 = sphi %s3379_s22, %s4304_s22   ;;  %s3312_s21 = sphi %s3377_s21, %s4303_s21   ;;  %s3308_s20 = sphi %s3375_s20, %s4302_s20   ;;  %s3304_s19 = sphi %s3373_s19, %s4301_s19   ;;  %s3300_s18 = sphi %s3371_s18, %s4300_s18   ;;  %s3296_s17 = sphi %s3369_s17, %s4299_s17   ;;  %s3292_s16 = sphi %s3367_s16, %s4298_s16   ;;  %s3288_s15 = sphi %s3365_s15, %s4297_s15  }
  0x10   : > { %4265 = sst [smem:[#allocation18_spill]] %s3316_s22  ;;  %s2371_s27 = sadd.s32 4294967294, %s3328_s25  }
  0x11   : > { %p63_p0 = scmp.ne.s32.totalorder %s3304_s19, %s3300_s18  ;;  %p3421_p1 = scmp.eq.s32.totalorder %s2370_s26, 0 }
  0x12   : > { %p156_p2 = scmp.ne.s32.totalorder %s3296_s17, %s3292_s16  ;;  %p157_p4 = scmp.eq.s32.totalorder %s2370_s26, 3 }
  0x13   : > { %s4266_s28 = scalar_select %p3421_p1, 1, 0 }
  0x14   : > { %p3430_p3 = por %p3421_p1, %p63_p0  ;;  %p162_p5 = scmp.ne.s32.totalorder %s3292_s16, %s3288_s15 }
  0x15   : > { %p163_p6 = scmp.eq.s32.totalorder %s2371_s27, 3  ;;  %p3436_p7 = por %p157_p4, %p156_p2 }
  0x16   : > { %s4267_s30 = scalar_select %p3430_p3, 1, 0 }
  0x17   : > { %s4268_s5 = scalar_select %p3436_p7, 1, 0 }
  0x18   : > { %p2372_p8 = scmp.ge.s32.totalorder %s3328_s25, 1  ;;  %p3441_p9 = por %p163_p6, %p162_p5 }
  0x19   : > { %4269 = sst [smem:[#allocation19_spill]] %s4268_s5  ;;  %p170_p10 = scmp.lt.s32.totalorder %s3328_s25, 5 }
  0x1a   : > { %s4270_s6 = scalar_select %p3441_p9, 1, 0 }
  0x1b   : > { %p3446_p11 = pnand %p2372_p8, %p170_p10  ;;  %s3330_s8 = smov [#allocation7]  }
  0x1c   : > { %4271 = sst [smem:[#allocation20_spill]] %s4270_s6  ;;  %s185_s9 = sshll.u32 %s3330_s8, 4  ;;  %s3450_s9 = int_to_ptr.vmem [resolvable:$true] %s185_s9 }
  0x1d   : > { %s4272_s7 = scalar_select %p3446_p11, 1, 0 }
  0x1e   : > { %p2880_p12 = pneg %p3446_p11  ;;  %s3331_s11 = smov [#allocation9]  }
  0x1f   : > { %s199_s12 = sshll.u32 %s3331_s11, 4  ;;  %s3332_s13 = smov [#allocation10]   ;;  %s3460_s12 = int_to_ptr.vmem [resolvable:$true] %s199_s12 }
  0x20   : > { %p3456_p13 = pnand %p2880_p12, %p3421_p1  ;;  %s3462_s14 = sshll.u32 %s3332_s13, 4  ;;  %s211_s14 = int_to_ptr.vmem [resolvable:$true] %s3462_s14 }
  0x21   : > { %s4274_s1 = sld [smem:[#allocation21_spill]] }
  0x22   : > { %p3472_p2 = pneg %p3456_p13 }
  0x27   : > { %s3084_s27 = scalar_lea.hbm %s4274_s1, 9216 }
  0x28   : > { %p3085_p0 = scmp.ne.s32.totalorder %s4274_s1, %s3084_s27  ;;  %p3091_p6 = scmp.lt.u32.totalorder %s3084_s27, %s4274_s1 }
  0x2a   : > { %p3087_p4 = pnand %p3472_p2, %p3085_p0 }
  0x2c   : > { %p3088_p5 = pneg %p3087_p4 }
  0x2e   : > { %p3093_p8 = pnand %p3091_p6, %p3088_p5 }
  0x30   : > { %3096 = shalt.err (!%p3093_p8)
}
  0x31   : > { %s3097_s29 = scalar_lea.vmem %s3450_s9, 9216  ;;  %p3105_p7 = scmp.lt.s32.totalorder %s3450_s9, %s3450_s9 }
  0x32   : > { %p3098_p10 = scmp.ne.s32.totalorder %s3450_s9, %s3097_s29  ;;  %p3106_p1 = scmp.lt.s32.totalorder %s3097_s29, %s3097_s29 }
  0x34   : > { %p3100_p12 = pnand %p3098_p10, %p3472_p2  ;;  %p3107_p0 = por %p3106_p1, %p3105_p7 }
  0x36   : > { %p3101_p9 = pneg %p3100_p12 }
  0x38   : > { %p3108_p4 = pnand %p3107_p0, %p3101_p9 }
  0x3a   : > { %3111 = shalt.err (!%p3108_p4)
}
  0x3b   : > { %s4259_s18 = smov 64   ;;  %s4260_s26 = smov 4  }
  0x3c   : > { %2883 = dma.hbm_to_vmem [thread:$0]  (!%p3456_p13), %s4274_s1, 9216, %s3450_s9, [#allocation8], %s4259_s18, %s4259_s18, %s4260_s26  }
  0x3d   : > { %s4276_s2 = sld [smem:[#allocation22_spill]] }
  0x43   : > { %s3112_s29 = scalar_lea.hbm %s4276_s2, 16 }
  0x44   : > { %p3113_p1 = scmp.ne.s32.totalorder %s4276_s2, %s3112_s29  ;;  %p3119_p5 = scmp.lt.u32.totalorder %s3112_s29, %s4276_s2 }
  0x46   : > { %p3115_p7 = pnand %p3113_p1, %p3472_p2 }
  0x48   : > { %p3116_p9 = pneg %p3115_p7 }
  0x4a   : > { %p3121_p6 = pnand %p3119_p5, %p3116_p9 }
  0x4c   : > { %3124 = shalt.err (!%p3121_p6)
}
  0x4d   : > { %s3125_s9 = scalar_lea.vmem %s3460_s12, 16  ;;  %s3132_s4 = scalar_lea.vmem %s3460_s12, 32 }
  0x4e   : > { %p3126_p8 = scmp.ne.s32.totalorder %s3460_s12, %s3125_s9  ;;  %p3133_p0 = scmp.lt.s32.totalorder %s3460_s12, %s3460_s12 }
  0x4f   : > { %p3134_p4 = scmp.lt.s32.totalorder %s3132_s4, %s3125_s9 }
  0x50   : > { %p3128_p10 = pnand %p3126_p8, %p3472_p2 }
  0x51   : > { %p3135_p1 = por %p3134_p4, %p3133_p0 }
  0x52   : > { %p3129_p12 = pneg %p3128_p10 }
  0x54   : > { %p3136_p7 = pnand %p3135_p1, %p3129_p12 }
  0x56   : > { %3139 = shalt.err (!%p3136_p7)
}
  0x57   : > { %2886 = dma.hbm_to_vmem [thread:$0]  (!%p3456_p13), %s4276_s2, 16, %s3460_s12, [#allocation8]  }
  0x58   : > { %s3140_s8 = scalar_lea.hbm %s4247_s3, 16 }
  0x59   : > { %p3141_p9 = scmp.ne.s32.totalorder %s4247_s3, %s3140_s8  ;;  %p3147_p8 = scmp.lt.u32.totalorder %s3140_s8, %s4247_s3 }
  0x5b   : > { %p3143_p5 = pnand %p3141_p9, %p3472_p2 }
  0x5d   : > { %p3144_p6 = pneg %p3143_p5 }
  0x5f   : > { %p3149_p10 = pnand %p3147_p8, %p3144_p6 }
  0x61   : > { %3152 = shalt.err (!%p3149_p10)
}
  0x62   : > { %s3153_s4 = scalar_lea.vmem %s211_s14, 16  ;;  %s3160_s12 = scalar_lea.vmem %s211_s14, 32 }
  0x63   : > { %p3154_p12 = scmp.ne.s32.totalorder %s211_s14, %s3153_s4  ;;  %p3161_p1 = scmp.lt.s32.totalorder %s211_s14, %s211_s14 }
  0x64   : > { %p3162_p7 = scmp.lt.s32.totalorder %s3160_s12, %s3153_s4 }
  0x65   : > { %p3156_p0 = pnand %p3154_p12, %p3472_p2 }
  0x66   : > { %p3163_p3 = por %p3162_p7, %p3161_p1 }
  0x67   : > { %p3157_p4 = pneg %p3156_p0 }
  0x69   : > { %p3164_p11 = pnand %p3163_p3, %p3157_p4 }
  0x6b   : > { %3167 = shalt.err (!%p3164_p11)
}
  0x6c   : > { %2889 = dma.hbm_to_vmem [thread:$0]  (!%p3456_p13), %s4247_s3, 16, %s211_s14, [#allocation11]  }
  0x6d   : > { %s37_s6 = sadd.s32 1, %s3320_s23  ;;  %s41_s5 = sadd.s32 1, %s3324_s24 }
  0x6e   : > { %p39_p3 = scmp.ge.s32.totalorder %s37_s6, 2  ;;  %s50_s10 = sadd.s32 1, %s3308_s20 }
  0x6f   : > { %p57_p11 = scmp.ne.s32.totalorder %s3308_s20, %s3304_s19  ;;  %p58_p2 = scmp.eq.s32.totalorder %s3328_s25, 0 }
  0x70   : > { %s4308_s6 = smov (%p39_p3, %s37_s6), 0  ;;  %s4310_s5 = smov (!%p39_p3, %s41_s5), %s3324_s24 }
  0x71   : > { %s142_s27 = ssub.s32 %s3320_s23, %s4308_s6  ;;  %p43_p9 = scmp.ge.s32.totalorder %s4310_s5, 2 }
  0x72   : > { %p2901_p5 = scmp.lt.s32.totalorder %s3328_s25, 4  ;;  %p3551_p13 = por %p58_p2, %p57_p11 }
  0x73   : > { %s221_s8 = sand.u32 1, %s3308_s20   ;;  %s4312_s5 = smov (%p43_p9, %s4310_s5), 0 }
  0x74   : > { %s2861_s11 = smul.u32 216, %s221_s8  ;;  %s45_s13 = ssub.s32 %s3324_s24, %s4312_s5 }
  0x75   : > { %s2862_s29 = smul.u32 3456, %s3324_s24  ;;  %p48_p6 = scmp.eq.s32.totalorder %s45_s13, 0 }
  0x76   : > { %s143_s9 = sor.u32 %s142_s27, %s45_s13  ;;  %s4278_s12 = sadd.s32 1, %s3296_s17 }
  0x77   : > { %p144_p8 = scmp.eq.s32.totalorder %s143_s9, 0  ;;  %s3572_s26 = scalar_lea.hbm %s4244_s0, %s2862_s29 }
  0x78   : > { %s3562_s4 = scalar_select %p48_p6, %s3308_s20, %s50_s10  }
  0x79   : > { %s3567_s15 = scalar_select %p144_p8, %s3296_s17, %s4278_s12  }
  0x7a   : > { %s225_s1 = scalar_lea.vmem [#allocation4], %s2861_s11  ;;  %p3580_p10 = pnand %p2901_p5, %p3551_p13 }
  0x7b   : > { %s233_s2 = sshll.u32 %s225_s1, 4  ;;  %s3584_s27 = scalar_lea.sflag [#allocation5], %s221_s8  ;;  %s3574_s2 = int_to_ptr.vmem [resolvable:$true] %s233_s2 }
  0x7c   : > { %s3168_s18 = scalar_lea.hbm %s3572_s26, 3456  ;;  %p3170_p0 = pneg %p3580_p10 }
  0x7d   : > { %p3169_p12 = scmp.ne.s32.totalorder %s3572_s26, %s3168_s18  ;;  %s3173_s14 = scalar_lea.hbm %s4244_s0, 6912 }
  0x7e   : > { %p3174_p7 = scmp.lt.u32.totalorder %s3572_s26, %s4244_s0  ;;  %p3175_p3 = scmp.lt.u32.totalorder %s3173_s14, %s3168_s18 }
  0x7f   : > { %p3171_p4 = pnand %p3170_p0, %p3169_p12  ;;  %p3177_p2 = scmp.lt.u32.totalorder %s3168_s18, %s3572_s26 }
  0x80   : > { %p3176_p11 = por %p3175_p3, %p3174_p7 }
  0x81   : > { %p3172_p1 = pneg %p3171_p4 }
  0x82   : > { %p3178_p9 = por %p3177_p2, %p3176_p11 }
  0x84   : > { %p3179_p5 = pnand %p3178_p9, %p3172_p1 }
  0x86   : > { %3182 = shalt.err (!%p3179_p5)
}
  0x87   : > { %s3183_s8 = scalar_lea.vmem %s3574_s2, 3456  ;;  %s3335_s9 = smov [#allocation4]  }
  0x88   : > { %p3184_p13 = scmp.ne.s32.totalorder %s3574_s2, %s3183_s8  ;;  %s3188_s12 = sshll.u32 %s3335_s9, 4  ;;  %s3189_s12 = int_to_ptr.vmem [resolvable:$false] %s3188_s12 }
  0x89   : > { %s3190_s22 = scalar_lea.vmem %s3189_s12, 6912  ;;  %p3191_p12 = scmp.lt.s32.totalorder %s3574_s2, %s3189_s12 }
  0x8a   : > { %p3186_p6 = pnand %p3184_p13, %p3170_p0  ;;  %p3192_p4 = scmp.lt.s32.totalorder %s3190_s22, %s3183_s8 }
  0x8c   : > { %p3187_p8 = pneg %p3186_p6  ;;  %p3193_p7 = por %p3192_p4, %p3191_p12 }
  0x8e   : > { %p3194_p3 = pnand %p3193_p7, %p3187_p8 }
  0x90   : > { %3197 = shalt.err (!%p3194_p3)
}
  0x91   : > { %s4280_s18 = smov 4   ;;  %s4281_s1 = smov 64  }
  0x92   : > { %2893 = dma.hbm_to_vmem [thread:$0]  (!%p3580_p10), %s3572_s26, 3456, %s3574_s2, %s3584_s27, %s4281_s1, %s4281_s1, %s4280_s18  }
  0x93   : > { %p4282_p0 = scmp.ne.s32.totalorder %s4272_s7, 0 }
  0x94   : > { %s247_s11 = sand.u32 (!%p4282_p0), 1, %s3304_s19   ;;  %p4283_p1 = scmp.ne.s32.totalorder (!%p4282_p0), %s4267_s30, 0 }
  0x95   : > { %245 = sbr.rel (%p4282_p0) target bundleno = 584 (0x248), region = 36  ;;  %s248_s13 = scalar_lea.sflag (!%p4282_p0), [#allocation5], %s247_s11 }
  0x96   : > { %s3618_s14 = smul.u32 (!%p4282_p0), 216, %s247_s11 }
  0x98   : > { %s251_s29 = scalar_lea.vmem (!%p4282_p0), [#allocation4], %s3618_s14 }
  0x9c   : > { %3271 = dma.done.wait (%p4283_p1), %s248_s13, 3456  }
  0x9d   : > { %3273 = vsyncadd (%p4283_p1), %s248_s13, 4294963840  ;;  %p4284_p11 = scmp.ne.s32.totalorder %s4266_s28, 0 }
  0x9f   : > { %3275 = dma.done.wait (%p4284_p11), [#allocation8], 9232  }
  0xa0   : > { %3277 = vsyncadd (%p4284_p11), [#allocation8], 4294958064 }
  0xa1   : > { %3279 = dma.done.wait (%p4284_p11), [#allocation11], 16  }
  0xa2   : > { %3281 = vsyncadd (%p4284_p11), [#allocation11], 4294967280  ;;  %v3002_v0 = vld [vmem:[#allocation7 + $0x40] sm:$0xff]   ;;  %v3006_v4 = vld [vmem:[#allocation7 + $0x48] sm:$0xff]   ;;  %s2523_s2 = smul.u32 96, %s3312_s21  ;;  %vm745_vm2 = vcmask 1042432  }
  0xa3   : > { %v3003_v1 = vld [vmem:[#allocation7 + $0xc0] sm:$0xff]   ;;  %2541 = vmatprep.subr.bf16.mxu0 %v3002_v0  ;;  %v3007_v5 = vld [vmem:[#allocation7 + $0xc8] sm:$0xff]   ;;  %v3010_v8 = vld [vmem:[#allocation7 + $0x50] sm:$0xff]   ;;  %vm430_vm0 = vsmask.f32 3328  ;;  %vm746_vm3 = vcmask 1046532  }
  0xa4   : > { %v3004_v2 = vld [vmem:[#allocation7] sm:$0xff]   ;;  %2605 = vmatprep.subr.bf16.mxu1 %v3003_v1  ;;  %v3008_v6 = vld [vmem:[#allocation7 + $0x8] sm:$0xff]   ;;  %v3011_v9 = vld [vmem:[#allocation7 + $0xd0] sm:$0xff]   ;;  %vm431_vm1 = vsmask.f32 7440  ;;  %s3636_s28 = scalar_lea.vmem %s251_s29, %s2523_s2 [#allocation4]  ;;  %vm295_vm6 = vcmask 261120  }
  0xa5   : > { %v3005_v3 = vld [vmem:[#allocation7 + $0x80] sm:$0xff]   ;;  %2542 = vmatpush3.bf16.msra.mxu0 %v3004_v2  ;;  %v3009_v7 = vld [vmem:[#allocation7 + $0x88] sm:$0xff]   ;;  %v3012_v10 = vld [vmem:[#allocation7 + $0x10] sm:$0xff]   ;;  %vm2211_vm7 = vcmask 257024   ;;  %s285_s30 = sand.u32 1, %s3292_s16   ;;  %s4289_s26 = sld [smem:[#allocation18_spill]] }
  0xa6   : > { %2606 = vmatpush3.bf16.msra.mxu1 %v3005_v3  ;;  %2543 = vmatprep.subr.bf16.mxu0 %v3006_v4  ;;  %v3013_v11 = vld [vmem:[#allocation7 + $0x90] sm:$0xff]   ;;  %v3014_v12 = vld [vmem:[#allocation7 + $0x58] sm:$0xff]   ;;  %v3018_v16 = vld [vmem:[#allocation7 + $0x60] sm:$0xff]   ;;  %s4099_s7 = sshll.u32 %s285_s30, 6  ;;  %s2540_s10 = sshll.u32 %s3312_s21, 4 }
  0xa7   : > { %2607 = vmatprep.subr.bf16.mxu1 %v3007_v5  ;;  %v3015_v13 = vld [vmem:[#allocation7 + $0xd8] sm:$0xff]   ;;  %v3019_v17 = vld [vmem:[#allocation7 + $0xe0] sm:$0xff]   ;;  %v3022_v20 = vld [vmem:[#allocation7 + $0x68] sm:$0xff]   ;;  %s4120_s8 = scalar_lea.vmem [#allocation12], %s4099_s7  ;;  %s4290_s22 = sld [smem:[#allocation19_spill]] }
  0xa8   : > { %v3016_v14 = vld [vmem:[#allocation7 + $0x18] sm:$0xff]   ;;  %v3020_v18 = vld [vmem:[#allocation7 + $0x20] sm:$0xff]   ;;  %v3023_v21 = vld [vmem:[#allocation7 + $0xe8] sm:$0xff]   ;;  %s2245_s12 = sshll.u32 %s4120_s8, 4  ;;  %s4291_s11 = sld [smem:[#allocation23_spill]]  ;;  %s4167_s12 = int_to_ptr.vmem [resolvable:$true] %s2245_s12 }
  0xa9   : > { %2544 = vmatpush3.bf16.msra.mxu0 %v3008_v6  ;;  %v3017_v15 = vld [vmem:[#allocation7 + $0x98] sm:$0xff]   ;;  %v3021_v19 = vld [vmem:[#allocation7 + $0xa0] sm:$0xff]   ;;  %v3024_v22 = vld [vmem:[#allocation7 + $0x28] sm:$0xff]   ;;  %s4183_s13 = scalar_lea.sflag [#allocation6], %s285_s30  ;;  %s3198_s29 = scalar_lea.vmem %s4167_s12, 1024 }
  0xaa   : > { %2608 = vmatpush3.bf16.msra.mxu1 %v3009_v7  ;;  %2545 = vmatprep.subr.bf16.mxu0 %v3010_v8  ;;  %v3025_v23 = vld [vmem:[#allocation7 + $0xa8] sm:$0xff]   ;;  %v3026_v24 = vld [vmem:[#allocation7 + $0x70] sm:$0xff]   ;;  %v3030_v28 = vld [vmem:[#allocation7 + $0x78] sm:$0xff]   ;;  %p3199_p10 = scmp.ne.s32.totalorder %s4167_s12, %s3198_s29  ;;  %s3337_s2 = smov [#allocation12]  }
  0xab   : > { %2609 = vmatprep.subr.bf16.mxu1 %v3011_v9  ;;  %v3027_v25 = vld [vmem:[#allocation7 + $0xf0] sm:$0xff]   ;;  %v3031_v29 = vld [vmem:[#allocation7 + $0xf8] sm:$0xff]   ;;  %v3653_v41 = vld [vmem:[%s3636_s28 + $0x10] sm:$0xf]  ;;  %s2519_s27 = sshll.u32 %s4289_s26, 5 }
  0xac   : > { %v3028_v26 = vld [vmem:[#allocation7 + $0x30] sm:$0xff]   ;;  %v3032_v30 = vld [vmem:[#allocation7 + $0x38] sm:$0xff]   ;;  %v3036_v52 = vld [vmem:[#allocation7 + $0x140] sm:$0xff]   ;;  %v467_v55 = vshll.u32 %v3653_v41, 16  ;;  %v471_v56 = vshrl.u32 %v3653_v41, 16  ;;  %s4142_s21 = sadd.s32 %s2540_s10, %s2519_s27 }
  0xad   : > { %2546 = vmatpush3.bf16.msra.mxu0 %v3012_v10  ;;  %v3029_v27 = vld [vmem:[#allocation7 + $0xb0] sm:$0xff]   ;;  %v3033_v31 = vld [vmem:[#allocation7 + $0xb8] sm:$0xff]   ;;  %vm3664_vm4 = vmor %vm745_vm2, %vm746_vm3  ;;  %s2520_s9 = sshll.u32 %s4142_s21, 6  ;;  %p4292_p2 = scmp.ne.s32.totalorder %s4290_s22, 0 }
  0xae   : > { %2610 = vmatpush3.bf16.msra.mxu1 %v3013_v11  ;;  %2547 = vmatprep.subr.bf16.mxu0 %v3014_v12  ;;  %v3639_v32 = vld [vmem:[%s3636_s28] sm:$0xf]  ;;  %v3642_v33 = vld [vmem:[%s3636_s28 + $0x4] sm:$0xf]  ;;  %v318_v34 = vld [vmem:[%s3636_s28 + $0x8] sm:$0x1]  ;;  %s4165_s14 = scalar_lea.hbm %s4291_s11, %s2520_s9 }
  0xaf   : > { %2611 = vmatprep.subr.bf16.mxu1 %v3015_v13  ;;  %v434_v35 = vshrl.u32 %v3639_v32, 16  ;;  %v437_v36 = vshll.u32 %v3639_v32, 16  ;;  %v443_v37 = vshll.u32 %v3642_v33, 16  ;;  %v447_v38 = vshrl.u32 %v3642_v33, 16  ;;  %v3650_v39 = vld [vmem:[%s3636_s28 + $0xc] sm:$0xf]  ;;  %vm3670_vm5 = vmor %vm430_vm0, %vm431_vm1  ;;  %p3200_p9 = pnand %p3199_p10, %p4292_p2 }
  0xb0   : > { %v453_v40 = vshll.u32 %v318_v34, 16  ;;  %v458_v42 = vshrl.u32 %v3650_v39, 16  ;;  %v461_v43 = vshll.u32 %v3650_v39, 16  ;;  %v3659_v49 = vcombine.low %v3650_v39, %v3653_v41  ;;  %v3037_v62 = vld [vmem:[#allocation7 + $0x1c0] sm:$0xff]   ;;  %v3687_v13 = vld [vmem:[%s3636_s28 + $0x18] sm:$0xf] }
  0xb1   : > { %2548 = vmatpush3.bf16.msra.mxu0 %v3016_v14  ;;  %v436_v44 = vrot.slane %v434_v35, 4  ;;  %v439_v45 = vrot.slane %v437_v36, 5  ;;  %v445_v46 = vrot.slane %v443_v37, 5  ;;  %v449_v47 = vrot.slane %v447_v38, 4  ;;  %v3038_v6 = vld [vmem:[#allocation7 + $0x100] sm:$0xff]   ;;  %v3044_v35 = vld [vmem:[#allocation7 + $0x188] sm:$0xff]   ;;  %p3201_p5 = pneg %p3200_p9 }
  0xb2   : > { %2612 = vmatpush3.bf16.msra.mxu1 %v3017_v15  ;;  %2549 = vmatprep.subr.bf16.mxu0 %v3018_v16  ;;  %v455_v48 = vrot.slane %v453_v40, 5  ;;  %v460_v50 = vrot.slane %v458_v42, 4  ;;  %v463_v51 = vrot.slane %v461_v43, 5  ;;  %v753_v59 = vrot.slane %v318_v34, 5  ;;  %v3039_v7 = vld [vmem:[#allocation7 + $0x180] sm:$0xff]  }
  0xb3   : > { %2613 = vmatprep.subr.bf16.mxu1 %v3019_v17  ;;  %v440_v53 = vor.u32 %v439_v45, %v436_v44  ;;  %v450_v54 = vor.u32 %v449_v47, %v445_v46  ;;  %1677 = vmatprep.mubr.bf16.mxu1 %v3659_v49  ;;  %v2406_v60 = vrot.slane %v3639_v32, 9  ;;  %v750_v61 = vrot.slane %v3642_v33, 5  ;;  %v321_v10 = vld [vmem:[%s3636_s28 + $0x14] sm:$0x1]  ;;  %v323_v17 = vld [vmem:[%s3636_s28 + $0x1c] sm:$0xf] }
  0xb4   : > { %v464_v63 = vor.u32 %v463_v51, %v460_v50  ;;  %v473_v2 = vrot.slane %v471_v56, 4  ;;  %v2386_v3 = vcombine.low %v3639_v32, %v3642_v33  ;;  %v469_v12 = vrot.slane %v467_v55, 5  ;;  %v3043_v32 = vld [vmem:[#allocation7 + $0x108] sm:$0xff]   ;;  %v324_v37 = vld [vmem:[%s3636_s28 + $0x20] sm:$0x1] }
  0xb5   : > { %2550 = vmatpush3.bf16.msra.mxu0 %v3020_v18  ;;  %v441_v0 = vrot.slane %v440_v53, 4  ;;  %v451_v1 = vrot.slane %v450_v54, 4  ;;  %v751_v4 = vsel %vm3664_vm4, %v2406_v60, %v750_v61  ;;  %v752_v5 = vrot.slane %v750_v61, 4  ;;  %v3712_v44 = vld [vmem:[%s3636_s28 + $0x24] sm:$0xf] }
  0xb6   : > { %2614 = vmatpush3.bf16.msra.mxu1 %v3021_v19  ;;  %2551 = vmatprep.subr.bf16.mxu0 %v3022_v20  ;;  %v465_v11 = vrot.slane %v464_v63, 4  ;;  %v477_v16 = vshll.u32 %v321_v10, 16  ;;  %v2407_v18 = vrot.slane %v3650_v39, 9  ;;  %v474_v20 = vor.u32 %v473_v2, %v469_v12  ;;  %v3715_v45 = vld [vmem:[%s3636_s28 + $0x28] sm:$0xf]  ;;  %v3046_v51 = vld [vmem:[#allocation7 + $0x150] sm:$0xff]  }
  0xb7   : > { %2615 = vmatprep.subr.bf16.mxu1 %v3023_v21  ;;  %v446_v8 = vsel %vm3670_vm5, %v441_v0, %v445_v46  ;;  %v456_v9 = vsel %vm3670_vm5, %v451_v1, %v455_v48  ;;  %v754_v15 = vsel %vm3664_vm4, %v752_v5, %v753_v59  ;;  %v3694_v21 = vcombine.low %v3687_v13, %v323_v17  ;;  %v3047_v0 = vld [vmem:[#allocation7 + $0x1d0] sm:$0xff]  }
  0xb8   : > { %v2396_v14 = vcombine.low %v446_v8, %v456_v9  ;;  %v2414_v19 = vcombine.low %v751_v4, %v754_v15  ;;  %v491_v42 = vshll.u32 %v323_v17, 16  ;;  %v501_v48 = vshll.u32 %v324_v37, 16 }
  0xb9   : > { %2552 = vmatpush3.bf16.msra.mxu0 %v3024_v22  ;;  %v482_v22 = vshrl.u32 %v3687_v13, 16  ;;  %v3721_v50 = vcombine.low %v3712_v44, %v3715_v45  ;;  %v506_v53 = vshrl.u32 %v3712_v44, 16  ;;  %v509_v54 = vshll.u32 %v3712_v44, 16 }
  0xba   : > { %2616 = vmatpush3.bf16.msra.mxu1 %v3025_v23  ;;  %2553 = vmatprep.subr.bf16.mxu0 %v3026_v24  ;;  %v3041_v23 = vld [vmem:[#allocation7 + $0x148] sm:$0xff]   ;;  %v479_v24 = vrot.slane %v477_v16, 5  ;;  %v519_v55 = vshrl.u32 %v3715_v45, 16  ;;  %v503_v59 = vrot.slane %v501_v48, 5  ;;  %v2408_v60 = vrot.slane %v3687_v13, 9 }
  0xbb   : > { %2617 = vmatprep.subr.bf16.mxu1 %v3027_v25  ;;  %1580 = vmatprep.mubr.bf16.mxu0 %v2396_v14  ;;  %v485_v25 = vshll.u32 %v3687_v13, 16  ;;  %v484_v38 = vrot.slane %v482_v22, 4  ;;  %v764_v61 = vrot.slane %v323_v17, 5  ;;  %v767_v63 = vrot.slane %v324_v37, 5  ;;  %v3740_v13 = vld [vmem:[%s3636_s28 + $0x30] sm:$0xf] }
  0xbc   : > { %v508_v8 = vrot.slane %v506_v53, 4  ;;  %v3051_v14 = vld [vmem:[#allocation7 + $0x158] sm:$0xff]   ;;  %v2410_v48 = vrot.slane %v3740_v13, 9 }
  0xbd   : > { %2554 = vmatpush3.bf16.msra.mxu0 %v3028_v26  ;;  %v495_v26 = vshrl.u32 %v323_v17, 16  ;;  %v487_v39 = vrot.slane %v485_v25, 5  ;;  %v765_v1 = vsel %vm3664_vm4, %v2408_v60, %v764_v61  ;;  %v766_v2 = vrot.slane %v764_v61, 4 }
  0xbe   : > { %2618 = vmatpush3.bf16.msra.mxu1 %v3029_v27  ;;  %2555 = vmatprep.subr.bf16.mxu0 %v3030_v28  ;;  %v757_v27 = vrot.slane %v3653_v41, 5  ;;  %v470_v28 = vsel %vm3670_vm5, %v465_v11, %v469_v12  ;;  %v521_v11 = vrot.slane %v519_v55, 4 }
  0xbf   : > { %2619 = vmatprep.subr.bf16.mxu1 %v3031_v29  ;;  %v475_v29 = vrot.slane %v474_v20, 4  ;;  %v497_v43 = vrot.slane %v495_v26, 4  ;;  %v488_v47 = vor.u32 %v487_v39, %v484_v38  ;;  %v768_v9 = vsel %vm3664_vm4, %v766_v2, %v767_v63  ;;  %v3052_v20 = vld [vmem:[#allocation7 + $0x1d8] sm:$0xff]   ;;  %v3057_v2 = vld [vmem:[#allocation7 + $0x1e0] sm:$0xff]  }
  0xc0   : > { %v758_v33 = vsel %vm3664_vm4, %v2407_v18, %v757_v27  ;;  %v759_v34 = vrot.slane %v757_v27, 4  ;;  %v3744_v16 = vcombine.low %v765_v1, %v768_v9  ;;  %v3747_v18 = vld [vmem:[%s3636_s28 + $0x34] sm:$0xf]  ;;  %v533_v27 = vshll.u32 %v3740_v13, 16  ;;  %v3054_v39 = vld [vmem:[#allocation7 + $0x198] sm:$0xff]  }
  0xc1   : > { %2556 = vmatpush3.bf16.msra.mxu0 %v3032_v30  ;;  %v760_v30 = vrot.slane %v321_v10, 5  ;;  %v480_v36 = vsel %vm3670_vm5, %v475_v29, %v479_v24  ;;  %v489_v56 = vrot.slane %v488_v47, 4  ;;  %v515_v10 = vshll.u32 %v3715_v45, 16  ;;  %v3771_v47 = vld [vmem:[%s3636_s28 + $0x3c] sm:$0xf] }
  0xc2   : > { %2620 = vmatpush3.bf16.msra.mxu1 %v3033_v31  ;;  %2669 = vmatprep.subr.bf16.mxu0 %v3036_v52  ;;  %v3042_v31 = vld [vmem:[#allocation7 + $0x1c8] sm:$0xff]   ;;  %v3707_v40 = vcombine.low %v470_v28, %v480_v36  ;;  %v493_v52 = vrot.slane %v491_v42, 5  ;;  %v3754_v25 = vcombine.low %v3740_v13, %v3747_v18  ;;  %v543_v28 = vshrl.u32 %v3747_v18, 16 }
  0xc3   : > { %2733 = vmatprep.subr.bf16.mxu1 %v3037_v62  ;;  %v761_v41 = vsel %vm3664_vm4, %v759_v34, %v760_v30  ;;  %v2409_v29 = vrot.slane %v3712_v44, 9  ;;  %v3053_v34 = vld [vmem:[#allocation7 + $0x118] sm:$0xff]   ;;  %v535_v42 = vrot.slane %v533_v27, 5  ;;  %v554_v55 = vshrl.u32 %v3771_v47, 16 }
  0xc4   : > { %1581 = vmatmul.mubr.bf16.vlgmr.msra.gmra.mrb[0].mxu0 %v2386_v3  ;;  %v3717_v46 = vcombine.low %v758_v33, %v761_v41  ;;  %v498_v62 = vor.u32 %v497_v43, %v493_v52  ;;  %v3048_v3 = vld [vmem:[#allocation7 + $0x110] sm:$0xff]   ;;  %v494_v4 = vsel %vm3670_vm5, %v489_v56, %v493_v52  ;;  %v330_v41 = vld [vmem:[%s3636_s28 + $0x38] sm:$0x1]  ;;  %v539_v43 = vshll.u32 %v3747_v18, 16  ;;  %v3056_v56 = vld [vmem:[#allocation7 + $0x160] sm:$0xff]  }
  0xc5   : > { %1678 = vmatmul.mubr.bf16.vlgmr.msra.gmra.mrb[0].mxu1 %v2414_v19  ;;  %2670 = vmatpush3.bf16.msra.mxu0 %v3038_v6  ;;  %v3049_v6 = vld [vmem:[#allocation7 + $0x190] sm:$0xff]   ;;  %v530_v19 = vshrl.u32 %v3740_v13, 16  ;;  %v545_v44 = vrot.slane %v543_v28, 4  ;;  %v3812_v27 = vld [vmem:[%s3636_s28 + $0x4c] sm:$0xf] }
  0xc6   : > { %2734 = vmatpush3.bf16.msra.mxu1 %v3039_v7  ;;  %1685 = vmatprep.mubr.bf16.mxu1 %v3694_v21  ;;  %v499_v5 = vrot.slane %v498_v62, 4  ;;  %v327_v7 = vld [vmem:[%s3636_s28 + $0x2c] sm:$0x1]  ;;  %v541_v60 = vrot.slane %v539_v43, 5  ;;  %v333_v13 = vld [vmem:[%s3636_s28 + $0x44] sm:$0x1] }
  0xc7   : > { %2671 = vmatprep.subr.bf16.mxu0 %v3041_v23  ;;  %2735 = vmatprep.subr.bf16.mxu1 %v3042_v31  ;;  %v525_v12 = vshll.u32 %v327_v7, 16  ;;  %v517_v23 = vrot.slane %v515_v10, 5  ;;  %v771_v31 = vrot.slane %v3715_v45, 5  ;;  %v549_v45 = vshll.u32 %v330_v41, 16  ;;  %v3063_v43 = vld [vmem:[#allocation7 + $0x128] sm:$0xff]  }
  0xc8   : > { %1588 = vmatprep.mubr.bf16.mxu0 %v3707_v40  ;;  %v504_v15 = vsel %vm3670_vm5, %v499_v5, %v503_v59  ;;  %v778_v5 = vrot.slane %v3747_v18, 5  ;;  %v573_v18 = vshll.u32 %v333_v13, 16 }
  0xc9   : > { %2672 = vmatpush3.bf16.msra.mxu0 %v3043_v32  ;;  %v3750_v22 = vcombine.low %v494_v4, %v504_v15  ;;  %v527_v24 = vrot.slane %v525_v12, 5  ;;  %v522_v30 = vor.u32 %v521_v11, %v517_v23  ;;  %v774_v32 = vrot.slane %v327_v7, 5  ;;  %v3059_v12 = vld [vmem:[#allocation7 + $0x1a0] sm:$0xff]  }
  0xca   : > { %2736 = vmatpush3.bf16.msra.mxu1 %v3044_v35  ;;  %2673 = vmatprep.subr.bf16.mxu0 %v3046_v51  ;;  %v532_v35 = vrot.slane %v530_v19, 4  ;;  %v772_v37 = vsel %vm3664_vm4, %v2409_v29, %v771_v31  ;;  %v773_v38 = vrot.slane %v771_v31, 4  ;;  %v551_v61 = vrot.slane %v549_v45, 5  ;;  %v3803_v19 = vld [vmem:[%s3636_s28 + $0x48] sm:$0xf]  ;;  %v3061_v29 = vld [vmem:[#allocation7 + $0x168] sm:$0xff]  }
  0xcb   : > { %2737 = vmatprep.subr.bf16.mxu1 %v3047_v0  ;;  %v523_v36 = vrot.slane %v522_v30, 4  ;;  %v557_v0 = vshll.u32 %v3771_v47, 16  ;;  %v779_v10 = vsel %vm3664_vm4, %v2410_v48, %v778_v5  ;;  %v780_v11 = vrot.slane %v778_v5, 4  ;;  %v3066_v5 = vld [vmem:[#allocation7 + $0x170] sm:$0xff]  }
  0xcc   : > { %1589 = vmatmul.mubr.bf16.gmra.mrb[4].mxu0 %v3659_v49  ;;  %v511_v49 = vrot.slane %v509_v54, 5  ;;  %v775_v52 = vsel %vm3664_vm4, %v773_v38, %v774_v32  ;;  %v536_v53 = vor.u32 %v535_v42, %v532_v35  ;;  %v3779_v54 = vld [vmem:[%s3636_s28 + $0x40] sm:$0xf]  ;;  %v578_v28 = vshrl.u32 %v3803_v19, 16 }
  0xcd   : > { %1686 = vmatmul.mubr.bf16.gmra.mrb[4].mxu1 %v3717_v46  ;;  %2674 = vmatpush3.bf16.msra.mxu0 %v3048_v3  ;;  %v528_v51 = vsel %vm3670_vm5, %v523_v36, %v527_v24  ;;  %v3784_v62 = vcombine.low %v772_v37, %v775_v52  ;;  %v567_v1 = vshrl.u32 %v3779_v54, 16  ;;  %v546_v3 = vor.u32 %v545_v44, %v541_v60  ;;  %v3062_v36 = vld [vmem:[#allocation7 + $0x1e8] sm:$0xff]   ;;  %v336_v52 = vld [vmem:[%s3636_s28 + $0x50] sm:$0x1] }
  0xce   : > { %1693 = vmatprep.mubr.bf16.mxu1 %v3721_v50  ;;  %2738 = vmatpush3.bf16.msra.mxu1 %v3049_v6  ;;  %v512_v17 = vor.u32 %v511_v49, %v508_v8  ;;  %v537_v63 = vrot.slane %v536_v53, 4  ;;  %v3791_v4 = vcombine.low %v3771_v47, %v3779_v54  ;;  %v781_v6 = vrot.slane %v330_v41, 5  ;;  %v3058_v8 = vld [vmem:[#allocation7 + $0x120] sm:$0xff]  }
  0xcf   : > { %2675 = vmatprep.subr.bf16.mxu0 %v3051_v14  ;;  %2739 = vmatprep.subr.bf16.mxu1 %v3052_v20  ;;  %v556_v49 = vrot.slane %v554_v55, 4  ;;  %v547_v9 = vrot.slane %v546_v3, 4  ;;  %v559_v14 = vrot.slane %v557_v0, 5  ;;  %v563_v15 = vshll.u32 %v3779_v54, 16 }
  0xd0   : > { %v513_v26 = vrot.slane %v512_v17, 4  ;;  %1596 = vmatprep.mubr.bf16.mxu0 %v3750_v22  ;;  %v542_v7 = vsel %vm3670_vm5, %v537_v63, %v541_v60  ;;  %v569_v17 = vrot.slane %v567_v1, 4  ;;  %v2411_v20 = vrot.slane %v3771_v47, 9  ;;  %v3832_v60 = vld [vmem:[%s3636_s28 + $0x54] sm:$0xf] }
  0xd1   : > { %2676 = vmatpush3.bf16.msra.mxu0 %v3053_v34  ;;  %v782_v24 = vsel %vm3664_vm4, %v780_v11, %v781_v6  ;;  %v565_v31 = vrot.slane %v563_v15, 5  ;;  %v575_v32 = vrot.slane %v573_v18, 5  ;;  %v581_v34 = vshll.u32 %v3803_v19, 16 }
  0xd2   : > { %v518_v33 = vsel %vm3670_vm5, %v513_v26, %v517_v23  ;;  %2740 = vmatpush3.bf16.msra.mxu1 %v3054_v39  ;;  %2677 = vmatprep.subr.bf16.mxu0 %v3056_v56  ;;  %v552_v23 = vsel %vm3670_vm5, %v547_v9, %v551_v61  ;;  %v560_v26 = vor.u32 %v559_v14, %v556_v49  ;;  %v591_v35 = vshrl.u32 %v3812_v27, 16 }
  0xd3   : > { %v3782_v59 = vcombine.low %v518_v33, %v528_v51  ;;  %2741 = vmatprep.subr.bf16.mxu1 %v3057_v2  ;;  %v3815_v30 = vcombine.low %v542_v7, %v552_v23  ;;  %v3820_v37 = vcombine.low %v779_v10, %v782_v24  ;;  %v570_v38 = vor.u32 %v569_v17, %v565_v31  ;;  %v3064_v51 = vld [vmem:[#allocation7 + $0x1a8] sm:$0xff]  }
  0xd4   : > { %1597 = vmatmul.mubr.bf16.gmra.mrb[8].mxu0 %v3694_v21  ;;  %v561_v33 = vrot.slane %v560_v26, 4  ;;  %v785_v39 = vrot.slane %v3779_v54, 5  ;;  %v788_v41 = vrot.slane %v333_v13, 5  ;;  %v3825_v42 = vcombine.low %v3803_v19, %v3812_v27  ;;  %v3842_v2 = vld [vmem:[%s3636_s28 + $0x58] sm:$0xf] }
  0xd5   : > { %1694 = vmatmul.mubr.bf16.gmra.mrb[8].mxu1 %v3744_v16  ;;  %1604 = vmatprep.mubr.bf16.mxu0 %v3782_v59  ;;  %v580_v44 = vrot.slane %v578_v28, 4  ;;  %v571_v47 = vrot.slane %v570_v38, 4  ;;  %v583_v53 = vrot.slane %v581_v34, 5  ;;  %v587_v54 = vshll.u32 %v3812_v27, 16  ;;  %v3069_v28 = vld [vmem:[#allocation7 + $0x1b0] sm:$0xff]  }
  0xd6   : > { %1701 = vmatprep.mubr.bf16.mxu1 %v3754_v25  ;;  %2678 = vmatpush3.bf16.msra.mxu0 %v3058_v8  ;;  %v566_v45 = vsel %vm3670_vm5, %v561_v33, %v565_v31  ;;  %v787_v48 = vrot.slane %v785_v39, 4  ;;  %v593_v55 = vrot.slane %v591_v35, 4  ;;  %v597_v56 = vshll.u32 %v336_v52, 16 }
  0xd7   : > { %2742 = vmatpush3.bf16.msra.mxu1 %v3059_v12  ;;  %2679 = vmatprep.subr.bf16.mxu0 %v3061_v29  ;;  %v2412_v61 = vrot.slane %v3803_v19, 9  ;;  %v576_v63 = vsel %vm3670_vm5, %v571_v47, %v575_v32  ;;  %v786_v0 = vsel %vm3664_vm4, %v2411_v20, %v785_v39  ;;  %v584_v1 = vor.u32 %v583_v53, %v580_v44  ;;  %v3067_v12 = vld [vmem:[#allocation7 + $0x1f0] sm:$0xff]   ;;  %v339_v29 = vld [vmem:[%s3636_s28 + $0x5c] sm:$0x1] }
  0xd8   : > { %2743 = vmatprep.subr.bf16.mxu1 %v3062_v36  ;;  %v602_v3 = vshrl.u32 %v3832_v60, 16  ;;  %v3845_v6 = vcombine.low %v566_v45, %v576_v63  ;;  %v789_v7 = vsel %vm3664_vm4, %v787_v48, %v788_v41  ;;  %v589_v8 = vrot.slane %v587_v54, 5  ;;  %v3068_v19 = vld [vmem:[#allocation7 + $0x130] sm:$0xff]   ;;  %v3071_v36 = vld [vmem:[#allocation7 + $0x178] sm:$0xff]  }
  0xd9   : > { %v599_v49 = vrot.slane %v597_v56, 5  ;;  %v585_v9 = vrot.slane %v584_v1, 4  ;;  %v605_v10 = vshll.u32 %v3832_v60, 16  ;;  %v615_v11 = vshrl.u32 %v3842_v2, 16  ;;  %v3871_v41 = vld [vmem:[%s3636_s28 + $0x60] sm:$0xf] }
  0xda   : > { %2680 = vmatpush3.bf16.msra.mxu0 %v3063_v43  ;;  %v594_v13 = vor.u32 %v593_v55, %v589_v8  ;;  %v792_v14 = vrot.slane %v3812_v27, 5  ;;  %v795_v15 = vrot.slane %v336_v52, 5  ;;  %v3854_v17 = vcombine.low %v786_v0, %v789_v7  ;;  %v3880_v48 = vld [vmem:[%s3636_s28 + $0x64] sm:$0xf]  ;;  %v3073_v56 = vld [vmem:[#allocation7 + $0x138] sm:$0xff]  }
  0xdb   : > { %2744 = vmatpush3.bf16.msra.mxu1 %v3064_v51  ;;  %2681 = vmatprep.subr.bf16.mxu0 %v3066_v5  ;;  %v3858_v18 = vcombine.low %v3832_v60, %v3842_v2  ;;  %v604_v20 = vrot.slane %v602_v3, 4  ;;  %v590_v23 = vsel %vm3670_vm5, %v585_v9, %v589_v8  ;;  %v607_v31 = vrot.slane %v605_v10, 5  ;;  %v3072_v51 = vld [vmem:[#allocation7 + $0x1f8] sm:$0xff]   ;;  %v3075_v3 = vld [vmem:[#allocation7 + $0x200] sm:$0xff]   ;;  %v3076_v10 = vld [vmem:[#allocation7 + $0x208] sm:$0xff]  }
  0xdc   : > { %1605 = vmatmul.mubr.bf16.gmra.mrb[12].mxu0 %v3721_v50  ;;  %2745 = vmatprep.subr.bf16.mxu1 %v3067_v12  ;;  %v595_v24 = vrot.slane %v594_v13, 4  ;;  %v794_v26 = vrot.slane %v792_v14, 4  ;;  %v611_v27 = vshll.u32 %v3842_v2, 16  ;;  %v617_v32 = vrot.slane %v615_v11, 4  ;;  %v3074_v1 = vld [vmem:[#allocation7 + $0x1b8] sm:$0xff]   ;;  %v3077_v11 = vld [vmem:[#allocation7 + $0x210] sm:$0xff]  }
  0xdd   : > { %1702 = vmatmul.mubr.bf16.gmra.mrb[12].mxu1 %v3784_v62  ;;  %1612 = vmatprep.mubr.bf16.mxu0 %v3815_v30  ;;  %v621_v33 = vshll.u32 %v339_v29, 16  ;;  %v608_v35 = vor.u32 %v607_v31, %v604_v20  ;;  %v2413_v43 = vrot.slane %v3832_v60, 9  ;;  %v793_v44 = vsel %vm3664_vm4, %v2412_v61, %v792_v14  ;;  %v342_v20 = vld [vmem:[%s3636_s28 + $0x68] sm:$0x1] }
  0xde   : > { %1709 = vmatprep.mubr.bf16.mxu1 %v3791_v4  ;;  %2682 = vmatpush3.bf16.msra.mxu0 %v3068_v19  ;;  %v600_v34 = vsel %vm3670_vm5, %v595_v24, %v599_v49  ;;  %v613_v39 = vrot.slane %v611_v27, 5  ;;  %v796_v45 = vsel %vm3664_vm4, %v794_v26, %v795_v15  ;;  %v799_v54 = vrot.slane %v3842_v2, 5  ;;  %v3931_v24 = vld [vmem:[%s3636_s28 + $0x70] sm:$0xf]  ;;  %v3083_v26 = vld [vmem:[#allocation7 + $0x238] sm:$0xff]  }
  0xdf   : > { %2746 = vmatpush3.bf16.msra.mxu1 %v3069_v28  ;;  %v3868_v38 = vcombine.low %v590_v23, %v600_v34  ;;  %v609_v47 = vrot.slane %v608_v35, 4  ;;  %2683 = vmatprep.subr.bf16.mxu0 %v3071_v36  ;;  %v623_v53 = vrot.slane %v621_v33, 5  ;;  %v802_v55 = vrot.slane %v339_v29, 5  ;;  %v3928_v23 = vld [vmem:[%s3636_s28 + $0x6c] sm:$0xf] }
  0xe0   : > { %v618_v52 = vor.u32 %v617_v32, %v613_v39  ;;  %2747 = vmatprep.subr.bf16.mxu1 %v3072_v51  ;;  %v3884_v60 = vcombine.low %v793_v44, %v796_v45  ;;  %v801_v0 = vrot.slane %v799_v54, 4  ;;  %v3890_v5 = vcombine.low %v3871_v41, %v3880_v48  ;;  %v345_v45 = vld [vmem:[%s3636_s28 + $0x74] sm:$0x1]  ;;  %s3202_s28 = sshll.u32 %s3337_s2, 4  ;;  %s3203_s28 = int_to_ptr.vmem [resolvable:$false] %s3202_s28 }
  0xe1   : > { %v614_v61 = vsel %vm3670_vm5, %v609_v47, %v613_v39  ;;  %v800_v8 = vsel %vm3664_vm4, %v2413_v43, %v799_v54  ;;  %v679_v12 = vshrl.u32 %v3880_v48, 16  ;;  %v675_v13 = vshll.u32 %v3880_v48, 16  ;;  %s3204_s7 = scalar_lea.vmem %s3203_s28, 2048  ;;  %p3205_p13 = scmp.lt.s32.totalorder %s4167_s12, %s3203_s28 }
  0xe2   : > { %v619_v63 = vrot.slane %v618_v52, 4  ;;  %2684 = vmatpush3.bf16.msra.mxu0 %v3073_v56  ;;  %v803_v49 = vsel %vm3664_vm4, %v801_v0, %v802_v55  ;;  %v685_v31 = vshll.u32 %v342_v20, 16  ;;  %v702_v27 = vshrl.u32 %v3928_v23, 16  ;;  %p3206_p6 = scmp.lt.s32.totalorder %s3204_s7, %s3198_s29 }
  0xe3   : > { %2748 = vmatpush3.bf16.msra.mxu1 %v3074_v1  ;;  %2813 = vmatprep.subr.bf16.mxu0 %v3075_v3  ;;  %v3904_v9 = vcombine.low %v800_v8, %v803_v49  ;;  %v677_v15 = vrot.slane %v675_v13, 5  ;;  %v681_v19 = vrot.slane %v679_v12, 4  ;;  %v705_v32 = vshll.u32 %v3928_v23, 16 }
  0xe4   : > { %1613 = vmatmul.mubr.bf16.gmra.mrb[16].mxu0 %v3754_v25  ;;  %v624_v2 = vsel %vm3670_vm5, %v619_v63, %v623_v53  ;;  %2845 = vmatprep.subr.bf16.mxu1 %v3075_v3  ;;  %v711_v33 = vshll.u32 %v3931_v24, 16  ;;  %v687_v35 = vrot.slane %v685_v31, 5  ;;  %v704_v36 = vrot.slane %v702_v27, 4  ;;  %p3207_p8 = por %p3206_p6, %p3205_p13 }
  0xe5   : > { %1710 = vmatmul.mubr.bf16.gmra.mrb[16].mxu1 %v3820_v37  ;;  %1620 = vmatprep.mubr.bf16.mxu0 %v3845_v6  ;;  %v3894_v7 = vcombine.low %v614_v61, %v624_v2  ;;  %v682_v29 = vor.u32 %v681_v19, %v677_v15  ;;  %v707_v39 = vrot.slane %v705_v32, 5  ;;  %v847_v51 = vrot.slane %v3880_v48, 5 }
  0xe6   : > { %1717 = vmatprep.mubr.bf16.mxu1 %v3825_v42  ;;  %v713_v43 = vrot.slane %v711_v33, 5  ;;  %v721_v55 = vshll.u32 %v345_v45, 16  ;;  %v850_v61 = vrot.slane %v342_v20, 5  ;;  %v867_v58 = vrot.slane %v3931_v24, 5  ;;  %p3208_p12 = pnand %p3207_p8, %p3201_p5 }
  0xe7   : > { %v683_v34 = vrot.slane %v682_v29, 4  ;;  %v708_v53 = vor.u32 %v707_v39, %v704_v36 }
  0xe8   : > { %v723_v1 = vrot.slane %v721_v55, 5 }
  0xe9   : > { %v688_v52 = vsel %vm3670_vm5, %v683_v34, %v687_v35  ;;  %v709_v63 = vrot.slane %v708_v53, 4 }
  0xec   : > { %1621 = vmatmul.mubr.bf16.gmra.mrb[20].mxu0 %v3791_v4 }
  0xed   : > { %1718 = vmatmul.mubr.bf16.gmra.mrb[20].mxu1 %v3854_v17  ;;  %1628 = vmatprep.mubr.bf16.mxu0 %v3868_v38 }
  0xee   : > { %1725 = vmatprep.mubr.bf16.mxu1 %v3858_v18 }
  0xf4   : > { %1629 = vmatmul.mubr.bf16.gmra.mrb[24].mxu0 %v3825_v42 }
  0xf5   : > { %1726 = vmatmul.mubr.bf16.gmra.mrb[24].mxu1 %v3884_v60  ;;  %1636 = vmatprep.mubr.bf16.mxu0 %v3894_v7 }
  0xf6   : > { %1733 = vmatprep.mubr.bf16.mxu1 %v3890_v5 }
  0xfc   : > { %1637 = vmatmul.mubr.bf16.gmra.mrb[28].mxu0 %v3858_v18 }
  0xfd   : > { %1734 = vmatmul.mubr.bf16.gmra.mrb[28].mxu1 %v3904_v9  ;;  %1774 = vmatprep.mubr.bf16.mxu0 %v3717_v46  ;;  %v3078_v46 = vld [vmem:[#allocation7 + $0x218] sm:$0xff]  }
  0xfe   : > { %1871 = vmatprep.mubr.bf16.mxu1 %v3750_v22 }
 0x104   : > { %1775 = vmatmul.mubr.bf16.vlgmr.msra.gmra.mrb[32].mxu0 %v3707_v40  ;;  %v3080_v40 = vld [vmem:[#allocation7 + $0x228] sm:$0xff]  }
 0x105   : > { %1872 = vmatmul.mubr.bf16.vlgmr.msra.gmra.mrb[32].mxu1 %v3694_v21  ;;  %2814 = vmatpush3.bf16.msra.mxu0 %v3075_v3  ;;  %v3079_v21 = vld [vmem:[#allocation7 + $0x220] sm:$0xff]  }
 0x106   : > { %2853 = vmatpush3.bf16.msra.mxu1 %v3075_v3  ;;  %1782 = vmatprep.mubr.bf16.mxu0 %v3744_v16 }
 0x107   : > { %1879 = vmatprep.mubr.bf16.mxu1 %v3782_v59  ;;  %2815 = vmatprep.subr.bf16.mxu0 %v3076_v10 }
 0x108   : > { %2846 = vmatprep.subr.bf16.mxu1 %v3076_v10 }
 0x109   : > { %2816 = vmatpush3.bf16.msra.mxu0 %v3076_v10 }
 0x10a   : > { %2854 = vmatpush3.bf16.msra.mxu1 %v3076_v10  ;;  %2817 = vmatprep.subr.bf16.mxu0 %v3077_v11  ;;  %v869_v10 = vrot.slane %v867_v58, 4 }
 0x10b   : > { %2847 = vmatprep.subr.bf16.mxu1 %v3077_v11 }
 0x10c   : > { %1783 = vmatmul.mubr.bf16.gmra.mrb[36].mxu0 %v3750_v22  ;;  %v669_v22 = vshll.u32 %v3871_v41, 16 }
 0x10d   : > { %1880 = vmatmul.mubr.bf16.gmra.mrb[36].mxu1 %v3721_v50  ;;  %1790 = vmatprep.mubr.bf16.mxu0 %v3784_v62  ;;  %v666_v50 = vshrl.u32 %v3871_v41, 16 }
 0x10e   : > { %1887 = vmatprep.mubr.bf16.mxu1 %v3815_v30  ;;  %2818 = vmatpush3.bf16.msra.mxu0 %v3077_v11  ;;  %v671_v14 = vrot.slane %v669_v22, 5 }
 0x10f   : > { %2855 = vmatpush3.bf16.msra.mxu1 %v3077_v11  ;;  %2819 = vmatprep.subr.bf16.mxu0 %v3078_v46  ;;  %v870_v11 = vrot.slane %v345_v45, 5 }
 0x110   : > { %2848 = vmatprep.subr.bf16.mxu1 %v3078_v46 }
 0x112   : > { %2820 = vmatpush3.bf16.msra.mxu0 %v3078_v46 }
 0x113   : > { %2856 = vmatpush3.bf16.msra.mxu1 %v3078_v46  ;;  %2821 = vmatprep.subr.bf16.mxu0 %v3079_v21 }
 0x114   : > { %2849 = vmatprep.subr.bf16.mxu1 %v3079_v21  ;;  %1791 = vmatmul.mubr.bf16.gmra.mrb[40].mxu0 %v3782_v59  ;;  %v668_v59 = vrot.slane %v666_v50, 4 }
 0x115   : > { %1888 = vmatmul.mubr.bf16.gmra.mrb[40].mxu1 %v3754_v25  ;;  %1798 = vmatprep.mubr.bf16.mxu0 %v3820_v37  ;;  %v3081_v25 = vld [vmem:[#allocation7 + $0x230] sm:$0xff]  }
 0x116   : > { %1895 = vmatprep.mubr.bf16.mxu1 %v3845_v6  ;;  %2822 = vmatpush3.bf16.msra.mxu0 %v3079_v21  ;;  %v672_v28 = vor.u32 %v671_v14, %v668_v59 }
 0x117   : > { %2857 = vmatpush3.bf16.msra.mxu1 %v3079_v21  ;;  %2823 = vmatprep.subr.bf16.mxu0 %v3080_v40 }
 0x118   : > { %2850 = vmatprep.subr.bf16.mxu1 %v3080_v40 }
 0x11a   : > { %2824 = vmatpush3.bf16.msra.mxu0 %v3080_v40 }
 0x11b   : > { %2858 = vmatpush3.bf16.msra.mxu1 %v3080_v40  ;;  %2825 = vmatprep.subr.bf16.mxu0 %v3081_v25 }
 0x11c   : > { %2851 = vmatprep.subr.bf16.mxu1 %v3081_v25  ;;  %1799 = vmatmul.mubr.bf16.gmra.mrb[44].mxu0 %v3815_v30  ;;  %v715_v30 = vshrl.u32 %v3931_v24, 16 }
 0x11d   : > { %1896 = vmatmul.mubr.bf16.gmra.mrb[44].mxu1 %v3791_v4  ;;  %1806 = vmatprep.mubr.bf16.mxu0 %v3854_v17  ;;  %v673_v4 = vrot.slane %v672_v28, 4 }
 0x11e   : > { %1903 = vmatprep.mubr.bf16.mxu1 %v3868_v38  ;;  %2826 = vmatpush3.bf16.msra.mxu0 %v3081_v25  ;;  %v717_v44 = vrot.slane %v715_v30, 4 }
 0x11f   : > { %2859 = vmatpush3.bf16.msra.mxu1 %v3081_v25  ;;  %2827 = vmatprep.subr.bf16.mxu0 %v3083_v26  ;;  %v678_v47 = vsel %vm3670_vm5, %v673_v4, %v677_v15 }
 0x120   : > { %2852 = vmatprep.subr.bf16.mxu1 %v3083_v26  ;;  %v718_v54 = vor.u32 %v717_v44, %v713_v43  ;;  %v2404_v56 = vcombine.low %v678_v47, %v688_v52 }
 0x122   : > { %2828 = vmatpush3.bf16.msra.mxu0 %v3083_v26  ;;  %v719_v0 = vrot.slane %v718_v54, 4 }
 0x123   : > { %2860 = vmatpush3.bf16.msra.mxu1 %v3083_v26 }
 0x124   : > { %1807 = vmatmul.mubr.bf16.gmra.mrb[48].mxu0 %v3845_v6  ;;  %v2422_v6 = vrot.slane %v3871_v41, 9  ;;  %v714_v41 = vsel %vm3670_vm5, %v709_v63, %v713_v43  ;;  %v724_v2 = vsel %vm3670_vm5, %v719_v0, %v723_v1 }
 0x125   : > { %1904 = vmatmul.mubr.bf16.gmra.mrb[48].mxu1 %v3825_v42  ;;  %1814 = vmatprep.mubr.bf16.mxu0 %v3884_v60  ;;  %v849_v42 = vrot.slane %v847_v51, 4  ;;  %v2405_v49 = vcombine.low %v714_v41, %v724_v2 }
 0x126   : > { %1911 = vmatprep.mubr.bf16.mxu1 %v3894_v7  ;;  %v848_v48 = vsel %vm3664_vm4, %v2422_v6, %v847_v51 }
 0x127   : > { %v851_v3 = vsel %vm3664_vm4, %v849_v42, %v850_v61 }
 0x128   : > { %v2423_v8 = vcombine.low %v848_v48, %v851_v3 }
 0x12c   : > { %1815 = vmatmul.mubr.bf16.gmra.mrb[52].mxu0 %v3868_v38  ;;  %v2424_v38 = vrot.slane %v3928_v23, 9 }
 0x12d   : > { %1912 = vmatmul.mubr.bf16.gmra.mrb[52].mxu1 %v3858_v18  ;;  %1822 = vmatprep.mubr.bf16.mxu0 %v3904_v9  ;;  %v2395_v18 = vcombine.low %v3928_v23, %v3931_v24 }
 0x12e   : > { %1919 = vmatprep.mubr.bf16.mxu1 %v2404_v56 }
 0x134   : > { %1823 = vmatmul.mubr.bf16.gmra.mrb[56].mxu0 %v3894_v7  ;;  %v3336_v7 = vmov 0.0  }
 0x135   : > { %1920 = vmatmul.mubr.bf16.gmra.mrb[56].mxu1 %v3890_v5  ;;  %1830 = vmatprep.mubr.bf16.mxu0 %v2423_v8  ;;  %v868_v5 = vsel %vm3664_vm4, %v2424_v38, %v867_v58  ;;  %298 = vst.msk [vmem:[#allocation2 + $0x10] sm:$0xff] %vm295_vm6, %v3336_v7  ;;  %296 = vst.msk [vmem:[#allocation2] sm:$0xff] %vm295_vm6, %v3336_v7 }
 0x136   : > { %1927 = vmatprep.mubr.bf16.mxu1 %v2405_v49  ;;  %297 = vst.msk [vmem:[#allocation2 + $0x8] sm:$0xff] %vm295_vm6, %v3336_v7  ;;  %299 = vst.msk [vmem:[#allocation2 + $0x18] sm:$0xff] %vm295_vm6, %v3336_v7 }
 0x137   : > { %300 = vst.msk [vmem:[#allocation2 + $0x20] sm:$0xff] %vm295_vm6, %v3336_v7  ;;  %301 = vst.msk [vmem:[#allocation2 + $0x28] sm:$0xff] %vm295_vm6, %v3336_v7 }
 0x138   : > { %302 = vst.msk [vmem:[#allocation2 + $0x30] sm:$0xff] %vm295_vm6, %v3336_v7  ;;  %303 = vst.msk [vmem:[#allocation2 + $0x38] sm:$0xff] %vm295_vm6, %v3336_v7 }
 0x139   : > { %304 = vst.msk [vmem:[#allocation2 + $0x40] sm:$0xff] %vm295_vm6, %v3336_v7  ;;  %305 = vst.msk [vmem:[#allocation2 + $0x48] sm:$0xff] %vm295_vm6, %v3336_v7 }
 0x13a   : > { %306 = vst.msk [vmem:[#allocation2 + $0x50] sm:$0xff] %vm295_vm6, %v3336_v7  ;;  %307 = vst.msk [vmem:[#allocation2 + $0x58] sm:$0xff] %vm295_vm6, %v3336_v7 }
 0x13b   : > { %308 = vst.msk [vmem:[#allocation2 + $0x60] sm:$0xff] %vm295_vm6, %v3336_v7  ;;  %309 = vst.msk [vmem:[#allocation2 + $0x68] sm:$0xff] %vm295_vm6, %v3336_v7 }
 0x13c   : > { %1831 = vmatmul.mubr.bf16.gmra.mrb[60].mxu0 %v2404_v56  ;;  %310 = vst.msk [vmem:[#allocation2 + $0x70] sm:$0xff] %vm295_vm6, %v3336_v7  ;;  %311 = vst.msk [vmem:[#allocation2 + $0x78] sm:$0xff] %vm295_vm6, %v3336_v7 }
 0x13d   : > { %1928 = vmatmul.mubr.bf16.gmra.mrb[60].mxu1 %v2395_v18  ;;  %2829 = vmatprep.mubr.bf16.mxu0 %v3744_v16  ;;  %v871_v16 = vsel %vm3664_vm4, %v869_v10, %v870_v11 }
 0x13e   : > { %2837 = vmatprep.mubr.bf16.mxu1 %v3884_v60  ;;  %v2425_v60 = vcombine.low %v868_v5, %v871_v16 }
 0x144   : > { %2830 = vmatmul.mubr.bf16.vlgmr.msra.gmra.mrb[64].mxu0 %v3784_v62 }
 0x145   : > { %2838 = vmatmul.mubr.bf16.vlgmr.msra.gmra.mrb[64].mxu1 %v3904_v9  ;;  %2833 = vmatprep.mubr.bf16.mxu0 %v3820_v37 }
 0x146   : > { %2841 = vmatprep.mubr.bf16.mxu1 %v2423_v8 }
 0x14c   : > { %2834 = vmatmul.mubr.bf16.gmra.mrb[68].mxu0 %v3854_v17 }
 0x14d   : > { %2842 = vmatmul.mubr.bf16.gmra.mrb[68].mxu1 %v2425_v60 }
 0x197   : > { %v2557_v57 = vpop.f32.mrb[0].mxu0 }
 0x198   : > { %v2621_v62 = vpop.f32.mrb[0].mxu1  ;;  %v2558_v37 = vpop.f32.mrb[1].mxu0 }
 0x199   : > { %v2622_v17 = vpop.f32.mrb[1].mxu1  ;;  %v2559_v9 = vadd.f32 %v2558_v37, %v2557_v57  ;;  %v2560_v21 = vpop.f32.mrb[2].mxu0 }
 0x19a   : > { %v2623_v46 = vadd.f32 %v2622_v17, %v2621_v62  ;;  %v2624_v40 = vpop.f32.mrb[2].mxu1  ;;  %v2561_v50 = vpop.f32.mrb[3].mxu0 }
 0x19b   : > { %v2625_v22 = vpop.f32.mrb[3].mxu1  ;;  %v2562_v13 = vadd.f32 %v2561_v50, %v2560_v21 }
 0x19c   : > { %v3995_v12 = vadd.f32 %v2623_v46, %v2559_v9  ;;  %v2626_v25 = vadd.f32 %v2625_v22, %v2624_v40 }
 0x19e   : > { %v3997_v59 = vadd.f32 %v2626_v25, %v2562_v13 }
 0x19f   : > { %v2563_v14 = vpop.f32.mrb[4].mxu0 }
 0x1a0   : > { %v2627_v15 = vpop.f32.mrb[4].mxu1  ;;  %v2564_v19 = vpop.f32.mrb[5].mxu0 }
 0x1a1   : > { %v2628_v20 = vpop.f32.mrb[5].mxu1  ;;  %v2565_v23 = vadd.f32 %v2564_v19, %v2563_v14  ;;  %v2566_v26 = vpop.f32.mrb[6].mxu0 }
 0x1a2   : > { %v2629_v24 = vadd.f32 %v2628_v20, %v2627_v15  ;;  %v2630_v28 = vpop.f32.mrb[6].mxu1  ;;  %v2567_v29 = vpop.f32.mrb[7].mxu0 }
 0x1a3   : > { %v2631_v31 = vpop.f32.mrb[7].mxu1  ;;  %v2568_v32 = vadd.f32 %v2567_v29, %v2566_v26 }
 0x1a4   : > { %v3999_v27 = vadd.f32 %v2629_v24, %v2565_v23  ;;  %v2632_v33 = vadd.f32 %v2631_v31, %v2630_v28 }
 0x1a6   : > { %v4001_v30 = vadd.f32 %v2632_v33, %v2568_v32 }
 0x1a7   : > { %v2569_v4 = vpop.f32.mrb[8].mxu0 }
 0x1a8   : > { %v2633_v34 = vpop.f32.mrb[8].mxu1  ;;  %v2570_v35 = vpop.f32.mrb[9].mxu0 }
 0x1a9   : > { %v2634_v36 = vpop.f32.mrb[9].mxu1  ;;  %v2571_v39 = vadd.f32 %v2570_v35, %v2569_v4  ;;  %v2572_v44 = vpop.f32.mrb[10].mxu0 }
 0x1aa   : > { %v2635_v43 = vadd.f32 %v2634_v36, %v2633_v34  ;;  %v2636_v45 = vpop.f32.mrb[10].mxu1  ;;  %v2573_v47 = vpop.f32.mrb[11].mxu0 }
 0x1ab   : > { %v2637_v51 = vpop.f32.mrb[11].mxu1  ;;  %v2574_v53 = vadd.f32 %v2573_v47, %v2572_v44 }
 0x1ac   : > { %v4003_v52 = vadd.f32 %v2635_v43, %v2571_v39  ;;  %v2638_v54 = vadd.f32 %v2637_v51, %v2636_v45 }
 0x1ae   : > { %v4005_v55 = vadd.f32 %v2638_v54, %v2574_v53 }
 0x1af   : > { %v2575_v56 = vpop.f32.mrb[12].mxu0 }
 0x1b0   : > { %v2639_v6 = vpop.f32.mrb[12].mxu1  ;;  %v2576_v61 = vpop.f32.mrb[13].mxu0 }
 0x1b1   : > { %v2640_v42 = vpop.f32.mrb[13].mxu1  ;;  %v2577_v63 = vadd.f32 %v2576_v61, %v2575_v56  ;;  %v2578_v1 = vpop.f32.mrb[14].mxu0 }
 0x1b2   : > { %v2641_v0 = vadd.f32 %v2640_v42, %v2639_v6  ;;  %v2642_v48 = vpop.f32.mrb[14].mxu1  ;;  %v2579_v3 = vpop.f32.mrb[15].mxu0 }
 0x1b3   : > { %v2643_v41 = vpop.f32.mrb[15].mxu1  ;;  %v2580_v8 = vadd.f32 %v2579_v3, %v2578_v1 }
 0x1b4   : > { %v4007_v2 = vadd.f32 %v2641_v0, %v2577_v63  ;;  %v2644_v49 = vadd.f32 %v2643_v41, %v2642_v48 }
 0x1b6   : > { %v4009_v18 = vadd.f32 %v2644_v49, %v2580_v8 }
 0x1b7   : > { %v2581_v58 = vpop.f32.mrb[16].mxu0 }
 0x1b8   : > { %v2645_v38 = vpop.f32.mrb[16].mxu1  ;;  %v2582_v10 = vpop.f32.mrb[17].mxu0 }
 0x1b9   : > { %v2646_v11 = vpop.f32.mrb[17].mxu1  ;;  %v2583_v5 = vadd.f32 %v2582_v10, %v2581_v58  ;;  %v2584_v60 = vpop.f32.mrb[18].mxu0 }
 0x1ba   : > { %v2647_v16 = vadd.f32 %v2646_v11, %v2645_v38  ;;  %v2648_v7 = vpop.f32.mrb[18].mxu1  ;;  %v2585_v57 = vpop.f32.mrb[19].mxu0 }
 0x1bb   : > { %v2649_v62 = vpop.f32.mrb[19].mxu1  ;;  %v2586_v17 = vadd.f32 %v2585_v57, %v2584_v60 }
 0x1bc   : > { %v4011_v37 = vadd.f32 %v2647_v16, %v2583_v5  ;;  %v2650_v9 = vadd.f32 %v2649_v62, %v2648_v7 }
 0x1be   : > { %v4013_v46 = vadd.f32 %v2650_v9, %v2586_v17 }
 0x1bf   : > { %v2587_v21 = vpop.f32.mrb[20].mxu0 }
 0x1c0   : > { %v2651_v40 = vpop.f32.mrb[20].mxu1  ;;  %v2588_v50 = vpop.f32.mrb[21].mxu0 }
 0x1c1   : > { %v2652_v22 = vpop.f32.mrb[21].mxu1  ;;  %v2589_v13 = vadd.f32 %v2588_v50, %v2587_v21  ;;  %v2590_v14 = vpop.f32.mrb[22].mxu0 }
 0x1c2   : > { %v2653_v25 = vadd.f32 %v2652_v22, %v2651_v40  ;;  %v2654_v15 = vpop.f32.mrb[22].mxu1  ;;  %v2591_v19 = vpop.f32.mrb[23].mxu0 }
 0x1c3   : > { %v2655_v20 = vpop.f32.mrb[23].mxu1  ;;  %v2592_v24 = vadd.f32 %v2591_v19, %v2590_v14 }
 0x1c4   : > { %v4015_v23 = vadd.f32 %v2653_v25, %v2589_v13  ;;  %v2656_v26 = vadd.f32 %v2655_v20, %v2654_v15 }
 0x1c6   : > { %v4017_v28 = vadd.f32 %v2656_v26, %v2592_v24 }
 0x1c7   : > { %v2593_v29 = vpop.f32.mrb[24].mxu0 }
 0x1c8   : > { %v2657_v31 = vpop.f32.mrb[24].mxu1  ;;  %v2594_v32 = vpop.f32.mrb[25].mxu0 }
 0x1c9   : > { %v2658_v33 = vpop.f32.mrb[25].mxu1  ;;  %v2595_v4 = vadd.f32 %v2594_v32, %v2593_v29  ;;  %v2596_v35 = vpop.f32.mrb[26].mxu0 }
 0x1ca   : > { %v2659_v34 = vadd.f32 %v2658_v33, %v2657_v31  ;;  %v2660_v36 = vpop.f32.mrb[26].mxu1  ;;  %v2597_v39 = vpop.f32.mrb[27].mxu0 }
 0x1cb   : > { %v2661_v43 = vpop.f32.mrb[27].mxu1  ;;  %v2598_v45 = vadd.f32 %v2597_v39, %v2596_v35 }
 0x1cc   : > { %v4019_v44 = vadd.f32 %v2659_v34, %v2595_v4  ;;  %v2662_v47 = vadd.f32 %v2661_v43, %v2660_v36 }
 0x1ce   : > { %v4021_v51 = vadd.f32 %v2662_v47, %v2598_v45 }
 0x1cf   : > { %v2599_v53 = vpop.f32.mrb[28].mxu0 }
 0x1d0   : > { %v2663_v54 = vpop.f32.mrb[28].mxu1  ;;  %v2600_v56 = vpop.f32.mrb[29].mxu0 }
 0x1d1   : > { %v2664_v6 = vpop.f32.mrb[29].mxu1  ;;  %v2601_v61 = vadd.f32 %v2600_v56, %v2599_v53  ;;  %v2602_v63 = vpop.f32.mrb[30].mxu0 }
 0x1d2   : > { %v2665_v42 = vadd.f32 %v2664_v6, %v2663_v54  ;;  %v2666_v0 = vpop.f32.mrb[30].mxu1  ;;  %v2603_v1 = vpop.f32.mrb[31].mxu0 }
 0x1d3   : > { %v2667_v48 = vpop.f32.mrb[31].mxu1  ;;  %v2604_v41 = vadd.f32 %v2603_v1, %v2602_v63 }
 0x1d4   : > { %v4023_v3 = vadd.f32 %v2665_v42, %v2601_v61  ;;  %v2668_v8 = vadd.f32 %v2667_v48, %v2666_v0 }
 0x1d6   : > { %v4025_v49 = vadd.f32 %v2668_v8, %v2604_v41 }
 0x1d7   : > { %v2685_v58 = vpop.f32.mrb[32].mxu0 }
 0x1d8   : > { %v2749_v38 = vpop.f32.mrb[32].mxu1  ;;  %v2686_v10 = vpop.f32.mrb[33].mxu0 }
 0x1d9   : > { %v2750_v11 = vpop.f32.mrb[33].mxu1  ;;  %v2687_v5 = vadd.f32 %v2686_v10, %v2685_v58  ;;  %v2688_v60 = vpop.f32.mrb[34].mxu0 }
 0x1da   : > { %v2751_v16 = vadd.f32 %v2750_v11, %v2749_v38  ;;  %v2752_v7 = vpop.f32.mrb[34].mxu1  ;;  %v2689_v57 = vpop.f32.mrb[35].mxu0 }
 0x1db   : > { %v2753_v62 = vpop.f32.mrb[35].mxu1  ;;  %v1777_v17 = vadd.f32 %v2687_v5, %v3995_v12  ;;  %v2690_v9 = vadd.f32 %v2689_v57, %v2688_v60 }
 0x1dc   : > { %v2754_v21 = vadd.f32 %v2753_v62, %v2752_v7 }
 0x1dd   : > { %v1780_v40 = vadd.f32 %v2690_v9, %v3997_v59  ;;  %v4029_v50 = vadd.f32 %v2751_v16, %v1777_v17 }
 0x1df   : > { %v2691_v22 = vpop.f32.mrb[36].mxu0  ;;  %v4031_v25 = vadd.f32 %v2754_v21, %v1780_v40 }
 0x1e0   : > { %v2755_v13 = vpop.f32.mrb[36].mxu1  ;;  %v2692_v14 = vpop.f32.mrb[37].mxu0 }
 0x1e1   : > { %v2756_v15 = vpop.f32.mrb[37].mxu1  ;;  %v2693_v19 = vadd.f32 %v2692_v14, %v2691_v22  ;;  %v2694_v24 = vpop.f32.mrb[38].mxu0 }
 0x1e2   : > { %v2757_v20 = vadd.f32 %v2756_v15, %v2755_v13  ;;  %v2758_v26 = vpop.f32.mrb[38].mxu1  ;;  %v2695_v29 = vpop.f32.mrb[39].mxu0 }
 0x1e3   : > { %v2759_v31 = vpop.f32.mrb[39].mxu1  ;;  %v1785_v12 = vadd.f32 %v2693_v19, %v3999_v27  ;;  %v2696_v32 = vadd.f32 %v2695_v29, %v2694_v24 }
 0x1e4   : > { %v2760_v33 = vadd.f32 %v2759_v31, %v2758_v26 }
 0x1e5   : > { %v1788_v59 = vadd.f32 %v2696_v32, %v4001_v30  ;;  %v4035_v4 = vadd.f32 %v2757_v20, %v1785_v12 }
 0x1e7   : > { %v2697_v34 = vpop.f32.mrb[40].mxu0  ;;  %v4037_v36 = vadd.f32 %v2760_v33, %v1788_v59 }
 0x1e8   : > { %v2761_v35 = vpop.f32.mrb[40].mxu1  ;;  %v2698_v39 = vpop.f32.mrb[41].mxu0 }
 0x1e9   : > { %v2762_v43 = vpop.f32.mrb[41].mxu1  ;;  %v2699_v45 = vadd.f32 %v2698_v39, %v2697_v34  ;;  %v2700_v53 = vpop.f32.mrb[42].mxu0 }
 0x1ea   : > { %v2763_v47 = vadd.f32 %v2762_v43, %v2761_v35  ;;  %v2764_v54 = vpop.f32.mrb[42].mxu1  ;;  %v2701_v56 = vpop.f32.mrb[43].mxu0 }
 0x1eb   : > { %v2765_v6 = vpop.f32.mrb[43].mxu1  ;;  %v1793_v27 = vadd.f32 %v2699_v45, %v4003_v52  ;;  %v2702_v61 = vadd.f32 %v2701_v56, %v2700_v53 }
 0x1ec   : > { %v2766_v42 = vadd.f32 %v2765_v6, %v2764_v54 }
 0x1ed   : > { %v1796_v30 = vadd.f32 %v2702_v61, %v4005_v55  ;;  %v4041_v63 = vadd.f32 %v2763_v47, %v1793_v27 }
 0x1ef   : > { %v2703_v0 = vpop.f32.mrb[44].mxu0  ;;  %v4043_v48 = vadd.f32 %v2766_v42, %v1796_v30 }
 0x1f0   : > { %v2767_v1 = vpop.f32.mrb[44].mxu1  ;;  %v2704_v41 = vpop.f32.mrb[45].mxu0 }
 0x1f1   : > { %v2768_v8 = vpop.f32.mrb[45].mxu1  ;;  %v2705_v58 = vadd.f32 %v2704_v41, %v2703_v0  ;;  %v2706_v10 = vpop.f32.mrb[46].mxu0 }
 0x1f2   : > { %v2769_v38 = vadd.f32 %v2768_v8, %v2767_v1  ;;  %v2770_v11 = vpop.f32.mrb[46].mxu1  ;;  %v2707_v5 = vpop.f32.mrb[47].mxu0 }
 0x1f3   : > { %v2771_v16 = vpop.f32.mrb[47].mxu1  ;;  %v1801_v52 = vadd.f32 %v2705_v58, %v4007_v2  ;;  %v2708_v60 = vadd.f32 %v2707_v5, %v2706_v10 }
 0x1f4   : > { %v2772_v7 = vadd.f32 %v2771_v16, %v2770_v11 }
 0x1f5   : > { %v1804_v55 = vadd.f32 %v2708_v60, %v4009_v18  ;;  %v4047_v57 = vadd.f32 %v2769_v38, %v1801_v52 }
 0x1f7   : > { %v2709_v62 = vpop.f32.mrb[48].mxu0  ;;  %v4049_v9 = vadd.f32 %v2772_v7, %v1804_v55 }
 0x1f8   : > { %v2773_v17 = vpop.f32.mrb[48].mxu1  ;;  %v2710_v21 = vpop.f32.mrb[49].mxu0 }
 0x1f9   : > { %v2774_v40 = vpop.f32.mrb[49].mxu1  ;;  %v2711_v22 = vadd.f32 %v2710_v21, %v2709_v62  ;;  %v2712_v14 = vpop.f32.mrb[50].mxu0 }
 0x1fa   : > { %v2775_v13 = vadd.f32 %v2774_v40, %v2773_v17  ;;  %v2776_v15 = vpop.f32.mrb[50].mxu1  ;;  %v2713_v19 = vpop.f32.mrb[51].mxu0 }
 0x1fb   : > { %v2777_v20 = vpop.f32.mrb[51].mxu1  ;;  %v1809_v2 = vadd.f32 %v2711_v22, %v4011_v37  ;;  %v2714_v24 = vadd.f32 %v2713_v19, %v2712_v14 }
 0x1fc   : > { %v2778_v26 = vadd.f32 %v2777_v20, %v2776_v15  ;;  %v886_v20 = vld [vmem:[#allocation2 + $0x10] sm:$0xff] }
 0x1fd   : > { %v1812_v18 = vadd.f32 %v2714_v24, %v4013_v46  ;;  %v1906_v29 = vadd.f32 %v2775_v13, %v1809_v2  ;;  %v894_v24 = vld [vmem:[#allocation2 + $0x50] sm:$0xff] }
 0x1ff   : > { %v2715_v31 = vpop.f32.mrb[52].mxu0  ;;  %v4053_v32 = vadd.f32 %v2778_v26, %v1812_v18 }
 0x200   : > { %v2779_v12 = vpop.f32.mrb[52].mxu1  ;;  %v2716_v33 = vpop.f32.mrb[53].mxu0 }
 0x201   : > { %v2780_v59 = vpop.f32.mrb[53].mxu1  ;;  %v2717_v34 = vadd.f32 %v2716_v33, %v2715_v31  ;;  %v2718_v39 = vpop.f32.mrb[54].mxu0  ;;  %v884_v33 = vld [vmem:[#allocation2] sm:$0xff] }
 0x202   : > { %v2781_v35 = vadd.f32 %v2780_v59, %v2779_v12  ;;  %v2782_v43 = vpop.f32.mrb[54].mxu1  ;;  %v2719_v45 = vpop.f32.mrb[55].mxu0 }
 0x203   : > { %v2783_v47 = vpop.f32.mrb[55].mxu1  ;;  %v1817_v53 = vadd.f32 %v2717_v34, %v4015_v23  ;;  %v2720_v37 = vadd.f32 %v2719_v45, %v2718_v39  ;;  %v892_v34 = vld [vmem:[#allocation2 + $0x40] sm:$0xff] }
 0x204   : > { %v2784_v54 = vadd.f32 %v2783_v47, %v2782_v43  ;;  %v887_v43 = vld [vmem:[#allocation2 + $0x18] sm:$0xff] }
 0x205   : > { %v1820_v56 = vadd.f32 %v2720_v37, %v4017_v28  ;;  %v1914_v46 = vadd.f32 %v2781_v35, %v1817_v53  ;;  %v895_v47 = vld [vmem:[#allocation2 + $0x58] sm:$0xff] }
 0x207   : > { %v2721_v6 = vpop.f32.mrb[56].mxu0  ;;  %v1917_v61 = vadd.f32 %v2784_v54, %v1820_v56 }
 0x208   : > { %v2785_v27 = vpop.f32.mrb[56].mxu1  ;;  %v2722_v42 = vpop.f32.mrb[57].mxu0 }
 0x209   : > { %v2786_v30 = vpop.f32.mrb[57].mxu1  ;;  %v2723_v0 = vadd.f32 %v2722_v42, %v2721_v6  ;;  %v2724_v41 = vpop.f32.mrb[58].mxu0  ;;  %v885_v6 = vld [vmem:[#allocation2 + $0x8] sm:$0xff] }
 0x20a   : > { %v2787_v1 = vadd.f32 %v2786_v30, %v2785_v27  ;;  %v2788_v8 = vpop.f32.mrb[58].mxu1  ;;  %v2725_v58 = vpop.f32.mrb[59].mxu0 }
 0x20b   : > { %v2789_v38 = vpop.f32.mrb[59].mxu1  ;;  %v1825_v10 = vadd.f32 %v2723_v0, %v4019_v44  ;;  %v2726_v11 = vadd.f32 %v2725_v58, %v2724_v41  ;;  %v898_v41 = vld [vmem:[#allocation2 + $0x70] sm:$0xff] }
 0x20c   : > { %v2790_v23 = vadd.f32 %v2789_v38, %v2788_v8  ;;  %v4078_v58 = vld [vmem:[#allocation9] ss:$0 sm:$0xff] }
 0x20d   : > { %v1828_v5 = vadd.f32 %v2726_v11, %v4021_v51  ;;  %v4059_v16 = vadd.f32 %v2787_v1, %v1825_v10  ;;  %v888_v11 = vld [vmem:[#allocation2 + $0x20] sm:$0xff] }
 0x20f   : > { %v2727_v28 = vpop.f32.mrb[60].mxu0  ;;  %v4061_v60 = vadd.f32 %v2790_v23, %v1828_v5  ;;  %v896_v5 = vld [vmem:[#allocation2 + $0x60] sm:$0xff] }
 0x210   : > { %v2791_v52 = vpop.f32.mrb[60].mxu1  ;;  %v2728_v7 = vpop.f32.mrb[61].mxu0 }
 0x211   : > { %v2792_v55 = vpop.f32.mrb[61].mxu1  ;;  %v2729_v62 = vadd.f32 %v2728_v7, %v2727_v28  ;;  %v2730_v21 = vpop.f32.mrb[62].mxu0 }
 0x212   : > { %v2793_v17 = vadd.f32 %v2792_v55, %v2791_v52  ;;  %v2794_v40 = vpop.f32.mrb[62].mxu1  ;;  %v2731_v22 = vpop.f32.mrb[63].mxu0  ;;  %v891_v55 = vld [vmem:[#allocation2 + $0x38] sm:$0xff] }
 0x213   : > { %v2795_v13 = vpop.f32.mrb[63].mxu1  ;;  %v1833_v44 = vadd.f32 %v2729_v62, %v4023_v3  ;;  %v2732_v14 = vadd.f32 %v2731_v22, %v2730_v21 }
 0x214   : > { %v2796_v15 = vadd.f32 %v2795_v13, %v2794_v40 }
 0x215   : > { %v1836_v51 = vadd.f32 %v2732_v14, %v4025_v49  ;;  %v1930_v19 = vadd.f32 %v2793_v17, %v1833_v44  ;;  %v899_v17 = vld [vmem:[#allocation2 + $0x78] sm:$0xff]  ;;  %v889_v44 = vld [vmem:[#allocation2 + $0x28] sm:$0xff] }
 0x217   : > { %v2831_v2 = vpop.f32.mrb[64].mxu0  ;;  %v1933_v18 = vadd.f32 %v2796_v15, %v1836_v51  ;;  %v897_v15 = vld [vmem:[#allocation2 + $0x68] sm:$0xff] }
 0x218   : > { %v2839_v26 = vpop.f32.mrb[64].mxu1  ;;  %v1979_v31 = vadd.f32 %v2831_v2, %v4035_v4  ;;  %v1970_v59 = vpop.f32.mrb[65].mxu0  ;;  %v893_v4 = vld [vmem:[#allocation2 + $0x48] sm:$0xff] }
 0x219   : > { %v2011_v12 = vadd.f32 %v2839_v26, %v1914_v46  ;;  %v2002_v35 = vpop.f32.mrb[65].mxu1  ;;  %v1971_v39 = vadd.f32 %v1970_v59, %v4029_v50  ;;  %v2832_v45 = vpop.f32.mrb[66].mxu0 }
 0x21a   : > { %v2003_v3 = vadd.f32 %v2002_v35, %v1906_v29  ;;  %v2840_v49 = vpop.f32.mrb[66].mxu1  ;;  %v2035_v53 = vadd.f32 %v1979_v31, %v886_v20  ;;  %v1982_v54 = vadd.f32 %v2832_v45, %v4037_v36  ;;  %v1973_v27 = vpop.f32.mrb[67].mxu0  ;;  %v4085_v20 = vld [vmem:[#allocation10] ss:$0 sm:$0xff] }
 0x21b   : > { %v2043_v37 = vadd.f32 %v2011_v12, %v894_v24  ;;  %v2014_v56 = vadd.f32 %v2840_v49, %v1917_v61  ;;  %v2005_v46 = vpop.f32.mrb[67].mxu1  ;;  %v2033_v42 = vadd.f32 %v1971_v39, %v884_v33  ;;  %v1974_v0 = vadd.f32 %v1973_v27, %v4031_v25  ;;  %v890_v25 = vld [vmem:[#allocation2 + $0x30] sm:$0xff] }
 0x21c   : > { %v2041_v30 = vadd.f32 %v2003_v3, %v892_v34  ;;  %v2006_v50 = vadd.f32 %v2005_v46, %v4053_v32  ;;  %2052 = vst.msk [vmem:[#allocation2 + $0x10] sm:$0xff] %vm295_vm6, %v2035_v53  ;;  %v2036_v29 = vadd.f32 %v1982_v54, %v887_v43 }
 0x21d   : > { %2060 = vst.msk [vmem:[#allocation2 + $0x50] sm:$0xff] %vm295_vm6, %v2043_v37  ;;  %v2044_v1 = vadd.f32 %v2014_v56, %v895_v47  ;;  %2050 = vst.msk [vmem:[#allocation2] sm:$0xff] %vm295_vm6, %v2033_v42  ;;  %v2034_v36 = vadd.f32 %v1974_v0, %v885_v6 }
 0x21e   : > { %2058 = vst.msk [vmem:[#allocation2 + $0x40] sm:$0xff] %vm295_vm6, %v2041_v30  ;;  %v2042_v61 = vadd.f32 %v2006_v50, %v893_v4  ;;  %2053 = vst.msk [vmem:[#allocation2 + $0x18] sm:$0xff] %vm295_vm6, %v2036_v29 }
 0x21f   : > { %2061 = vst.msk [vmem:[#allocation2 + $0x58] sm:$0xff] %vm295_vm6, %v2044_v1  ;;  %2051 = vst.msk [vmem:[#allocation2 + $0x8] sm:$0xff] %vm295_vm6, %v2034_v36  ;;  %v2835_v32 = vpop.f32.mrb[68].mxu0 }
 0x220   : > { %2059 = vst.msk [vmem:[#allocation2 + $0x48] sm:$0xff] %vm295_vm6, %v2042_v61  ;;  %v2843_v8 = vpop.f32.mrb[68].mxu1  ;;  %v1995_v38 = vadd.f32 %v2835_v32, %v4047_v57  ;;  %v1986_v23 = vpop.f32.mrb[69].mxu0 }
 0x221   : > { %v2027_v10 = vadd.f32 %v2843_v8, %v1930_v19  ;;  %v2018_v28 = vpop.f32.mrb[69].mxu1  ;;  %v1987_v52 = vadd.f32 %v1986_v23, %v4041_v63  ;;  %v2836_v62 = vpop.f32.mrb[70].mxu0 }
 0x222   : > { %v2019_v7 = vadd.f32 %v2018_v28, %v4059_v16  ;;  %v2844_v21 = vpop.f32.mrb[70].mxu1  ;;  %v2039_v40 = vadd.f32 %v1995_v38, %v890_v25  ;;  %v1998_v13 = vadd.f32 %v2836_v62, %v4049_v9  ;;  %v1989_v14 = vpop.f32.mrb[71].mxu0 }
 0x223   : > { %v2047_v22 = vadd.f32 %v2027_v10, %v898_v41  ;;  %v2030_v57 = vadd.f32 %v2844_v21, %v1933_v18  ;;  %v2021_v51 = vpop.f32.mrb[71].mxu1  ;;  %v2071_v19 = vld [vmem:[#allocation2 + $0x10] sm:$0xff]  ;;  %v2037_v2 = vadd.f32 %v1987_v52, %v888_v11  ;;  %v1990_v24 = vadd.f32 %v1989_v14, %v4043_v48 }
 0x224   : > { %v2079_v63 = vld [vmem:[#allocation2 + $0x50] sm:$0xff]  ;;  %v2045_v16 = vadd.f32 %v2019_v7, %v896_v5  ;;  %v2022_v26 = vadd.f32 %v2021_v51, %v4061_v60  ;;  %v2094_v31 = vmul.f32 %v4078_v58, %v2071_v19  ;;  %v2069_v18 = vld [vmem:[#allocation2] sm:$0xff]  ;;  %2056 = vst.msk [vmem:[#allocation2 + $0x30] sm:$0xff] %vm295_vm6, %v2039_v40  ;;  %v2040_v33 = vadd.f32 %v1998_v13, %v891_v55 }
 0x225   : > { %v2102_v9 = vmul.f32 %v4078_v58, %v2079_v63  ;;  %v2077_v12 = vld [vmem:[#allocation2 + $0x40] sm:$0xff]  ;;  %2064 = vst.msk [vmem:[#allocation2 + $0x70] sm:$0xff] %vm295_vm6, %v2047_v22  ;;  %v2048_v59 = vadd.f32 %v2030_v57, %v899_v17  ;;  %v2092_v34 = vmul.f32 %v4078_v58, %v2069_v18  ;;  %v2072_v48 = vld [vmem:[#allocation2 + $0x18] sm:$0xff]  ;;  %2054 = vst.msk [vmem:[#allocation2 + $0x20] sm:$0xff] %vm295_vm6, %v2037_v2 }
 0x226   : > { %v2100_v35 = vmul.f32 %v4078_v58, %v2077_v12  ;;  %v2080_v39 = vld [vmem:[#allocation2 + $0x58] sm:$0xff]  ;;  %2062 = vst.msk [vmem:[#allocation2 + $0x60] sm:$0xff] %vm295_vm6, %v2045_v16  ;;  %v2038_v60 = vadd.f32 %v1990_v24, %v889_v44  ;;  %v2046_v3 = vadd.f32 %v2022_v26, %v897_v15  ;;  %v2117_v43 = vadd.f32 %v4085_v20, %v2094_v31  ;;  %v2070_v53 = vld [vmem:[#allocation2 + $0x8] sm:$0xff] }
 0x227   : > { %v2125_v45 = vadd.f32 %v4085_v20, %v2102_v9  ;;  %v2095_v47 = vmul.f32 %v4078_v58, %v2072_v48  ;;  %v2103_v49 = vmul.f32 %v4078_v58, %v2080_v39  ;;  %v2078_v37 = vld [vmem:[#allocation2 + $0x48] sm:$0xff]  ;;  %2057 = vst.msk [vmem:[#allocation2 + $0x38] sm:$0xff] %vm295_vm6, %v2040_v33  ;;  %2065 = vst.msk [vmem:[#allocation2 + $0x78] sm:$0xff] %vm295_vm6, %v2048_v59 }
 0x228   : > { %v2115_v54 = vadd.f32 %v4085_v20, %v2092_v34  ;;  %v2123_v56 = vadd.f32 %v4085_v20, %v2100_v35  ;;  %v2093_v6 = vmul.f32 %v4078_v58, %v2070_v53  ;;  %v2101_v27 = vmul.f32 %v4078_v58, %v2078_v37  ;;  %2055 = vst.msk [vmem:[#allocation2 + $0x28] sm:$0xff] %vm295_vm6, %v2038_v60 }
 0x229   : > { %2063 = vst.msk [vmem:[#allocation2 + $0x68] sm:$0xff] %vm295_vm6, %v2046_v3  ;;  %v2133_v4 = vmax.f32 %v2117_v43, 0.0  ;;  %v2141_v46 = vmax.f32 %v2125_v45, 0.0  ;;  %v2118_v42 = vadd.f32 %v4085_v20, %v2095_v47  ;;  %v2126_v30 = vadd.f32 %v4085_v20, %v2103_v49 }
 0x22a   : > { %v2131_v0 = vmax.f32 %v2115_v54, 0.0  ;;  %v2139_v50 = vmax.f32 %v2123_v56, 0.0  ;;  %v2116_v29 = vadd.f32 %v4085_v20, %v2093_v6  ;;  %v2124_v1 = vadd.f32 %v4085_v20, %v2101_v27 }
 0x22b   : > { %v2526_v36 = vpack.c.bf16 %v2133_v4, %v2133_v4  ;;  %v2534_v61 = vpack.c.bf16 %v2141_v46, %v2141_v46  ;;  %v2134_v25 = vmax.f32 %v2118_v42, 0.0  ;;  %v2142_v32 = vmax.f32 %v2126_v30, 0.0  ;;  %v2075_v11 = vld [vmem:[#allocation2 + $0x30] sm:$0xff] }
 0x22c   : > { %v2524_v41 = vpack.c.bf16 %v2131_v0, %v2131_v0  ;;  %v2532_v8 = vpack.c.bf16 %v2139_v50, %v2139_v50  ;;  %v2132_v38 = vmax.f32 %v2116_v29, 0.0  ;;  %v2140_v10 = vmax.f32 %v2124_v1, 0.0  ;;  %v2083_v23 = vld [vmem:[#allocation2 + $0x70] sm:$0xff]  ;;  %v2073_v55 = vld [vmem:[#allocation2 + $0x20] sm:$0xff] }
 0x22d   : > { %2214 = vst.msk [vmem:[%s4120_s8 + $0x8] sm:$0xf] %vm2211_vm7, %v2526_v36  ;;  %2222 = vst.msk [vmem:[%s4120_s8 + $0x28] sm:$0xf] %vm2211_vm7, %v2534_v61  ;;  %v2527_v5 = vpack.c.bf16 %v2134_v25, %v2134_v25  ;;  %v2535_v28 = vpack.c.bf16 %v2142_v32, %v2142_v32  ;;  %v2098_v52 = vmul.f32 %v4078_v58, %v2075_v11  ;;  %v2081_v62 = vld [vmem:[#allocation2 + $0x60] sm:$0xff] }
 0x22e   : > { %v2106_v7 = vmul.f32 %v4078_v58, %v2083_v23  ;;  %2212 = vst.msk [vmem:[%s4120_s8] sm:$0xf] %vm2211_vm7, %v2524_v41  ;;  %2220 = vst.msk [vmem:[%s4120_s8 + $0x20] sm:$0xf] %vm2211_vm7, %v2532_v8  ;;  %v2525_v17 = vpack.c.bf16 %v2132_v38, %v2132_v38  ;;  %v2533_v21 = vpack.c.bf16 %v2140_v10, %v2140_v10  ;;  %v2076_v13 = vld [vmem:[#allocation2 + $0x38] sm:$0xff] }
 0x22f   : > { %v2096_v40 = vmul.f32 %v4078_v58, %v2073_v55  ;;  %v2104_v22 = vmul.f32 %v4078_v58, %v2081_v62  ;;  %v2084_v57 = vld [vmem:[#allocation2 + $0x78] sm:$0xff]  ;;  %2215 = vst.msk [vmem:[%s4120_s8 + $0xc] sm:$0xf] %vm2211_vm7, %v2527_v5  ;;  %2223 = vst.msk [vmem:[%s4120_s8 + $0x2c] sm:$0xf] %vm2211_vm7, %v2535_v28  ;;  %v2121_v44 = vadd.f32 %v4085_v20, %v2098_v52  ;;  %v2074_v19 = vld [vmem:[#allocation2 + $0x28] sm:$0xff] }
 0x230   : > { %v2129_v14 = vadd.f32 %v4085_v20, %v2106_v7  ;;  %v2099_v15 = vmul.f32 %v4078_v58, %v2076_v13  ;;  %v2107_v51 = vmul.f32 %v4078_v58, %v2084_v57  ;;  %v2082_v63 = vld [vmem:[#allocation2 + $0x68] sm:$0xff]  ;;  %2213 = vst.msk [vmem:[%s4120_s8 + $0x4] sm:$0xf] %vm2211_vm7, %v2525_v17  ;;  %2221 = vst.msk [vmem:[%s4120_s8 + $0x24] sm:$0xf] %vm2211_vm7, %v2533_v21 }
 0x231   : > { %v2119_v2 = vadd.f32 %v4085_v20, %v2096_v40  ;;  %v2127_v16 = vadd.f32 %v4085_v20, %v2104_v22  ;;  %v2097_v24 = vmul.f32 %v4078_v58, %v2074_v19  ;;  %v2105_v26 = vmul.f32 %v4078_v58, %v2082_v63 }
 0x232   : > { %v2137_v31 = vmax.f32 %v2121_v44, 0.0  ;;  %v2145_v9 = vmax.f32 %v2129_v14, 0.0  ;;  %v2122_v18 = vadd.f32 %v4085_v20, %v2099_v15  ;;  %v2130_v12 = vadd.f32 %v4085_v20, %v2107_v51 }
 0x233   : > { %v2135_v33 = vmax.f32 %v2119_v2, 0.0  ;;  %v2143_v59 = vmax.f32 %v2127_v16, 0.0  ;;  %v2120_v34 = vadd.f32 %v4085_v20, %v2097_v24  ;;  %v2128_v35 = vadd.f32 %v4085_v20, %v2105_v26 }
 0x234   : > { %v2530_v48 = vpack.c.bf16 %v2137_v31, %v2137_v31  ;;  %v2538_v58 = vpack.c.bf16 %v2145_v9, %v2145_v9  ;;  %v2138_v39 = vmax.f32 %v2122_v18, 0.0  ;;  %v2146_v60 = vmax.f32 %v2130_v12, 0.0 }
 0x235   : > { %v2528_v3 = vpack.c.bf16 %v2135_v33, %v2135_v33  ;;  %v2536_v43 = vpack.c.bf16 %v2143_v59, %v2143_v59  ;;  %v2136_v45 = vmax.f32 %v2120_v34, 0.0  ;;  %v2144_v47 = vmax.f32 %v2128_v35, 0.0 }
 0x236   : > { %2218 = vst.msk [vmem:[%s4120_s8 + $0x18] sm:$0xf] %vm2211_vm7, %v2530_v48  ;;  %2226 = vst.msk [vmem:[%s4120_s8 + $0x38] sm:$0xf] %vm2211_vm7, %v2538_v58  ;;  %v2531_v20 = vpack.c.bf16 %v2138_v39, %v2138_v39  ;;  %v2539_v49 = vpack.c.bf16 %v2146_v60, %v2146_v60 }
 0x237   : > { %2216 = vst.msk [vmem:[%s4120_s8 + $0x10] sm:$0xf] %vm2211_vm7, %v2528_v3  ;;  %2224 = vst.msk [vmem:[%s4120_s8 + $0x30] sm:$0xf] %vm2211_vm7, %v2536_v43  ;;  %v2529_v53 = vpack.c.bf16 %v2136_v45, %v2136_v45  ;;  %v2537_v37 = vpack.c.bf16 %v2144_v47, %v2144_v47 }
 0x238   : > { %2219 = vst.msk [vmem:[%s4120_s8 + $0x1c] sm:$0xf] %vm2211_vm7, %v2531_v20  ;;  %2227 = vst.msk [vmem:[%s4120_s8 + $0x3c] sm:$0xf] %vm2211_vm7, %v2539_v49 }
 0x239   : > { %2217 = vst.msk [vmem:[%s4120_s8 + $0x14] sm:$0xf] %vm2211_vm7, %v2529_v53  ;;  %2225 = vst.msk [vmem:[%s4120_s8 + $0x34] sm:$0xf] %vm2211_vm7, %v2537_v37 }
 0x23a   : > { %3211 = shalt.err (!%p3208_p12)
}
 0x23b   : > { %s3212_s30 = scalar_lea.hbm %s4165_s14, 1024  ;;  %s3216_s27 = scalar_lea.hbm %s4291_s11, 4096 }
 0x23c   : > { %p3213_p4 = scmp.ne.s32.totalorder %s4165_s14, %s3212_s30  ;;  %p3217_p0 = scmp.lt.u32.totalorder %s4165_s14, %s4291_s11 }
 0x23d   : > { %p3218_p1 = scmp.lt.u32.totalorder %s3216_s27, %s3212_s30  ;;  %p3220_p10 = scmp.lt.u32.totalorder %s3212_s30, %s4165_s14 }
 0x23e   : > { %p3214_p7 = pnand %p3213_p4, %p4292_p2 }
 0x23f   : > { %p3219_p11 = por %p3218_p1, %p3217_p0 }
 0x240   : > { %p3215_p3 = pneg %p3214_p7 }
 0x241   : > { %p3221_p9 = por %p3220_p10, %p3219_p11 }
 0x243   : > { %p3222_p5 = pnand %p3221_p9, %p3215_p3 }
 0x245   : > { %3225 = shalt.err (!%p3222_p5)
}
 0x246   : > { %s3338_s9 = smov 64   ;;  %s3339_s18 = smov 4  }
 0x247   : > { %2878 = dma.vmem_to_hbm [thread:$0]  (%p4292_p2), %s4167_s12, 1024, %s4165_s14, %s4183_s13, %s3338_s9, %s3338_s9, %s3339_s18  }
 0x248 PF: > { %s4293_s1 = sld [smem:[#allocation17_spill]]  ;;  %s4294_s29 = sld [smem:[#allocation20_spill]] }
 0x249   : > { %p2905_p13 = scmp.ge.s32.totalorder %s3328_s25, 2 }
 0x24e   : > { %s2260_s2 = sand.u32 1, %s4293_s1   ;;  %p4295_p6 = scmp.ne.s32.totalorder %s4294_s29, 0 }
 0x24f   : > { %s2261_s28 = scalar_lea.sflag [#allocation6], %s2260_s2 }
 0x250   : > { %p2895_p8 = pnand %p2905_p13, %p4295_p6 }
 0x252   : > { %3283 = dma.done.wait (!%p2895_p8), %s2261_s28, 1024  }
 0x253   : > { %3285 = vsyncadd (!%p2895_p8), %s2261_s28, 4294966272  ;;  %s22_s25 = sadd.s32 1, %s3328_s25   ;;  %s4296_s7 = smov %s3567_s15 }
 0x254   : > { %p19_p12 = scmp.ge.s32.totalorder %s22_s25, 6   ;;  %s4297_s15 = smov %s3292_s16 }
 0x255   : > { %s4298_s16 = smov %s3296_s17  ;;  %s4299_s17 = smov %s4296_s7 }
 0x256   : > { %s4300_s18 = smov %s3304_s19  ;;  %s4301_s19 = smov %s3308_s20 }
 0x257   : > { %s4302_s20 = smov %s3562_s4  ;;  %s4303_s21 = smov %s3320_s23 }
 0x258   : > { %s4304_s22 = smov %s3324_s24  ;;  %s4305_s23 = smov %s4308_s6 }
 0x259   : > { %s4306_s24 = smov %s4312_s5  ;;  %21 = sbr.rel (!%p19_p12) target bundleno = 15 (0xf), region = 103 }
 0x260   :  { %2266 = vsyncpa [#allocation5], 1 }
 0x261   :  { %2268 = vsyncpa [#allocation5 + $0x1], 1 }
 0x262   :  { %2269 = vsyncpa [#allocation8], 1 }
 0x263   :  { %2270 = vsyncpa [#allocation11], 1 }
 0x264   :  { %2271 = vsyncpa [#allocation6], 1 }
 0x265   :  { %2273 = vsyncpa [#allocation6 + $0x1], 1 }

// kernel: dablock_forward.14
= control target key start
LH: loop header
LB: loop body
LE: loop exit
PB: predicated region body
PF: predicated region fallthrough
CT: control target
= control target key end

     0   :  { %6 = vsyncpa [#allocation4], 0  ;;  %s1103_s0 = inlined_call_operand.hbm [shape: bf16[2,256,32], index: 0, kind: input, shape index: {}]   ;;  %s1104_s1 = inlined_call_operand.hbm [shape: bf16[2,32,32], index: 1, kind: output, shape index: {}]  }
   0x1   :  { %8 = vsyncpa [#allocation4 + $0x1], 0 }
   0x2   :  { %9 = vsyncpa [#allocation5], 0 }
   0x3   :  { %11 = vsyncpa [#allocation5 + $0x1], 0  ;;  %s885_s6 = smov 0   ;;  %s887_s7 = smov 0  }
   0x4   :  { %s889_s8 = smov 0   ;;  %s891_s9 = smov 0  }
   0x5   :  { %s893_s10 = smov 0   ;;  %s895_s11 = smov 0  }
   0x6 LB: > { %s570_s12 = sadd.s32 4294967295, %s866_s11   ;;  %s571_s13 = sadd.s32 4294967294, %s866_s11   ;;  %s866_s11 = sphi %s895_s11, %s17_s11   ;;  %s862_s10 = sphi %s893_s10, %s1119_s10   ;;  %s858_s9 = sphi %s891_s9, %s1118_s9   ;;  %s854_s8 = sphi %s889_s8, %s1117_s8   ;;  %s850_s7 = sphi %s887_s7, %s1116_s7   ;;  %s846_s6 = sphi %s885_s6, %s1115_s6  }
   0x7   : > { %s29_s14 = sadd.s32 1, %s862_s10  ;;  %s38_s15 = sadd.s32 1, %s854_s8 }
   0x8   : > { %p31_p0 = scmp.ge.s32.totalorder %s29_s14, 2  ;;  %p45_p1 = scmp.ne.s32.totalorder %s854_s8, %s850_s7 }
   0x9   : > { %p46_p2 = scmp.eq.s32.totalorder %s866_s11, 0  ;;  %p51_p3 = scmp.ne.s32.totalorder %s850_s7, %s846_s6 }
   0xa   : > { %s1121_s14 = smov (%p31_p0, %s29_s14), 0  ;;  %p52_p5 = scmp.eq.s32.totalorder %s570_s12, 0 }
   0xb   : > { %p926_p4 = por %p46_p2, %p45_p1  ;;  %s33_s17 = ssub.s32 %s862_s10, %s1121_s14 }
   0xc   : > { %p75_p6 = scmp.eq.s32.totalorder %s570_s12, 1  ;;  %p36_p7 = scmp.eq.s32.totalorder %s33_s17, 0 }
   0xd   : > { %p932_p8 = por %p52_p5, %p51_p3  ;;  %p81_p10 = scmp.eq.s32.totalorder %s571_s13, 1 }
   0xe   : > { %p936_p9 = por %p75_p6, %p45_p1  ;;  %p667_p13 = scmp.lt.s32.totalorder %s866_s11, 2 }
   0xf   : > { %s941_s20 = scalar_select %p36_p7, %s854_s8, %s38_s15  }
  0x10   : > { %s1108_s19 = scalar_select %p936_p9, 1, 0 }
  0x11   : > { %p943_p11 = por %p81_p10, %p51_p3  ;;  %s101_s22 = sand.u32 1, %s854_s8  }
  0x12   : > { %s574_s23 = sshll.u32 %s101_s22, 7  ;;  %s605_s24 = sshll.u32 %s862_s10, 11 }
  0x13   : > { %s1109_s21 = scalar_select %p943_p11, 1, 0 }
  0x14   : > { %s954_s27 = scalar_lea.hbm %s1103_s0, %s605_s24  ;;  %s105_s28 = scalar_lea.vmem [#allocation3], %s574_s23 }
  0x15   : > { %s114_s29 = sshll.u32 %s105_s28, 4  ;;  %p960_p0 = pnand %p667_p13, %p926_p4  ;;  %s956_s29 = int_to_ptr.vmem [resolvable:$true] %s114_s29 }
  0x16   : > { %s965_s2 = scalar_lea.sflag [#allocation4], %s101_s22  ;;  %s754_s3 = scalar_lea.hbm %s954_s27, 2048 }
  0x17   : > { %p755_p2 = scmp.ne.s32.totalorder %s954_s27, %s754_s3  ;;  %p756_p3 = pneg %p960_p0 }
  0x18   : > { %s759_s12 = scalar_lea.hbm %s1103_s0, 4096  ;;  %p760_p4 = scmp.lt.u32.totalorder %s954_s27, %s1103_s0 }
  0x19   : > { %p757_p5 = pnand %p756_p3, %p755_p2  ;;  %p761_p7 = scmp.lt.u32.totalorder %s759_s12, %s754_s3 }
  0x1a   : > { %p763_p13 = scmp.lt.u32.totalorder %s754_s3, %s954_s27 }
  0x1b   : > { %p758_p6 = pneg %p757_p5  ;;  %p762_p10 = por %p761_p7, %p760_p4 }
  0x1d   : > { %p764_p12 = por %p763_p13, %p762_p10 }
  0x1f   : > { %p765_p1 = pnand %p764_p12, %p758_p6 }
  0x21   : > { %768 = shalt.err (!%p765_p1)
}
  0x22   : > { %s769_s16 = scalar_lea.vmem %s956_s29, 2048  ;;  %s868_s17 = smov [#allocation3]  }
  0x23   : > { %p770_p2 = scmp.ne.s32.totalorder %s956_s29, %s769_s16  ;;  %s774_s22 = sshll.u32 %s868_s17, 4  ;;  %s775_s22 = int_to_ptr.vmem [resolvable:$false] %s774_s22 }
  0x24   : > { %s776_s23 = scalar_lea.vmem %s775_s22, 4096  ;;  %p777_p9 = scmp.lt.s32.totalorder %s956_s29, %s775_s22 }
  0x25   : > { %p772_p5 = pnand %p770_p2, %p756_p3  ;;  %p778_p4 = scmp.lt.s32.totalorder %s776_s23, %s769_s16 }
  0x27   : > { %p773_p11 = pneg %p772_p5  ;;  %p779_p7 = por %p778_p4, %p777_p9 }
  0x29   : > { %p780_p10 = pnand %p779_p7, %p773_p11 }
  0x2b   : > { %783 = shalt.err (!%p780_p10)
}
  0x2c   : > { %s869_s24 = smov 64   ;;  %s870_s25 = smov 4  }
  0x2d   : > { %662 = dma.hbm_to_vmem [thread:$0]  (!%p960_p0), %s954_s27, 2048, %s956_s29, %s965_s2, %s869_s24, %s869_s24, %s870_s25  }
  0x2e   : > { %p122_p12 = scmp.lt.s32.totalorder %s866_s11, 3  ;;  %p1111_p1 = scmp.ge.s32.totalorder %s866_s11, 1 }
  0x30   : > { %p123_p3 = pnand %p1111_p1, %p122_p12 }
  0x31   : > { %s997_s26 = sand.u32 (!%p123_p3), 1, %s850_s7  }
  0x32   : > { %126 = sbr.rel (%p123_p3) target bundleno = 870 (0x366), region = 24  ;;  %s578_s28 = sshll.u32 (!%p123_p3), %s997_s26, 7 }
  0x33   : > { %s129_s3 = scalar_lea.sflag (!%p123_p3), [#allocation4], %s997_s26  ;;  %s1001_s4 = scalar_lea.vmem (!%p123_p3), [#allocation3], %s578_s28 }
  0x39   : > { %837 = dma.done.wait (%p932_p8), %s129_s3, 2048  }
  0x3a   : > { %839 = vsyncadd (%p932_p8), %s129_s3, 4294965248  ;;  %v722_v0 = vld [vmem:[%s1001_s4 + $0x40] sm:$0xff]   ;;  %v724_v2 = vld [vmem:[%s1001_s4 + $0x48] sm:$0xff]   ;;  %vm157_vm0 = vcmask 261120   ;;  %v871_v20 = vmov 0.0   ;;  %s579_s18 = sshll.u32 %s997_s26, 4 }
  0x3b   : > { %v723_v1 = vld [vmem:[%s1001_s4] sm:$0xff]   ;;  %310 = vxpose.xlu0.c.b16.start [1/8] (narrow) %v722_v0, 32  ;;  %611 = vmatprep.subr.bf16.mxu0 %v722_v0  ;;  %v725_v3 = vld [vmem:[%s1001_s4 + $0x8] sm:$0xff]   ;;  %v726_v4 = vld [vmem:[%s1001_s4 + $0x50] sm:$0xff]   ;;  %158 = vst.msk [vmem:[#allocation2] sm:$0xff] %vm157_vm0, %v871_v20  ;;  %vm467_vm1 = vcmask 257024  }
  0x3c   : > { %294 = vxpose.xlu1.c.b16.start [1/8] (narrow) %v723_v1, 32  ;;  %612 = vmatpush3.bf16.msra.mxu0 %v723_v1  ;;  %v727_v5 = vld [vmem:[%s1001_s4 + $0x10] sm:$0xff]   ;;  %v728_v6 = vld [vmem:[%s1001_s4 + $0x58] sm:$0xff]   ;;  %v730_v8 = vld [vmem:[%s1001_s4 + $0x60] sm:$0xff]   ;;  %159 = vst.msk [vmem:[#allocation2 + $0x8] sm:$0xff] %vm157_vm0, %v871_v20  ;;  %s150_s27 = scalar_lea.vmem [#allocation6], %s579_s18 }
  0x3d   : > { %639 = vmatprep.subr.bf16.mxu1 %v722_v0  ;;  %613 = vmatprep.subr.bf16.mxu0 %v724_v2  ;;  %v729_v7 = vld [vmem:[%s1001_s4 + $0x18] sm:$0xff]   ;;  %v731_v9 = vld [vmem:[%s1001_s4 + $0x20] sm:$0xff]   ;;  %v732_v10 = vld [vmem:[%s1001_s4 + $0x68] sm:$0xff]   ;;  %160 = vst.msk [vmem:[#allocation2 + $0x10] sm:$0xff] %vm157_vm0, %v871_v20  ;;  %s610_s29 = sshll.u32 %s858_s9, 8  ;;  %s486_s30 = sshll.u32 %s150_s27, 4  ;;  %s1052_s30 = int_to_ptr.vmem [resolvable:$true] %s486_s30 }
  0x3e   : > { %647 = vmatpush3.bf16.msra.mxu1 %v723_v1  ;;  %v733_v11 = vld [vmem:[%s1001_s4 + $0x28] sm:$0xff]   ;;  %v734_v12 = vld [vmem:[%s1001_s4 + $0x70] sm:$0xff]   ;;  %v736_v14 = vld [vmem:[%s1001_s4 + $0x78] sm:$0xff]   ;;  %161 = vst.msk [vmem:[#allocation2 + $0x18] sm:$0xff] %vm157_vm0, %v871_v20  ;;  %s1050_s12 = scalar_lea.hbm %s1104_s1, %s610_s29  ;;  %s473_s9 = scalar_lea.sflag [#allocation5], %s997_s26 }
  0x3f   : > { %311 = vxpose.xlu0.c.b16.cont [2/8] (narrow) %v724_v2, 32  ;;  %640 = vmatprep.subr.bf16.mxu1 %v724_v2  ;;  %v735_v13 = vld [vmem:[%s1001_s4 + $0x30] sm:$0xff]   ;;  %v737_v15 = vld [vmem:[%s1001_s4 + $0x38] sm:$0xff]   ;;  %s784_s13 = scalar_lea.vmem %s1052_s30, 256  ;;  %p1112_p9 = scmp.ne.s32.totalorder %s1108_s19, 0 }
  0x40   : > { %295 = vxpose.xlu1.c.b16.cont [2/8] (narrow) %v725_v3, 32  ;;  %614 = vmatpush3.bf16.msra.mxu0 %v725_v3  ;;  %p785_p8 = scmp.ne.s32.totalorder %s1052_s30, %s784_s13  ;;  %s872_s15 = smov [#allocation6]  }
  0x41   : > { %615 = vmatprep.subr.bf16.mxu0 %v726_v4  ;;  %s788_s16 = sshll.u32 %s872_s15, 4  ;;  %s789_s16 = int_to_ptr.vmem [resolvable:$false] %s788_s16 }
  0x42   : > { %648 = vmatpush3.bf16.msra.mxu1 %v725_v3  ;;  %v194_v22 = vld [vmem:[#allocation2] sm:$0xff]  ;;  %p786_p11 = pnand %p785_p8, %p1112_p9  ;;  %s790_s17 = scalar_lea.vmem %s789_s16, 512 }
  0x43   : > { %312 = vxpose.xlu0.c.b16.cont [3/8] (narrow) %v726_v4, 32  ;;  %641 = vmatprep.subr.bf16.mxu1 %v726_v4  ;;  %v195_v26 = vld [vmem:[#allocation2 + $0x8] sm:$0xff]  ;;  %p791_p6 = scmp.lt.s32.totalorder %s1052_s30, %s789_s16  ;;  %p792_p13 = scmp.lt.s32.totalorder %s790_s17, %s784_s13 }
  0x44   : > { %296 = vxpose.xlu1.c.b16.cont [3/8] (narrow) %v727_v5, 32  ;;  %616 = vmatpush3.bf16.msra.mxu0 %v727_v5  ;;  %v196_v31 = vld [vmem:[#allocation2 + $0x10] sm:$0xff]  ;;  %p787_p0 = pneg %p786_p11 }
  0x45   : > { %617 = vmatprep.subr.bf16.mxu0 %v728_v6  ;;  %v197_v36 = vld [vmem:[#allocation2 + $0x18] sm:$0xff]  ;;  %p793_p2 = por %p792_p13, %p791_p6 }
  0x46   : > { %649 = vmatpush3.bf16.msra.mxu1 %v727_v5 }
  0x47   : > { %313 = vxpose.xlu0.c.b16.cont [4/8] (narrow) %v728_v6, 32  ;;  %642 = vmatprep.subr.bf16.mxu1 %v728_v6  ;;  %p794_p5 = pnand %p793_p2, %p787_p0 }
  0x48   : > { %297 = vxpose.xlu1.c.b16.cont [4/8] (narrow) %v729_v7, 32  ;;  %618 = vmatpush3.bf16.msra.mxu0 %v729_v7 }
  0x49   : > { %619 = vmatprep.subr.bf16.mxu0 %v730_v8 }
  0x4a   : > { %650 = vmatpush3.bf16.msra.mxu1 %v729_v7 }
  0x4b   : > { %314 = vxpose.xlu0.c.b16.cont [5/8] (narrow) %v730_v8, 32  ;;  %643 = vmatprep.subr.bf16.mxu1 %v730_v8 }
  0x4c   : > { %298 = vxpose.xlu1.c.b16.cont [5/8] (narrow) %v731_v9, 32  ;;  %620 = vmatpush3.bf16.msra.mxu0 %v731_v9 }
  0x4d   : > { %621 = vmatprep.subr.bf16.mxu0 %v732_v10 }
  0x4e   : > { %651 = vmatpush3.bf16.msra.mxu1 %v731_v9 }
  0x4f   : > { %315 = vxpose.xlu0.c.b16.cont [6/8] (narrow) %v732_v10, 32  ;;  %644 = vmatprep.subr.bf16.mxu1 %v732_v10 }
  0x50   : > { %299 = vxpose.xlu1.c.b16.cont [6/8] (narrow) %v733_v11, 32  ;;  %622 = vmatpush3.bf16.msra.mxu0 %v733_v11 }
  0x51   : > { %623 = vmatprep.subr.bf16.mxu0 %v734_v12 }
  0x52   : > { %652 = vmatpush3.bf16.msra.mxu1 %v733_v11 }
  0x53   : > { %316 = vxpose.xlu0.c.b16.cont [7/8] (narrow) %v734_v12, 32  ;;  %645 = vmatprep.subr.bf16.mxu1 %v734_v12 }
  0x54   : > { %300 = vxpose.xlu1.c.b16.cont [7/8] (narrow) %v735_v13, 32  ;;  %624 = vmatpush3.bf16.msra.mxu0 %v735_v13 }
  0x55   : > { %625 = vmatprep.subr.bf16.mxu0 %v736_v14 }
  0x56   : > { %653 = vmatpush3.bf16.msra.mxu1 %v735_v13 }
  0x57   : > { %317 = vxpose.xlu0.c.b16.end [8/8] (narrow) %v736_v14, 32  ;;  %646 = vmatprep.subr.bf16.mxu1 %v736_v14 }
  0x58   : > { %301 = vxpose.xlu1.c.b16.end [8/8] (narrow) %v737_v15, 32  ;;  %626 = vmatpush3.bf16.msra.mxu0 %v737_v15 }
  0x5a   : > { %654 = vmatpush3.bf16.msra.mxu1 %v737_v15 }
  0xa1   : > { %v318_v16 = vpop.trf.xlu0 }
  0xa2   : > { %358 = vmatprep.mubr.bf16.mxu0 %v318_v16  ;;  %v302_v17 = vpop.trf.xlu1 }
  0xa3   : > { %359 = vmatmul.mubr.bf16.vlgmr.msra.gmra.mrb[0].mxu0 %v302_v17 }
  0xa5   : > { %v319_v18 = vpop.trf.xlu0 }
  0xa6   : > { %366 = vmatprep.mubr.bf16.mxu1 %v319_v18  ;;  %v303_v19 = vpop.trf.xlu1 }
  0xa7   : > { %367 = vmatmul.mubr.bf16.vlgmr.msra.gmra.mrb[0].mxu1 %v303_v19 }
 0x176   : > { %v627_v21 = vpop.f32.mrb[0].mxu0 }
 0x177   : > { %v628_v23 = vpop.f32.mrb[1].mxu0 }
 0x178   : > { %v629_v24 = vadd.f32 %v628_v23, %v627_v21  ;;  %v630_v25 = vpop.f32.mrb[2].mxu0 }
 0x179   : > { %v631_v27 = vpop.f32.mrb[3].mxu0 }
 0x17a   : > { %v375_v28 = vadd.f32 %v629_v24, %v194_v22  ;;  %v632_v29 = vadd.f32 %v631_v27, %v630_v25  ;;  %v633_v30 = vpop.f32.mrb[0].mxu1 }
 0x17b   : > { %v634_v32 = vpop.f32.mrb[1].mxu1 }
 0x17c   : > { %380 = vst.msk [vmem:[#allocation2] sm:$0xff] %vm157_vm0, %v375_v28  ;;  %v376_v33 = vadd.f32 %v632_v29, %v195_v26  ;;  %v635_v34 = vadd.f32 %v634_v32, %v633_v30  ;;  %v636_v35 = vpop.f32.mrb[2].mxu1 }
 0x17d   : > { %v637_v37 = vpop.f32.mrb[3].mxu1 }
 0x17e   : > { %381 = vst.msk [vmem:[#allocation2 + $0x8] sm:$0xff] %vm157_vm0, %v376_v33  ;;  %v377_v38 = vadd.f32 %v635_v34, %v196_v31  ;;  %v638_v39 = vadd.f32 %v637_v37, %v636_v35 }
 0x180   : > { %382 = vst.msk [vmem:[#allocation2 + $0x10] sm:$0xff] %vm157_vm0, %v377_v38  ;;  %v378_v40 = vadd.f32 %v638_v39, %v197_v36 }
 0x182   : > { %383 = vst.msk [vmem:[#allocation2 + $0x18] sm:$0xff] %vm157_vm0, %v378_v40 }
 0x183   : > { %v387_v41 = vld [vmem:[#allocation2] sm:$0xff] }
 0x184   : > { %v391_v42 = vsel %vm157_vm0, %v387_v41, -inf }
 0x185   : > { %392 = vmax.xlane.f32.xlu0 %v391_v42  ;;  %v388_v43 = vld [vmem:[#allocation2 + $0x8] sm:$0xff] }
 0x186   : > { %v394_v44 = vsel %vm157_vm0, %v388_v43, -inf }
 0x187   : > { %395 = vmax.xlane.f32.xlu1 %v394_v44  ;;  %v389_v45 = vld [vmem:[#allocation2 + $0x10] sm:$0xff] }
 0x188   : > { %v397_v46 = vsel %vm157_vm0, %v389_v45, -inf }
 0x189   : > { %398 = vmax.xlane.f32.xlu0 %v397_v46  ;;  %v390_v47 = vld [vmem:[#allocation2 + $0x18] sm:$0xff] }
 0x18a   : > { %v400_v48 = vsel %vm157_vm0, %v390_v47, -inf }
 0x18b   : > { %401 = vmax.xlane.f32.xlu1 %v400_v48 }
 0x212   : > { %v393_v49 = vpop.xlane.xlu0 %392 }
 0x213   : > { %v403_v50 = vsub.f32 %v393_v49, %v387_v41 }
 0x214   : > { %v396_v51 = vpop.xlane.xlu1 %395 }
 0x215   : > { %v404_v52 = vsub.f32 %v396_v51, %v388_v43  ;;  %v407_v53 = vsel %vm157_vm0, %v403_v50, -inf }
 0x216   : > { %408 = vmax.xlane.f32.xlu0 %v407_v53  ;;  %v399_v54 = vpop.xlane.xlu0 %398 }
 0x217   : > { %v405_v55 = vsub.f32 %v399_v54, %v389_v45  ;;  %v410_v56 = vsel %vm157_vm0, %v404_v52, -inf }
 0x218   : > { %411 = vmax.xlane.f32.xlu1 %v410_v56  ;;  %v402_v57 = vpop.xlane.xlu1 %401 }
 0x219   : > { %v406_v58 = vsub.f32 %v402_v57, %v390_v47  ;;  %v413_v59 = vsel %vm157_vm0, %v405_v55, -inf }
 0x21a   : > { %414 = vmax.xlane.f32.xlu0 %v413_v59 }
 0x21b   : > { %v416_v60 = vsel %vm157_vm0, %v406_v58, -inf }
 0x21c   : > { %417 = vmax.xlane.f32.xlu1 %v416_v60 }
 0x2a3   : > { %v409_v61 = vpop.xlane.xlu0 %408 }
 0x2a4   : > { %v419_v62 = vsub.f32 %v403_v50, %v409_v61 }
 0x2a5   : > { %v412_v63 = vpop.xlane.xlu1 %411 }
 0x2a6   : > { %v423_v0 = vmul.f32 1.442695, %v419_v62  ;;  %v420_v1 = vsub.f32 %v404_v52, %v412_v63 }
 0x2a7   : > { %v415_v2 = vpop.xlane.xlu0 %414 }
 0x2a8   : > { %738 = vpow2.f32 %v423_v0  ;;  %v425_v3 = vmul.f32 1.442695, %v420_v1  ;;  %v421_v4 = vsub.f32 %v405_v55, %v415_v2 }
 0x2a9   : > { %v418_v5 = vpop.xlane.xlu1 %417 }
 0x2aa   : > { %740 = vpow2.f32 %v425_v3  ;;  %v427_v6 = vmul.f32 1.442695, %v421_v4  ;;  %v422_v7 = vsub.f32 %v406_v58, %v418_v5 }
 0x2ac   : > { %742 = vpow2.f32 %v427_v6  ;;  %v429_v8 = vmul.f32 1.442695, %v422_v7 }
 0x2ae   : > { %744 = vpow2.f32 %v429_v8 }
 0x2b2   : > { %v739_v9 = vpop.eup %738 }
 0x2b3   : > { %v431_v10 = vsel %vm157_vm0, %v739_v9, 0.0 }
 0x2b4   : > { %v741_v11 = vpop.eup %740  ;;  %432 = vadd.xlane.f32.xlu0 %v431_v10 }
 0x2b5   : > { %v434_v12 = vsel %vm157_vm0, %v741_v11, 0.0 }
 0x2b6   : > { %v743_v13 = vpop.eup %742  ;;  %435 = vadd.xlane.f32.xlu1 %v434_v12 }
 0x2b7   : > { %v437_v14 = vsel %vm157_vm0, %v743_v13, 0.0 }
 0x2b8   : > { %v745_v15 = vpop.eup %744  ;;  %438 = vadd.xlane.f32.xlu0 %v437_v14 }
 0x2b9   : > { %v440_v16 = vsel %vm157_vm0, %v745_v15, 0.0 }
 0x2ba   : > { %441 = vadd.xlane.f32.xlu1 %v440_v16 }
 0x341   : > { %v433_v17 = vpop.xlane.xlu0 %432 }
 0x342   : > { %746 = vrcp.f32 %v433_v17 }
 0x343   : > { %v436_v18 = vpop.xlane.xlu1 %435 }
 0x344   : > { %748 = vrcp.f32 %v436_v18 }
 0x345   : > { %v439_v19 = vpop.xlane.xlu0 %438 }
 0x346   : > { %750 = vrcp.f32 %v439_v19 }
 0x347   : > { %v442_v20 = vpop.xlane.xlu1 %441 }
 0x348   : > { %752 = vrcp.f32 %v442_v20 }
 0x34c   : > { %v747_v21 = vpop.eup %746 }
 0x34d   : > { %v447_v22 = vmul.f32 %v747_v21, %v739_v9 }
 0x34e   : > { %v749_v23 = vpop.eup %748 }
 0x34f   : > { %v606_v24 = vpack.c.bf16 %v447_v22, %v447_v22  ;;  %v448_v25 = vmul.f32 %v749_v23, %v741_v11 }
 0x350   : > { %v751_v26 = vpop.eup %750 }
 0x351   : > { %468 = vst.msk [vmem:[%s150_s27] sm:$0xf] %vm467_vm1, %v606_v24  ;;  %v607_v27 = vpack.c.bf16 %v448_v25, %v448_v25  ;;  %v449_v28 = vmul.f32 %v751_v26, %v743_v13 }
 0x352   : > { %v753_v29 = vpop.eup %752 }
 0x353   : > { %469 = vst.msk [vmem:[%s150_s27 + $0x4] sm:$0xf] %vm467_vm1, %v607_v27  ;;  %v608_v30 = vpack.c.bf16 %v449_v28, %v449_v28  ;;  %v450_v31 = vmul.f32 %v753_v29, %v745_v15 }
 0x355   : > { %470 = vst.msk [vmem:[%s150_s27 + $0x8] sm:$0xf] %vm467_vm1, %v608_v30  ;;  %v609_v32 = vpack.c.bf16 %v450_v31, %v450_v31 }
 0x357   : > { %471 = vst.msk [vmem:[%s150_s27 + $0xc] sm:$0xf] %vm467_vm1, %v609_v32 }
 0x358   : > { %797 = shalt.err (!%p794_p5)
}
 0x359   : > { %s798_s22 = scalar_lea.hbm %s1050_s12, 256  ;;  %s802_s25 = scalar_lea.hbm %s1104_s1, 512 }
 0x35a   : > { %p799_p4 = scmp.ne.s32.totalorder %s1050_s12, %s798_s22  ;;  %p803_p12 = scmp.lt.u32.totalorder %s1050_s12, %s1104_s1 }
 0x35b   : > { %p804_p1 = scmp.lt.u32.totalorder %s802_s25, %s798_s22  ;;  %p806_p8 = scmp.lt.u32.totalorder %s798_s22, %s1050_s12 }
 0x35c   : > { %p800_p7 = pnand %p799_p4, %p1112_p9 }
 0x35d   : > { %p805_p3 = por %p804_p1, %p803_p12 }
 0x35e   : > { %p801_p10 = pneg %p800_p7 }
 0x35f   : > { %p807_p11 = por %p806_p8, %p805_p3 }
 0x361   : > { %p808_p0 = pnand %p807_p11, %p801_p10 }
 0x363   : > { %811 = shalt.err (!%p808_p0)
}
 0x364   : > { %s873_s4 = smov 64   ;;  %s874_s18 = smov 4  }
 0x365   : > { %657 = dma.vmem_to_hbm [thread:$0]  (%p1112_p9), %s1052_s30, 256, %s1050_s12, %s473_s9, %s873_s4, %s873_s4, %s874_s18  }
 0x366 PF: > { %s501_s27 = sand.u32 1, %s846_s6   ;;  %p1113_p6 = scmp.ne.s32.totalorder %s1109_s21, 0 }
 0x367   : > { %p1114_p13 = scmp.ge.s32.totalorder %s866_s11, 2  ;;  %s502_s29 = scalar_lea.sflag [#allocation5], %s501_s27 }
 0x369   : > { %p664_p2 = pnand %p1114_p13, %p1113_p6 }
 0x36b   : > { %841 = dma.done.wait (!%p664_p2), %s502_s29, 256  }
 0x36c   : > { %843 = vsyncadd (!%p664_p2), %s502_s29, 4294967040  ;;  %s17_s11 = sadd.s32 1, %s866_s11   ;;  %s1115_s6 = smov %s850_s7 }
 0x36d   : > { %p14_p5 = scmp.ge.s32.totalorder %s17_s11, 4   ;;  %s1116_s7 = smov %s854_s8 }
 0x36e   : > { %s1117_s8 = smov %s941_s20  ;;  %s1118_s9 = smov %s862_s10 }
 0x36f   : > { %s1119_s10 = smov %s1121_s14  ;;  %16 = sbr.rel (!%p14_p5) target bundleno = 6 (0x6), region = 77 }
 0x376   :  { %507 = vsyncpa [#allocation4], 1 }
 0x377   :  { %509 = vsyncpa [#allocation4 + $0x1], 1 }
 0x378   :  { %510 = vsyncpa [#allocation5], 1 }
 0x379   :  { %512 = vsyncpa [#allocation5 + $0x1], 1 }

// kernel: dablock_forward.15
= control target key start
LH: loop header
LB: loop body
LE: loop exit
PB: predicated region body
PF: predicated region fallthrough
CT: control target
= control target key end

     0   :  { %s1889_s0 = inlined_call_operand.hbm [shape: bf16[2,256,32], index: 0, kind: input, shape index: {}]   ;;  %s1890_s1 = inlined_call_operand.hbm [shape: bf16[2,32,32], index: 1, kind: input, shape index: {}]   ;;  %s1891_s2 = inlined_call_operand.<no memory space> [shape: f32[1], index: 2, kind: input, shape index: {}]   ;;  %s1892_s3 = inlined_call_operand.hbm [shape: bf16[2,256,32], index: 3, kind: output, shape index: {}]  }
   0x1   :  { %8 = sst [smem:[#allocation2]] %s1891_s2 }
   0x2   :  { %9 = vsyncpa [#allocation4], 0 }
   0x3   :  { %11 = vsyncpa [#allocation4 + $0x1], 0 }
   0x4   :  { %12 = vsyncpa [#allocation7], 0 }
   0x5   :  { %14 = vsyncpa [#allocation7 + $0x1], 0 }
   0x6   :  { %15 = vsyncpa [#allocation5], 0 }
   0x7   :  { %17 = vsyncpa [#allocation5 + $0x1], 0  ;;  %s1443_s14 = smov 0   ;;  %s1445_s15 = smov 0  }
   0x8   :  { %s1447_s16 = smov 0   ;;  %s1449_s17 = smov 0  }
   0x9   :  { %s1451_s18 = smov 0   ;;  %s1453_s19 = smov 0  }
   0xa LB: > { %s978_s2 = sadd.s32 4294967295, %s1411_s19   ;;  %s979_s20 = sadd.s32 4294967294, %s1411_s19   ;;  %s1411_s19 = sphi %s1453_s19, %s23_s19   ;;  %s1407_s18 = sphi %s1451_s18, %s1910_s18   ;;  %s1403_s17 = sphi %s1449_s17, %s1909_s17   ;;  %s1399_s16 = sphi %s1447_s16, %s1908_s16   ;;  %s1395_s15 = sphi %s1445_s15, %s1907_s15   ;;  %s1391_s14 = sphi %s1443_s14, %s1906_s14  }
   0xb   : > { %s35_s21 = sadd.s32 1, %s1407_s18  ;;  %s44_s22 = sadd.s32 1, %s1399_s16 }
   0xc   : > { %p37_p0 = scmp.ge.s32.totalorder %s35_s21, 2  ;;  %p51_p1 = scmp.ne.s32.totalorder %s1399_s16, %s1395_s15 }
   0xd   : > { %p52_p2 = scmp.eq.s32.totalorder %s1411_s19, 0  ;;  %p57_p3 = scmp.ne.s32.totalorder %s1395_s15, %s1391_s14 }
   0xe   : > { %s1912_s21 = smov (%p37_p0, %s35_s21), 0  ;;  %p58_p5 = scmp.eq.s32.totalorder %s978_s2, 0 }
   0xf   : > { %p1484_p4 = por %p52_p2, %p51_p1  ;;  %s39_s24 = ssub.s32 %s1407_s18, %s1912_s21 }
  0x10   : > { %p130_p6 = scmp.eq.s32.totalorder %s978_s2, 1  ;;  %p42_p7 = scmp.eq.s32.totalorder %s39_s24, 0 }
  0x11   : > { %p1490_p8 = por %p58_p5, %p57_p3  ;;  %p136_p10 = scmp.eq.s32.totalorder %s979_s20, 1 }
  0x12   : > { %p1494_p9 = por %p130_p6, %p51_p1  ;;  %p1177_p13 = scmp.lt.s32.totalorder %s1411_s19, 2 }
  0x13   : > { %s1896_s25 = scalar_select %p1490_p8, 1, 0 }
  0x14   : > { %s1897_s26 = scalar_select %p1494_p9, 1, 0 }
  0x15   : > { %s1499_s27 = scalar_select %p42_p7, %s1399_s16, %s44_s22  }
  0x16   : > { %p1501_p11 = por %p136_p10, %p57_p3  ;;  %s1508_s29 = sand.u32 1, %s1399_s16  }
  0x17   : > { %s982_s30 = sshll.u32 %s1508_s29, 7  ;;  %s1063_s4 = sshll.u32 %s1407_s18, 11 }
  0x18   : > { %s1898_s28 = scalar_select %p1501_p11, 1, 0 }
  0x19   : > { %s1515_s7 = scalar_lea.hbm %s1889_s0, %s1063_s4  ;;  %s163_s8 = scalar_lea.vmem [#allocation3], %s982_s30 }
  0x1a   : > { %s172_s9 = sshll.u32 %s163_s8, 4  ;;  %p1521_p0 = pnand %p1177_p13, %p1484_p4  ;;  %s1517_s9 = int_to_ptr.vmem [resolvable:$true] %s172_s9 }
  0x1b   : > { %s160_s11 = scalar_lea.sflag [#allocation4], %s1508_s29  ;;  %s1265_s12 = scalar_lea.hbm %s1515_s7, 2048 }
  0x1c   : > { %p1266_p2 = scmp.ne.s32.totalorder %s1515_s7, %s1265_s12  ;;  %p1267_p3 = pneg %p1521_p0 }
  0x1d   : > { %s1270_s20 = scalar_lea.hbm %s1889_s0, 4096  ;;  %p1271_p4 = scmp.lt.u32.totalorder %s1515_s7, %s1889_s0 }
  0x1e   : > { %p1268_p5 = pnand %p1267_p3, %p1266_p2  ;;  %p1272_p7 = scmp.lt.u32.totalorder %s1270_s20, %s1265_s12 }
  0x1f   : > { %p1274_p13 = scmp.lt.u32.totalorder %s1265_s12, %s1515_s7 }
  0x20   : > { %p1269_p6 = pneg %p1268_p5  ;;  %p1273_p10 = por %p1272_p7, %p1271_p4 }
  0x22   : > { %p1275_p12 = por %p1274_p13, %p1273_p10 }
  0x24   : > { %p1276_p1 = pnand %p1275_p12, %p1269_p6 }
  0x26   : > { %1279 = shalt.err (!%p1276_p1)
}
  0x27   : > { %s1280_s24 = scalar_lea.vmem %s1517_s9, 2048  ;;  %s1413_s30 = smov [#allocation3]  }
  0x28   : > { %p1281_p2 = scmp.ne.s32.totalorder %s1517_s9, %s1280_s24  ;;  %s1285_s4 = sshll.u32 %s1413_s30, 4  ;;  %s1286_s4 = int_to_ptr.vmem [resolvable:$false] %s1285_s4 }
  0x29   : > { %s1287_s5 = scalar_lea.vmem %s1286_s4, 4096  ;;  %p1288_p9 = scmp.lt.s32.totalorder %s1517_s9, %s1286_s4 }
  0x2a   : > { %p1283_p5 = pnand %p1281_p2, %p1267_p3  ;;  %p1289_p4 = scmp.lt.s32.totalorder %s1287_s5, %s1280_s24 }
  0x2c   : > { %p1284_p11 = pneg %p1283_p5  ;;  %p1290_p7 = por %p1289_p4, %p1288_p9 }
  0x2e   : > { %p1291_p10 = pnand %p1290_p7, %p1284_p11 }
  0x30   : > { %1294 = shalt.err (!%p1291_p10)
}
  0x31   : > { %s1414_s6 = smov 64   ;;  %s1415_s8 = smov 4  }
  0x32   : > { %1169 = dma.hbm_to_vmem [thread:$0]  (!%p1521_p0), %s1515_s7, 2048, %s1517_s9, %s160_s11, %s1414_s6, %s1414_s6, %s1415_s8  }
  0x33   : > { %p201_p9 = scmp.lt.s32.totalorder %s1411_s19, 3  ;;  %s985_s12 = sshll.u32 %s1508_s29, 4 }
  0x34   : > { %s1064_s13 = sshll.u32 %s1407_s18, 8  ;;  %p1900_p11 = scmp.ge.s32.totalorder %s1411_s19, 1 }
  0x35   : > { %s1569_s23 = scalar_lea.hbm %s1890_s1, %s1064_s13  ;;  %s186_s24 = scalar_lea.vmem [#allocation6], %s985_s12 }
  0x36   : > { %p1562_p12 = pnand %p1900_p11, %p201_p9  ;;  %s193_s30 = sshll.u32 %s186_s24, 4  ;;  %s1571_s30 = int_to_ptr.vmem [resolvable:$true] %s193_s30 }
  0x37   : > { %s183_s7 = scalar_lea.sflag [#allocation7], %s1508_s29  ;;  %s1295_s9 = scalar_lea.hbm %s1569_s23, 256 }
  0x38   : > { %p1296_p1 = scmp.ne.s32.totalorder %s1569_s23, %s1295_s9  ;;  %s1300_s5 = scalar_lea.hbm %s1890_s1, 512 }
  0x39   : > { %p1301_p2 = scmp.lt.u32.totalorder %s1569_s23, %s1890_s1  ;;  %p1302_p5 = scmp.lt.u32.totalorder %s1300_s5, %s1295_s9 }
  0x3a   : > { %p1298_p6 = pnand %p1296_p1, %p1267_p3  ;;  %p1304_p7 = scmp.lt.u32.totalorder %s1295_s9, %s1569_s23 }
  0x3b   : > { %p1303_p4 = por %p1302_p5, %p1301_p2 }
  0x3c   : > { %p1299_p13 = pneg %p1298_p6 }
  0x3d   : > { %p1305_p10 = por %p1304_p7, %p1303_p4 }
  0x3f   : > { %p1306_p9 = pnand %p1305_p10, %p1299_p13 }
  0x41   : > { %1309 = shalt.err (!%p1306_p9)
}
  0x42   : > { %s1310_s12 = scalar_lea.vmem %s1571_s30, 256  ;;  %s1416_s22 = smov [#allocation6]  }
  0x43   : > { %p1311_p11 = scmp.ne.s32.totalorder %s1571_s30, %s1310_s12  ;;  %s1315_s24 = sshll.u32 %s1416_s22, 4  ;;  %s1316_s24 = int_to_ptr.vmem [resolvable:$false] %s1315_s24 }
  0x44   : > { %s1317_s11 = scalar_lea.vmem %s1316_s24, 512  ;;  %p1318_p8 = scmp.lt.s32.totalorder %s1571_s30, %s1316_s24 }
  0x45   : > { %p1313_p1 = pnand %p1311_p11, %p1267_p3  ;;  %p1319_p2 = scmp.lt.s32.totalorder %s1317_s11, %s1310_s12 }
  0x47   : > { %p1314_p6 = pneg %p1313_p1  ;;  %p1320_p5 = por %p1319_p2, %p1318_p8 }
  0x49   : > { %p1321_p4 = pnand %p1320_p5, %p1314_p6 }
  0x4b   : > { %1324 = shalt.err (!%p1321_p4)
}
  0x4c   : > { %1172 = dma.hbm_to_vmem [thread:$0]  (!%p1521_p0), %s1569_s23, 256, %s1571_s30, %s183_s7, %s1414_s6, %s1414_s6, %s1415_s8  }
  0x4d   : > { %205 = sbr.rel (%p1562_p12) target bundleno = 365 (0x16d), region = 32  ;;  %s1605_s9 = sand.u32 (!%p1562_p12), 1, %s1395_s15  }
  0x4e   : > { %s989_s4 = sshll.u32 (!%p1562_p12), %s1605_s9, 7  ;;  %s208_s10 = scalar_lea.sflag (!%p1562_p12), [#allocation4], %s1605_s9 }
  0x4f   : > { %s1611_s5 = scalar_lea.vmem (!%p1562_p12), [#allocation3], %s989_s4  ;;  %p1902_p8 = scmp.ne.s32.totalorder (!%p1562_p12), %s1896_s25, 0 }
  0x54   : > { %1378 = dma.done.wait (%p1902_p8), %s208_s10, 2048  }
  0x55   : > { %1380 = vsyncadd (%p1902_p8), %s208_s10, 4294965248  ;;  %s990_s29 = sshll.u32 %s1605_s9, 4  ;;  %s217_s6 = scalar_lea.sflag [#allocation7], %s1605_s9 }
  0x56   : > { %s220_s8 = scalar_lea.vmem [#allocation6], %s990_s29 }
  0x57   : > { %1382 = dma.done.wait (%p1902_p8), %s217_s6, 256  }
  0x58   : > { %1384 = vsyncadd (%p1902_p8), %s217_s6, 4294967040  ;;  %vm377_vm0 = vcmask 261120   ;;  %v1231_v0 = vld [vmem:[%s220_s8] sm:$0xff]   ;;  %v1232_v1 = vld [vmem:[%s220_s8 + $0x8] sm:$0xff]   ;;  %s593_s25 = sld [smem:[#allocation2]]  ;;  %vm819_vm1 = vcmask 257024  }
  0x59   : > { %1156 = vmatprep.subr.msk.bf16.mxu0 %vm377_vm0, %v1231_v0  ;;  %1157 = vmatprep.subr.msk.bf16.mxu1 %vm377_vm0, %v1231_v0  ;;  %v427_v2 = vsel %vm377_vm0, %v1231_v0, 0  ;;  %v1627_v3 = vld [vmem:[%s1611_s5] sm:$0xff]   ;;  %v430_v5 = vsel %vm377_vm0, %v1232_v1, 0  ;;  %v253_v6 = vld [vmem:[%s1611_s5 + $0x8] sm:$0xff]   ;;  %v1642_v8 = vld [vmem:[%s1611_s5 + $0x10] sm:$0xff]   ;;  %s1719_s2 = scalar_lea.vmem [#allocation8], %s989_s4 }
  0x5a   : > { %v1630_v4 = vld [vmem:[%s1611_s5 + $0x40] sm:$0xff]   ;;  %1117 = vmatpush3.bf16.xpose.msra.mxu0 %v427_v2  ;;  %1154 = vmatpush3.bf16.xpose.msra.mxu1 %v427_v2  ;;  %v269_v7 = vld [vmem:[%s1611_s5 + $0x48] sm:$0xff]   ;;  %v1645_v9 = vld [vmem:[%s1611_s5 + $0x50] sm:$0xff]   ;;  %v629_v21 = vunpack.c.l.bf16 %v253_v6  ;;  %v627_v23 = vunpack.c.l.bf16 %v1627_v3  ;;  %v628_v24 = vunpack.c.h.bf16 %v1627_v3  ;;  %v630_v32 = vunpack.c.h.bf16 %v253_v6  ;;  %s1097_s23 = sshll.u32 %s1403_s17, 11  ;;  %s868_s30 = sshll.u32 %s1719_s2, 4  ;;  %s1828_s30 = int_to_ptr.vmem [resolvable:$true] %s868_s30 }
  0x5b   : > { %1158 = vmatprep.subr.msk.bf16.mxu0 %vm377_vm0, %v1232_v1  ;;  %1159 = vmatprep.subr.msk.bf16.mxu1 %vm377_vm0, %v1232_v1  ;;  %v1654_v10 = vld [vmem:[%s1611_s5 + $0x18] sm:$0xff]   ;;  %v1660_v12 = vld [vmem:[%s1611_s5 + $0x20] sm:$0xff]   ;;  %v1674_v14 = vld [vmem:[%s1611_s5 + $0x28] sm:$0xff]   ;;  %v645_v22 = vunpack.c.l.bf16 %v269_v7  ;;  %v643_v25 = vunpack.c.l.bf16 %v1630_v4  ;;  %v646_v33 = vunpack.c.h.bf16 %v269_v7  ;;  %v644_v34 = vunpack.c.h.bf16 %v1630_v4  ;;  %s1826_s13 = scalar_lea.hbm %s1892_s3, %s1097_s23  ;;  %s853_s20 = scalar_lea.sflag [#allocation5], %s1605_s9 }
  0x5c   : > { %1120 = vmatprep.mubr.msk.bf16.mxu0 %vm377_vm0, %v1627_v3  ;;  %1136 = vmatprep.mubr.msk.bf16.mxu1 %vm377_vm0, %v1630_v4  ;;  %v1657_v11 = vld [vmem:[%s1611_s5 + $0x58] sm:$0xff]   ;;  %v1663_v13 = vld [vmem:[%s1611_s5 + $0x60] sm:$0xff]   ;;  %v1677_v15 = vld [vmem:[%s1611_s5 + $0x68] sm:$0xff]   ;;  %v633_v59 = vunpack.c.l.bf16 %v1654_v10  ;;  %v631_v1 = vunpack.c.l.bf16 %v1642_v8  ;;  %v647_v2 = vunpack.c.l.bf16 %v1645_v9  ;;  %s1325_s12 = scalar_lea.vmem %s1828_s30, 2048  ;;  %p1903_p3 = scmp.ne.s32.totalorder %s1897_s26, 0 }
  0x5d   : > { %v1680_v16 = vld [vmem:[%s1611_s5 + $0x30] sm:$0xff]   ;;  %v1694_v18 = vld [vmem:[%s1611_s5 + $0x38] sm:$0xff]   ;;  %v649_v60 = vunpack.c.l.bf16 %v1657_v11  ;;  %p1326_p0 = scmp.ne.s32.totalorder %s1828_s30, %s1325_s12  ;;  %s1417_s22 = smov [#allocation8]  }
  0x5e   : > { %v1683_v17 = vld [vmem:[%s1611_s5 + $0x70] sm:$0xff]   ;;  %v1697_v19 = vld [vmem:[%s1611_s5 + $0x78] sm:$0xff]   ;;  %v1703_v20 = vstv %s593_s25  ;;  %s1329_s24 = sshll.u32 %s1417_s22, 4  ;;  %s1330_s24 = int_to_ptr.vmem [resolvable:$false] %s1329_s24 }
  0x5f   : > { %p1327_p12 = pnand %p1326_p0, %p1903_p3  ;;  %s1331_s11 = scalar_lea.vmem %s1330_s24, 4096 }
  0x60   : > { %p1332_p7 = scmp.lt.s32.totalorder %s1828_s30, %s1330_s24  ;;  %p1333_p10 = scmp.lt.s32.totalorder %s1331_s11, %s1325_s12 }
  0x61   : > { %p1328_p13 = pneg %p1327_p12 }
  0x62   : > { %1119 = vmatpush3.bf16.xpose.msra.mxu0 %v430_v5  ;;  %1155 = vmatpush3.bf16.xpose.msra.mxu1 %v430_v5  ;;  %p1334_p9 = por %p1333_p10, %p1332_p7 }
  0x64   : > { %p1335_p11 = pnand %p1334_p9, %p1328_p13 }
  0x69   : > { %1121 = vmatmul.mubr.msk.bf16.vlgmr.msra.gmra.mrb[0].mxu0 %vm377_vm0, %v253_v6  ;;  %1137 = vmatmul.mubr.msk.bf16.vlgmr.msra.gmra.mrb[0].mxu1 %vm377_vm0, %v269_v7  ;;  %v634_v7 = vunpack.c.h.bf16 %v1654_v10 }
  0x6a   : > { %1124 = vmatprep.mubr.msk.bf16.mxu0 %vm377_vm0, %v1642_v8  ;;  %1140 = vmatprep.mubr.msk.bf16.mxu1 %vm377_vm0, %v1645_v9 }
  0x71   : > { %1125 = vmatmul.mubr.msk.bf16.gmra.mrb[4].mxu0 %vm377_vm0, %v1654_v10  ;;  %1141 = vmatmul.mubr.msk.bf16.gmra.mrb[4].mxu1 %vm377_vm0, %v1657_v11 }
  0x72   : > { %1128 = vmatprep.mubr.msk.bf16.mxu0 %vm377_vm0, %v1660_v12  ;;  %1144 = vmatprep.mubr.msk.bf16.mxu1 %vm377_vm0, %v1663_v13 }
  0x79   : > { %1129 = vmatmul.mubr.msk.bf16.gmra.mrb[8].mxu0 %vm377_vm0, %v1674_v14  ;;  %1145 = vmatmul.mubr.msk.bf16.gmra.mrb[8].mxu1 %vm377_vm0, %v1677_v15 }
  0x7a   : > { %1132 = vmatprep.mubr.msk.bf16.mxu0 %vm377_vm0, %v1680_v16  ;;  %1148 = vmatprep.mubr.msk.bf16.mxu1 %vm377_vm0, %v1683_v17 }
  0x81   : > { %1133 = vmatmul.mubr.msk.bf16.gmra.mrb[12].mxu0 %vm377_vm0, %v1694_v18  ;;  %1149 = vmatmul.mubr.msk.bf16.gmra.mrb[12].mxu1 %vm377_vm0, %v1697_v19 }
 0x13c   : > { %v1122_v26 = vpop.f32.mrb[0].mxu0  ;;  %v1138_v27 = vpop.f32.mrb[0].mxu1 }
 0x13d   : > { %v597_v28 = vmul.f32 %v1122_v26, %v1703_v20  ;;  %v613_v29 = vmul.f32 %v1138_v27, %v1703_v20  ;;  %v466_v30 = vpop.f32.mrb[1].mxu0  ;;  %v530_v31 = vpop.f32.mrb[1].mxu1  ;;  %v632_v26 = vunpack.c.h.bf16 %v1642_v8  ;;  %v648_v27 = vunpack.c.h.bf16 %v1645_v9 }
 0x13e   : > { %v595_v35 = vmul.f32 %v1703_v20, %v466_v30  ;;  %v611_v36 = vmul.f32 %v1703_v20, %v530_v31  ;;  %v1123_v37 = vpop.f32.mrb[2].mxu0  ;;  %v1139_v38 = vpop.f32.mrb[2].mxu1 }
 0x13f   : > { %v661_v39 = vadd.f32 %v629_v21, %v597_v28  ;;  %v677_v40 = vadd.f32 %v645_v22, %v613_v29  ;;  %v598_v41 = vmul.f32 %v1123_v37, %v1703_v20  ;;  %v614_v42 = vmul.f32 %v1139_v38, %v1703_v20  ;;  %v469_v43 = vpop.f32.mrb[3].mxu0  ;;  %v533_v44 = vpop.f32.mrb[3].mxu1 }
 0x140   : > { %v659_v45 = vadd.f32 %v627_v23, %v595_v35  ;;  %v675_v46 = vadd.f32 %v643_v25, %v611_v36  ;;  %v596_v47 = vmul.f32 %v1703_v20, %v469_v43  ;;  %v612_v48 = vmul.f32 %v1703_v20, %v533_v44 }
 0x141   : > { %v1067_v49 = vpack.c.bf16 %v661_v39, %v661_v39  ;;  %v1083_v50 = vpack.c.bf16 %v677_v40, %v677_v40  ;;  %v662_v51 = vadd.f32 %v630_v32, %v598_v41  ;;  %v678_v52 = vadd.f32 %v646_v33, %v614_v42 }
 0x142   : > { %v1065_v53 = vpack.c.bf16 %v659_v45, %v659_v45  ;;  %v1081_v54 = vpack.c.bf16 %v675_v46, %v675_v46  ;;  %v660_v55 = vadd.f32 %v628_v24, %v596_v47  ;;  %v676_v56 = vadd.f32 %v644_v34, %v612_v48 }
 0x143   : > { %822 = vst.msk [vmem:[%s1719_s2 + $0x8] sm:$0xf] %vm819_vm1, %v1067_v49  ;;  %838 = vst.msk [vmem:[%s1719_s2 + $0x48] sm:$0xf] %vm819_vm1, %v1083_v50  ;;  %v1068_v57 = vpack.c.bf16 %v662_v51, %v662_v51  ;;  %v1084_v58 = vpack.c.bf16 %v678_v52, %v678_v52  ;;  %v650_v21 = vunpack.c.h.bf16 %v1657_v11  ;;  %v637_v44 = vunpack.c.l.bf16 %v1674_v14 }
 0x144   : > { %820 = vst.msk [vmem:[%s1719_s2] sm:$0xf] %vm819_vm1, %v1065_v53  ;;  %836 = vst.msk [vmem:[%s1719_s2 + $0x40] sm:$0xf] %vm819_vm1, %v1081_v54  ;;  %v1066_v61 = vpack.c.bf16 %v660_v55, %v660_v55  ;;  %v1082_v62 = vpack.c.bf16 %v676_v56, %v676_v56  ;;  %v1126_v63 = vpop.f32.mrb[4].mxu0  ;;  %v1142_v0 = vpop.f32.mrb[4].mxu1  ;;  %v653_v45 = vunpack.c.l.bf16 %v1677_v15  ;;  %v635_v50 = vunpack.c.l.bf16 %v1660_v12 }
 0x145   : > { %823 = vst.msk [vmem:[%s1719_s2 + $0xc] sm:$0xf] %vm819_vm1, %v1068_v57  ;;  %839 = vst.msk [vmem:[%s1719_s2 + $0x4c] sm:$0xf] %vm819_vm1, %v1084_v58  ;;  %v601_v3 = vmul.f32 %v1126_v63, %v1703_v20  ;;  %v617_v4 = vmul.f32 %v1142_v0, %v1703_v20  ;;  %v482_v5 = vpop.f32.mrb[5].mxu0  ;;  %v546_v6 = vpop.f32.mrb[5].mxu1  ;;  %v651_v51 = vunpack.c.l.bf16 %v1663_v13  ;;  %v638_v56 = vunpack.c.h.bf16 %v1674_v14 }
 0x146   : > { %821 = vst.msk [vmem:[%s1719_s2 + $0x4] sm:$0xf] %vm819_vm1, %v1066_v61  ;;  %837 = vst.msk [vmem:[%s1719_s2 + $0x44] sm:$0xf] %vm819_vm1, %v1082_v62  ;;  %v599_v22 = vmul.f32 %v1703_v20, %v482_v5  ;;  %v615_v23 = vmul.f32 %v1703_v20, %v546_v6  ;;  %v1127_v24 = vpop.f32.mrb[6].mxu0  ;;  %v1143_v25 = vpop.f32.mrb[6].mxu1  ;;  %v654_v57 = vunpack.c.h.bf16 %v1677_v15  ;;  %v636_v62 = vunpack.c.h.bf16 %v1660_v12 }
 0x147   : > { %v665_v28 = vadd.f32 %v633_v59, %v601_v3  ;;  %v681_v29 = vadd.f32 %v649_v60, %v617_v4  ;;  %v602_v10 = vmul.f32 %v1127_v24, %v1703_v20  ;;  %v618_v11 = vmul.f32 %v1143_v25, %v1703_v20  ;;  %v485_v30 = vpop.f32.mrb[7].mxu0  ;;  %v549_v31 = vpop.f32.mrb[7].mxu1 }
 0x148   : > { %v663_v32 = vadd.f32 %v631_v1, %v599_v22  ;;  %v679_v33 = vadd.f32 %v647_v2, %v615_v23  ;;  %v600_v34 = vmul.f32 %v1703_v20, %v485_v30  ;;  %v616_v35 = vmul.f32 %v1703_v20, %v549_v31 }
 0x149   : > { %v1071_v8 = vpack.c.bf16 %v665_v28, %v665_v28  ;;  %v1087_v9 = vpack.c.bf16 %v681_v29, %v681_v29  ;;  %v666_v36 = vadd.f32 %v634_v7, %v602_v10  ;;  %v682_v37 = vadd.f32 %v650_v21, %v618_v11 }
 0x14a   : > { %v1069_v38 = vpack.c.bf16 %v663_v32, %v663_v32  ;;  %v1085_v39 = vpack.c.bf16 %v679_v33, %v679_v33  ;;  %v664_v40 = vadd.f32 %v632_v26, %v600_v34  ;;  %v680_v41 = vadd.f32 %v648_v27, %v616_v35 }
 0x14b   : > { %826 = vst.msk [vmem:[%s1719_s2 + $0x18] sm:$0xf] %vm819_vm1, %v1071_v8  ;;  %842 = vst.msk [vmem:[%s1719_s2 + $0x58] sm:$0xf] %vm819_vm1, %v1087_v9  ;;  %v1072_v42 = vpack.c.bf16 %v666_v36, %v666_v36  ;;  %v1088_v43 = vpack.c.bf16 %v682_v37, %v682_v37  ;;  %v652_v63 = vunpack.c.h.bf16 %v1663_v13  ;;  %v641_v29 = vunpack.c.l.bf16 %v1694_v18 }
 0x14c   : > { %824 = vst.msk [vmem:[%s1719_s2 + $0x10] sm:$0xf] %vm819_vm1, %v1069_v38  ;;  %840 = vst.msk [vmem:[%s1719_s2 + $0x50] sm:$0xf] %vm819_vm1, %v1085_v39  ;;  %v1070_v46 = vpack.c.bf16 %v664_v40, %v664_v40  ;;  %v1086_v47 = vpack.c.bf16 %v680_v41, %v680_v41  ;;  %v1130_v48 = vpop.f32.mrb[8].mxu0  ;;  %v1146_v49 = vpop.f32.mrb[8].mxu1  ;;  %v657_v10 = vunpack.c.l.bf16 %v1697_v19  ;;  %v639_v33 = vunpack.c.l.bf16 %v1680_v16 }
 0x14d   : > { %827 = vst.msk [vmem:[%s1719_s2 + $0x1c] sm:$0xf] %vm819_vm1, %v1072_v42  ;;  %843 = vst.msk [vmem:[%s1719_s2 + $0x5c] sm:$0xf] %vm819_vm1, %v1088_v43  ;;  %v605_v52 = vmul.f32 %v1130_v48, %v1703_v20  ;;  %v621_v53 = vmul.f32 %v1146_v49, %v1703_v20  ;;  %v498_v54 = vpop.f32.mrb[9].mxu0  ;;  %v562_v55 = vpop.f32.mrb[9].mxu1  ;;  %v655_v34 = vunpack.c.l.bf16 %v1683_v17  ;;  %v642_v37 = vunpack.c.h.bf16 %v1694_v18 }
 0x14e   : > { %825 = vst.msk [vmem:[%s1719_s2 + $0x14] sm:$0xf] %vm819_vm1, %v1070_v46  ;;  %841 = vst.msk [vmem:[%s1719_s2 + $0x54] sm:$0xf] %vm819_vm1, %v1086_v47  ;;  %v603_v58 = vmul.f32 %v1703_v20, %v498_v54  ;;  %v619_v59 = vmul.f32 %v1703_v20, %v562_v55  ;;  %v1131_v60 = vpop.f32.mrb[10].mxu0  ;;  %v1147_v61 = vpop.f32.mrb[10].mxu1  ;;  %v658_v38 = vunpack.c.h.bf16 %v1697_v19  ;;  %v640_v43 = vunpack.c.h.bf16 %v1680_v16 }
 0x14f   : > { %v669_v0 = vadd.f32 %v637_v44, %v605_v52  ;;  %v685_v1 = vadd.f32 %v653_v45, %v621_v53  ;;  %v606_v14 = vmul.f32 %v1131_v60, %v1703_v20  ;;  %v622_v15 = vmul.f32 %v1147_v61, %v1703_v20  ;;  %v501_v2 = vpop.f32.mrb[11].mxu0  ;;  %v565_v3 = vpop.f32.mrb[11].mxu1 }
 0x150   : > { %v667_v4 = vadd.f32 %v635_v50, %v603_v58  ;;  %v683_v5 = vadd.f32 %v651_v51, %v619_v59  ;;  %v604_v6 = vmul.f32 %v1703_v20, %v501_v2  ;;  %v620_v7 = vmul.f32 %v1703_v20, %v565_v3 }
 0x151   : > { %v1075_v12 = vpack.c.bf16 %v669_v0, %v669_v0  ;;  %v1091_v13 = vpack.c.bf16 %v685_v1, %v685_v1  ;;  %v670_v21 = vadd.f32 %v638_v56, %v606_v14  ;;  %v686_v22 = vadd.f32 %v654_v57, %v622_v15 }
 0x152   : > { %v1073_v23 = vpack.c.bf16 %v667_v4, %v667_v4  ;;  %v1089_v24 = vpack.c.bf16 %v683_v5, %v683_v5  ;;  %v668_v25 = vadd.f32 %v636_v62, %v604_v6  ;;  %v684_v26 = vadd.f32 %v652_v63, %v620_v7 }
 0x153   : > { %830 = vst.msk [vmem:[%s1719_s2 + $0x28] sm:$0xf] %vm819_vm1, %v1075_v12  ;;  %846 = vst.msk [vmem:[%s1719_s2 + $0x68] sm:$0xf] %vm819_vm1, %v1091_v13  ;;  %v1076_v27 = vpack.c.bf16 %v670_v21, %v670_v21  ;;  %v1092_v28 = vpack.c.bf16 %v686_v22, %v686_v22  ;;  %v656_v44 = vunpack.c.h.bf16 %v1683_v17 }
 0x154   : > { %828 = vst.msk [vmem:[%s1719_s2 + $0x20] sm:$0xf] %vm819_vm1, %v1073_v23  ;;  %844 = vst.msk [vmem:[%s1719_s2 + $0x60] sm:$0xf] %vm819_vm1, %v1089_v24  ;;  %v1074_v11 = vpack.c.bf16 %v668_v25, %v668_v25  ;;  %v1090_v30 = vpack.c.bf16 %v684_v26, %v684_v26  ;;  %v1134_v31 = vpop.f32.mrb[12].mxu0  ;;  %v1150_v32 = vpop.f32.mrb[12].mxu1 }
 0x155   : > { %831 = vst.msk [vmem:[%s1719_s2 + $0x2c] sm:$0xf] %vm819_vm1, %v1076_v27  ;;  %847 = vst.msk [vmem:[%s1719_s2 + $0x6c] sm:$0xf] %vm819_vm1, %v1092_v28  ;;  %v609_v35 = vmul.f32 %v1134_v31, %v1703_v20  ;;  %v625_v8 = vmul.f32 %v1150_v32, %v1703_v20  ;;  %v514_v9 = vpop.f32.mrb[13].mxu0  ;;  %v578_v36 = vpop.f32.mrb[13].mxu1 }
 0x156   : > { %829 = vst.msk [vmem:[%s1719_s2 + $0x24] sm:$0xf] %vm819_vm1, %v1074_v11  ;;  %845 = vst.msk [vmem:[%s1719_s2 + $0x64] sm:$0xf] %vm819_vm1, %v1090_v30  ;;  %v607_v39 = vmul.f32 %v1703_v20, %v514_v9  ;;  %v623_v40 = vmul.f32 %v1703_v20, %v578_v36  ;;  %v1135_v41 = vpop.f32.mrb[14].mxu0  ;;  %v1151_v42 = vpop.f32.mrb[14].mxu1 }
 0x157   : > { %v673_v45 = vadd.f32 %v641_v29, %v609_v35  ;;  %v689_v18 = vadd.f32 %v657_v10, %v625_v8  ;;  %v610_v19 = vmul.f32 %v1135_v41, %v1703_v20  ;;  %v626_v46 = vmul.f32 %v1151_v42, %v1703_v20  ;;  %v517_v47 = vpop.f32.mrb[15].mxu0  ;;  %v581_v48 = vpop.f32.mrb[15].mxu1 }
 0x158   : > { %v671_v49 = vadd.f32 %v639_v33, %v607_v39  ;;  %v687_v50 = vadd.f32 %v655_v34, %v623_v40  ;;  %v608_v51 = vmul.f32 %v1703_v20, %v517_v47  ;;  %v624_v52 = vmul.f32 %v1703_v20, %v581_v48 }
 0x159   : > { %v1079_v16 = vpack.c.bf16 %v673_v45, %v673_v45  ;;  %v1095_v17 = vpack.c.bf16 %v689_v18, %v689_v18  ;;  %v674_v53 = vadd.f32 %v642_v37, %v610_v19  ;;  %v690_v54 = vadd.f32 %v658_v38, %v626_v46 }
 0x15a   : > { %v1077_v55 = vpack.c.bf16 %v671_v49, %v671_v49  ;;  %v1093_v56 = vpack.c.bf16 %v687_v50, %v687_v50  ;;  %v672_v57 = vadd.f32 %v640_v43, %v608_v51  ;;  %v688_v58 = vadd.f32 %v656_v44, %v624_v52 }
 0x15b   : > { %834 = vst.msk [vmem:[%s1719_s2 + $0x38] sm:$0xf] %vm819_vm1, %v1079_v16  ;;  %850 = vst.msk [vmem:[%s1719_s2 + $0x78] sm:$0xf] %vm819_vm1, %v1095_v17  ;;  %v1080_v20 = vpack.c.bf16 %v674_v53, %v674_v53  ;;  %v1096_v59 = vpack.c.bf16 %v690_v54, %v690_v54 }
 0x15c   : > { %832 = vst.msk [vmem:[%s1719_s2 + $0x30] sm:$0xf] %vm819_vm1, %v1077_v55  ;;  %848 = vst.msk [vmem:[%s1719_s2 + $0x70] sm:$0xf] %vm819_vm1, %v1093_v56  ;;  %v1078_v60 = vpack.c.bf16 %v672_v57, %v672_v57  ;;  %v1094_v61 = vpack.c.bf16 %v688_v58, %v688_v58 }
 0x15d   : > { %835 = vst.msk [vmem:[%s1719_s2 + $0x3c] sm:$0xf] %vm819_vm1, %v1080_v20  ;;  %851 = vst.msk [vmem:[%s1719_s2 + $0x7c] sm:$0xf] %vm819_vm1, %v1096_v59 }
 0x15e   : > { %833 = vst.msk [vmem:[%s1719_s2 + $0x34] sm:$0xf] %vm819_vm1, %v1078_v60  ;;  %849 = vst.msk [vmem:[%s1719_s2 + $0x74] sm:$0xf] %vm819_vm1, %v1094_v61 }
 0x15f   : > { %1338 = shalt.err (!%p1335_p11)
}
 0x160   : > { %s1339_s4 = scalar_lea.hbm %s1826_s13, 2048  ;;  %s1343_s29 = scalar_lea.hbm %s1892_s3, 4096 }
 0x161   : > { %p1340_p1 = scmp.ne.s32.totalorder %s1826_s13, %s1339_s4  ;;  %p1344_p5 = scmp.lt.u32.totalorder %s1826_s13, %s1892_s3 }
 0x162   : > { %p1345_p4 = scmp.lt.u32.totalorder %s1343_s29, %s1339_s4  ;;  %p1347_p0 = scmp.lt.u32.totalorder %s1339_s4, %s1826_s13 }
 0x163   : > { %p1341_p6 = pnand %p1340_p1, %p1903_p3 }
 0x164   : > { %p1346_p8 = por %p1345_p4, %p1344_p5 }
 0x165   : > { %p1342_p2 = pneg %p1341_p6 }
 0x166   : > { %p1348_p12 = por %p1347_p0, %p1346_p8 }
 0x168   : > { %p1349_p13 = pnand %p1348_p12, %p1342_p2 }
 0x16a   : > { %1352 = shalt.err (!%p1349_p13)
}
 0x16b   : > { %s1418_s25 = smov 64   ;;  %s1419_s2 = smov 4  }
 0x16c   : > { %1164 = dma.vmem_to_hbm [thread:$0]  (%p1903_p3), %s1828_s30, 2048, %s1826_s13, %s853_s20, %s1418_s25, %s1418_s25, %s1419_s2  }
 0x16d PF: > { %s883_s23 = sand.u32 1, %s1391_s14   ;;  %p1904_p7 = scmp.ne.s32.totalorder %s1898_s28, 0 }
 0x16e   : > { %p1905_p10 = scmp.ge.s32.totalorder %s1411_s19, 2  ;;  %s884_s17 = scalar_lea.sflag [#allocation5], %s883_s23 }
 0x170   : > { %p1174_p9 = pnand %p1905_p10, %p1904_p7 }
 0x172   : > { %1386 = dma.done.wait (!%p1174_p9), %s884_s17, 2048  }
 0x173   : > { %1388 = vsyncadd (!%p1174_p9), %s884_s17, 4294965248  ;;  %s23_s19 = sadd.s32 1, %s1411_s19   ;;  %s1906_s14 = smov %s1395_s15 }
 0x174   : > { %p20_p11 = scmp.ge.s32.totalorder %s23_s19, 4   ;;  %s1907_s15 = smov %s1399_s16 }
 0x175   : > { %s1908_s16 = smov %s1499_s27  ;;  %s1909_s17 = smov %s1407_s18 }
 0x176   : > { %s1910_s18 = smov %s1912_s21  ;;  %22 = sbr.rel (!%p20_p11) target bundleno = 10 (0xa), region = 90 }
 0x17d   :  { %889 = vsyncpa [#allocation4], 1 }
 0x17e   :  { %891 = vsyncpa [#allocation4 + $0x1], 1 }
 0x17f   :  { %892 = vsyncpa [#allocation7], 1 }
 0x180   :  { %894 = vsyncpa [#allocation7 + $0x1], 1 }
 0x181   :  { %895 = vsyncpa [#allocation5], 1 }
 0x182   :  { %897 = vsyncpa [#allocation5 + $0x1], 1 }

// kernel: dablock_forward.17
= control target key start
LH: loop header
LB: loop body
LE: loop exit
PB: predicated region body
PF: predicated region fallthrough
CT: control target
= control target key end

     0   :  { %10 = vsyncpa [#allocation3], 0  ;;  %s2445_s0 = inlined_call_operand.hbm [shape: bf16[512,32], index: 0, kind: input, shape index: {}]   ;;  %s2446_s1 = inlined_call_operand.hbm [shape: bf16[512,32], index: 1, kind: input, shape index: {}]   ;;  %s2447_s2 = inlined_call_operand.hbm [shape: bf16[32,64], index: 2, kind: input, shape index: {}]   ;;  %s2448_s3 = inlined_call_operand.hbm [shape: bf16[32,64], index: 3, kind: input, shape index: {}]   ;;  %s2449_s4 = inlined_call_operand.hbm [shape: f32[1,64], index: 4, kind: input, shape index: {}]   ;;  %s2450_s5 = inlined_call_operand.hbm [shape: f32[512,64], index: 5, kind: output, shape index: {}]  }
   0x1   :  { %11 = vsyncpa [#allocation6], 0 }
   0x2   :  { %12 = vsyncpa [#allocation9], 0 }
   0x3   :  { %13 = vsyncpa [#allocation4], 0  ;;  %s2113_s18 = smov [#allocation5]   ;;  %s2114_s20 = smov [#allocation8]  }
   0x4   :  { %s31_s19 = sshll.u32 %s2113_s18, 4  ;;  %s55_s21 = sshll.u32 %s2114_s20, 4  ;;  %s32_s19 = int_to_ptr.vmem [resolvable:$true] %s31_s19  ;;  %s2153_s21 = int_to_ptr.vmem [resolvable:$true] %s55_s21 }
   0x5   :  { %s1973_s24 = scalar_lea.hbm %s2446_s1, 4096 }
   0x6   :  { %p1974_p0 = scmp.ne.s32.totalorder %s2446_s1, %s1973_s24  ;;  %p1977_p1 = scmp.lt.u32.totalorder %s1973_s24, %s2446_s1 }
   0x8   :  { %p1979_p2 = pnand %p1977_p1, %p1974_p0 }
   0xa   :  { %1982 = shalt.err (!%p1979_p2)
}
   0xb   :  { %s1983_s29 = scalar_lea.vmem %s32_s19, 4096  ;;  %p1988_p4 = scmp.lt.s32.totalorder %s32_s19, %s32_s19 }
   0xc   :  { %p1984_p3 = scmp.ne.s32.totalorder %s32_s19, %s1983_s29  ;;  %p1989_p5 = scmp.lt.s32.totalorder %s1983_s29, %s1983_s29 }
   0xe   :  { %p1990_p6 = por %p1989_p5, %p1988_p4 }
  0x10   :  { %p1991_p7 = pnand %p1990_p6, %p1984_p3 }
  0x12   :  { %1994 = shalt.err (!%p1991_p7)
}
  0x13   :  { %s2115_s30 = smov 64   ;;  %s2116_s6 = smov 4  }
  0x14   :  { %37 = dma.hbm_to_vmem [thread:$0]  %s2446_s1, 4096, %s32_s19, [#allocation6], %s2115_s30, %s2115_s30, %s2116_s6  }
  0x15   :  { %s1995_s11 = scalar_lea.hbm %s2448_s3, 256 }
  0x16   :  { %p1996_p8 = scmp.ne.s32.totalorder %s2448_s3, %s1995_s11  ;;  %p1999_p9 = scmp.lt.u32.totalorder %s1995_s11, %s2448_s3 }
  0x18   :  { %p2001_p10 = pnand %p1999_p9, %p1996_p8 }
  0x1a   :  { %2004 = shalt.err (!%p2001_p10)
}
  0x1b   :  { %s2005_s16 = scalar_lea.vmem %s2153_s21, 256  ;;  %p2010_p12 = scmp.lt.s32.totalorder %s2153_s21, %s2153_s21 }
  0x1c   :  { %p2006_p11 = scmp.ne.s32.totalorder %s2153_s21, %s2005_s16  ;;  %p2011_p13 = scmp.lt.s32.totalorder %s2005_s16, %s2005_s16 }
  0x1e   :  { %p2012_p0 = por %p2011_p13, %p2010_p12 }
  0x20   :  { %p2013_p1 = pnand %p2012_p0, %p2006_p11 }
  0x22   :  { %2016 = shalt.err (!%p2013_p1)
}
  0x23   :  { %61 = dma.hbm_to_vmem [thread:$0]  %s2448_s3, 256, %s2153_s21, [#allocation9], %s2115_s30, %s2115_s30, %s2116_s6  }
  0x24   :  { %s2117_s18 = smov [#allocation2]   ;;  %s2118_s20 = smov [#allocation7]  }
  0x25   :  { %s19_s19 = sshll.u32 %s2117_s18, 4  ;;  %s43_s22 = sshll.u32 %s2118_s20, 4  ;;  %s20_s19 = int_to_ptr.vmem [resolvable:$true] %s19_s19  ;;  %s2190_s22 = int_to_ptr.vmem [resolvable:$true] %s43_s22 }
  0x26   :  { %s2017_s25 = scalar_lea.hbm %s2445_s0, 4096 }
  0x27   :  { %p2018_p2 = scmp.ne.s32.totalorder %s2445_s0, %s2017_s25  ;;  %p2021_p3 = scmp.lt.u32.totalorder %s2017_s25, %s2445_s0 }
  0x29   :  { %p2023_p4 = pnand %p2021_p3, %p2018_p2 }
  0x2b   :  { %2026 = shalt.err (!%p2023_p4)
}
  0x2c   :  { %s2027_s3 = scalar_lea.vmem %s20_s19, 4096  ;;  %p2032_p6 = scmp.lt.s32.totalorder %s20_s19, %s20_s19 }
  0x2d   :  { %p2028_p5 = scmp.ne.s32.totalorder %s20_s19, %s2027_s3  ;;  %p2033_p7 = scmp.lt.s32.totalorder %s2027_s3, %s2027_s3 }
  0x2f   :  { %p2034_p8 = por %p2033_p7, %p2032_p6 }
  0x31   :  { %p2035_p9 = pnand %p2034_p8, %p2028_p5 }
  0x33   :  { %2038 = shalt.err (!%p2035_p9)
}
  0x34   :  { %25 = dma.hbm_to_vmem [thread:$0]  %s2445_s0, 4096, %s20_s19, [#allocation3], %s2115_s30, %s2115_s30, %s2116_s6  }
  0x35   :  { %s2039_s10 = scalar_lea.hbm %s2447_s2, 256 }
  0x36   :  { %p2040_p10 = scmp.ne.s32.totalorder %s2447_s2, %s2039_s10  ;;  %p2043_p11 = scmp.lt.u32.totalorder %s2039_s10, %s2447_s2 }
  0x38   :  { %p2045_p12 = pnand %p2043_p11, %p2040_p10 }
  0x3a   :  { %2048 = shalt.err (!%p2045_p12)
}
  0x3b   :  { %s2049_s15 = scalar_lea.vmem %s2190_s22, 256  ;;  %p2054_p0 = scmp.lt.s32.totalorder %s2190_s22, %s2190_s22 }
  0x3c   :  { %p2050_p13 = scmp.ne.s32.totalorder %s2190_s22, %s2049_s15  ;;  %p2055_p1 = scmp.lt.s32.totalorder %s2049_s15, %s2049_s15 }
  0x3e   :  { %p2056_p2 = por %p2055_p1, %p2054_p0 }
  0x40   :  { %p2057_p3 = pnand %p2056_p2, %p2050_p13 }
  0x42   :  { %2060 = shalt.err (!%p2057_p3)
}
  0x43   :  { %49 = dma.hbm_to_vmem [thread:$0]  %s2447_s2, 256, %s2190_s22, [#allocation6], %s2115_s30, %s2115_s30, %s2116_s6  }
  0x44   :  { %s2119_s1 = smov [#allocation10]   ;;  %s2061_s20 = scalar_lea.hbm %s2449_s4, 16 }
  0x45   :  { %s68_s17 = sshll.u32 %s2119_s1, 4  ;;  %p2062_p4 = scmp.ne.s32.totalorder %s2449_s4, %s2061_s20  ;;  %s69_s17 = int_to_ptr.vmem [resolvable:$true] %s68_s17 }
  0x46   :  { %p2065_p5 = scmp.lt.u32.totalorder %s2061_s20, %s2449_s4 }
  0x48   :  { %p2067_p6 = pnand %p2065_p5, %p2062_p4 }
  0x4a   :  { %2070 = shalt.err (!%p2067_p6)
}
  0x4b   :  { %s2071_s27 = scalar_lea.vmem %s69_s17, 16  ;;  %s2075_s2 = scalar_lea.vmem %s69_s17, 32 }
  0x4c   :  { %p2072_p7 = scmp.ne.s32.totalorder %s69_s17, %s2071_s27  ;;  %p2076_p8 = scmp.lt.s32.totalorder %s69_s17, %s69_s17 }
  0x4d   :  { %p2077_p9 = scmp.lt.s32.totalorder %s2075_s2, %s2071_s27 }
  0x4f   :  { %p2078_p10 = por %p2077_p9, %p2076_p8 }
  0x51   :  { %p2079_p11 = pnand %p2078_p10, %p2072_p7 }
  0x53   :  { %2082 = shalt.err (!%p2079_p11)
}
  0x54   :  { %71 = dma.hbm_to_vmem [thread:$0]  %s2449_s4, 16, %s69_s17, [#allocation9]  }
  0x55   :  { %2105 = dma.done.wait [#allocation3], 4096  }
  0x56   :  { %2106 = vsyncadd [#allocation3], 4294963200 }
  0x57   :  { %2107 = dma.done.wait [#allocation6], 4352  }
  0x58   :  { %2108 = vsyncadd [#allocation6], 4294962944 }
  0x59   :  { %2109 = dma.done.wait [#allocation9], 272  }
  0x5a   :  { %2110 = vsyncadd [#allocation9], 4294967024  ;;  %v1905_v0 = vld [vmem:[#allocation8] sm:$0xff]   ;;  %v1906_v1 = vld [vmem:[#allocation7] sm:$0xff]   ;;  %vm396_vm0 = vcmask 261120   ;;  %vm1410_vm1 = vcmask 523264  }
  0x5b   :  { %1695 = vmatprep.subr.bf16.mxu1 %v1905_v0  ;;  %v1907_v2 = vld [vmem:[#allocation8 + $0x8] sm:$0xff]   ;;  %1763 = vmatprep.subr.bf16.mxu0 %v1906_v1  ;;  %v1908_v3 = vld [vmem:[#allocation7 + $0x8] sm:$0xff]   ;;  %v1909_v4 = vld [vmem:[#allocation5] sm:$0xff]   ;;  %s2120_s4 = smov [#allocation11]  }
  0x5c   :  { %1696 = vmatpush3.bf16.msra.mxu1 %v1905_v0  ;;  %1764 = vmatpush3.bf16.msra.mxu0 %v1906_v1  ;;  %v1910_v5 = vld [vmem:[#allocation2] sm:$0xff]   ;;  %v1911_v6 = vld [vmem:[#allocation5 + $0x8] sm:$0xff]   ;;  %v1913_v8 = vld [vmem:[#allocation5 + $0x10] sm:$0xff]   ;;  %s1480_s22 = sshll.u32 %s2120_s4, 4  ;;  %s1481_s22 = int_to_ptr.vmem [resolvable:$true] %s1480_s22 }
  0x5d   :  { %1697 = vmatprep.subr.bf16.mxu1 %v1907_v2  ;;  %1765 = vmatprep.subr.bf16.mxu0 %v1908_v3  ;;  %v1912_v7 = vld [vmem:[#allocation2 + $0x8] sm:$0xff]   ;;  %v1914_v9 = vld [vmem:[#allocation2 + $0x10] sm:$0xff]   ;;  %v1915_v10 = vld [vmem:[#allocation5 + $0x18] sm:$0xff]   ;;  %s2083_s28 = scalar_lea.vmem %s1481_s22, 8192  ;;  %p2088_p13 = scmp.lt.s32.totalorder %s1481_s22, %s1481_s22 }
  0x5e   :  { %1699 = vmatprep.mubr.msk.bf16.mxu1 %vm396_vm0, %v1909_v4  ;;  %1767 = vmatprep.mubr.msk.bf16.mxu0 %vm396_vm0, %v1910_v5  ;;  %v1916_v11 = vld [vmem:[#allocation2 + $0x18] sm:$0xff]   ;;  %v1917_v12 = vld [vmem:[#allocation5 + $0x20] sm:$0xff]   ;;  %v1919_v14 = vld [vmem:[#allocation5 + $0x28] sm:$0xff]   ;;  %p2084_p12 = scmp.ne.s32.totalorder %s1481_s22, %s2083_s28  ;;  %p2089_p0 = scmp.lt.s32.totalorder %s2083_s28, %s2083_s28 }
  0x5f   :  { %v1918_v13 = vld [vmem:[#allocation2 + $0x20] sm:$0xff]   ;;  %v1920_v15 = vld [vmem:[#allocation2 + $0x28] sm:$0xff]   ;;  %v1921_v16 = vld [vmem:[#allocation5 + $0x30] sm:$0xff]  }
  0x60   :  { %1698 = vmatpush3.bf16.msra.mxu1 %v1907_v2  ;;  %1766 = vmatpush3.bf16.msra.mxu0 %v1908_v3  ;;  %v1922_v17 = vld [vmem:[#allocation2 + $0x30] sm:$0xff]   ;;  %v1923_v18 = vld [vmem:[#allocation5 + $0x38] sm:$0xff]   ;;  %v1925_v20 = vld [vmem:[#allocation5 + $0x40] sm:$0xff]   ;;  %p2090_p1 = por %p2089_p0, %p2088_p13 }
  0x61   :  { %v1924_v19 = vld [vmem:[#allocation2 + $0x38] sm:$0xff]   ;;  %v1926_v21 = vld [vmem:[#allocation2 + $0x40] sm:$0xff]   ;;  %v1927_v22 = vld [vmem:[#allocation5 + $0x48] sm:$0xff]  }
  0x62   :  { %v1928_v23 = vld [vmem:[#allocation2 + $0x48] sm:$0xff]   ;;  %v1929_v24 = vld [vmem:[#allocation5 + $0x50] sm:$0xff]   ;;  %v1931_v26 = vld [vmem:[#allocation5 + $0x58] sm:$0xff]   ;;  %p2091_p2 = pnand %p2090_p1, %p2084_p12 }
  0x63   :  { %1700 = vmatmul.mubr.msk.bf16.vlgmr.msra.gmra.mrb[0].mxu1 %vm396_vm0, %v1911_v6  ;;  %1768 = vmatmul.mubr.msk.bf16.vlgmr.msra.gmra.mrb[0].mxu0 %vm396_vm0, %v1912_v7  ;;  %v1930_v25 = vld [vmem:[#allocation2 + $0x50] sm:$0xff]   ;;  %v1932_v27 = vld [vmem:[#allocation2 + $0x58] sm:$0xff]   ;;  %v1933_v28 = vld [vmem:[#allocation5 + $0x60] sm:$0xff]  }
  0x64   :  { %1703 = vmatprep.mubr.msk.bf16.mxu1 %vm396_vm0, %v1913_v8  ;;  %1771 = vmatprep.mubr.msk.bf16.mxu0 %vm396_vm0, %v1914_v9  ;;  %v1934_v29 = vld [vmem:[#allocation2 + $0x60] sm:$0xff]   ;;  %v1935_v30 = vld [vmem:[#allocation5 + $0x68] sm:$0xff]   ;;  %v1937_v32 = vld [vmem:[#allocation5 + $0x70] sm:$0xff]  }
  0x65   :  { %v1936_v31 = vld [vmem:[#allocation2 + $0x68] sm:$0xff]   ;;  %v1938_v33 = vld [vmem:[#allocation2 + $0x70] sm:$0xff]   ;;  %v1939_v34 = vld [vmem:[#allocation5 + $0x78] sm:$0xff]  }
  0x66   :  { %v1940_v35 = vld [vmem:[#allocation2 + $0x78] sm:$0xff]   ;;  %v1941_v36 = vld [vmem:[#allocation5 + $0x80] sm:$0xff]   ;;  %v1943_v38 = vld [vmem:[#allocation5 + $0x88] sm:$0xff]  }
  0x67   :  { %v1942_v37 = vld [vmem:[#allocation2 + $0x80] sm:$0xff]   ;;  %v1944_v39 = vld [vmem:[#allocation2 + $0x88] sm:$0xff]   ;;  %v1945_v40 = vld [vmem:[#allocation5 + $0x90] sm:$0xff]  }
  0x68   :  { %v1946_v41 = vld [vmem:[#allocation2 + $0x90] sm:$0xff]   ;;  %v1947_v42 = vld [vmem:[#allocation5 + $0x98] sm:$0xff]   ;;  %v1949_v44 = vld [vmem:[#allocation5 + $0xa0] sm:$0xff]  }
  0x69   :  { %v1948_v43 = vld [vmem:[#allocation2 + $0x98] sm:$0xff]   ;;  %v1950_v45 = vld [vmem:[#allocation2 + $0xa0] sm:$0xff]   ;;  %v1951_v46 = vld [vmem:[#allocation5 + $0xa8] sm:$0xff]  }
  0x6a   :  { %v1952_v47 = vld [vmem:[#allocation2 + $0xa8] sm:$0xff]   ;;  %v1953_v48 = vld [vmem:[#allocation5 + $0xb0] sm:$0xff]   ;;  %v1955_v50 = vld [vmem:[#allocation5 + $0xb8] sm:$0xff]  }
  0x6b   :  { %1704 = vmatmul.mubr.msk.bf16.gmra.mrb[4].mxu1 %vm396_vm0, %v1915_v10  ;;  %1772 = vmatmul.mubr.msk.bf16.gmra.mrb[4].mxu0 %vm396_vm0, %v1916_v11  ;;  %v1954_v49 = vld [vmem:[#allocation2 + $0xb0] sm:$0xff]   ;;  %v1956_v51 = vld [vmem:[#allocation2 + $0xb8] sm:$0xff]   ;;  %v1957_v52 = vld [vmem:[#allocation5 + $0xc0] sm:$0xff]  }
  0x6c   :  { %1707 = vmatprep.mubr.msk.bf16.mxu1 %vm396_vm0, %v1917_v12  ;;  %1775 = vmatprep.mubr.msk.bf16.mxu0 %vm396_vm0, %v1918_v13  ;;  %v1958_v53 = vld [vmem:[#allocation2 + $0xc0] sm:$0xff]   ;;  %v1959_v54 = vld [vmem:[#allocation5 + $0xc8] sm:$0xff]   ;;  %v1961_v56 = vld [vmem:[#allocation5 + $0xd0] sm:$0xff]  }
  0x6d   :  { %v1960_v55 = vld [vmem:[#allocation2 + $0xc8] sm:$0xff]   ;;  %v1962_v57 = vld [vmem:[#allocation2 + $0xd0] sm:$0xff]   ;;  %v1963_v58 = vld [vmem:[#allocation5 + $0xd8] sm:$0xff]  }
  0x6e   :  { %v1964_v59 = vld [vmem:[#allocation2 + $0xd8] sm:$0xff]   ;;  %v1965_v60 = vld [vmem:[#allocation5 + $0xe0] sm:$0xff]   ;;  %v1967_v62 = vld [vmem:[#allocation5 + $0xe8] sm:$0xff]  }
  0x6f   :  { %v1966_v61 = vld [vmem:[#allocation2 + $0xe0] sm:$0xff]   ;;  %v1968_v63 = vld [vmem:[#allocation2 + $0xe8] sm:$0xff]   ;;  %v1969_v0 = vld [vmem:[#allocation5 + $0xf0] sm:$0xff]  }
  0x70   :  { %v1970_v1 = vld [vmem:[#allocation2 + $0xf0] sm:$0xff]   ;;  %v1971_v2 = vld [vmem:[#allocation5 + $0xf8] sm:$0xff]   ;;  %v2303_v6 = vld [vmem:[#allocation10] ss:$0 sm:$0xff] }
  0x71   :  { %v1972_v3 = vld [vmem:[#allocation2 + $0xf8] sm:$0xff]  }
  0x73   :  { %1708 = vmatmul.mubr.msk.bf16.gmra.mrb[8].mxu1 %vm396_vm0, %v1919_v14  ;;  %1776 = vmatmul.mubr.msk.bf16.gmra.mrb[8].mxu0 %vm396_vm0, %v1920_v15 }
  0x74   :  { %1711 = vmatprep.mubr.msk.bf16.mxu1 %vm396_vm0, %v1921_v16  ;;  %1779 = vmatprep.mubr.msk.bf16.mxu0 %vm396_vm0, %v1922_v17 }
  0x7b   :  { %1712 = vmatmul.mubr.msk.bf16.gmra.mrb[12].mxu1 %vm396_vm0, %v1923_v18  ;;  %1780 = vmatmul.mubr.msk.bf16.gmra.mrb[12].mxu0 %vm396_vm0, %v1924_v19 }
  0x7c   :  { %1715 = vmatprep.mubr.msk.bf16.mxu1 %vm396_vm0, %v1925_v20  ;;  %1783 = vmatprep.mubr.msk.bf16.mxu0 %vm396_vm0, %v1926_v21 }
  0x83   :  { %1716 = vmatmul.mubr.msk.bf16.gmra.mrb[16].mxu1 %vm396_vm0, %v1927_v22  ;;  %1784 = vmatmul.mubr.msk.bf16.gmra.mrb[16].mxu0 %vm396_vm0, %v1928_v23 }
  0x84   :  { %1719 = vmatprep.mubr.msk.bf16.mxu1 %vm396_vm0, %v1929_v24  ;;  %1787 = vmatprep.mubr.msk.bf16.mxu0 %vm396_vm0, %v1930_v25 }
  0x8b   :  { %1720 = vmatmul.mubr.msk.bf16.gmra.mrb[20].mxu1 %vm396_vm0, %v1931_v26  ;;  %1788 = vmatmul.mubr.msk.bf16.gmra.mrb[20].mxu0 %vm396_vm0, %v1932_v27 }
  0x8c   :  { %1723 = vmatprep.mubr.msk.bf16.mxu1 %vm396_vm0, %v1933_v28  ;;  %1791 = vmatprep.mubr.msk.bf16.mxu0 %vm396_vm0, %v1934_v29 }
  0x93   :  { %1724 = vmatmul.mubr.msk.bf16.gmra.mrb[24].mxu1 %vm396_vm0, %v1935_v30  ;;  %1792 = vmatmul.mubr.msk.bf16.gmra.mrb[24].mxu0 %vm396_vm0, %v1936_v31 }
  0x94   :  { %1727 = vmatprep.mubr.msk.bf16.mxu1 %vm396_vm0, %v1937_v32  ;;  %1795 = vmatprep.mubr.msk.bf16.mxu0 %vm396_vm0, %v1938_v33 }
  0x9b   :  { %1728 = vmatmul.mubr.msk.bf16.gmra.mrb[28].mxu1 %vm396_vm0, %v1939_v34  ;;  %1796 = vmatmul.mubr.msk.bf16.gmra.mrb[28].mxu0 %vm396_vm0, %v1940_v35 }
  0x9c   :  { %1731 = vmatprep.mubr.msk.bf16.mxu1 %vm396_vm0, %v1941_v36  ;;  %1799 = vmatprep.mubr.msk.bf16.mxu0 %vm396_vm0, %v1942_v37 }
  0xa3   :  { %1732 = vmatmul.mubr.msk.bf16.gmra.mrb[32].mxu1 %vm396_vm0, %v1943_v38  ;;  %1800 = vmatmul.mubr.msk.bf16.gmra.mrb[32].mxu0 %vm396_vm0, %v1944_v39 }
  0xa4   :  { %1735 = vmatprep.mubr.msk.bf16.mxu1 %vm396_vm0, %v1945_v40  ;;  %1803 = vmatprep.mubr.msk.bf16.mxu0 %vm396_vm0, %v1946_v41 }
  0xab   :  { %1736 = vmatmul.mubr.msk.bf16.gmra.mrb[36].mxu1 %vm396_vm0, %v1947_v42  ;;  %1804 = vmatmul.mubr.msk.bf16.gmra.mrb[36].mxu0 %vm396_vm0, %v1948_v43 }
  0xac   :  { %1739 = vmatprep.mubr.msk.bf16.mxu1 %vm396_vm0, %v1949_v44  ;;  %1807 = vmatprep.mubr.msk.bf16.mxu0 %vm396_vm0, %v1950_v45 }
  0xb3   :  { %1740 = vmatmul.mubr.msk.bf16.gmra.mrb[40].mxu1 %vm396_vm0, %v1951_v46  ;;  %1808 = vmatmul.mubr.msk.bf16.gmra.mrb[40].mxu0 %vm396_vm0, %v1952_v47 }
  0xb4   :  { %1743 = vmatprep.mubr.msk.bf16.mxu1 %vm396_vm0, %v1953_v48  ;;  %1811 = vmatprep.mubr.msk.bf16.mxu0 %vm396_vm0, %v1954_v49 }
  0xbb   :  { %1744 = vmatmul.mubr.msk.bf16.gmra.mrb[44].mxu1 %vm396_vm0, %v1955_v50  ;;  %1812 = vmatmul.mubr.msk.bf16.gmra.mrb[44].mxu0 %vm396_vm0, %v1956_v51 }
  0xbc   :  { %1747 = vmatprep.mubr.msk.bf16.mxu1 %vm396_vm0, %v1957_v52  ;;  %1815 = vmatprep.mubr.msk.bf16.mxu0 %vm396_vm0, %v1958_v53 }
  0xc3   :  { %1748 = vmatmul.mubr.msk.bf16.gmra.mrb[48].mxu1 %vm396_vm0, %v1959_v54  ;;  %1816 = vmatmul.mubr.msk.bf16.gmra.mrb[48].mxu0 %vm396_vm0, %v1960_v55 }
  0xc4   :  { %1751 = vmatprep.mubr.msk.bf16.mxu1 %vm396_vm0, %v1961_v56  ;;  %1819 = vmatprep.mubr.msk.bf16.mxu0 %vm396_vm0, %v1962_v57 }
  0xcb   :  { %1752 = vmatmul.mubr.msk.bf16.gmra.mrb[52].mxu1 %vm396_vm0, %v1963_v58  ;;  %1820 = vmatmul.mubr.msk.bf16.gmra.mrb[52].mxu0 %vm396_vm0, %v1964_v59 }
  0xcc   :  { %1755 = vmatprep.mubr.msk.bf16.mxu1 %vm396_vm0, %v1965_v60  ;;  %1823 = vmatprep.mubr.msk.bf16.mxu0 %vm396_vm0, %v1966_v61 }
  0xd3   :  { %1756 = vmatmul.mubr.msk.bf16.gmra.mrb[56].mxu1 %vm396_vm0, %v1967_v62  ;;  %1824 = vmatmul.mubr.msk.bf16.gmra.mrb[56].mxu0 %vm396_vm0, %v1968_v63 }
  0xd4   :  { %1759 = vmatprep.mubr.msk.bf16.mxu1 %vm396_vm0, %v1969_v0  ;;  %1827 = vmatprep.mubr.msk.bf16.mxu0 %vm396_vm0, %v1970_v1 }
  0xdb   :  { %1760 = vmatmul.mubr.msk.bf16.gmra.mrb[60].mxu1 %vm396_vm0, %v1971_v2  ;;  %1828 = vmatmul.mubr.msk.bf16.gmra.mrb[60].mxu0 %vm396_vm0, %v1972_v3 }
 0x136   :  { %v1701_v4 = vpop.f32.mrb[0].mxu1  ;;  %v1769_v5 = vpop.f32.mrb[0].mxu0 }
 0x137   :  { %v527_v7 = vpop.f32.mrb[1].mxu1  ;;  %v1093_v8 = vadd.f32 %v1769_v5, %v1701_v4  ;;  %v1084_v9 = vpop.f32.mrb[1].mxu0 }
 0x138   :  { %v1702_v10 = vpop.f32.mrb[2].mxu1  ;;  %v1085_v11 = vadd.f32 %v1084_v9, %v527_v7  ;;  %v1770_v12 = vpop.f32.mrb[2].mxu0 }
 0x139   :  { %v530_v13 = vpop.f32.mrb[3].mxu1  ;;  %v1348_v14 = vadd.f32 %v2303_v6, %v1093_v8  ;;  %v1096_v15 = vadd.f32 %v1770_v12, %v1702_v10  ;;  %v1087_v16 = vpop.f32.mrb[3].mxu0 }
 0x13a   :  { %v1346_v17 = vadd.f32 %v2303_v6, %v1085_v11  ;;  %v1088_v18 = vadd.f32 %v1087_v16, %v530_v13 }
 0x13b   :  { %1413 = vst.msk [vmem:[#allocation11 + $0x10] sm:$0xff] %vm1410_vm1, %v1348_v14  ;;  %v1349_v19 = vadd.f32 %v2303_v6, %v1096_v15 }
 0x13c   :  { %1411 = vst.msk [vmem:[#allocation11] sm:$0xff] %vm1410_vm1, %v1346_v17  ;;  %v1347_v20 = vadd.f32 %v2303_v6, %v1088_v18 }
 0x13d   :  { %1414 = vst.msk [vmem:[#allocation11 + $0x18] sm:$0xff] %vm1410_vm1, %v1349_v19 }
 0x13e   :  { %v1705_v21 = vpop.f32.mrb[4].mxu1  ;;  %1412 = vst.msk [vmem:[#allocation11 + $0x8] sm:$0xff] %vm1410_vm1, %v1347_v20  ;;  %v1773_v22 = vpop.f32.mrb[4].mxu0 }
 0x13f   :  { %v543_v23 = vpop.f32.mrb[5].mxu1  ;;  %v1109_v24 = vadd.f32 %v1773_v22, %v1705_v21  ;;  %v1100_v25 = vpop.f32.mrb[5].mxu0 }
 0x140   :  { %v1706_v26 = vpop.f32.mrb[6].mxu1  ;;  %v1101_v27 = vadd.f32 %v1100_v25, %v543_v23  ;;  %v1774_v28 = vpop.f32.mrb[6].mxu0 }
 0x141   :  { %v546_v29 = vpop.f32.mrb[7].mxu1  ;;  %v1352_v30 = vadd.f32 %v2303_v6, %v1109_v24  ;;  %v1112_v31 = vadd.f32 %v1774_v28, %v1706_v26  ;;  %v1103_v32 = vpop.f32.mrb[7].mxu0 }
 0x142   :  { %v1350_v33 = vadd.f32 %v2303_v6, %v1101_v27  ;;  %v1104_v34 = vadd.f32 %v1103_v32, %v546_v29 }
 0x143   :  { %1417 = vst.msk [vmem:[#allocation11 + $0x30] sm:$0xff] %vm1410_vm1, %v1352_v30  ;;  %v1353_v35 = vadd.f32 %v2303_v6, %v1112_v31 }
 0x144   :  { %1415 = vst.msk [vmem:[#allocation11 + $0x20] sm:$0xff] %vm1410_vm1, %v1350_v33  ;;  %v1351_v36 = vadd.f32 %v2303_v6, %v1104_v34 }
 0x145   :  { %1418 = vst.msk [vmem:[#allocation11 + $0x38] sm:$0xff] %vm1410_vm1, %v1353_v35 }
 0x146   :  { %v1709_v37 = vpop.f32.mrb[8].mxu1  ;;  %1416 = vst.msk [vmem:[#allocation11 + $0x28] sm:$0xff] %vm1410_vm1, %v1351_v36  ;;  %v1777_v38 = vpop.f32.mrb[8].mxu0 }
 0x147   :  { %v559_v39 = vpop.f32.mrb[9].mxu1  ;;  %v1125_v40 = vadd.f32 %v1777_v38, %v1709_v37  ;;  %v1116_v41 = vpop.f32.mrb[9].mxu0 }
 0x148   :  { %v1710_v42 = vpop.f32.mrb[10].mxu1  ;;  %v1117_v43 = vadd.f32 %v1116_v41, %v559_v39  ;;  %v1778_v44 = vpop.f32.mrb[10].mxu0 }
 0x149   :  { %v562_v45 = vpop.f32.mrb[11].mxu1  ;;  %v1356_v46 = vadd.f32 %v2303_v6, %v1125_v40  ;;  %v1128_v47 = vadd.f32 %v1778_v44, %v1710_v42  ;;  %v1119_v48 = vpop.f32.mrb[11].mxu0 }
 0x14a   :  { %v1354_v49 = vadd.f32 %v2303_v6, %v1117_v43  ;;  %v1120_v50 = vadd.f32 %v1119_v48, %v562_v45 }
 0x14b   :  { %1421 = vst.msk [vmem:[#allocation11 + $0x50] sm:$0xff] %vm1410_vm1, %v1356_v46  ;;  %v1357_v51 = vadd.f32 %v2303_v6, %v1128_v47 }
 0x14c   :  { %1419 = vst.msk [vmem:[#allocation11 + $0x40] sm:$0xff] %vm1410_vm1, %v1354_v49  ;;  %v1355_v52 = vadd.f32 %v2303_v6, %v1120_v50 }
 0x14d   :  { %1422 = vst.msk [vmem:[#allocation11 + $0x58] sm:$0xff] %vm1410_vm1, %v1357_v51 }
 0x14e   :  { %v1713_v53 = vpop.f32.mrb[12].mxu1  ;;  %1420 = vst.msk [vmem:[#allocation11 + $0x48] sm:$0xff] %vm1410_vm1, %v1355_v52  ;;  %v1781_v54 = vpop.f32.mrb[12].mxu0 }
 0x14f   :  { %v575_v55 = vpop.f32.mrb[13].mxu1  ;;  %v1141_v56 = vadd.f32 %v1781_v54, %v1713_v53  ;;  %v1132_v57 = vpop.f32.mrb[13].mxu0 }
 0x150   :  { %v1714_v58 = vpop.f32.mrb[14].mxu1  ;;  %v1133_v59 = vadd.f32 %v1132_v57, %v575_v55  ;;  %v1782_v60 = vpop.f32.mrb[14].mxu0 }
 0x151   :  { %v578_v61 = vpop.f32.mrb[15].mxu1  ;;  %v1360_v62 = vadd.f32 %v2303_v6, %v1141_v56  ;;  %v1144_v63 = vadd.f32 %v1782_v60, %v1714_v58  ;;  %v1135_v0 = vpop.f32.mrb[15].mxu0 }
 0x152   :  { %v1358_v1 = vadd.f32 %v2303_v6, %v1133_v59  ;;  %v1136_v2 = vadd.f32 %v1135_v0, %v578_v61 }
 0x153   :  { %1425 = vst.msk [vmem:[#allocation11 + $0x70] sm:$0xff] %vm1410_vm1, %v1360_v62  ;;  %v1361_v3 = vadd.f32 %v2303_v6, %v1144_v63 }
 0x154   :  { %1423 = vst.msk [vmem:[#allocation11 + $0x60] sm:$0xff] %vm1410_vm1, %v1358_v1  ;;  %v1359_v4 = vadd.f32 %v2303_v6, %v1136_v2 }
 0x155   :  { %1426 = vst.msk [vmem:[#allocation11 + $0x78] sm:$0xff] %vm1410_vm1, %v1361_v3 }
 0x156   :  { %v1717_v5 = vpop.f32.mrb[16].mxu1  ;;  %1424 = vst.msk [vmem:[#allocation11 + $0x68] sm:$0xff] %vm1410_vm1, %v1359_v4  ;;  %v1785_v7 = vpop.f32.mrb[16].mxu0 }
 0x157   :  { %v591_v8 = vpop.f32.mrb[17].mxu1  ;;  %v1157_v9 = vadd.f32 %v1785_v7, %v1717_v5  ;;  %v1148_v10 = vpop.f32.mrb[17].mxu0 }
 0x158   :  { %v1718_v11 = vpop.f32.mrb[18].mxu1  ;;  %v1149_v12 = vadd.f32 %v1148_v10, %v591_v8  ;;  %v1786_v13 = vpop.f32.mrb[18].mxu0 }
 0x159   :  { %v594_v14 = vpop.f32.mrb[19].mxu1  ;;  %v1364_v15 = vadd.f32 %v2303_v6, %v1157_v9  ;;  %v1160_v16 = vadd.f32 %v1786_v13, %v1718_v11  ;;  %v1151_v17 = vpop.f32.mrb[19].mxu0 }
 0x15a   :  { %v1362_v18 = vadd.f32 %v2303_v6, %v1149_v12  ;;  %v1152_v19 = vadd.f32 %v1151_v17, %v594_v14 }
 0x15b   :  { %1429 = vst.msk [vmem:[#allocation11 + $0x90] sm:$0xff] %vm1410_vm1, %v1364_v15  ;;  %v1365_v20 = vadd.f32 %v2303_v6, %v1160_v16 }
 0x15c   :  { %1427 = vst.msk [vmem:[#allocation11 + $0x80] sm:$0xff] %vm1410_vm1, %v1362_v18  ;;  %v1363_v21 = vadd.f32 %v2303_v6, %v1152_v19 }
 0x15d   :  { %1430 = vst.msk [vmem:[#allocation11 + $0x98] sm:$0xff] %vm1410_vm1, %v1365_v20 }
 0x15e   :  { %v1721_v22 = vpop.f32.mrb[20].mxu1  ;;  %1428 = vst.msk [vmem:[#allocation11 + $0x88] sm:$0xff] %vm1410_vm1, %v1363_v21  ;;  %v1789_v23 = vpop.f32.mrb[20].mxu0 }
 0x15f   :  { %v607_v24 = vpop.f32.mrb[21].mxu1  ;;  %v1173_v25 = vadd.f32 %v1789_v23, %v1721_v22  ;;  %v1164_v26 = vpop.f32.mrb[21].mxu0 }
 0x160   :  { %v1722_v27 = vpop.f32.mrb[22].mxu1  ;;  %v1165_v28 = vadd.f32 %v1164_v26, %v607_v24  ;;  %v1790_v29 = vpop.f32.mrb[22].mxu0 }
 0x161   :  { %v610_v30 = vpop.f32.mrb[23].mxu1  ;;  %v1368_v31 = vadd.f32 %v2303_v6, %v1173_v25  ;;  %v1176_v32 = vadd.f32 %v1790_v29, %v1722_v27  ;;  %v1167_v33 = vpop.f32.mrb[23].mxu0 }
 0x162   :  { %v1366_v34 = vadd.f32 %v2303_v6, %v1165_v28  ;;  %v1168_v35 = vadd.f32 %v1167_v33, %v610_v30 }
 0x163   :  { %1433 = vst.msk [vmem:[#allocation11 + $0xb0] sm:$0xff] %vm1410_vm1, %v1368_v31  ;;  %v1369_v36 = vadd.f32 %v2303_v6, %v1176_v32 }
 0x164   :  { %1431 = vst.msk [vmem:[#allocation11 + $0xa0] sm:$0xff] %vm1410_vm1, %v1366_v34  ;;  %v1367_v37 = vadd.f32 %v2303_v6, %v1168_v35 }
 0x165   :  { %1434 = vst.msk [vmem:[#allocation11 + $0xb8] sm:$0xff] %vm1410_vm1, %v1369_v36 }
 0x166   :  { %v1725_v38 = vpop.f32.mrb[24].mxu1  ;;  %1432 = vst.msk [vmem:[#allocation11 + $0xa8] sm:$0xff] %vm1410_vm1, %v1367_v37  ;;  %v1793_v39 = vpop.f32.mrb[24].mxu0 }
 0x167   :  { %v623_v40 = vpop.f32.mrb[25].mxu1  ;;  %v1189_v41 = vadd.f32 %v1793_v39, %v1725_v38  ;;  %v1180_v42 = vpop.f32.mrb[25].mxu0 }
 0x168   :  { %v1726_v43 = vpop.f32.mrb[26].mxu1  ;;  %v1181_v44 = vadd.f32 %v1180_v42, %v623_v40  ;;  %v1794_v45 = vpop.f32.mrb[26].mxu0 }
 0x169   :  { %v626_v46 = vpop.f32.mrb[27].mxu1  ;;  %v1372_v47 = vadd.f32 %v2303_v6, %v1189_v41  ;;  %v1192_v48 = vadd.f32 %v1794_v45, %v1726_v43  ;;  %v1183_v49 = vpop.f32.mrb[27].mxu0 }
 0x16a   :  { %v1370_v50 = vadd.f32 %v2303_v6, %v1181_v44  ;;  %v1184_v51 = vadd.f32 %v1183_v49, %v626_v46 }
 0x16b   :  { %1437 = vst.msk [vmem:[#allocation11 + $0xd0] sm:$0xff] %vm1410_vm1, %v1372_v47  ;;  %v1373_v52 = vadd.f32 %v2303_v6, %v1192_v48 }
 0x16c   :  { %1435 = vst.msk [vmem:[#allocation11 + $0xc0] sm:$0xff] %vm1410_vm1, %v1370_v50  ;;  %v1371_v53 = vadd.f32 %v2303_v6, %v1184_v51 }
 0x16d   :  { %1438 = vst.msk [vmem:[#allocation11 + $0xd8] sm:$0xff] %vm1410_vm1, %v1373_v52 }
 0x16e   :  { %v1729_v54 = vpop.f32.mrb[28].mxu1  ;;  %1436 = vst.msk [vmem:[#allocation11 + $0xc8] sm:$0xff] %vm1410_vm1, %v1371_v53  ;;  %v1797_v55 = vpop.f32.mrb[28].mxu0 }
 0x16f   :  { %v639_v56 = vpop.f32.mrb[29].mxu1  ;;  %v1205_v57 = vadd.f32 %v1797_v55, %v1729_v54  ;;  %v1196_v58 = vpop.f32.mrb[29].mxu0 }
 0x170   :  { %v1730_v59 = vpop.f32.mrb[30].mxu1  ;;  %v1197_v60 = vadd.f32 %v1196_v58, %v639_v56  ;;  %v1798_v61 = vpop.f32.mrb[30].mxu0 }
 0x171   :  { %v642_v62 = vpop.f32.mrb[31].mxu1  ;;  %v1376_v63 = vadd.f32 %v2303_v6, %v1205_v57  ;;  %v1208_v0 = vadd.f32 %v1798_v61, %v1730_v59  ;;  %v1199_v1 = vpop.f32.mrb[31].mxu0 }
 0x172   :  { %v1374_v2 = vadd.f32 %v2303_v6, %v1197_v60  ;;  %v1200_v3 = vadd.f32 %v1199_v1, %v642_v62 }
 0x173   :  { %1441 = vst.msk [vmem:[#allocation11 + $0xf0] sm:$0xff] %vm1410_vm1, %v1376_v63  ;;  %v1377_v4 = vadd.f32 %v2303_v6, %v1208_v0 }
 0x174   :  { %1439 = vst.msk [vmem:[#allocation11 + $0xe0] sm:$0xff] %vm1410_vm1, %v1374_v2  ;;  %v1375_v5 = vadd.f32 %v2303_v6, %v1200_v3 }
 0x175   :  { %1442 = vst.msk [vmem:[#allocation11 + $0xf8] sm:$0xff] %vm1410_vm1, %v1377_v4 }
 0x176   :  { %v1733_v7 = vpop.f32.mrb[32].mxu1  ;;  %1440 = vst.msk [vmem:[#allocation11 + $0xe8] sm:$0xff] %vm1410_vm1, %v1375_v5  ;;  %v1801_v8 = vpop.f32.mrb[32].mxu0 }
 0x177   :  { %v655_v9 = vpop.f32.mrb[33].mxu1  ;;  %v1221_v10 = vadd.f32 %v1801_v8, %v1733_v7  ;;  %v1212_v11 = vpop.f32.mrb[33].mxu0 }
 0x178   :  { %v1734_v12 = vpop.f32.mrb[34].mxu1  ;;  %v1213_v13 = vadd.f32 %v1212_v11, %v655_v9  ;;  %v1802_v14 = vpop.f32.mrb[34].mxu0 }
 0x179   :  { %v658_v15 = vpop.f32.mrb[35].mxu1  ;;  %v1380_v16 = vadd.f32 %v2303_v6, %v1221_v10  ;;  %v1224_v17 = vadd.f32 %v1802_v14, %v1734_v12  ;;  %v1215_v18 = vpop.f32.mrb[35].mxu0 }
 0x17a   :  { %v1378_v19 = vadd.f32 %v2303_v6, %v1213_v13  ;;  %v1216_v20 = vadd.f32 %v1215_v18, %v658_v15 }
 0x17b   :  { %1445 = vst.msk [vmem:[#allocation11 + $0x110] sm:$0xff] %vm1410_vm1, %v1380_v16  ;;  %v1381_v21 = vadd.f32 %v2303_v6, %v1224_v17 }
 0x17c   :  { %1443 = vst.msk [vmem:[#allocation11 + $0x100] sm:$0xff] %vm1410_vm1, %v1378_v19  ;;  %v1379_v22 = vadd.f32 %v2303_v6, %v1216_v20 }
 0x17d   :  { %1446 = vst.msk [vmem:[#allocation11 + $0x118] sm:$0xff] %vm1410_vm1, %v1381_v21 }
 0x17e   :  { %v1737_v23 = vpop.f32.mrb[36].mxu1  ;;  %1444 = vst.msk [vmem:[#allocation11 + $0x108] sm:$0xff] %vm1410_vm1, %v1379_v22  ;;  %v1805_v24 = vpop.f32.mrb[36].mxu0 }
 0x17f   :  { %v671_v25 = vpop.f32.mrb[37].mxu1  ;;  %v1237_v26 = vadd.f32 %v1805_v24, %v1737_v23  ;;  %v1228_v27 = vpop.f32.mrb[37].mxu0 }
 0x180   :  { %v1738_v28 = vpop.f32.mrb[38].mxu1  ;;  %v1229_v29 = vadd.f32 %v1228_v27, %v671_v25  ;;  %v1806_v30 = vpop.f32.mrb[38].mxu0 }
 0x181   :  { %v674_v31 = vpop.f32.mrb[39].mxu1  ;;  %v1384_v32 = vadd.f32 %v2303_v6, %v1237_v26  ;;  %v1240_v33 = vadd.f32 %v1806_v30, %v1738_v28  ;;  %v1231_v34 = vpop.f32.mrb[39].mxu0 }
 0x182   :  { %v1382_v35 = vadd.f32 %v2303_v6, %v1229_v29  ;;  %v1232_v36 = vadd.f32 %v1231_v34, %v674_v31 }
 0x183   :  { %1449 = vst.msk [vmem:[#allocation11 + $0x130] sm:$0xff] %vm1410_vm1, %v1384_v32  ;;  %v1385_v37 = vadd.f32 %v2303_v6, %v1240_v33 }
 0x184   :  { %1447 = vst.msk [vmem:[#allocation11 + $0x120] sm:$0xff] %vm1410_vm1, %v1382_v35  ;;  %v1383_v38 = vadd.f32 %v2303_v6, %v1232_v36 }
 0x185   :  { %1450 = vst.msk [vmem:[#allocation11 + $0x138] sm:$0xff] %vm1410_vm1, %v1385_v37 }
 0x186   :  { %v1741_v39 = vpop.f32.mrb[40].mxu1  ;;  %1448 = vst.msk [vmem:[#allocation11 + $0x128] sm:$0xff] %vm1410_vm1, %v1383_v38  ;;  %v1809_v40 = vpop.f32.mrb[40].mxu0 }
 0x187   :  { %v687_v41 = vpop.f32.mrb[41].mxu1  ;;  %v1253_v42 = vadd.f32 %v1809_v40, %v1741_v39  ;;  %v1244_v43 = vpop.f32.mrb[41].mxu0 }
 0x188   :  { %v1742_v44 = vpop.f32.mrb[42].mxu1  ;;  %v1245_v45 = vadd.f32 %v1244_v43, %v687_v41  ;;  %v1810_v46 = vpop.f32.mrb[42].mxu0 }
 0x189   :  { %v690_v47 = vpop.f32.mrb[43].mxu1  ;;  %v1388_v48 = vadd.f32 %v2303_v6, %v1253_v42  ;;  %v1256_v49 = vadd.f32 %v1810_v46, %v1742_v44  ;;  %v1247_v50 = vpop.f32.mrb[43].mxu0 }
 0x18a   :  { %v1386_v51 = vadd.f32 %v2303_v6, %v1245_v45  ;;  %v1248_v52 = vadd.f32 %v1247_v50, %v690_v47 }
 0x18b   :  { %1453 = vst.msk [vmem:[#allocation11 + $0x150] sm:$0xff] %vm1410_vm1, %v1388_v48  ;;  %v1389_v53 = vadd.f32 %v2303_v6, %v1256_v49 }
 0x18c   :  { %1451 = vst.msk [vmem:[#allocation11 + $0x140] sm:$0xff] %vm1410_vm1, %v1386_v51  ;;  %v1387_v54 = vadd.f32 %v2303_v6, %v1248_v52 }
 0x18d   :  { %1454 = vst.msk [vmem:[#allocation11 + $0x158] sm:$0xff] %vm1410_vm1, %v1389_v53 }
 0x18e   :  { %v1745_v55 = vpop.f32.mrb[44].mxu1  ;;  %1452 = vst.msk [vmem:[#allocation11 + $0x148] sm:$0xff] %vm1410_vm1, %v1387_v54  ;;  %v1813_v56 = vpop.f32.mrb[44].mxu0 }
 0x18f   :  { %v703_v57 = vpop.f32.mrb[45].mxu1  ;;  %v1269_v58 = vadd.f32 %v1813_v56, %v1745_v55  ;;  %v1260_v59 = vpop.f32.mrb[45].mxu0 }
 0x190   :  { %v1746_v60 = vpop.f32.mrb[46].mxu1  ;;  %v1261_v61 = vadd.f32 %v1260_v59, %v703_v57  ;;  %v1814_v62 = vpop.f32.mrb[46].mxu0 }
 0x191   :  { %v706_v63 = vpop.f32.mrb[47].mxu1  ;;  %v1392_v0 = vadd.f32 %v2303_v6, %v1269_v58  ;;  %v1272_v1 = vadd.f32 %v1814_v62, %v1746_v60  ;;  %v1263_v2 = vpop.f32.mrb[47].mxu0 }
 0x192   :  { %v1390_v3 = vadd.f32 %v2303_v6, %v1261_v61  ;;  %v1264_v4 = vadd.f32 %v1263_v2, %v706_v63 }
 0x193   :  { %1457 = vst.msk [vmem:[#allocation11 + $0x170] sm:$0xff] %vm1410_vm1, %v1392_v0  ;;  %v1393_v5 = vadd.f32 %v2303_v6, %v1272_v1 }
 0x194   :  { %1455 = vst.msk [vmem:[#allocation11 + $0x160] sm:$0xff] %vm1410_vm1, %v1390_v3  ;;  %v1391_v7 = vadd.f32 %v2303_v6, %v1264_v4 }
 0x195   :  { %1458 = vst.msk [vmem:[#allocation11 + $0x178] sm:$0xff] %vm1410_vm1, %v1393_v5 }
 0x196   :  { %v1749_v8 = vpop.f32.mrb[48].mxu1  ;;  %1456 = vst.msk [vmem:[#allocation11 + $0x168] sm:$0xff] %vm1410_vm1, %v1391_v7  ;;  %v1817_v9 = vpop.f32.mrb[48].mxu0 }
 0x197   :  { %v719_v10 = vpop.f32.mrb[49].mxu1  ;;  %v1285_v11 = vadd.f32 %v1817_v9, %v1749_v8  ;;  %v1276_v12 = vpop.f32.mrb[49].mxu0 }
 0x198   :  { %v1750_v13 = vpop.f32.mrb[50].mxu1  ;;  %v1277_v14 = vadd.f32 %v1276_v12, %v719_v10  ;;  %v1818_v15 = vpop.f32.mrb[50].mxu0 }
 0x199   :  { %v722_v16 = vpop.f32.mrb[51].mxu1  ;;  %v1396_v17 = vadd.f32 %v2303_v6, %v1285_v11  ;;  %v1288_v18 = vadd.f32 %v1818_v15, %v1750_v13  ;;  %v1279_v19 = vpop.f32.mrb[51].mxu0 }
 0x19a   :  { %v1394_v20 = vadd.f32 %v2303_v6, %v1277_v14  ;;  %v1280_v21 = vadd.f32 %v1279_v19, %v722_v16 }
 0x19b   :  { %1461 = vst.msk [vmem:[#allocation11 + $0x190] sm:$0xff] %vm1410_vm1, %v1396_v17  ;;  %v1397_v22 = vadd.f32 %v2303_v6, %v1288_v18 }
 0x19c   :  { %1459 = vst.msk [vmem:[#allocation11 + $0x180] sm:$0xff] %vm1410_vm1, %v1394_v20  ;;  %v1395_v23 = vadd.f32 %v2303_v6, %v1280_v21 }
 0x19d   :  { %1462 = vst.msk [vmem:[#allocation11 + $0x198] sm:$0xff] %vm1410_vm1, %v1397_v22 }
 0x19e   :  { %v1753_v24 = vpop.f32.mrb[52].mxu1  ;;  %1460 = vst.msk [vmem:[#allocation11 + $0x188] sm:$0xff] %vm1410_vm1, %v1395_v23  ;;  %v1821_v25 = vpop.f32.mrb[52].mxu0 }
 0x19f   :  { %v735_v26 = vpop.f32.mrb[53].mxu1  ;;  %v1301_v27 = vadd.f32 %v1821_v25, %v1753_v24  ;;  %v1292_v28 = vpop.f32.mrb[53].mxu0 }
 0x1a0   :  { %v1754_v29 = vpop.f32.mrb[54].mxu1  ;;  %v1293_v30 = vadd.f32 %v1292_v28, %v735_v26  ;;  %v1822_v31 = vpop.f32.mrb[54].mxu0 }
 0x1a1   :  { %v738_v32 = vpop.f32.mrb[55].mxu1  ;;  %v1400_v33 = vadd.f32 %v2303_v6, %v1301_v27  ;;  %v1304_v34 = vadd.f32 %v1822_v31, %v1754_v29  ;;  %v1295_v35 = vpop.f32.mrb[55].mxu0 }
 0x1a2   :  { %v1398_v36 = vadd.f32 %v2303_v6, %v1293_v30  ;;  %v1296_v37 = vadd.f32 %v1295_v35, %v738_v32 }
 0x1a3   :  { %1465 = vst.msk [vmem:[#allocation11 + $0x1b0] sm:$0xff] %vm1410_vm1, %v1400_v33  ;;  %v1401_v38 = vadd.f32 %v2303_v6, %v1304_v34 }
 0x1a4   :  { %1463 = vst.msk [vmem:[#allocation11 + $0x1a0] sm:$0xff] %vm1410_vm1, %v1398_v36  ;;  %v1399_v39 = vadd.f32 %v2303_v6, %v1296_v37 }
 0x1a5   :  { %1466 = vst.msk [vmem:[#allocation11 + $0x1b8] sm:$0xff] %vm1410_vm1, %v1401_v38 }
 0x1a6   :  { %v1757_v40 = vpop.f32.mrb[56].mxu1  ;;  %1464 = vst.msk [vmem:[#allocation11 + $0x1a8] sm:$0xff] %vm1410_vm1, %v1399_v39  ;;  %v1825_v41 = vpop.f32.mrb[56].mxu0 }
 0x1a7   :  { %v751_v42 = vpop.f32.mrb[57].mxu1  ;;  %v1317_v43 = vadd.f32 %v1825_v41, %v1757_v40  ;;  %v1308_v44 = vpop.f32.mrb[57].mxu0 }
 0x1a8   :  { %v1758_v45 = vpop.f32.mrb[58].mxu1  ;;  %v1309_v46 = vadd.f32 %v1308_v44, %v751_v42  ;;  %v1826_v47 = vpop.f32.mrb[58].mxu0 }
 0x1a9   :  { %v754_v48 = vpop.f32.mrb[59].mxu1  ;;  %v1404_v49 = vadd.f32 %v2303_v6, %v1317_v43  ;;  %v1320_v50 = vadd.f32 %v1826_v47, %v1758_v45  ;;  %v1311_v51 = vpop.f32.mrb[59].mxu0 }
 0x1aa   :  { %v1402_v52 = vadd.f32 %v2303_v6, %v1309_v46  ;;  %v1312_v53 = vadd.f32 %v1311_v51, %v754_v48 }
 0x1ab   :  { %1469 = vst.msk [vmem:[#allocation11 + $0x1d0] sm:$0xff] %vm1410_vm1, %v1404_v49  ;;  %v1405_v54 = vadd.f32 %v2303_v6, %v1320_v50 }
 0x1ac   :  { %1467 = vst.msk [vmem:[#allocation11 + $0x1c0] sm:$0xff] %vm1410_vm1, %v1402_v52  ;;  %v1403_v55 = vadd.f32 %v2303_v6, %v1312_v53 }
 0x1ad   :  { %1470 = vst.msk [vmem:[#allocation11 + $0x1d8] sm:$0xff] %vm1410_vm1, %v1405_v54 }
 0x1ae   :  { %v1761_v56 = vpop.f32.mrb[60].mxu1  ;;  %1468 = vst.msk [vmem:[#allocation11 + $0x1c8] sm:$0xff] %vm1410_vm1, %v1403_v55  ;;  %v1829_v57 = vpop.f32.mrb[60].mxu0 }
 0x1af   :  { %v767_v58 = vpop.f32.mrb[61].mxu1  ;;  %v1333_v59 = vadd.f32 %v1829_v57, %v1761_v56  ;;  %v1324_v60 = vpop.f32.mrb[61].mxu0 }
 0x1b0   :  { %v1762_v61 = vpop.f32.mrb[62].mxu1  ;;  %v1325_v62 = vadd.f32 %v1324_v60, %v767_v58  ;;  %v1830_v63 = vpop.f32.mrb[62].mxu0 }
 0x1b1   :  { %v770_v0 = vpop.f32.mrb[63].mxu1  ;;  %v1408_v1 = vadd.f32 %v2303_v6, %v1333_v59  ;;  %v1336_v2 = vadd.f32 %v1830_v63, %v1762_v61  ;;  %v1327_v3 = vpop.f32.mrb[63].mxu0 }
 0x1b2   :  { %v1406_v4 = vadd.f32 %v2303_v6, %v1325_v62  ;;  %v1328_v5 = vadd.f32 %v1327_v3, %v770_v0 }
 0x1b3   :  { %1473 = vst.msk [vmem:[#allocation11 + $0x1f0] sm:$0xff] %vm1410_vm1, %v1408_v1  ;;  %v1409_v7 = vadd.f32 %v2303_v6, %v1336_v2 }
 0x1b4   :  { %1471 = vst.msk [vmem:[#allocation11 + $0x1e0] sm:$0xff] %vm1410_vm1, %v1406_v4  ;;  %v1407_v8 = vadd.f32 %v2303_v6, %v1328_v5 }
 0x1b5   :  { %1474 = vst.msk [vmem:[#allocation11 + $0x1f8] sm:$0xff] %vm1410_vm1, %v1409_v7 }
 0x1b6   :  { %1472 = vst.msk [vmem:[#allocation11 + $0x1e8] sm:$0xff] %vm1410_vm1, %v1407_v8 }
 0x1b7   :  { %2094 = shalt.err (!%p2091_p2)
}
 0x1b8   :  { %s2095_s21 = scalar_lea.hbm %s2450_s5, 8192 }
 0x1b9   :  { %p2096_p3 = scmp.ne.s32.totalorder %s2450_s5, %s2095_s21  ;;  %p2099_p4 = scmp.lt.u32.totalorder %s2095_s21, %s2450_s5 }
 0x1bb   :  { %p2101_p5 = pnand %p2099_p4, %p2096_p3 }
 0x1bd   :  { %2104 = shalt.err (!%p2101_p5)
}
 0x1be   :  { %s2121_s11 = smov 128   ;;  %s2122_s12 = smov 8  }
 0x1bf   :  { %1486 = dma.vmem_to_hbm [thread:$0]  %s1481_s22, 8192, %s2450_s5, [#allocation4], %s2121_s11, %s2121_s11, %s2122_s12  }
 0x1c0   :  { %2111 = dma.done.wait [#allocation4], 8192  }
 0x1c1   :  { %2112 = vsyncadd [#allocation4], 4294959104 }
 0x1c2   :  { %1490 = vsyncpa [#allocation3], 1 }
 0x1c3   :  { %1491 = vsyncpa [#allocation6], 1 }
 0x1c4   :  { %1492 = vsyncpa [#allocation9], 1 }
 0x1c5   :  { %1493 = vsyncpa [#allocation4], 1 }

</bundles_post_ra>
